<compile_context>
chip_gen: v7x
topology: tpu7x:2x2x1
jax: 0.10.0
libtpu: 0.0.40
codegen_flags: <defaults>
</compile_context>

<pallas_src>
import jax
import jax.numpy as jnp
from jax.experimental import pallas as pl
from jax.experimental.pallas import tpu as pltpu


# ----------------------------- model dimensions -----------------------------
IN_FEATURES = 478 * 2     # 956
K_PAD = 1024              # feat1 input padded with zero rows/cols
D1 = 8192                 # feat1 output
D2 = 1024                 # feat2 output
D3 = 256                  # feat3 output
HEAD = 128                # mean / std head width
LEAKY = 0.01              # nn.LeakyReLU default slope

# -------------------- tiling of the fused feat1+feat2 stream ----------------
TN1 = 2048                # feat1 output-tile width == feat2 K-block height
N1_TILES = D1 // TN1      # 4 blocks: W1 block (1024, 2048), W2 block (2048, 1024)
NSPLIT = 2                # "parallel" grid axis (2 TensorCores on v7x)
STEPS = N1_TILES // NSPLIT  # sequential ("arbitrary") steps per split


# ---------------------------------------------------------------------------
# Kernel 1: fused feat1 + feat2 weight streaming.
# Step (c, s) uses W1 block t and W2 block t (t = c*STEPS + s):
#   h1_t = LeakyReLU(x @ W1[:, t-block] + b1[t-block])          (B, TN1)
#   acc_c += h1_t @ W2[t-block, :]                              (B, D2)
# Output: per-split partial feat2 pre-activations (NSPLIT, B, D2) f32.
# ---------------------------------------------------------------------------
def _core_kernel(x_ref, w1_ref, b1_ref, w2_ref, acc_ref):
    s = pl.program_id(1)                       # sequential step within split

    x = x_ref[...].astype(jnp.bfloat16)        # (B, K_PAD)
    z1 = jnp.dot(x, w1_ref[0], preferred_element_type=jnp.float32)
    z1 = z1 + b1_ref[0]                        # f32 bias after f32 accumulation
    h1 = jnp.where(z1 > 0, z1, LEAKY * z1).astype(jnp.bfloat16)   # (B, TN1)

    part = jnp.dot(h1, w2_ref[0], preferred_element_type=jnp.float32)  # (B, D2)

    @pl.when(s == 0)
    def _init():
        acc_ref[...] = jnp.zeros_like(acc_ref)

    acc_ref[...] += part[None]                 # accumulate across K-blocks


def encoder_core(x, w1_blocks, b1_blocks, w2_blocks):
    """Returns partial feat2 pre-activations (NSPLIT, B, D2) f32."""
    B = x.shape[0]
    cost = pl.CostEstimate(
        flops=2 * B * K_PAD * D1 + 2 * B * D1 * D2,
        transcendentals=0,
        bytes_accessed=(K_PAD * D1 + D1 * D2) * 2      # bf16 weights
        + B * K_PAD * 4 + D1 * 4 + NSPLIT * B * D2 * 4,
    )
    return pl.pallas_call(
        _core_kernel,
        out_shape=jax.ShapeDtypeStruct((NSPLIT, B, D2), jnp.float32),
        grid_spec=pltpu.PrefetchScalarGridSpec(
            num_scalar_prefetch=0,
            grid=(NSPLIT, STEPS),
            in_specs=[
                # x: small, resident across the whole grid.
                pl.BlockSpec((B, K_PAD), lambda c, s: (0, 0)),
                # W1: block-contiguous (N1_TILES, K_PAD, TN1) bf16.
                pl.BlockSpec((1, K_PAD, TN1), lambda c, s: (c * STEPS + s, 0, 0)),
                # b1: blocked (N1_TILES, 1, TN1) f32 (8 KB per step).
                pl.BlockSpec((1, 1, TN1), lambda c, s: (c * STEPS + s, 0, 0)),
                # W2: block-contiguous K-blocks (N1_TILES, TN1, D2) bf16.
                pl.BlockSpec((1, TN1, D2), lambda c, s: (c * STEPS + s, 0, 0)),
            ],
            # Per-split partial accumulator, resident across the arbitrary axis.
            out_specs=pl.BlockSpec((1, B, D2), lambda c, s: (c, 0, 0)),
        ),
        compiler_params=pltpu.CompilerParams(
            dimension_semantics=("parallel", "arbitrary"),
            vmem_limit_bytes=28 * 1024 * 1024,   # ~16.1 MiB needed + headroom
        ),
        cost_estimate=cost,
    )(x, w1_blocks, b1_blocks, w2_blocks)


# ---------------------------------------------------------------------------
# Kernel 2: tiny tail — finish feat2, feat3 and BOTH heads in one grid step.
#   h2 = LeakyReLU(sum(partials) + b2)
#   h3 = LeakyReLU(h2 @ W3 + b3)
#   z  = h3 @ [Wmean || Wstd] + [bmean || bstd]
#   mean = LeakyReLU(z[:, :128]);  std = exp(0.5 * ReLU(z[:, 128:]))
# ---------------------------------------------------------------------------
def _tail_kernel(part_ref, b2_ref, w3_ref, b3_ref, wh_ref, bh_ref,
                 mean_ref, std_ref):
    acc = part_ref[0]
    for k in range(1, NSPLIT):
        acc = acc + part_ref[k]                                  # (B, D2) f32
    z2 = acc + b2_ref[...]
    h2 = jnp.where(z2 > 0, z2, LEAKY * z2).astype(jnp.bfloat16)

    z3 = jnp.dot(h2, w3_ref[...], preferred_element_type=jnp.float32) + b3_ref[...]
    h3 = jnp.where(z3 > 0, z3, LEAKY * z3).astype(jnp.bfloat16)

    z = jnp.dot(h3, wh_ref[...], preferred_element_type=jnp.float32) + bh_ref[...]
    zm = z[:, :HEAD]                                             # mean head
    zs = z[:, HEAD:]                                             # std head
    mean_ref[...] = jnp.where(zm > 0, zm, LEAKY * zm)
    std_ref[...] = jnp.exp(jnp.maximum(zs, 0.0) * 0.5)


def encoder_tail(partials, b2, w3, b3, wh, bh):
    B = partials.shape[1]
    cost = pl.CostEstimate(
        flops=2 * B * D2 * D3 + 2 * B * D3 * (2 * HEAD),
        transcendentals=B * HEAD,
        bytes_accessed=(D2 * D3 + D3 * 2 * HEAD) * 2
        + NSPLIT * B * D2 * 4 + B * 2 * HEAD * 4 + (D2 + 2 * D3) * 4,
    )
    return pl.pallas_call(
        _tail_kernel,
        out_shape=(jax.ShapeDtypeStruct((B, HEAD), jnp.float32),
                   jax.ShapeDtypeStruct((B, HEAD), jnp.float32)),
        grid_spec=pltpu.PrefetchScalarGridSpec(
            num_scalar_prefetch=0,
            grid=(1,),
            in_specs=[
                pl.BlockSpec((NSPLIT, B, D2), lambda i: (0, 0, 0)),  # partials
                pl.BlockSpec((1, D2), lambda i: (0, 0)),             # b2
                pl.BlockSpec((D2, D3), lambda i: (0, 0)),            # W3 (bf16)
                pl.BlockSpec((1, D3), lambda i: (0, 0)),             # b3
                pl.BlockSpec((D3, 2 * HEAD), lambda i: (0, 0)),      # heads W
                pl.BlockSpec((1, 2 * HEAD), lambda i: (0, 0)),       # heads b
            ],
            out_specs=[pl.BlockSpec((B, HEAD), lambda i: (0, 0)),
                       pl.BlockSpec((B, HEAD), lambda i: (0, 0))],
        ),
        compiler_params=pltpu.CompilerParams(
            dimension_semantics=("arbitrary",)),
        cost_estimate=cost,
    )(partials, b2, w3, b3, wh, bh)


# ---------------------------------------------------------------------------
# Parameters (deterministic synthetic init, PyTorch-Linear-like uniform).
# Big weights are stored bf16, block-contiguous; biases f32.
# ---------------------------------------------------------------------------
def _uniform(key, shape, fan_in):
    scale = 1.0 / jnp.sqrt(jnp.float32(fan_in))
    return jax.random.uniform(key, shape, jnp.float32, minval=-scale, maxval=scale)


def init_params(key):
    k = jax.random.split(key, 10)
    p = {}

    # feat1: K zero-padded 956 -> 1024, weight repacked to (N1_TILES, K_PAD, TN1).
    w1 = _uniform(k[0], (IN_FEATURES, D1), IN_FEATURES)
    w1 = jnp.pad(w1, ((0, K_PAD - IN_FEATURES), (0, 0)))
    w1 = jnp.transpose(w1.reshape(K_PAD, N1_TILES, TN1), (1, 0, 2))
    b1 = _uniform(k[1], (1, D1), IN_FEATURES)
    b1 = jnp.transpose(b1.reshape(1, N1_TILES, TN1), (1, 0, 2))   # (N1_TILES,1,TN1)
    p["feat1"] = {"w": w1.astype(jnp.bfloat16), "b": b1}

    # feat2: weight repacked into K-blocks (N1_TILES, TN1, D2).
    w2 = _uniform(k[2], (D1, D2), D1).reshape(N1_TILES, TN1, D2)
    p["feat2"] = {"w": w2.astype(jnp.bfloat16), "b": _uniform(k[3], (1, D2), D1)}

    p["feat3"] = {"w": _uniform(k[4], (D2, D3), D2).astype(jnp.bfloat16),
                  "b": _uniform(k[5], (1, D3), D2)}

    wm = _uniform(k[6], (D3, HEAD), D3)
    bm = _uniform(k[7], (1, HEAD), D3)
    ws = _uniform(k[8], (D3, HEAD), D3)
    bs = _uniform(k[9], (1, HEAD), D3)
    p["heads"] = {"w": jnp.concatenate([wm, ws], axis=1).astype(jnp.bfloat16),
                  "b": jnp.concatenate([bm, bs], axis=1)}
    return p


# ---------------------------------------------------------------------------
# Forward pass and pure-JAX reference.
# ---------------------------------------------------------------------------
def encoder_forward(params, x):
    """x: (B, 478, 2) f32 -> (mean (B,128), standard_deviation (B,128))."""
    B = x.shape[0]
    h = x.reshape(B, -1)                                   # nn.Flatten
    h = jnp.pad(h, ((0, 0), (0, K_PAD - IN_FEATURES)))     # align K to 1024
    partials = encoder_core(h, params["feat1"]["w"], params["feat1"]["b"],
                            params["feat2"]["w"])
    return encoder_tail(partials, params["feat2"]["b"],
                        params["feat3"]["w"], params["feat3"]["b"],
                        params["heads"]["w"], params["heads"]["b"])


def encoder_reference(params, x):
    """Pure-JAX reference using the same bf16 weights / f32 accumulation."""
    B = x.shape[0]
    h = x.reshape(B, -1)
    h = jnp.pad(h, ((0, 0), (0, K_PAD - IN_FEATURES)))

    w1 = jnp.transpose(params["feat1"]["w"], (1, 0, 2)).reshape(K_PAD, D1)
    b1 = jnp.transpose(params["feat1"]["b"], (1, 0, 2)).reshape(1, D1)
    w2 = params["feat2"]["w"].reshape(D1, D2)

    def lin(a, w, b):
        return jnp.dot(a.astype(jnp.bfloat16), w,
                       preferred_element_type=jnp.float32) + b

    def leaky(z):
        return jnp.where(z > 0, z, LEAKY * z)

    h = leaky(lin(h, w1, b1))
    h = leaky(lin(h, w2, params["feat2"]["b"]))
    h = leaky(lin(h, params["feat3"]["w"], params["feat3"]["b"]))
    z = lin(h, params["heads"]["w"], params["heads"]["b"])
    mean = leaky(z[:, :HEAD])
    std = jnp.exp(jnp.maximum(z[:, HEAD:], 0.0) * 0.5)
    return mean, std


if __name__ == "__main__":
    key = jax.random.PRNGKey(0)
    kp, kx = jax.random.split(key)
    params = init_params(kp)

    B = 2
    x = jax.random.normal(kx, (B, 478, 2), jnp.float32)

    mean, std = jax.jit(encoder_forward)(params, x)
    jax.block_until_ready((mean, std))

    ref_mean, ref_std = encoder_reference(params, x)
    assert mean.shape == (B, HEAD) and std.shape == (B, HEAD)
    assert jnp.allclose(mean, ref_mean, atol=1e-2, rtol=1e-2), \
        float(jnp.max(jnp.abs(mean - ref_mean)))
    assert jnp.allclose(std, ref_std, atol=1e-2, rtol=1e-2), \
        float(jnp.max(jnp.abs(std - ref_std)))

    print("KERNEL_OK")
</pallas_src>

<mosaic_0001>
module attributes {stable_mosaic.version = 11 : i64} {
  func.func @_core_kernel(%arg0: i32, %arg1: i32, %arg2: memref<2x1024xf32, #tpu.memory_space<vmem>>, %arg3: memref<1x1024x2048xbf16, #tpu.memory_space<vmem>>, %arg4: memref<1x1x2048xf32, #tpu.memory_space<vmem>>, %arg5: memref<1x2048x1024xbf16, #tpu.memory_space<vmem>>, %arg6: memref<1x2x1024xf32, #tpu.memory_space<vmem>>) attributes {dimension_semantics = [#tpu.dimension_semantics<parallel>, #tpu.dimension_semantics<arbitrary>], iteration_bounds = array<i64: 2, 2>, scalar_prefetch = 0 : i64, scratch_operands = 0 : i64, tpu.core_type = #tpu.core_type<tc>, window_params = [{pipeline_mode = #tpu.pipeline_mode<synchronous>, transform_indices = @transform_0, window_bounds = array<i64: 2, 1024>}, {transform_indices = @transform_1, window_bounds = array<i64: 1, 1024, 2048>}, {transform_indices = @transform_2, window_bounds = array<i64: 1, 1, 2048>}, {transform_indices = @transform_3, window_bounds = array<i64: 1, 2048, 1024>}, {transform_indices = @transform_4, window_bounds = array<i64: 1, 2, 1024>}]} {
    %c0 = arith.constant 0 : index
    %c0_0 = arith.constant 0 : index
    %0 = vector.load %arg2[%c0, %c0_0] : memref<2x1024xf32, #tpu.memory_space<vmem>>, vector<2x1024xf32>
    %1 = arith.truncf %0 : vector<2x1024xf32> to vector<2x1024xbf16>
    %c0_1 = arith.constant 0 : index
    %c0_2 = arith.constant 0 : index
    %c0_3 = arith.constant 0 : index
    %2 = vector.load %arg3[%c0_1, %c0_2, %c0_3] : memref<1x1024x2048xbf16, #tpu.memory_space<vmem>>, vector<1x1024x2048xbf16>
    %3 = vector.shape_cast %2 : vector<1x1024x2048xbf16> to vector<1024x2048xbf16>
    %cst = arith.constant dense<0.000000e+00> : vector<2x2048xf32>
    %4 = tpu.matmul %1, %3, %cst {dimension_numbers = #tpu.dot_dimension_numbers<[1], [0], [0], [1], [0, 0, 1, 1], [], []>} : vector<2x1024xbf16>, vector<1024x2048xbf16>, vector<2x2048xf32> -> vector<2x2048xf32>
    %c0_4 = arith.constant 0 : index
    %c0_5 = arith.constant 0 : index
    %c0_6 = arith.constant 0 : index
    %5 = vector.load %arg4[%c0_4, %c0_5, %c0_6] : memref<1x1x2048xf32, #tpu.memory_space<vmem>>, vector<1x1x2048xf32>
    %6 = vector.shape_cast %5 : vector<1x1x2048xf32> to vector<1x2048xf32>
    %7 = vector.broadcast %6 : vector<1x2048xf32> to vector<2x2048xf32>
    %8 = arith.addf %4, %7 : vector<2x2048xf32>
    %cst_7 = arith.constant 0.000000e+00 : f32
    %9 = vector.broadcast %cst_7 : f32 to vector<2x2048xf32>
    %10 = arith.cmpf ogt, %8, %9 : vector<2x2048xf32>
    %cst_8 = arith.constant 0.00999999977 : f32
    %11 = vector.broadcast %cst_8 : f32 to vector<2x2048xf32>
    %12 = arith.mulf %11, %8 : vector<2x2048xf32>
    %13 = arith.select %10, %8, %12 : vector<2x2048xi1>, vector<2x2048xf32>
    %14 = arith.truncf %13 : vector<2x2048xf32> to vector<2x2048xbf16>
    %c0_9 = arith.constant 0 : index
    %c0_10 = arith.constant 0 : index
    %c0_11 = arith.constant 0 : index
    %15 = vector.load %arg5[%c0_9, %c0_10, %c0_11] : memref<1x2048x1024xbf16, #tpu.memory_space<vmem>>, vector<1x2048x1024xbf16>
    %16 = vector.shape_cast %15 : vector<1x2048x1024xbf16> to vector<2048x1024xbf16>
    %cst_12 = arith.constant dense<0.000000e+00> : vector<2x1024xf32>
    %17 = tpu.matmul %14, %16, %cst_12 {dimension_numbers = #tpu.dot_dimension_numbers<[1], [0], [0], [1], [0, 0, 1, 1], [], []>} : vector<2x2048xbf16>, vector<2048x1024xbf16>, vector<2x1024xf32> -> vector<2x1024xf32>
    %c0_i32 = arith.constant 0 : i32
    %18 = arith.cmpi eq, %arg1, %c0_i32 : i32
    %19 = arith.extui %18 : i1 to i32
    %c0_i32_13 = arith.constant 0 : i32
    %20 = arith.cmpi ne, %19, %c0_i32_13 : i32
    scf.if %20 {
      %cst_20 = arith.constant 0.000000e+00 : f32
      %25 = vector.broadcast %cst_20 : f32 to vector<1x2x1024xf32>
      %c0_21 = arith.constant 0 : index
      %c0_22 = arith.constant 0 : index
      %c0_23 = arith.constant 0 : index
      %26 = vector.load %arg6[%c0_21, %c0_22, %c0_23] : memref<1x2x1024xf32, #tpu.memory_space<vmem>>, vector<1x2x1024xf32>
      tpu.vector_store %arg6[%c0_21, %c0_22, %c0_23], %25 {strides = array<i32>} : memref<1x2x1024xf32, #tpu.memory_space<vmem>>, vector<1x2x1024xf32>,
    } else {
    }
    %c0_14 = arith.constant 0 : index
    %c0_15 = arith.constant 0 : index
    %c0_16 = arith.constant 0 : index
    %21 = vector.load %arg6[%c0_14, %c0_15, %c0_16] : memref<1x2x1024xf32, #tpu.memory_space<vmem>>, vector<1x2x1024xf32>
    %22 = vector.shape_cast %17 : vector<2x1024xf32> to vector<1x2x1024xf32>
    %23 = arith.addf %21, %22 : vector<1x2x1024xf32>
    %c0_17 = arith.constant 0 : index
    %c0_18 = arith.constant 0 : index
    %c0_19 = arith.constant 0 : index
    %24 = vector.load %arg6[%c0_17, %c0_18, %c0_19] : memref<1x2x1024xf32, #tpu.memory_space<vmem>>, vector<1x2x1024xf32>
    tpu.vector_store %arg6[%c0_17, %c0_18, %c0_19], %23 {strides = array<i32>} : memref<1x2x1024xf32, #tpu.memory_space<vmem>>, vector<1x2x1024xf32>,
    return
  }
  func.func @transform_0(%arg0: i32, %arg1: i32) -> (i32, i32) {
    %c0_i32 = arith.constant 0 : i32
    %c0_i32_0 = arith.constant 0 : i32
    %c0_i32_1 = arith.constant 0 : i32
    return %c0_i32, %c0_i32_0 : i32, i32
  }
  func.func @transform_1(%arg0: i32, %arg1: i32) -> (i32, i32, i32) {
    %c2_i32 = arith.constant 2 : i32
    %0 = arith.muli %arg0, %c2_i32 : i32
    %1 = arith.addi %0, %arg1 : i32
    %c0_i32 = arith.constant 0 : i32
    %c0_i32_0 = arith.constant 0 : i32
    %c0_i32_1 = arith.constant 0 : i32
    return %1, %c0_i32, %c0_i32_0 : i32, i32, i32
  }
  func.func @transform_2(%arg0: i32, %arg1: i32) -> (i32, i32, i32) {
    %c2_i32 = arith.constant 2 : i32
    %0 = arith.muli %arg0, %c2_i32 : i32
    %1 = arith.addi %0, %arg1 : i32
    %c0_i32 = arith.constant 0 : i32
    %c0_i32_0 = arith.constant 0 : i32
    %c0_i32_1 = arith.constant 0 : i32
    return %1, %c0_i32, %c0_i32_0 : i32, i32, i32
  }
  func.func @transform_3(%arg0: i32, %arg1: i32) -> (i32, i32, i32) {
    %c2_i32 = arith.constant 2 : i32
    %0 = arith.muli %arg0, %c2_i32 : i32
    %1 = arith.addi %0, %arg1 : i32
    %c0_i32 = arith.constant 0 : i32
    %c0_i32_0 = arith.constant 0 : i32
    %c0_i32_1 = arith.constant 0 : i32
    return %1, %c0_i32, %c0_i32_0 : i32, i32, i32
  }
  func.func @transform_4(%arg0: i32, %arg1: i32) -> (i32, i32, i32) {
    %c0_i32 = arith.constant 0 : i32
    %c0_i32_0 = arith.constant 0 : i32
    %c0_i32_1 = arith.constant 0 : i32
    return %arg0, %c0_i32, %c0_i32_0 : i32, i32, i32
  }
}

module attributes {stable_mosaic.version = 11 : i64} {
  func.func @_tail_kernel(%arg0: i32, %arg1: memref<2x2x1024xf32, #tpu.memory_space<vmem>>, %arg2: memref<1x1024xf32, #tpu.memory_space<vmem>>, %arg3: memref<1024x256xbf16, #tpu.memory_space<vmem>>, %arg4: memref<1x256xf32, #tpu.memory_space<vmem>>, %arg5: memref<256x256xbf16, #tpu.memory_space<vmem>>, %arg6: memref<1x256xf32, #tpu.memory_space<vmem>>, %arg7: memref<2x128xf32, #tpu.memory_space<vmem>>, %arg8: memref<2x128xf32, #tpu.memory_space<vmem>>) attributes {dimension_semantics = [#tpu.dimension_semantics<arbitrary>], iteration_bounds = array<i64: 1>, scalar_prefetch = 0 : i64, scratch_operands = 0 : i64, tpu.core_type = #tpu.core_type<tc>, window_params = [{pipeline_mode = #tpu.pipeline_mode<synchronous>, transform_indices = @transform_0, window_bounds = array<i64: 2, 2, 1024>}, {pipeline_mode = #tpu.pipeline_mode<synchronous>, transform_indices = @transform_1, window_bounds = array<i64: 1, 1024>}, {pipeline_mode = #tpu.pipeline_mode<synchronous>, transform_indices = @transform_2, window_bounds = array<i64: 1024, 256>}, {pipeline_mode = #tpu.pipeline_mode<synchronous>, transform_indices = @transform_3, window_bounds = array<i64: 1, 256>}, {pipeline_mode = #tpu.pipeline_mode<synchronous>, transform_indices = @transform_4, window_bounds = array<i64: 256, 256>}, {pipeline_mode = #tpu.pipeline_mode<synchronous>, transform_indices = @transform_5, window_bounds = array<i64: 1, 256>}, {pipeline_mode = #tpu.pipeline_mode<synchronous>, transform_indices = @transform_6, window_bounds = array<i64: 2, 128>}, {pipeline_mode = #tpu.pipeline_mode<synchronous>, transform_indices = @transform_7, window_bounds = array<i64: 2, 128>}]} {
    %c0 = arith.constant 0 : index
    %c0_0 = arith.constant 0 : index
    %c0_1 = arith.constant 0 : index
    %0 = vector.load %arg1[%c0, %c0_0, %c0_1] : memref<2x2x1024xf32, #tpu.memory_space<vmem>>, vector<1x2x1024xf32>
    %1 = vector.shape_cast %0 : vector<1x2x1024xf32> to vector<2x1024xf32>
    %c1 = arith.constant 1 : index
    %c0_2 = arith.constant 0 : index
    %c0_3 = arith.constant 0 : index
    %2 = vector.load %arg1[%c1, %c0_2, %c0_3] : memref<2x2x1024xf32, #tpu.memory_space<vmem>>, vector<1x2x1024xf32>
    %3 = vector.shape_cast %2 : vector<1x2x1024xf32> to vector<2x1024xf32>
    %4 = arith.addf %1, %3 : vector<2x1024xf32>
    %c0_4 = arith.constant 0 : index
    %c0_5 = arith.constant 0 : index
    %5 = vector.load %arg2[%c0_4, %c0_5] : memref<1x1024xf32, #tpu.memory_space<vmem>>, vector<1x1024xf32>
    %6 = vector.broadcast %5 : vector<1x1024xf32> to vector<2x1024xf32>
    %7 = arith.addf %4, %6 : vector<2x1024xf32>
    %cst = arith.constant 0.000000e+00 : f32
    %8 = vector.broadcast %cst : f32 to vector<2x1024xf32>
    %9 = arith.cmpf ogt, %7, %8 : vector<2x1024xf32>
    %cst_6 = arith.constant 0.00999999977 : f32
    %10 = vector.broadcast %cst_6 : f32 to vector<2x1024xf32>
    %11 = arith.mulf %10, %7 : vector<2x1024xf32>
    %12 = arith.select %9, %7, %11 : vector<2x1024xi1>, vector<2x1024xf32>
    %13 = arith.truncf %12 : vector<2x1024xf32> to vector<2x1024xbf16>
    %c0_7 = arith.constant 0 : index
    %c0_8 = arith.constant 0 : index
    %14 = vector.load %arg3[%c0_7, %c0_8] : memref<1024x256xbf16, #tpu.memory_space<vmem>>, vector<1024x256xbf16>
    %cst_9 = arith.constant dense<0.000000e+00> : vector<2x256xf32>
    %15 = tpu.matmul %13, %14, %cst_9 {dimension_numbers = #tpu.dot_dimension_numbers<[1], [0], [0], [1], [0, 0, 1, 1], [], []>} : vector<2x1024xbf16>, vector<1024x256xbf16>, vector<2x256xf32> -> vector<2x256xf32>
    %c0_10 = arith.constant 0 : index
    %c0_11 = arith.constant 0 : index
    %16 = vector.load %arg4[%c0_10, %c0_11] : memref<1x256xf32, #tpu.memory_space<vmem>>, vector<1x256xf32>
    %17 = vector.broadcast %16 : vector<1x256xf32> to vector<2x256xf32>
    %18 = arith.addf %15, %17 : vector<2x256xf32>
    %cst_12 = arith.constant 0.000000e+00 : f32
    %19 = vector.broadcast %cst_12 : f32 to vector<2x256xf32>
    %20 = arith.cmpf ogt, %18, %19 : vector<2x256xf32>
    %cst_13 = arith.constant 0.00999999977 : f32
    %21 = vector.broadcast %cst_13 : f32 to vector<2x256xf32>
    %22 = arith.mulf %21, %18 : vector<2x256xf32>
    %23 = arith.select %20, %18, %22 : vector<2x256xi1>, vector<2x256xf32>
    %24 = arith.truncf %23 : vector<2x256xf32> to vector<2x256xbf16>
    %c0_14 = arith.constant 0 : index
    %c0_15 = arith.constant 0 : index
    %25 = vector.load %arg5[%c0_14, %c0_15] : memref<256x256xbf16, #tpu.memory_space<vmem>>, vector<256x256xbf16>
    %cst_16 = arith.constant dense<0.000000e+00> : vector<2x256xf32>
    %26 = tpu.matmul %24, %25, %cst_16 {dimension_numbers = #tpu.dot_dimension_numbers<[1], [0], [0], [1], [0, 0, 1, 1], [], []>} : vector<2x256xbf16>, vector<256x256xbf16>, vector<2x256xf32> -> vector<2x256xf32>
    %c0_17 = arith.constant 0 : index
    %c0_18 = arith.constant 0 : index
    %27 = vector.load %arg6[%c0_17, %c0_18] : memref<1x256xf32, #tpu.memory_space<vmem>>, vector<1x256xf32>
    %28 = vector.broadcast %27 : vector<1x256xf32> to vector<2x256xf32>
    %29 = arith.addf %26, %28 : vector<2x256xf32>
    %30 = vector.extract_strided_slice %29 {offsets = [0, 0], sizes = [2, 128], strides = [1, 1]} : vector<2x256xf32> to vector<2x128xf32>
    %31 = vector.extract_strided_slice %29 {offsets = [0, 128], sizes = [2, 128], strides = [1, 1]} : vector<2x256xf32> to vector<2x128xf32>
    %cst_19 = arith.constant 0.000000e+00 : f32
    %32 = vector.broadcast %cst_19 : f32 to vector<2x128xf32>
    %33 = arith.cmpf ogt, %30, %32 : vector<2x128xf32>
    %cst_20 = arith.constant 0.00999999977 : f32
    %34 = vector.broadcast %cst_20 : f32 to vector<2x128xf32>
    %35 = arith.mulf %34, %30 : vector<2x128xf32>
    %36 = arith.select %33, %30, %35 : vector<2x128xi1>, vector<2x128xf32>
    %c0_21 = arith.constant 0 : index
    %c0_22 = arith.constant 0 : index
    %37 = vector.load %arg7[%c0_21, %c0_22] : memref<2x128xf32, #tpu.memory_space<vmem>>, vector<2x128xf32>
    tpu.vector_store %arg7[%c0_21, %c0_22], %36 {strides = array<i32>} : memref<2x128xf32, #tpu.memory_space<vmem>>, vector<2x128xf32>,
    %cst_23 = arith.constant 0.000000e+00 : f32
    %38 = vector.broadcast %cst_23 : f32 to vector<2x128xf32>
    %39 = arith.maximumf %31, %38 : vector<2x128xf32>
    %cst_24 = arith.constant 5.000000e-01 : f32
    %40 = vector.broadcast %cst_24 : f32 to vector<2x128xf32>
    %41 = arith.mulf %39, %40 : vector<2x128xf32>
    %42 = math.exp %41 : vector<2x128xf32>
    %c0_25 = arith.constant 0 : index
    %c0_26 = arith.constant 0 : index
    %43 = vector.load %arg8[%c0_25, %c0_26] : memref<2x128xf32, #tpu.memory_space<vmem>>, vector<2x128xf32>
    tpu.vector_store %arg8[%c0_25, %c0_26], %42 {strides = array<i32>} : memref<2x128xf32, #tpu.memory_space<vmem>>, vector<2x128xf32>,
    return
  }
  func.func @transform_0(%arg0: i32) -> (i32, i32, i32) {
    %c0_i32 = arith.constant 0 : i32
    %c0_i32_0 = arith.constant 0 : i32
    %c0_i32_1 = arith.constant 0 : i32
    %c0_i32_2 = arith.constant 0 : i32
    return %c0_i32, %c0_i32_0, %c0_i32_1 : i32, i32, i32
  }
  func.func @transform_1(%arg0: i32) -> (i32, i32) {
    %c0_i32 = arith.constant 0 : i32
    %c0_i32_0 = arith.constant 0 : i32
    %c0_i32_1 = arith.constant 0 : i32
    return %c0_i32, %c0_i32_0 : i32, i32
  }
  func.func @transform_2(%arg0: i32) -> (i32, i32) {
    %c0_i32 = arith.constant 0 : i32
    %c0_i32_0 = arith.constant 0 : i32
    %c0_i32_1 = arith.constant 0 : i32
    return %c0_i32, %c0_i32_0 : i32, i32
  }
  func.func @transform_3(%arg0: i32) -> (i32, i32) {
    %c0_i32 = arith.constant 0 : i32
    %c0_i32_0 = arith.constant 0 : i32
    %c0_i32_1 = arith.constant 0 : i32
    return %c0_i32, %c0_i32_0 : i32, i32
  }
  func.func @transform_4(%arg0: i32) -> (i32, i32) {
    %c0_i32 = arith.constant 0 : i32
    %c0_i32_0 = arith.constant 0 : i32
    %c0_i32_1 = arith.constant 0 : i32
    return %c0_i32, %c0_i32_0 : i32, i32
  }
  func.func @transform_5(%arg0: i32) -> (i32, i32) {
    %c0_i32 = arith.constant 0 : i32
    %c0_i32_0 = arith.constant 0 : i32
    %c0_i32_1 = arith.constant 0 : i32
    return %c0_i32, %c0_i32_0 : i32, i32
  }
  func.func @transform_6(%arg0: i32) -> (i32, i32) {
    %c0_i32 = arith.constant 0 : i32
    %c0_i32_0 = arith.constant 0 : i32
    %c0_i32_1 = arith.constant 0 : i32
    return %c0_i32, %c0_i32_0 : i32, i32
  }
  func.func @transform_7(%arg0: i32) -> (i32, i32) {
    %c0_i32 = arith.constant 0 : i32
    %c0_i32_0 = arith.constant 0 : i32
    %c0_i32_1 = arith.constant 0 : i32
    return %c0_i32, %c0_i32_0 : i32, i32
  }
}

</mosaic_0001>

<bundles_post_ra>
// kernel: encoder_forward.3
= control target key start
LH: loop header
LB: loop body
LE: loop exit
PB: predicated region body
PF: predicated region fallthrough
CT: control target
= control target key end

     0   :  { %13 = vsyncpa [#allocation3], 0  ;;  %v36_v7 = vlaneseq  ;;  %v1865_v11 = vmov 1983009808   ;;  %s2482_s0 = inlined_call_operand.vmem [shape: f32[2,2,1024], index: 0, kind: input, shape index: {}]   ;;  %s2483_s1 = inlined_call_operand.vmem [shape: f32[1,1024], index: 1, kind: input, shape index: {}]   ;;  %s2484_s2 = inlined_call_operand.vmem [shape: bf16[1024,256], index: 2, kind: input, shape index: {}]   ;;  %s2485_s3 = inlined_call_operand.vmem [shape: f32[1,256], index: 3, kind: input, shape index: {}]   ;;  %s2486_s4 = inlined_call_operand.vmem [shape: bf16[256,256], index: 4, kind: input, shape index: {}]   ;;  %s2487_s5 = inlined_call_operand.vmem [shape: f32[1,256], index: 5, kind: input, shape index: {}]   ;;  %s2488_s6 = inlined_call_operand.hbm [shape: f32[2,128], index: 6, kind: output, shape index: {0}]   ;;  %s2489_s7 = inlined_call_operand.hbm [shape: f32[2,128], index: 7, kind: output, shape index: {1}]  }
   0x1   :  { %v1575_v0 = vld [vmem:[%s2484_s2 + $0x104] ss:$8 sps:$4 sm:$0xff]   ;;  %v1577_v1 = vld [vmem:[%s2484_s2 + $0x100] ss:$8 sps:$4 sm:$0xff]   ;;  %v1578_v2 = vld [vmem:[%s2484_s2 + $0x114] ss:$8 sps:$4 sm:$0xff]   ;;  %v71_v12 = vunpack.c.l.s4 %v1865_v11 }
   0x2   :  { %985 = vmatprep.subr.bf16.mxu0 %v1575_v0  ;;  %v1580_v3 = vld [vmem:[%s2484_s2 + $0x110] ss:$8 sps:$4 sm:$0xff]   ;;  %v1581_v4 = vld [vmem:[%s2484_s2 + $0x124] ss:$8 sps:$4 sm:$0xff]   ;;  %v1583_v5 = vld [vmem:[%s2484_s2 + $0x120] ss:$8 sps:$4 sm:$0xff]  }
   0x3   :  { %986 = vmatpush1.bf16.msra.mxu0 %v1577_v1  ;;  %v1584_v6 = vld [vmem:[%s2484_s2 + $0x134] ss:$8 sps:$4 sm:$0xff]   ;;  %v1586_v8 = vld [vmem:[%s2484_s2 + $0x130] ss:$8 sps:$4 sm:$0xff]   ;;  %v1587_v9 = vld [vmem:[%s2484_s2 + $0x144] ss:$8 sps:$4 sm:$0xff]   ;;  %v72_v16 = vunpack.c.0.s8 %v71_v12 }
   0x4   :  { %987 = vmatprep.subr.bf16.mxu0 %v1578_v2  ;;  %v37_v10 = vshrl.u32 %v36_v7, 7  ;;  %v1589_v13 = vld [vmem:[%s2484_s2 + $0x140] ss:$8 sps:$4 sm:$0xff]   ;;  %v1590_v14 = vld [vmem:[%s2484_s2 + $0x154] ss:$8 sps:$4 sm:$0xff]  }
   0x5   :  { %v1592_v17 = vld [vmem:[%s2484_s2 + $0x150] ss:$8 sps:$4 sm:$0xff]   ;;  %v1593_v21 = vld [vmem:[%s2484_s2 + $0x164] ss:$8 sps:$4 sm:$0xff]   ;;  %v1595_v24 = vld [vmem:[%s2484_s2 + $0x160] ss:$8 sps:$4 sm:$0xff]  }
   0x6   :  { %v1941_v15 = vsub.s32 0, %v37_v10  ;;  %v1946_v18 = vsub.s32 1, %v37_v10  ;;  %v46_v19 = vsub.s32 2, %v37_v10  ;;  %v50_v20 = vsub.s32 3, %v37_v10  ;;  %v34_v22 = vld [vmem:[%s2483_s1] sm:$0xff]  ;;  %v1398_v31 = vld [vmem:[%s2482_s0 + $0x10] sm:$0xff] }
   0x7   :  { %988 = vmatpush1.bf16.msra.mxu0 %v1580_v3  ;;  %v1954_v23 = vsub.s32 %v72_v16, %v37_v10  ;;  %v1596_v25 = vld [vmem:[%s2484_s2 + $0x174] ss:$8 sps:$4 sm:$0xff]   ;;  %v27_v30 = vld [vmem:[%s2482_s0] sm:$0xff]  ;;  %v1598_v34 = vld [vmem:[%s2484_s2 + $0x170] ss:$8 sps:$4 sm:$0xff]   ;;  %v54_v39 = vsub.s32 4, %v37_v10 }
   0x8   :  { %989 = vmatprep.subr.bf16.mxu0 %v1581_v4  ;;  %v39_v26 = vrot.slane %v34_v22, %v1941_v15  ;;  %v43_v27 = vrot.slane %v34_v22, %v1946_v18  ;;  %v47_v28 = vrot.slane %v34_v22, %v46_v19  ;;  %v51_v29 = vrot.slane %v34_v22, %v50_v20  ;;  %v1599_v38 = vld [vmem:[%s2484_s2 + $0x184] ss:$8 sps:$4 sm:$0xff]   ;;  %v1601_v44 = vld [vmem:[%s2484_s2 + $0x180] ss:$8 sps:$4 sm:$0xff]   ;;  %v1602_v46 = vld [vmem:[%s2484_s2 + $0x194] ss:$8 sps:$4 sm:$0xff]  }
   0x9   :  { %v32_v35 = vadd.f32 %v1398_v31, %v27_v30  ;;  %v58_v40 = vsub.s32 5, %v37_v10  ;;  %v62_v42 = vsub.s32 6, %v37_v10  ;;  %v66_v43 = vsub.s32 7, %v37_v10  ;;  %v1604_v52 = vld [vmem:[%s2484_s2 + $0x190] ss:$8 sps:$4 sm:$0xff]  }
   0xa   :  { %v68_v32 = vcombine.low %v39_v26, %v43_v27  ;;  %v69_v33 = vcombine.low %v47_v28, %v51_v29  ;;  %v55_v47 = vrot.slane %v34_v22, %v54_v39  ;;  %v1605_v54 = vld [vmem:[%s2484_s2 + $0x1a4] ss:$8 sps:$4 sm:$0xff]   ;;  %v1607_v59 = vld [vmem:[%s2484_s2 + $0x1a0] ss:$8 sps:$4 sm:$0xff]   ;;  %v1608_v60 = vld [vmem:[%s2484_s2 + $0x1b4] ss:$8 sps:$4 sm:$0xff]  }
   0xb   :  { %990 = vmatpush1.bf16.msra.mxu0 %v1583_v5  ;;  %v59_v48 = vrot.slane %v34_v22, %v58_v40  ;;  %v63_v50 = vrot.slane %v34_v22, %v62_v42  ;;  %v67_v51 = vrot.slane %v34_v22, %v66_v43  ;;  %v1610_v0 = vld [vmem:[%s2484_s2 + $0x1b0] ss:$8 sps:$4 sm:$0xff]   ;;  %v1668_v2 = vld [vmem:[%s2484_s2 + $0x4] ss:$8 sps:$4 sm:$0xff]   ;;  %v1670_v3 = vld [vmem:[%s2484_s2] ss:$8 sps:$4 sm:$0xff]  }
   0xc   :  { %991 = vmatprep.subr.bf16.mxu0 %v1584_v6  ;;  %v76_v36 = vrot.slane %v68_v32, %v1954_v23  ;;  %v83_v37 = vrot.slane %v69_v33, %v1954_v23  ;;  %v1611_v4 = vld [vmem:[%s2484_s2 + $0x1c4] ss:$8 sps:$4 sm:$0xff]   ;;  %944 = vmatprep.subr.bf16.mxu1 %v1668_v2  ;;  %v1674_v5 = vld [vmem:[%s2484_s2 + $0x14] ss:$8 sps:$4 sm:$0xff]   ;;  %v1676_v7 = vld [vmem:[%s2484_s2 + $0x10] ss:$8 sps:$4 sm:$0xff]  }
   0xd   :  { %v85_v56 = vcombine.low %v55_v47, %v59_v48  ;;  %v86_v57 = vcombine.low %v63_v50, %v67_v51  ;;  %945 = vmatpush1.bf16.msra.mxu1 %v1670_v3  ;;  %v1613_v10 = vld [vmem:[%s2484_s2 + $0x1c0] ss:$8 sps:$4 sm:$0xff]   ;;  %v1614_v12 = vld [vmem:[%s2484_s2 + $0x1d4] ss:$8 sps:$4 sm:$0xff]   ;;  %v1616_v16 = vld [vmem:[%s2484_s2 + $0x1d0] ss:$8 sps:$4 sm:$0xff]  }
   0xe   :  { %v84_v41 = vcombine.low %v76_v36, %v83_v37  ;;  %946 = vmatprep.subr.bf16.mxu1 %v1674_v5  ;;  %v1617_v20 = vld [vmem:[%s2484_s2 + $0x1e4] ss:$8 sps:$4 sm:$0xff]   ;;  %v1620_v29 = vld [vmem:[%s2484_s2 + $0x1f4] ss:$8 sps:$4 sm:$0xff]   ;;  %v1622_v31 = vld [vmem:[%s2484_s2 + $0x1f0] ss:$8 sps:$4 sm:$0xff]  }
   0xf   :  { %992 = vmatpush1.bf16.msra.mxu0 %v1586_v8  ;;  %v93_v62 = vrot.slane %v85_v56, %v1954_v23  ;;  %v100_v63 = vrot.slane %v86_v57, %v1954_v23  ;;  %v28_v8 = vld [vmem:[%s2482_s0 + $0x8] sm:$0xff]  ;;  %v1700_v39 = vld [vmem:[%s2484_s2 + $0x50] ss:$8 sps:$4 sm:$0xff]   ;;  %v1628_v40 = vld [vmem:[%s2484_s2 + $0x214] ss:$8 sps:$4 sm:$0xff]  }
  0x10   :  { %993 = vmatprep.subr.bf16.mxu0 %v1587_v9  ;;  %v104_v45 = vadd.f32 %v84_v41, %v32_v35  ;;  %v1399_v9 = vld [vmem:[%s2482_s0 + $0x18] sm:$0xff]  ;;  %v1692_v28 = vld [vmem:[%s2484_s2 + $0x44] ss:$8 sps:$4 sm:$0xff]   ;;  %v1694_v32 = vld [vmem:[%s2484_s2 + $0x40] ss:$8 sps:$4 sm:$0xff]  }
  0x11   :  { %v101_v6 = vcombine.low %v93_v62, %v100_v63  ;;  %v33_v11 = vadd.f32 %v1399_v9, %v28_v8  ;;  %947 = vmatpush1.bf16.msra.mxu1 %v1676_v7  ;;  %v1698_v35 = vld [vmem:[%s2484_s2 + $0x54] ss:$8 sps:$4 sm:$0xff]   ;;  %v1625_v36 = vld [vmem:[%s2484_s2 + $0x204] ss:$8 sps:$4 sm:$0xff]   ;;  %v1623_v37 = vld [vmem:[%s2484_s2 + $0x200] ss:$8 sps:$4 sm:$0xff]  }
  0x12   :  { %vm106_vm0 = vcmp.gt.f32.partialorder %v104_v45, 0.0  ;;  %v108_v49 = vmul.f32 0.01, %v104_v45  ;;  %v1704_v42 = vld [vmem:[%s2484_s2 + $0x64] ss:$8 sps:$4 sm:$0xff]  }
  0x13   :  { %994 = vmatpush1.bf16.msra.mxu0 %v1589_v13  ;;  %v105_v13 = vadd.f32 %v101_v6, %v33_v11  ;;  %v1626_v43 = vld [vmem:[%s2484_s2 + $0x210] ss:$8 sps:$4 sm:$0xff]   ;;  %v1629_v47 = vld [vmem:[%s2484_s2 + $0x220] ss:$8 sps:$4 sm:$0xff]   ;;  %v1634_v50 = vld [vmem:[%s2484_s2 + $0x234] ss:$8 sps:$4 sm:$0xff]  }
  0x14   :  { %995 = vmatprep.subr.bf16.mxu0 %v1590_v14  ;;  %v110_v53 = vsel %vm106_vm0, %v104_v45, %v108_v49  ;;  %v1680_v14 = vld [vmem:[%s2484_s2 + $0x24] ss:$8 sps:$4 sm:$0xff]   ;;  %v1710_v45 = vld [vmem:[%s2484_s2 + $0x74] ss:$8 sps:$4 sm:$0xff]   ;;  %v1712_v48 = vld [vmem:[%s2484_s2 + $0x70] ss:$8 sps:$4 sm:$0xff]  }
  0x15   :  { %v114_v55 = vcombine.high %v110_v53, %v110_v53  ;;  %vm107_vm1 = vcmp.gt.f32.partialorder %v105_v13, 0.0  ;;  %v109_v19 = vmul.f32 0.01, %v105_v13  ;;  %948 = vmatprep.subr.bf16.mxu1 %v1680_v14  ;;  %v2057_v26 = vrot.slane %v110_v53, %v1954_v23  ;;  %v1716_v49 = vld [vmem:[%s2484_s2 + $0x84] ss:$8 sps:$4 sm:$0xff]  }
  0x16   :  { %v1632_v51 = vld [vmem:[%s2484_s2 + $0x230] ss:$8 sps:$4 sm:$0xff]   ;;  %v1722_v53 = vld [vmem:[%s2484_s2 + $0x94] ss:$8 sps:$4 sm:$0xff]   ;;  %v1728_v57 = vld [vmem:[%s2484_s2 + $0xa4] ss:$8 sps:$4 sm:$0xff]  }
  0x17   :  { %996 = vmatpush1.bf16.msra.mxu0 %v1592_v17  ;;  %v1991_v58 = vrot.slane %v114_v55, %v1954_v23  ;;  %v1682_v17 = vld [vmem:[%s2484_s2 + $0x20] ss:$8 sps:$4 sm:$0xff]   ;;  %v2048_v22 = vsel %vm107_vm1, %v105_v13, %v109_v19  ;;  %v129_v30 = vcombine.high %v2057_v26, %v2057_v26  ;;  %v1724_v56 = vld [vmem:[%s2484_s2 + $0x90] ss:$8 sps:$4 sm:$0xff]   ;;  %v1643_v62 = vld [vmem:[%s2484_s2 + $0x264] ss:$8 sps:$4 sm:$0xff]  }
  0x18   :  { %997 = vmatprep.subr.bf16.mxu0 %v1593_v21  ;;  %v1686_v21 = vld [vmem:[%s2484_s2 + $0x34] ss:$8 sps:$4 sm:$0xff]   ;;  %949 = vmatpush1.bf16.msra.mxu1 %v1682_v17  ;;  %v2061_v27 = vrot.slane %v2048_v22, %v1954_v23  ;;  %v1635_v55 = vld [vmem:[%s2484_s2 + $0x240] ss:$8 sps:$4 sm:$0xff]   ;;  %v1644_v3 = vld [vmem:[%s2484_s2 + $0x270] ss:$8 sps:$4 sm:$0xff]  }
  0x19   :  { %v130_v61 = vcombine.high %v1991_v58, %v1991_v58  ;;  %950 = vmatprep.subr.bf16.mxu1 %v1686_v21  ;;  %v157_v33 = vpack.c.bf16 %v129_v30, %v129_v30  ;;  %v1641_v63 = vld [vmem:[%s2484_s2 + $0x260] ss:$8 sps:$4 sm:$0xff]   ;;  %v1646_v2 = vld [vmem:[%s2484_s2 + $0x274] ss:$8 sps:$4 sm:$0xff]   ;;  %v1649_v6 = vld [vmem:[%s2484_s2 + $0x284] ss:$8 sps:$4 sm:$0xff]  }
  0x1a   :  { %v1746_v5 = vld [vmem:[%s2484_s2 + $0xd4] ss:$8 sps:$4 sm:$0xff]   ;;  %v1647_v7 = vld [vmem:[%s2484_s2 + $0x280] ss:$8 sps:$4 sm:$0xff]   ;;  %v1748_v8 = vld [vmem:[%s2484_s2 + $0xd0] ss:$8 sps:$4 sm:$0xff]  }
  0x1b   :  { %998 = vmatpush1.bf16.msra.mxu0 %v1595_v24  ;;  %v159_v1 = vpack.c.bf16 %v130_v61, %v130_v61  ;;  %v1619_v24 = vld [vmem:[%s2484_s2 + $0x1e0] ss:$8 sps:$4 sm:$0xff]   ;;  %976 = vmatprep.mubr.bf16.mxu1 %v157_v33  ;;  %v1734_v61 = vld [vmem:[%s2484_s2 + $0xb4] ss:$8 sps:$4 sm:$0xff]   ;;  %v1752_v9 = vld [vmem:[%s2484_s2 + $0xe4] ss:$8 sps:$4 sm:$0xff]  }
  0x1c   :  { %999 = vmatprep.subr.bf16.mxu0 %v1596_v25  ;;  %v1688_v25 = vld [vmem:[%s2484_s2 + $0x30] ss:$8 sps:$4 sm:$0xff]   ;;  %v1758_v13 = vld [vmem:[%s2484_s2 + $0xf4] ss:$8 sps:$4 sm:$0xff]   ;;  %v1655_v14 = vld [vmem:[%s2484_s2 + $0x2a4] ss:$8 sps:$4 sm:$0xff]  }
  0x1d   :  { %1017 = vmatprep.mubr.bf16.mxu0 %v159_v1  ;;  %951 = vmatpush1.bf16.msra.mxu1 %v1688_v25  ;;  %v1740_v1 = vld [vmem:[%s2484_s2 + $0xc4] ss:$8 sps:$4 sm:$0xff]   ;;  %v1650_v11 = vld [vmem:[%s2484_s2 + $0x290] ss:$8 sps:$4 sm:$0xff]   ;;  %v1767_v21 = vld [vmem:[%s2486_s4] ss:$8 sps:$4 sm:$0xff]  }
  0x1e   :  { %952 = vmatprep.subr.bf16.mxu1 %v1692_v28  ;;  %v1760_v17 = vld [vmem:[%s2484_s2 + $0xf0] ss:$8 sps:$4 sm:$0xff]   ;;  %v1769_v19 = vld [vmem:[%s2486_s4 + $0x4] ss:$8 sps:$4 sm:$0xff]  }
  0x1f   :  { %1000 = vmatpush1.bf16.msra.mxu0 %v1598_v34  ;;  %v146_v34 = vcombine.high %v2061_v27, %v2061_v27 }
  0x20   :  { %1001 = vmatprep.subr.bf16.mxu0 %v1599_v38  ;;  %v158_v38 = vpack.c.bf16 %v1991_v58, %v1991_v58  ;;  %v1640_v58 = vld [vmem:[%s2484_s2 + $0x254] ss:$8 sps:$4 sm:$0xff]  }
  0x21   :  { %953 = vmatpush1.bf16.msra.mxu1 %v1694_v32  ;;  %v161_v41 = vpack.c.bf16 %v146_v34, %v146_v34 }
  0x22   :  { %954 = vmatprep.subr.bf16.mxu1 %v1698_v35 }
  0x23   :  { %1002 = vmatpush1.bf16.msra.mxu0 %v1601_v44  ;;  %v1706_v44 = vld [vmem:[%s2484_s2 + $0x60] ss:$8 sps:$4 sm:$0xff]  }
  0x24   :  { %1003 = vmatprep.subr.bf16.mxu0 %v1602_v46  ;;  %v1631_v46 = vld [vmem:[%s2484_s2 + $0x224] ss:$8 sps:$4 sm:$0xff]  }
  0x25   :  { %955 = vmatpush1.bf16.msra.mxu1 %v1700_v39 }
  0x26   :  { %956 = vmatprep.subr.bf16.mxu1 %v1704_v42 }
  0x27   :  { %1004 = vmatpush1.bf16.msra.mxu0 %v1604_v52  ;;  %v1718_v52 = vld [vmem:[%s2484_s2 + $0x80] ss:$8 sps:$4 sm:$0xff]  }
  0x28   :  { %1005 = vmatprep.subr.bf16.mxu0 %v1605_v54  ;;  %v1637_v54 = vld [vmem:[%s2484_s2 + $0x244] ss:$8 sps:$4 sm:$0xff]  }
  0x29   :  { %957 = vmatpush1.bf16.msra.mxu1 %v1706_v44 }
  0x2a   :  { %958 = vmatprep.subr.bf16.mxu1 %v1710_v45 }
  0x2b   :  { %1006 = vmatpush1.bf16.msra.mxu0 %v1607_v59  ;;  %v1638_v59 = vld [vmem:[%s2484_s2 + $0x250] ss:$8 sps:$4 sm:$0xff]  }
  0x2c   :  { %1007 = vmatprep.subr.bf16.mxu0 %v1608_v60  ;;  %v1730_v60 = vld [vmem:[%s2484_s2 + $0xa0] ss:$8 sps:$4 sm:$0xff]  }
  0x2d   :  { %959 = vmatpush1.bf16.msra.mxu1 %v1712_v48 }
  0x2e   :  { %960 = vmatprep.subr.bf16.mxu1 %v1716_v49 }
  0x2f   :  { %1008 = vmatpush1.bf16.msra.mxu0 %v1610_v0  ;;  %v1736_v0 = vld [vmem:[%s2484_s2 + $0xb0] ss:$8 sps:$4 sm:$0xff]  }
  0x30   :  { %1009 = vmatprep.subr.bf16.mxu0 %v1611_v4  ;;  %v1742_v4 = vld [vmem:[%s2484_s2 + $0xc0] ss:$8 sps:$4 sm:$0xff]  }
  0x31   :  { %961 = vmatpush1.bf16.msra.mxu1 %v1718_v52 }
  0x32   :  { %962 = vmatprep.subr.bf16.mxu1 %v1722_v53 }
  0x33   :  { %1010 = vmatpush1.bf16.msra.mxu0 %v1613_v10  ;;  %v1652_v10 = vld [vmem:[%s2484_s2 + $0x294] ss:$8 sps:$4 sm:$0xff]  }
  0x34   :  { %1011 = vmatprep.subr.bf16.mxu0 %v1614_v12  ;;  %v1754_v12 = vld [vmem:[%s2484_s2 + $0xe0] ss:$8 sps:$4 sm:$0xff]  }
  0x35   :  { %963 = vmatpush1.bf16.msra.mxu1 %v1724_v56 }
  0x36   :  { %964 = vmatprep.subr.bf16.mxu1 %v1728_v57 }
  0x37   :  { %1012 = vmatpush1.bf16.msra.mxu0 %v1616_v16  ;;  %v1653_v16 = vld [vmem:[%s2484_s2 + $0x2a0] ss:$8 sps:$4 sm:$0xff]  }
  0x38   :  { %1013 = vmatprep.subr.bf16.mxu0 %v1617_v20  ;;  %v1658_v20 = vld [vmem:[%s2484_s2 + $0x2b4] ss:$8 sps:$4 sm:$0xff]  }
  0x39   :  { %965 = vmatpush1.bf16.msra.mxu1 %v1730_v60 }
  0x3a   :  { %966 = vmatprep.subr.bf16.mxu1 %v1734_v61 }
  0x3b   :  { %1014 = vmatpush1.bf16.msra.mxu0 %v1619_v24  ;;  %v156_v24 = vpack.c.bf16 %v2057_v26, %v2057_v26 }
  0x3c   :  { %1015 = vmatprep.subr.bf16.mxu0 %v1620_v29 }
  0x3d   :  { %967 = vmatpush1.bf16.msra.mxu1 %v1736_v0 }
  0x3e   :  { %968 = vmatprep.subr.bf16.mxu1 %v1740_v1 }
  0x3f   :  { %1016 = vmatpush1.bf16.msra.mxu0 %v1622_v31 }
  0x40   :  { %1026 = vmatprep.subr.bf16.mxu0 %v1625_v36 }
  0x41   :  { %969 = vmatpush1.bf16.msra.mxu1 %v1742_v4 }
  0x42   :  { %1018 = vmatmul.mubr.bf16.vlgmr.msra.gmra.mrb[0].mxu0 %v158_v38  ;;  %970 = vmatprep.subr.bf16.mxu1 %v1746_v5 }
  0x43   :  { %1027 = vmatpush1.bf16.msra.mxu0 %v1623_v37  ;;  %1058 = vmatprep.mubr.bf16.mxu0 %v161_v41 }
  0x44   :  { %1028 = vmatprep.subr.bf16.mxu0 %v1628_v40 }
  0x45   :  { %971 = vmatpush1.bf16.msra.mxu1 %v1748_v8 }
  0x46   :  { %972 = vmatprep.subr.bf16.mxu1 %v1752_v9 }
  0x47   :  { %1029 = vmatpush1.bf16.msra.mxu0 %v1626_v43 }
  0x48   :  { %1030 = vmatprep.subr.bf16.mxu0 %v1631_v46 }
  0x49   :  { %973 = vmatpush1.bf16.msra.mxu1 %v1754_v12 }
  0x4a   :  { %974 = vmatprep.subr.bf16.mxu1 %v1758_v13 }
  0x4b   :  { %1031 = vmatpush1.bf16.msra.mxu0 %v1629_v47 }
  0x4c   :  { %1032 = vmatprep.subr.bf16.mxu0 %v1634_v50 }
  0x4d   :  { %975 = vmatpush1.bf16.msra.mxu1 %v1760_v17 }
  0x4f   :  { %1033 = vmatpush1.bf16.msra.mxu0 %v1632_v51 }
  0x50   :  { %1034 = vmatprep.subr.bf16.mxu0 %v1637_v54 }
  0x53   :  { %1035 = vmatpush1.bf16.msra.mxu0 %v1635_v55 }
  0x54   :  { %1036 = vmatprep.subr.bf16.mxu0 %v1640_v58 }
  0x57   :  { %1037 = vmatpush1.bf16.msra.mxu0 %v1638_v59 }
  0x58   :  { %1038 = vmatprep.subr.bf16.mxu0 %v1643_v62 }
  0x5b   :  { %1039 = vmatpush1.bf16.msra.mxu0 %v1641_v63 }
  0x5c   :  { %1040 = vmatprep.subr.bf16.mxu0 %v1646_v2 }
  0x5f   :  { %1041 = vmatpush1.bf16.msra.mxu0 %v1644_v3 }
  0x60   :  { %1042 = vmatprep.subr.bf16.mxu0 %v1649_v6 }
  0x63   :  { %1043 = vmatpush1.bf16.msra.mxu0 %v1647_v7 }
  0x64   :  { %1044 = vmatprep.subr.bf16.mxu0 %v1652_v10 }
  0x67   :  { %1045 = vmatpush1.bf16.msra.mxu0 %v1650_v11 }
  0x68   :  { %1046 = vmatprep.subr.bf16.mxu0 %v1655_v14 }
  0x69   :  { %14 = vsyncpa [#allocation5], 0  ;;  %v1656_v25 = vld [vmem:[%s2484_s2 + $0x2b0] ss:$8 sps:$4 sm:$0xff]   ;;  %1320 = vmatprep.subr.bf16.mxu1 %v1769_v19  ;;  %v1772_v28 = vld [vmem:[%s2486_s4 + $0x14] ss:$8 sps:$4 sm:$0xff]   ;;  %977 = vmatmul.mubr.bf16.vlgmr.msra.gmra.mrb[0].mxu1 %v156_v24  ;;  %v131_v35 = vcombine.high %v2048_v22, %v2048_v22  ;;  %v160_v46 = vpack.c.bf16 %v2061_v27, %v2061_v27 }
  0x6a   :  { %v1661_v29 = vld [vmem:[%s2484_s2 + $0x2c4] ss:$8 sps:$4 sm:$0xff]   ;;  %1321 = vmatpush1.bf16.msra.mxu1 %v1767_v21  ;;  %v1770_v26 = vld [vmem:[%s2486_s4 + $0x10] ss:$8 sps:$4 sm:$0xff]   ;;  %v1659_v30 = vld [vmem:[%s2484_s2 + $0x2c0] ss:$8 sps:$4 sm:$0xff]  }
  0x6b   :  { %1047 = vmatpush1.bf16.msra.mxu0 %v1653_v16  ;;  %1322 = vmatprep.subr.bf16.mxu1 %v1772_v28  ;;  %v1775_v31 = vld [vmem:[%s2486_s4 + $0x24] ss:$8 sps:$4 sm:$0xff]   ;;  %v1664_v32 = vld [vmem:[%s2484_s2 + $0x2d4] ss:$8 sps:$4 sm:$0xff]   ;;  %v1773_v33 = vld [vmem:[%s2486_s4 + $0x20] ss:$8 sps:$4 sm:$0xff]   ;;  %v2266_v39 = vrot.slane %v131_v35, %v1954_v23 }
  0x6c   :  { %1048 = vmatprep.subr.bf16.mxu0 %v1658_v20  ;;  %v1662_v34 = vld [vmem:[%s2484_s2 + $0x2d0] ss:$8 sps:$4 sm:$0xff]   ;;  %v1778_v36 = vld [vmem:[%s2486_s4 + $0x34] ss:$8 sps:$4 sm:$0xff]   ;;  %v1667_v37 = vld [vmem:[%s2484_s2 + $0x2e4] ss:$8 sps:$4 sm:$0xff]  }
  0x6d   :  { %v1776_v38 = vld [vmem:[%s2486_s4 + $0x30] ss:$8 sps:$4 sm:$0xff]   ;;  %v1665_v22 = vld [vmem:[%s2484_s2 + $0x2e0] ss:$8 sps:$4 sm:$0xff]   ;;  %v1781_v40 = vld [vmem:[%s2486_s4 + $0x44] ss:$8 sps:$4 sm:$0xff]   ;;  %v147_v43 = vcombine.high %v2266_v39, %v2266_v39 }
  0x6e   :  { %1323 = vmatpush1.bf16.msra.mxu1 %v1770_v26  ;;  %v1673_v41 = vld [vmem:[%s2484_s2 + $0x2f4] ss:$8 sps:$4 sm:$0xff]   ;;  %v1779_v42 = vld [vmem:[%s2486_s4 + $0x40] ss:$8 sps:$4 sm:$0xff]   ;;  %v1671_v23 = vld [vmem:[%s2484_s2 + $0x2f0] ss:$8 sps:$4 sm:$0xff]  }
  0x6f   :  { %1049 = vmatpush1.bf16.msra.mxu0 %v1656_v25  ;;  %1324 = vmatprep.subr.bf16.mxu1 %v1775_v31  ;;  %v1784_v44 = vld [vmem:[%s2486_s4 + $0x54] ss:$8 sps:$4 sm:$0xff]   ;;  %v1679_v45 = vld [vmem:[%s2484_s2 + $0x304] ss:$8 sps:$4 sm:$0xff]   ;;  %v1782_v47 = vld [vmem:[%s2486_s4 + $0x50] ss:$8 sps:$4 sm:$0xff]   ;;  %v163_v49 = vpack.c.bf16 %v147_v43, %v147_v43 }
  0x70   :  { %1050 = vmatprep.subr.bf16.mxu0 %v1661_v29  ;;  %v1677_v48 = vld [vmem:[%s2484_s2 + $0x300] ss:$8 sps:$4 sm:$0xff]   ;;  %v1685_v50 = vld [vmem:[%s2484_s2 + $0x314] ss:$8 sps:$4 sm:$0xff]   ;;  %v1787_v27 = vld [vmem:[%s2486_s4 + $0x64] ss:$8 sps:$4 sm:$0xff]  }
  0x71   :  { %v1785_v51 = vld [vmem:[%s2486_s4 + $0x60] ss:$8 sps:$4 sm:$0xff]   ;;  %v1683_v52 = vld [vmem:[%s2484_s2 + $0x310] ss:$8 sps:$4 sm:$0xff]   ;;  %v1790_v53 = vld [vmem:[%s2486_s4 + $0x74] ss:$8 sps:$4 sm:$0xff]  }
  0x72   :  { %1325 = vmatpush1.bf16.msra.mxu1 %v1773_v33  ;;  %v1691_v54 = vld [vmem:[%s2484_s2 + $0x324] ss:$8 sps:$4 sm:$0xff]   ;;  %v1788_v55 = vld [vmem:[%s2486_s4 + $0x70] ss:$8 sps:$4 sm:$0xff]   ;;  %v1689_v56 = vld [vmem:[%s2484_s2 + $0x320] ss:$8 sps:$4 sm:$0xff]  }
  0x73   :  { %1051 = vmatpush1.bf16.msra.mxu0 %v1659_v30  ;;  %1326 = vmatprep.subr.bf16.mxu1 %v1778_v36  ;;  %v1793_v57 = vld [vmem:[%s2486_s4 + $0x84] ss:$8 sps:$4 sm:$0xff]   ;;  %v1697_v58 = vld [vmem:[%s2484_s2 + $0x334] ss:$8 sps:$4 sm:$0xff]   ;;  %v1791_v59 = vld [vmem:[%s2486_s4 + $0x80] ss:$8 sps:$4 sm:$0xff]  }
  0x74   :  { %1052 = vmatprep.subr.bf16.mxu0 %v1664_v32  ;;  %v1695_v60 = vld [vmem:[%s2484_s2 + $0x330] ss:$8 sps:$4 sm:$0xff]   ;;  %v1796_v61 = vld [vmem:[%s2486_s4 + $0x94] ss:$8 sps:$4 sm:$0xff]   ;;  %v1703_v62 = vld [vmem:[%s2484_s2 + $0x344] ss:$8 sps:$4 sm:$0xff]  }
  0x75   :  { %v1794_v63 = vld [vmem:[%s2486_s4 + $0x90] ss:$8 sps:$4 sm:$0xff]   ;;  %v1701_v0 = vld [vmem:[%s2484_s2 + $0x340] ss:$8 sps:$4 sm:$0xff]   ;;  %v1799_v1 = vld [vmem:[%s2486_s4 + $0xa4] ss:$8 sps:$4 sm:$0xff]  }
  0x76   :  { %1327 = vmatpush1.bf16.msra.mxu1 %v1776_v38  ;;  %v1709_v2 = vld [vmem:[%s2484_s2 + $0x354] ss:$8 sps:$4 sm:$0xff]   ;;  %v1797_v3 = vld [vmem:[%s2486_s4 + $0xa0] ss:$8 sps:$4 sm:$0xff]   ;;  %v1707_v4 = vld [vmem:[%s2484_s2 + $0x350] ss:$8 sps:$4 sm:$0xff]  }
  0x77   :  { %1053 = vmatpush1.bf16.msra.mxu0 %v1662_v34  ;;  %1328 = vmatprep.subr.bf16.mxu1 %v1781_v40  ;;  %v1802_v5 = vld [vmem:[%s2486_s4 + $0xb4] ss:$8 sps:$4 sm:$0xff]   ;;  %v1715_v6 = vld [vmem:[%s2484_s2 + $0x364] ss:$8 sps:$4 sm:$0xff]   ;;  %v1800_v7 = vld [vmem:[%s2486_s4 + $0xb0] ss:$8 sps:$4 sm:$0xff]   ;;  %v162_v34 = vpack.c.bf16 %v2266_v39, %v2266_v39 }
  0x78   :  { %1054 = vmatprep.subr.bf16.mxu0 %v1667_v37  ;;  %v1713_v8 = vld [vmem:[%s2484_s2 + $0x360] ss:$8 sps:$4 sm:$0xff]   ;;  %v1805_v9 = vld [vmem:[%s2486_s4 + $0xc4] ss:$8 sps:$4 sm:$0xff]   ;;  %v1721_v10 = vld [vmem:[%s2484_s2 + $0x374] ss:$8 sps:$4 sm:$0xff]  }
  0x79   :  { %v1803_v11 = vld [vmem:[%s2486_s4 + $0xc0] ss:$8 sps:$4 sm:$0xff]   ;;  %v1719_v12 = vld [vmem:[%s2484_s2 + $0x370] ss:$8 sps:$4 sm:$0xff]   ;;  %v1727_v13 = vld [vmem:[%s2484_s2 + $0x384] ss:$8 sps:$4 sm:$0xff]  }
  0x7a   :  { %1329 = vmatpush1.bf16.msra.mxu1 %v1779_v42  ;;  %v1725_v14 = vld [vmem:[%s2484_s2 + $0x380] ss:$8 sps:$4 sm:$0xff]   ;;  %v1733_v16 = vld [vmem:[%s2484_s2 + $0x394] ss:$8 sps:$4 sm:$0xff]   ;;  %v1731_v17 = vld [vmem:[%s2484_s2 + $0x390] ss:$8 sps:$4 sm:$0xff]  }
  0x7b   :  { %1055 = vmatpush1.bf16.msra.mxu0 %v1665_v22  ;;  %1330 = vmatprep.subr.bf16.mxu1 %v1784_v44  ;;  %v1739_v19 = vld [vmem:[%s2484_s2 + $0x3a4] ss:$8 sps:$4 sm:$0xff]   ;;  %v1737_v20 = vld [vmem:[%s2484_s2 + $0x3a0] ss:$8 sps:$4 sm:$0xff]   ;;  %v1745_v21 = vld [vmem:[%s2484_s2 + $0x3b4] ss:$8 sps:$4 sm:$0xff]  }
  0x7c   :  { %1056 = vmatprep.subr.bf16.mxu0 %v1673_v41  ;;  %v1743_v24 = vld [vmem:[%s2484_s2 + $0x3b0] ss:$8 sps:$4 sm:$0xff]   ;;  %v1751_v25 = vld [vmem:[%s2484_s2 + $0x3c4] ss:$8 sps:$4 sm:$0xff]   ;;  %v1749_v28 = vld [vmem:[%s2484_s2 + $0x3c0] ss:$8 sps:$4 sm:$0xff]  }
  0x7d   :  { %v1757_v29 = vld [vmem:[%s2484_s2 + $0x3d4] ss:$8 sps:$4 sm:$0xff]   ;;  %v1755_v26 = vld [vmem:[%s2484_s2 + $0x3d0] ss:$8 sps:$4 sm:$0xff]   ;;  %v1763_v30 = vld [vmem:[%s2484_s2 + $0x3e4] ss:$8 sps:$4 sm:$0xff]  }
  0x7e   :  { %1331 = vmatpush1.bf16.msra.mxu1 %v1782_v47  ;;  %v1761_v31 = vld [vmem:[%s2484_s2 + $0x3e0] ss:$8 sps:$4 sm:$0xff]   ;;  %v1766_v32 = vld [vmem:[%s2484_s2 + $0x3f4] ss:$8 sps:$4 sm:$0xff]   ;;  %v1764_v33 = vld [vmem:[%s2484_s2 + $0x3f0] ss:$8 sps:$4 sm:$0xff]  }
  0x7f   :  { %1057 = vmatpush1.bf16.msra.mxu0 %v1671_v23  ;;  %1332 = vmatprep.subr.bf16.mxu1 %v1787_v27  ;;  %v1806_v35 = vld [vmem:[%s2486_s4 + $0xd0] ss:$8 sps:$4 sm:$0xff]   ;;  %v1808_v36 = vld [vmem:[%s2486_s4 + $0xd4] ss:$8 sps:$4 sm:$0xff]   ;;  %v1811_v37 = vld [vmem:[%s2486_s4 + $0xe4] ss:$8 sps:$4 sm:$0xff]  }
  0x80   :  { %1067 = vmatprep.subr.bf16.mxu0 %v1679_v45  ;;  %v1809_v38 = vld [vmem:[%s2486_s4 + $0xe0] ss:$8 sps:$4 sm:$0xff]   ;;  %v1814_v22 = vld [vmem:[%s2486_s4 + $0xf4] ss:$8 sps:$4 sm:$0xff]   ;;  %v1812_v39 = vld [vmem:[%s2486_s4 + $0xf0] ss:$8 sps:$4 sm:$0xff]  }
  0x81   :  { %v292_v43 = vld [vmem:[%s2485_s3] sm:$0x3]  ;;  %s1866_s10 = smov [#allocation2]  }
  0x82   :  { %1059 = vmatmul.mubr.bf16.vlgmr.msra.gmra.mrb[0].mxu0 %v160_v46  ;;  %1333 = vmatpush1.bf16.msra.mxu1 %v1785_v51  ;;  %v297_v44 = vrot.slane %v292_v43, %v1941_v15  ;;  %v301_v45 = vrot.slane %v292_v43, %v1946_v18  ;;  %s1376_s1 = sshll.u32 %s1866_s10, 4  ;;  %s1377_s1 = int_to_ptr.vmem [resolvable:$true] %s1376_s1 }
  0x83   :  { %1068 = vmatpush1.bf16.msra.mxu0 %v1677_v48  ;;  %1099 = vmatprep.mubr.bf16.mxu0 %v163_v49  ;;  %p1822_p1 = scmp.lt.s32.totalorder %s1377_s1, %s1377_s1 }
  0x84   :  { %1069 = vmatprep.subr.bf16.mxu0 %v1685_v50  ;;  %1334 = vmatprep.subr.bf16.mxu1 %v1790_v53 }
  0x86   :  { %1335 = vmatpush1.bf16.msra.mxu1 %v1788_v55 }
  0x87   :  { %1070 = vmatpush1.bf16.msra.mxu0 %v1683_v52  ;;  %1336 = vmatprep.subr.bf16.mxu1 %v1793_v57 }
  0x88   :  { %1071 = vmatprep.subr.bf16.mxu0 %v1691_v54 }
  0x8a   :  { %1337 = vmatpush1.bf16.msra.mxu1 %v1791_v59  ;;  %v1148_v59 = vld [vmem:[%s2487_s5] sm:$0x3]  ;;  %s1817_s5 = scalar_lea.vmem %s1377_s1, 32 }
  0x8b   :  { %1072 = vmatpush1.bf16.msra.mxu0 %v1689_v56  ;;  %1338 = vmatprep.subr.bf16.mxu1 %v1796_v61  ;;  %v1157_v61 = vrot.slane %v1148_v59, %v1946_v18  ;;  %p1818_p0 = scmp.ne.s32.totalorder %s1377_s1, %s1817_s5  ;;  %p1823_p2 = scmp.lt.s32.totalorder %s1817_s5, %s1817_s5 }
  0x8c   :  { %1073 = vmatprep.subr.bf16.mxu0 %v1697_v58 }
  0x8d   :  { %p1824_p3 = por %p1823_p2, %p1822_p1 }
  0x8e   :  { %1339 = vmatpush1.bf16.msra.mxu1 %v1794_v63 }
  0x8f   :  { %1074 = vmatpush1.bf16.msra.mxu0 %v1695_v60  ;;  %1340 = vmatprep.subr.bf16.mxu1 %v1799_v1  ;;  %v1153_v60 = vrot.slane %v1148_v59, %v1941_v15  ;;  %p1825_p4 = pnand %p1824_p3, %p1818_p0 }
  0x90   :  { %1075 = vmatprep.subr.bf16.mxu0 %v1703_v62 }
  0x92   :  { %1341 = vmatpush1.bf16.msra.mxu1 %v1797_v3 }
  0x93   :  { %1076 = vmatpush1.bf16.msra.mxu0 %v1701_v0  ;;  %1342 = vmatprep.subr.bf16.mxu1 %v1802_v5 }
  0x94   :  { %1077 = vmatprep.subr.bf16.mxu0 %v1709_v2 }
  0x96   :  { %1343 = vmatpush1.bf16.msra.mxu1 %v1800_v7 }
  0x97   :  { %1078 = vmatpush1.bf16.msra.mxu0 %v1707_v4  ;;  %1344 = vmatprep.subr.bf16.mxu1 %v1805_v9 }
  0x98   :  { %1079 = vmatprep.subr.bf16.mxu0 %v1715_v6 }
  0x9a   :  { %1345 = vmatpush1.bf16.msra.mxu1 %v1803_v11 }
  0x9b   :  { %1080 = vmatpush1.bf16.msra.mxu0 %v1713_v8  ;;  %1346 = vmatprep.subr.bf16.mxu1 %v1808_v36 }
  0x9c   :  { %1081 = vmatprep.subr.bf16.mxu0 %v1721_v10 }
  0x9e   :  { %1347 = vmatpush1.bf16.msra.mxu1 %v1806_v35 }
  0x9f   :  { %1082 = vmatpush1.bf16.msra.mxu0 %v1719_v12  ;;  %1348 = vmatprep.subr.bf16.mxu1 %v1811_v37 }
  0xa0   :  { %1083 = vmatprep.subr.bf16.mxu0 %v1727_v13 }
  0xa2   :  { %1349 = vmatpush1.bf16.msra.mxu1 %v1809_v38 }
  0xa3   :  { %1084 = vmatpush1.bf16.msra.mxu0 %v1725_v14  ;;  %1350 = vmatprep.subr.bf16.mxu1 %v1814_v22 }
  0xa4   :  { %1085 = vmatprep.subr.bf16.mxu0 %v1733_v16 }
  0xa6   :  { %1351 = vmatpush1.bf16.msra.mxu1 %v1812_v39 }
  0xa7   :  { %1086 = vmatpush1.bf16.msra.mxu0 %v1731_v17 }
  0xa8   :  { %1087 = vmatprep.subr.bf16.mxu0 %v1739_v19 }
  0xab   :  { %1088 = vmatpush1.bf16.msra.mxu0 %v1737_v20 }
  0xac   :  { %1089 = vmatprep.subr.bf16.mxu0 %v1745_v21 }
  0xaf   :  { %1090 = vmatpush1.bf16.msra.mxu0 %v1743_v24 }
  0xb0   :  { %1091 = vmatprep.subr.bf16.mxu0 %v1751_v25 }
  0xb3   :  { %1092 = vmatpush1.bf16.msra.mxu0 %v1749_v28 }
  0xb4   :  { %1093 = vmatprep.subr.bf16.mxu0 %v1757_v29 }
  0xb7   :  { %1094 = vmatpush1.bf16.msra.mxu0 %v1755_v26 }
  0xb8   :  { %1095 = vmatprep.subr.bf16.mxu0 %v1763_v30 }
  0xbb   :  { %1096 = vmatpush1.bf16.msra.mxu0 %v1761_v31 }
  0xbc   :  { %1097 = vmatprep.subr.bf16.mxu0 %v1766_v32 }
  0xbf   :  { %1098 = vmatpush1.bf16.msra.mxu0 %v1764_v33 }
  0xc2   :  { %1100 = vmatmul.mubr.bf16.vlgmr.msra.gmra.mrb[0].mxu0 %v162_v34 }
 0x13c   :  { %v978_v40 = vpop.f32.mrb[0].mxu1 }
 0x13d   :  { %v980_v41 = vpop.f32.mrb[1].mxu1  ;;  %v979_v46 = vadd.f32 %v978_v40, %v297_v44 }
 0x13e   :  { %v982_v42 = vpop.f32.mrb[2].mxu1  ;;  %v981_v47 = vadd.f32 %v980_v41, %v301_v45 }
 0x13f   :  { %v983_v23 = vpop.f32.mrb[3].mxu1 }
 0x195   :  { %v1101_v48 = vpop.f32.mrb[0].mxu0 }
 0x196   :  { %v1561_v49 = vadd.f32 %v1101_v48, %v979_v46  ;;  %v1103_v50 = vpop.f32.mrb[1].mxu0 }
 0x197   :  { %v1563_v27 = vadd.f32 %v1103_v50, %v981_v47  ;;  %v1105_v51 = vpop.f32.mrb[2].mxu0 }
 0x198   :  { %vm1108_vm2 = vcmp.gt.f32.partialorder %v1561_v49, 0.0  ;;  %v1110_v52 = vmul.f32 0.01, %v1561_v49  ;;  %v1106_v53 = vpop.f32.mrb[3].mxu0 }
 0x199   :  { %vm1109_vm3 = vcmp.gt.f32.partialorder %v1563_v27, 0.0  ;;  %v1111_v54 = vmul.f32 0.01, %v1563_v27 }
 0x19a   :  { %v1112_v55 = vsel %vm1108_vm2, %v1561_v49, %v1110_v52 }
 0x19b   :  { %v1113_v56 = vsel %vm1109_vm3, %v1563_v27, %v1111_v54  ;;  %v1114_v58 = vpack.c.bf16 %v1112_v55, %v1112_v55 }
 0x19c   :  { %v1115_v57 = vpack.c.bf16 %v1113_v56, %v1113_v56 }
 0x19e   :  { %1352 = vmatprep.mubr.bf16.mxu1 %v1115_v57 }
 0x19f   :  { %1353 = vmatmul.mubr.bf16.vlgmr.msra.gmra.mrb[4].mxu1 %v1114_v58 }
 0x272   :  { %v1354_v62 = vpop.f32.mrb[4].mxu1 }
 0x273   :  { %v1355_v63 = vadd.f32 %v1354_v62, %v1153_v60  ;;  %v1356_v0 = vpop.f32.mrb[5].mxu1 }
 0x274   :  { %v1357_v1 = vadd.f32 %v1356_v0, %v1157_v61  ;;  %v1358_v2 = vpop.f32.mrb[6].mxu1 }
 0x275   :  { %v1362_v3 = vmul.f32 0.01, %v1355_v63  ;;  %v1359_v4 = vpop.f32.mrb[7].mxu1  ;;  %vm1361_vm4 = vcmp.gt.f32.partialorder %v1355_v63, 0.0 }
 0x276   :  { %v1365_v5 = vmax.f32 %v1357_v1, 0.0 }
 0x277   :  { %v1363_v6 = vsel %vm1361_vm4, %v1355_v63, %v1362_v3 }
 0x278   :  { %v1366_v7 = vmul.f32 0.5, %v1365_v5  ;;  %1364 = vst [vmem:[#allocation2] sm:$0x3] %v1363_v6 }
 0x279   :  { %1828 = shalt.err (!%p1825_p4)
}
 0x27a   :  { %s1829_s13 = scalar_lea.hbm %s2488_s6, 32 }
 0x27b   :  { %p1830_p5 = scmp.ne.s32.totalorder %s2488_s6, %s1829_s13  ;;  %p1833_p6 = scmp.lt.u32.totalorder %s1829_s13, %s2488_s6 }
 0x27d   :  { %p1835_p7 = pnand %p1833_p6, %p1830_p5 }
 0x27f   :  { %1838 = shalt.err (!%p1835_p7)
}
 0x280   :  { %1379 = dma.vmem_to_hbm [thread:$0]  %s1377_s1, 32, %s2488_s6, [#allocation3]   ;;  %v1367_v15 = vmul.f32 1.442695, %v1366_v7 }
 0x281   :  { %s1867_s20 = smov [#allocation4]  }
 0x282   :  { %1815 = vpow2.f32 %v1367_v15  ;;  %s1386_s21 = sshll.u32 %s1867_s20, 4  ;;  %s1387_s21 = int_to_ptr.vmem [resolvable:$true] %s1386_s21 }
 0x283   :  { %s1839_s22 = scalar_lea.vmem %s1387_s21, 32  ;;  %p1844_p9 = scmp.lt.s32.totalorder %s1387_s21, %s1387_s21 }
 0x284   :  { %p1840_p8 = scmp.ne.s32.totalorder %s1387_s21, %s1839_s22  ;;  %p1845_p10 = scmp.lt.s32.totalorder %s1839_s22, %s1839_s22 }
 0x286   :  { %p1846_p11 = por %p1845_p10, %p1844_p9 }
 0x288   :  { %p1847_p12 = pnand %p1846_p11, %p1840_p8 }
 0x28c   :  { %v1816_v18 = vpop.eup %1815 }
 0x28d   :  { %1369 = vst [vmem:[#allocation4] sm:$0x3] %v1816_v18 }
 0x28e   :  { %1850 = shalt.err (!%p1847_p12)
}
 0x28f   :  { %s1851_s25 = scalar_lea.hbm %s2489_s7, 32 }
 0x290   :  { %p1852_p13 = scmp.ne.s32.totalorder %s2489_s7, %s1851_s25  ;;  %p1855_p0 = scmp.lt.u32.totalorder %s1851_s25, %s2489_s7 }
 0x292   :  { %p1857_p1 = pnand %p1855_p0, %p1852_p13 }
 0x294   :  { %1860 = shalt.err (!%p1857_p1)
}
 0x295   :  { %1389 = dma.vmem_to_hbm [thread:$0]  %s1387_s21, 32, %s2489_s7, [#allocation5]  }
 0x296   :  { %1861 = dma.done.wait [#allocation3], 32  }
 0x297   :  { %1862 = vsyncadd [#allocation3], 4294967264 }
 0x298   :  { %1863 = dma.done.wait [#allocation5], 32  }
 0x299   :  { %1864 = vsyncadd [#allocation5], 4294967264 }
 0x29a   :  { %1396 = vsyncpa [#allocation3], 1 }
 0x29b   :  { %1397 = vsyncpa [#allocation5], 1 }

// kernel: encoder_forward.2
= control target key start
LH: loop header
LB: loop body
LE: loop exit
PB: predicated region body
PF: predicated region fallthrough
CT: control target
= control target key end

     0   :  { %s20882_s0 = inlined_call_operand.vmem [shape: f32[2,1024], index: 0, kind: input, shape index: {}]   ;;  %s20883_s1 = inlined_call_operand.hbm [shape: bf16[4,1024,2048], index: 1, kind: input, shape index: {}]   ;;  %s20884_s2 = inlined_call_operand.hbm [shape: f32[4,1,2048], index: 2, kind: input, shape index: {}]   ;;  %s20885_s3 = inlined_call_operand.hbm [shape: bf16[4,2048,1024], index: 3, kind: input, shape index: {}]   ;;  %s20886_s4 = inlined_call_operand.vmem [shape: f32[2,2,1024], index: 4, kind: output, shape index: {}]  }
   0x1   :  { %20891 = sst [smem:[#allocation11_spill]] %s20884_s2 }
   0x2   :  { %9 = vsyncpa [#allocation3], 0 }
   0x3   :  { %11 = vsyncpa [#allocation3 + $0x1], 0 }
   0x4   :  { %12 = vsyncpa [#allocation5], 0 }
   0x5   :  { %14 = vsyncpa [#allocation5 + $0x1], 0  ;;  %s18220_s15 = smov 0   ;;  %s18222_s16 = smov 0  }
   0x6   :  { %s18224_s17 = smov 0   ;;  %s18226_s18 = smov 0  }
   0x7   :  { %s18228_s19 = smov 0   ;;  %s18230_s20 = smov 0  }
   0x8   :  { %s18232_s21 = smov 0   ;;  %s18234_s22 = smov 0  }
   0x9 LB: > { %s20887_s23 = sadd.s32 4294967295, %s18184_s22   ;;  %s29_s24 = sadd.s32 1, %s18176_s20  ;;  %s18184_s22 = sphi %s18234_s22, %s20_s22   ;;  %s18180_s21 = sphi %s18232_s21, %s20912_s21   ;;  %s18176_s20 = sphi %s18230_s20, %s20911_s20   ;;  %s18172_s19 = sphi %s18228_s19, %s20910_s19   ;;  %s18168_s18 = sphi %s18226_s18, %s20909_s18   ;;  %s18164_s17 = sphi %s18224_s17, %s20908_s17   ;;  %s18160_s16 = sphi %s18222_s16, %s20907_s16   ;;  %s18156_s15 = sphi %s18220_s15, %s20906_s15  }
   0xa   : > { %p30_p0 = scmp.ge.s32.totalorder %s29_s24, 2  ;;  %s32_s25 = sadd.s32 1, %s18180_s21 }
   0xb   : > { %s15628_s26 = sshll.u32 %s18180_s21, 1  ;;  %s64_s27 = sadd.s32 1, %s18164_s17 }
   0xc   : > { %s20914_s24 = smov (%p30_p0, %s29_s24), 0  ;;  %s20916_s25 = smov (!%p30_p0, %s32_s25), %s18180_s21 }
   0xd   : > { %20892 = sst [smem:[#allocation9_spill]] %s20914_s24  ;;  %s18267_s28 = sadd.s32 %s18176_s20, %s15628_s26 }
   0xe   : > { %p71_p1 = scmp.ne.s32.totalorder %s18164_s17, %s18160_s16  ;;  %p34_p2 = scmp.ge.s32.totalorder %s20916_s25, 2 }
   0xf   : > { %p72_p3 = scmp.eq.s32.totalorder %s18184_s22, 0  ;;  %p77_p4 = scmp.ne.s32.totalorder %s18160_s16, %s18156_s15 }
  0x10   : > { %p78_p5 = scmp.eq.s32.totalorder %s20887_s23, 0  ;;  %s20918_s25 = smov (%p34_p2, %s20916_s25), 0 }
  0x11   : > { %20893 = sst [smem:[#allocation10_spill]] %s20918_s25  ;;  %p73_p6 = por %p72_p3, %p71_p1 }
  0x12   : > { %p18277_p7 = por %p78_p5, %p77_p4  ;;  %s15629_s30 = sshll.u32 %s20918_s25, 1 }
  0x13   : > { %s60_s5 = sadd.s32 %s15629_s30, %s20914_s24  ;;  %p17949_p8 = scmp.lt.s32.totalorder %s18184_s22, 4 }
  0x14   : > { %s20894_s29 = scalar_select %p18277_p7, 1, 0 }
  0x15   : > { %s61_s6 = ssub.s32 %s18267_s28, %s60_s5  ;;  %s18286_s7 = sand.u32 1, %s18164_s17  }
  0x16   : > { %p62_p9 = scmp.eq.s32.totalorder %s61_s6, 0  ;;  %s17705_s9 = sshll.u32 %s18267_s28, 17 }
  0x17   : > { %p18290_p10 = pnand %p17949_p8, %p73_p6  ;;  %s213_s12 = sand.u32 1, %s18184_s22  }
  0x18   : > { %s18295_s11 = scalar_select %p62_p9, %s18164_s17, %s64_s27  }
  0x19   : > { %s15640_s13 = sshll.u32 %s18286_s7, 4  ;;  %s17706_s14 = sshll.u32 %s18267_s28, 8 }
  0x1a   : > { %s20896_s2 = sld [smem:[#allocation11_spill]]  ;;  %s217_s5 = scalar_lea.vmem [#allocation4], %s15640_s13 }
  0x1b   : > { %s227_s6 = sshll.u32 %s217_s5, 4  ;;  %s18307_s23 = scalar_lea.sflag [#allocation5], %s213_s12  ;;  %s18305_s6 = int_to_ptr.vmem [resolvable:$true] %s227_s6 }
  0x1c   : > { %p18313_p12 = pneg %p18290_p10 }
  0x20   : > { %s18303_s30 = scalar_lea.hbm %s20896_s2, %s17706_s14  ;;  %s18029_s13 = scalar_lea.hbm %s20896_s2, 1024 }
  0x21   : > { %s18024_s27 = scalar_lea.hbm %s18303_s30, 256  ;;  %p18030_p1 = scmp.lt.u32.totalorder %s18303_s30, %s20896_s2 }
  0x22   : > { %p18025_p11 = scmp.ne.s32.totalorder %s18303_s30, %s18024_s27  ;;  %p18031_p2 = scmp.lt.u32.totalorder %s18029_s13, %s18024_s27 }
  0x23   : > { %p18033_p4 = scmp.lt.u32.totalorder %s18024_s27, %s18303_s30 }
  0x24   : > { %p18027_p13 = pnand %p18313_p12, %p18025_p11  ;;  %p18032_p3 = por %p18031_p2, %p18030_p1 }
  0x26   : > { %p18028_p0 = pneg %p18027_p13  ;;  %p18034_p5 = por %p18033_p4, %p18032_p3 }
  0x28   : > { %p18035_p6 = pnand %p18034_p5, %p18028_p0 }
  0x2a   : > { %18038 = shalt.err (!%p18035_p6)
}
  0x2b   : > { %s18039_s12 = scalar_lea.vmem %s18305_s6, 256  ;;  %s18186_s14 = smov [#allocation4]  }
  0x2c   : > { %p18040_p8 = scmp.ne.s32.totalorder %s18305_s6, %s18039_s12  ;;  %s18044_s15 = sshll.u32 %s18186_s14, 4  ;;  %s18045_s15 = int_to_ptr.vmem [resolvable:$false] %s18044_s15 }
  0x2d   : > { %s18046_s26 = scalar_lea.vmem %s18045_s15, 512  ;;  %p18047_p13 = scmp.lt.s32.totalorder %s18305_s6, %s18045_s15 }
  0x2e   : > { %p18042_p9 = pnand %p18040_p8, %p18313_p12  ;;  %p18048_p7 = scmp.lt.s32.totalorder %s18046_s26, %s18039_s12 }
  0x30   : > { %p18043_p11 = pneg %p18042_p9  ;;  %p18049_p1 = por %p18048_p7, %p18047_p13 }
  0x32   : > { %p18050_p2 = pnand %p18049_p1, %p18043_p11 }
  0x34   : > { %18053 = shalt.err (!%p18050_p2)
}
  0x35   : > { %17945 = dma.hbm_to_vmem [thread:$0]  (!%p18290_p10), %s18303_s30, 256, %s18305_s6, %s18307_s23  }
  0x36   : > { %s18342_s5 = scalar_lea.hbm %s20885_s3, %s17705_s9  ;;  %s20898_s12 = sshll.u32 %s18286_s7, 13 }
  0x37   : > { %s238_s14 = scalar_lea.vmem [#allocation6], %s20898_s12  ;;  %p15648_p7 = scmp.ge.s32.totalorder %s18184_s22, 1 }
  0x38   : > { %s247_s15 = sshll.u32 %s238_s14, 4  ;;  %p255_p0 = scmp.lt.s32.totalorder %s18184_s22, 5  ;;  %s18346_s15 = int_to_ptr.vmem [resolvable:$true] %s247_s15 }
  0x39   : > { %s18359_s6 = scalar_lea.hbm %s20883_s1, %s17705_s9  ;;  %s20900_s27 = smov %s20898_s12 }
  0x3a   : > { %p18350_p3 = pnand %p15648_p7, %p255_p0  ;;  %s194_s13 = scalar_lea.vmem [#allocation2], %s20900_s27 }
  0x3b   : > { %s203_s12 = sshll.u32 %s194_s13, 4  ;;  %s191_s14 = scalar_lea.sflag [#allocation3], %s18286_s7  ;;  %s18363_s12 = int_to_ptr.vmem [resolvable:$true] %s203_s12 }
  0x3c   : > { %s20899_s26 = scalar_select %p18350_p3, 1, 0 }
  0x3d   : > { %s18054_s25 = scalar_lea.hbm %s18359_s6, 131072  ;;  %s18059_s2 = scalar_lea.hbm %s20883_s1, 524288 }
  0x3e   : > { %p18055_p4 = scmp.ne.s32.totalorder %s18359_s6, %s18054_s25  ;;  %p18060_p8 = scmp.lt.u32.totalorder %s18359_s6, %s20883_s1 }
  0x3f   : > { %p18061_p9 = scmp.lt.u32.totalorder %s18059_s2, %s18054_s25  ;;  %p18063_p13 = scmp.lt.u32.totalorder %s18054_s25, %s18359_s6 }
  0x40   : > { %p18057_p5 = pnand %p18055_p4, %p18313_p12 }
  0x41   : > { %p18062_p11 = por %p18061_p9, %p18060_p8 }
  0x42   : > { %p18058_p6 = pneg %p18057_p5 }
  0x43   : > { %p18064_p1 = por %p18063_p13, %p18062_p11 }
  0x45   : > { %p18065_p2 = pnand %p18064_p1, %p18058_p6 }
  0x47   : > { %18068 = shalt.err (!%p18065_p2)
}
  0x48   : > { %s18069_s27 = scalar_lea.vmem %s18363_s12, 131072  ;;  %s18187_s24 = smov [#allocation2]  }
  0x49   : > { %p18070_p7 = scmp.ne.s32.totalorder %s18363_s12, %s18069_s27  ;;  %s18074_s13 = sshll.u32 %s18187_s24, 4  ;;  %s18075_s13 = int_to_ptr.vmem [resolvable:$false] %s18074_s13 }
  0x4a   : > { %s18076_s28 = scalar_lea.vmem %s18075_s13, 262144  ;;  %p18077_p5 = scmp.lt.s32.totalorder %s18363_s12, %s18075_s13 }
  0x4b   : > { %p18072_p0 = pnand %p18070_p7, %p18313_p12  ;;  %p18078_p3 = scmp.lt.s32.totalorder %s18076_s28, %s18069_s27 }
  0x4d   : > { %p18073_p4 = pneg %p18072_p0  ;;  %p18079_p8 = por %p18078_p3, %p18077_p5 }
  0x4f   : > { %p18080_p9 = pnand %p18079_p8, %p18073_p4 }
  0x51   : > { %18083 = shalt.err (!%p18080_p9)
}
  0x52   : > { %s18188_s25 = smov 1024   ;;  %s18189_s2 = smov 64  }
  0x53   : > { %17942 = dma.hbm_to_vmem [thread:$0]  (!%p18290_p10), %s18359_s6, 131072, %s18363_s12, %s191_s14, %s18188_s25, %s18188_s25, %s18189_s2  }
  0x54   : > { %s18084_s9 = scalar_lea.hbm %s18342_s5, 131072  ;;  %s18089_s24 = scalar_lea.hbm %s20885_s3, 524288 }
  0x55   : > { %p18085_p6 = scmp.ne.s32.totalorder %s18342_s5, %s18084_s9  ;;  %p18090_p13 = scmp.lt.u32.totalorder %s18342_s5, %s20885_s3 }
  0x56   : > { %p18091_p1 = scmp.lt.u32.totalorder %s18089_s24, %s18084_s9  ;;  %p18093_p7 = scmp.lt.u32.totalorder %s18084_s9, %s18342_s5 }
  0x57   : > { %p18087_p3 = pnand %p18085_p6, %p18313_p12 }
  0x58   : > { %p18092_p2 = por %p18091_p1, %p18090_p13 }
  0x59   : > { %p18088_p11 = pneg %p18087_p3 }
  0x5a   : > { %p18094_p0 = por %p18093_p7, %p18092_p2 }
  0x5c   : > { %p18095_p4 = pnand %p18094_p0, %p18088_p11 }
  0x5e   : > { %18098 = shalt.err (!%p18095_p4)
}
  0x5f   : > { %s18099_s7 = scalar_lea.vmem %s18346_s15, 131072  ;;  %s18190_s6 = smov [#allocation6]  }
  0x60   : > { %p18100_p5 = scmp.ne.s32.totalorder %s18346_s15, %s18099_s7  ;;  %s18104_s12 = sshll.u32 %s18190_s6, 4  ;;  %s18105_s12 = int_to_ptr.vmem [resolvable:$false] %s18104_s12 }
  0x61   : > { %s18106_s14 = scalar_lea.vmem %s18105_s12, 262144  ;;  %p18107_p6 = scmp.lt.s32.totalorder %s18346_s15, %s18105_s12 }
  0x62   : > { %p18102_p8 = pnand %p18100_p5, %p18313_p12  ;;  %p18108_p3 = scmp.lt.s32.totalorder %s18106_s14, %s18099_s7 }
  0x64   : > { %p18103_p9 = pneg %p18102_p8  ;;  %p18109_p13 = por %p18108_p3, %p18107_p6 }
  0x66   : > { %p18110_p1 = pnand %p18109_p13, %p18103_p9 }
  0x68   : > { %18113 = shalt.err (!%p18110_p1)
}
  0x69   : > { %s18191_s25 = smov 512   ;;  %s18192_s2 = smov 32  }
  0x6a   : > { %17948 = dma.hbm_to_vmem [thread:$0]  (!%p18290_p10), %s18342_s5, 131072, %s18346_s15, %s18307_s23, %s18191_s25, %s18191_s25, %s18192_s2  }
  0x6b   : > { %p20901_p12 = scmp.ne.s32.totalorder %s20899_s26, 0 }
  0x6c   : > { %s18414_s8 = sand.u32 (!%p20901_p12), 1, %s18160_s16   ;;  %p20902_p11 = scmp.ne.s32.totalorder (!%p20901_p12), %s20894_s29, 0 }
  0x6d   : > { %259 = sbr.rel (%p20901_p12) target bundleno = 2398 (0x95e), region = 36  ;;  %s15649_s9 = sshll.u32 (!%p20901_p12), %s18414_s8, 13 }
  0x6e   : > { %s262_s30 = scalar_lea.sflag (!%p20901_p12), [#allocation3], %s18414_s8  ;;  %s18420_s27 = scalar_lea.vmem (!%p20901_p12), [#allocation2], %s15649_s9 }
  0x74   : > { %18147 = dma.done.wait (%p20902_p11), %s262_s30, 131072  }
  0x75   : > { %18149 = vsyncadd (%p20902_p11), %s262_s30, 4294836224  ;;  %s20903_s23 = sadd.s32 4294967295, %s18184_s22   ;;  %s15650_s5 = sshll.u32 %s18414_s8, 4 }
  0x76   : > { %s270_s10 = sand.u32 1, %s20903_s23   ;;  %s18429_s26 = scalar_lea.vmem [#allocation4], %s15650_s5 }
  0x77   : > { %s271_s15 = scalar_lea.sflag [#allocation5], %s270_s10 }
  0x78   : > { %18151 = dma.done.wait (%p20902_p11), %s271_s15, 131328  }
  0x79   : > { %18153 = vsyncadd (%p20902_p11), %s271_s15, 4294835968  ;;  %p324_p10 = scmp.lt.s32.totalorder %s18172_s19, 1  ;;  %v383_v0 = vld [vmem:[%s18420_s27] sm:$0xff]  ;;  %v384_v2 = vld [vmem:[%s18420_s27 + $0x8] sm:$0xff]  ;;  %v18193_v32 = vmov 1983009808   ;;  %v337_v34 = vlaneseq }
  0x7a   : > { %v391_v1 = vld [vmem:[%s18420_s27 + $0x40] sm:$0xff]  ;;  %v392_v4 = vld [vmem:[%s18420_s27 + $0x48] sm:$0xff]  ;;  %v335_v33 = vunpack.c.l.s4 %v18193_v32  ;;  %s19627_s14 = scalar_lea.vmem [#allocation6], %s15649_s9  ;;  %p17702_p2 = scmp.ne.s32.totalorder %s18168_s18, 0 }
  0x7b   : > { %s20920_s19 = smov (!%p324_p10, %s18172_s19), 1  ;;  %v15655_v3 = vcombine.high %v383_v0, %v391_v1  ;;  %v15654_v5 = vcombine.low %v383_v0, %v391_v1  ;;  %v399_v6 = vld [vmem:[%s18420_s27 + $0x80] sm:$0xff]  ;;  %v15657_v8 = vcombine.high %v384_v2, %v392_v4  ;;  %v15656_v9 = vcombine.low %v384_v2, %v392_v4  ;;  %v400_v11 = vld [vmem:[%s18420_s27 + $0x88] sm:$0xff] }
  0x7c   : > { %s17708_s24 = sshll.u32 %s20920_s19, 4  ;;  %v407_v7 = vld [vmem:[%s18420_s27 + $0xc0] sm:$0xff]  ;;  %v408_v12 = vld [vmem:[%s18420_s27 + $0xc8] sm:$0xff]  ;;  %v336_v43 = vunpack.c.0.s8 %v335_v33  ;;  %v18464_v44 = vshrl.u32 %v337_v34, 7 }
  0x7d   : > { %s18440_s7 = scalar_lea.vmem %s20886_s4, %s17708_s24  ;;  %v15671_v10 = vcombine.high %v399_v6, %v407_v7  ;;  %v415_v13 = vld [vmem:[%s18420_s27 + $0x100] sm:$0xff]  ;;  %6611 = vmatprep.subr.bf16.mxu0 %v15655_v3  ;;  %v15673_v14 = vcombine.high %v400_v11, %v408_v12  ;;  %v416_v16 = vld [vmem:[%s18420_s27 + $0x108] sm:$0xff]  ;;  %6775 = vmatprep.subr.bf16.mxu1 %v15657_v8  ;;  %v15670_v18 = vcombine.low %v399_v6, %v407_v7 }
  0x7e   : > { %v423_v15 = vld [vmem:[%s18420_s27 + $0x140] sm:$0xff]  ;;  %v424_v17 = vld [vmem:[%s18420_s27 + $0x148] sm:$0xff]  ;;  %6612 = vmatpush1.bf16.msra.mxu0 %v15654_v5  ;;  %6776 = vmatpush1.bf16.msra.mxu1 %v15656_v9  ;;  %v15672_v19 = vcombine.low %v400_v11, %v408_v12  ;;  %v18471_v53 = vsub.s32 %v336_v43, %v18464_v44 }
  0x7f   : > { %6613 = vmatprep.subr.bf16.mxu0 %v15671_v10  ;;  %v15687_v20 = vcombine.high %v415_v13, %v423_v15  ;;  %6777 = vmatprep.subr.bf16.mxu1 %v15673_v14  ;;  %v15689_v21 = vcombine.high %v416_v16, %v424_v17  ;;  %v431_v22 = vld [vmem:[%s18420_s27 + $0x180] sm:$0xff]  ;;  %v432_v24 = vld [vmem:[%s18420_s27 + $0x188] sm:$0xff]  ;;  %v15686_v26 = vcombine.low %v415_v13, %v423_v15 }
  0x80   : > { %v439_v23 = vld [vmem:[%s18420_s27 + $0x1c0] sm:$0xff]  ;;  %v440_v25 = vld [vmem:[%s18420_s27 + $0x1c8] sm:$0xff]  ;;  %v15688_v27 = vcombine.low %v416_v16, %v424_v17 }
  0x81   : > { %v15703_v28 = vcombine.high %v431_v22, %v439_v23  ;;  %v15705_v29 = vcombine.high %v432_v24, %v440_v25  ;;  %v447_v30 = vld [vmem:[%s18420_s27 + $0x200] sm:$0xff]  ;;  %v448_v35 = vld [vmem:[%s18420_s27 + $0x208] sm:$0xff]  ;;  %v15702_v37 = vcombine.low %v431_v22, %v439_v23  ;;  %v15704_v38 = vcombine.low %v432_v24, %v440_v25 }
  0x82   : > { %6614 = vmatpush1.bf16.msra.mxu0 %v15670_v18  ;;  %6778 = vmatpush1.bf16.msra.mxu1 %v15672_v19  ;;  %v455_v31 = vld [vmem:[%s18420_s27 + $0x240] sm:$0xff]  ;;  %v456_v36 = vld [vmem:[%s18420_s27 + $0x248] sm:$0xff] }
  0x83   : > { %6615 = vmatprep.subr.bf16.mxu0 %v15687_v20  ;;  %6779 = vmatprep.subr.bf16.mxu1 %v15689_v21  ;;  %v15719_v39 = vcombine.high %v447_v30, %v455_v31  ;;  %v15721_v40 = vcombine.high %v448_v35, %v456_v36  ;;  %v463_v41 = vld [vmem:[%s18420_s27 + $0x280] sm:$0xff]  ;;  %v464_v45 = vld [vmem:[%s18420_s27 + $0x288] sm:$0xff]  ;;  %v15718_v47 = vcombine.low %v447_v30, %v455_v31 }
  0x84   : > { %v471_v42 = vld [vmem:[%s18420_s27 + $0x2c0] sm:$0xff]  ;;  %v472_v46 = vld [vmem:[%s18420_s27 + $0x2c8] sm:$0xff]  ;;  %v15720_v48 = vcombine.low %v448_v35, %v456_v36 }
  0x85   : > { %v15735_v49 = vcombine.high %v463_v41, %v471_v42  ;;  %v15737_v50 = vcombine.high %v464_v45, %v472_v46  ;;  %v479_v51 = vld [vmem:[%s18420_s27 + $0x300] sm:$0xff]  ;;  %v480_v54 = vld [vmem:[%s18420_s27 + $0x308] sm:$0xff]  ;;  %v15734_v56 = vcombine.low %v463_v41, %v471_v42  ;;  %v15736_v57 = vcombine.low %v464_v45, %v472_v46 }
  0x86   : > { %6616 = vmatpush1.bf16.msra.mxu0 %v15686_v26  ;;  %6780 = vmatpush1.bf16.msra.mxu1 %v15688_v27  ;;  %v487_v52 = vld [vmem:[%s18420_s27 + $0x340] sm:$0xff]  ;;  %v488_v55 = vld [vmem:[%s18420_s27 + $0x348] sm:$0xff] }
  0x87   : > { %6617 = vmatprep.subr.bf16.mxu0 %v15703_v28  ;;  %6781 = vmatprep.subr.bf16.mxu1 %v15705_v29  ;;  %v15751_v58 = vcombine.high %v479_v51, %v487_v52  ;;  %v18478_v59 = vld [vmem:[%s20882_s0] sm:$0xff]  ;;  %v15753_v60 = vcombine.high %v480_v54, %v488_v55  ;;  %v496_v0 = vld [vmem:[%s18420_s27 + $0x388] sm:$0xff]  ;;  %v15750_v2 = vcombine.low %v479_v51, %v487_v52 }
  0x88   : > { %v495_v61 = vld [vmem:[%s18420_s27 + $0x380] sm:$0xff]  ;;  %v18484_v63 = vrot.slane %v18478_v59, %v18471_v53  ;;  %v504_v1 = vld [vmem:[%s18420_s27 + $0x3c8] sm:$0xff]  ;;  %v15752_v4 = vcombine.low %v480_v54, %v488_v55 }
  0x89   : > { %v503_v62 = vld [vmem:[%s18420_s27 + $0x3c0] sm:$0xff]  ;;  %v15769_v6 = vcombine.high %v496_v0, %v504_v1  ;;  %v512_v10 = vld [vmem:[%s18420_s27 + $0x408] sm:$0xff]  ;;  %v15768_v13 = vcombine.low %v496_v0, %v504_v1 }
  0x8a   : > { %6618 = vmatpush1.bf16.msra.mxu0 %v15702_v37  ;;  %6782 = vmatpush1.bf16.msra.mxu1 %v15704_v38  ;;  %v348_v3 = vcombine.high %v18484_v63, %v18484_v63  ;;  %v15767_v5 = vcombine.high %v495_v61, %v503_v62  ;;  %v511_v7 = vld [vmem:[%s18420_s27 + $0x400] sm:$0xff]  ;;  %v520_v11 = vld [vmem:[%s18420_s27 + $0x448] sm:$0xff]  ;;  %v15766_v12 = vcombine.low %v495_v61, %v503_v62 }
  0x8b   : > { %6619 = vmatprep.subr.bf16.mxu0 %v15719_v39  ;;  %6783 = vmatprep.subr.bf16.mxu1 %v15721_v40  ;;  %v519_v8 = vld [vmem:[%s18420_s27 + $0x440] sm:$0xff]  ;;  %v15785_v15 = vcombine.high %v512_v10, %v520_v11  ;;  %v528_v18 = vld [vmem:[%s18420_s27 + $0x488] sm:$0xff]  ;;  %v15784_v21 = vcombine.low %v512_v10, %v520_v11 }
  0x8c   : > { %v18492_v9 = vpack.c.bf16 %v348_v3, %v348_v3  ;;  %v15783_v14 = vcombine.high %v511_v7, %v519_v8  ;;  %v527_v16 = vld [vmem:[%s18420_s27 + $0x480] sm:$0xff]  ;;  %v536_v19 = vld [vmem:[%s18420_s27 + $0x4c8] sm:$0xff]  ;;  %v15782_v20 = vcombine.low %v511_v7, %v519_v8 }
  0x8d   : > { %v535_v17 = vld [vmem:[%s18420_s27 + $0x4c0] sm:$0xff]  ;;  %v15801_v23 = vcombine.high %v528_v18, %v536_v19  ;;  %v544_v26 = vld [vmem:[%s18420_s27 + $0x508] sm:$0xff]  ;;  %v15800_v29 = vcombine.low %v528_v18, %v536_v19 }
  0x8e   : > { %6620 = vmatpush1.bf16.msra.mxu0 %v15718_v47  ;;  %6784 = vmatpush1.bf16.msra.mxu1 %v15720_v48  ;;  %v15799_v22 = vcombine.high %v527_v16, %v535_v17  ;;  %v543_v24 = vld [vmem:[%s18420_s27 + $0x500] sm:$0xff]  ;;  %v552_v27 = vld [vmem:[%s18420_s27 + $0x548] sm:$0xff]  ;;  %v15798_v28 = vcombine.low %v527_v16, %v535_v17 }
  0x8f   : > { %6621 = vmatprep.subr.bf16.mxu0 %v15735_v49  ;;  %6785 = vmatprep.subr.bf16.mxu1 %v15737_v50  ;;  %v551_v25 = vld [vmem:[%s18420_s27 + $0x540] sm:$0xff]  ;;  %v15817_v31 = vcombine.high %v544_v26, %v552_v27  ;;  %v560_v34 = vld [vmem:[%s18420_s27 + $0x588] sm:$0xff]  ;;  %v15816_v37 = vcombine.low %v544_v26, %v552_v27 }
  0x90   : > { %6643 = vmatprep.mubr.bf16.mxu0 %v18492_v9  ;;  %6807 = vmatprep.mubr.bf16.mxu1 %v18492_v9  ;;  %v15815_v30 = vcombine.high %v543_v24, %v551_v25  ;;  %v559_v32 = vld [vmem:[%s18420_s27 + $0x580] sm:$0xff]  ;;  %v568_v35 = vld [vmem:[%s18420_s27 + $0x5c8] sm:$0xff]  ;;  %v15814_v36 = vcombine.low %v543_v24, %v551_v25  ;;  %v18541_v25 = vpack.c.bf16 %v18484_v63, %v18484_v63 }
  0x91   : > { %v567_v33 = vld [vmem:[%s18420_s27 + $0x5c0] sm:$0xff]  ;;  %v15833_v39 = vcombine.high %v560_v34, %v568_v35  ;;  %v576_v42 = vld [vmem:[%s18420_s27 + $0x608] sm:$0xff]  ;;  %v15832_v46 = vcombine.low %v560_v34, %v568_v35 }
  0x92   : > { %6622 = vmatpush1.bf16.msra.mxu0 %v15734_v56  ;;  %6786 = vmatpush1.bf16.msra.mxu1 %v15736_v57  ;;  %v15831_v38 = vcombine.high %v559_v32, %v567_v33  ;;  %v575_v40 = vld [vmem:[%s18420_s27 + $0x600] sm:$0xff]  ;;  %v584_v43 = vld [vmem:[%s18420_s27 + $0x648] sm:$0xff]  ;;  %v15830_v45 = vcombine.low %v559_v32, %v567_v33 }
  0x93   : > { %6623 = vmatprep.subr.bf16.mxu0 %v15751_v58  ;;  %6787 = vmatprep.subr.bf16.mxu1 %v15753_v60  ;;  %v583_v41 = vld [vmem:[%s18420_s27 + $0x640] sm:$0xff]  ;;  %v15849_v48 = vcombine.high %v576_v42, %v584_v43  ;;  %v592_v51 = vld [vmem:[%s18420_s27 + $0x688] sm:$0xff]  ;;  %v15848_v55 = vcombine.low %v576_v42, %v584_v43 }
  0x94   : > { %v15847_v47 = vcombine.high %v575_v40, %v583_v41  ;;  %v591_v49 = vld [vmem:[%s18420_s27 + $0x680] sm:$0xff]  ;;  %v600_v52 = vld [vmem:[%s18420_s27 + $0x6c8] sm:$0xff]  ;;  %v15846_v54 = vcombine.low %v575_v40, %v583_v41 }
  0x95   : > { %v599_v50 = vld [vmem:[%s18420_s27 + $0x6c0] sm:$0xff]  ;;  %v15865_v57 = vcombine.high %v592_v51, %v600_v52  ;;  %v608_v61 = vld [vmem:[%s18420_s27 + $0x708] sm:$0xff]  ;;  %v15864_v1 = vcombine.low %v592_v51, %v600_v52 }
  0x96   : > { %6624 = vmatpush1.bf16.msra.mxu0 %v15750_v2  ;;  %6788 = vmatpush1.bf16.msra.mxu1 %v15752_v4  ;;  %v15863_v56 = vcombine.high %v591_v49, %v599_v50  ;;  %v607_v58 = vld [vmem:[%s18420_s27 + $0x700] sm:$0xff]  ;;  %v616_v62 = vld [vmem:[%s18420_s27 + $0x748] sm:$0xff]  ;;  %v15862_v0 = vcombine.low %v591_v49, %v599_v50 }
  0x97   : > { %6625 = vmatprep.subr.bf16.mxu0 %v15767_v5  ;;  %6789 = vmatprep.subr.bf16.mxu1 %v15769_v6  ;;  %v615_v60 = vld [vmem:[%s18420_s27 + $0x740] sm:$0xff]  ;;  %v15881_v3 = vcombine.high %v608_v61, %v616_v62  ;;  %v333_v6 = vcombine.high %v18478_v59, %v18478_v59  ;;  %v624_v7 = vld [vmem:[%s18420_s27 + $0x788] sm:$0xff]  ;;  %v15880_v11 = vcombine.low %v608_v61, %v616_v62 }
  0x98   : > { %v15879_v2 = vcombine.high %v607_v58, %v615_v60  ;;  %v623_v4 = vld [vmem:[%s18420_s27 + $0x780] sm:$0xff]  ;;  %v632_v8 = vld [vmem:[%s18420_s27 + $0x7c8] sm:$0xff]  ;;  %v15878_v10 = vcombine.low %v607_v58, %v615_v60 }
  0x99   : > { %v631_v5 = vld [vmem:[%s18420_s27 + $0x7c0] sm:$0xff]  ;;  %v18531_v16 = vrot.slane %v333_v6, %v18471_v53  ;;  %v640_v59 = vld [vmem:[%s18420_s27 + $0x808] sm:$0xff]  ;;  %v15896_v19 = vcombine.low %v624_v7, %v632_v8 }
  0x9a   : > { %6626 = vmatpush1.bf16.msra.mxu0 %v15766_v12  ;;  %6790 = vmatpush1.bf16.msra.mxu1 %v15768_v13  ;;  %v15895_v12 = vcombine.high %v623_v4, %v631_v5  ;;  %v15897_v13 = vcombine.high %v624_v7, %v632_v8  ;;  %v648_v17 = vld [vmem:[%s18420_s27 + $0x848] sm:$0xff]  ;;  %v15894_v18 = vcombine.low %v623_v4, %v631_v5  ;;  %v671_v32 = vld [vmem:[%s18420_s27 + $0x900] sm:$0xff] }
  0x9b   : > { %6627 = vmatprep.subr.bf16.mxu0 %v15783_v14  ;;  %6791 = vmatprep.subr.bf16.mxu1 %v15785_v15  ;;  %v639_v14 = vld [vmem:[%s18420_s27 + $0x800] sm:$0xff]  ;;  %v349_v24 = vcombine.high %v18531_v16, %v18531_v16  ;;  %v656_v26 = vld [vmem:[%s18420_s27 + $0x888] sm:$0xff] }
  0x9c   : > { %v647_v15 = vld [vmem:[%s18420_s27 + $0x840] sm:$0xff]  ;;  %v664_v27 = vld [vmem:[%s18420_s27 + $0x8c8] sm:$0xff] }
  0x9d   : > { %v679_v33 = vld [vmem:[%s18420_s27 + $0x940] sm:$0xff]  ;;  %v18547_v34 = vpack.c.bf16 %v349_v24, %v349_v24  ;;  %v672_v63 = vld [vmem:[%s18420_s27 + $0x908] sm:$0xff] }
  0x9e   : > { %6628 = vmatpush1.bf16.msra.mxu0 %v15782_v20  ;;  %6792 = vmatpush1.bf16.msra.mxu1 %v15784_v21  ;;  %v15911_v20 = vcombine.high %v639_v14, %v647_v15  ;;  %v15913_v21 = vcombine.high %v640_v59, %v648_v17  ;;  %v680_v35 = vld [vmem:[%s18420_s27 + $0x948] sm:$0xff]  ;;  %v687_v40 = vld [vmem:[%s18420_s27 + $0x980] sm:$0xff] }
  0x9f   : > { %6629 = vmatprep.subr.bf16.mxu0 %v15799_v22  ;;  %6793 = vmatprep.subr.bf16.mxu1 %v15801_v23  ;;  %v655_v22 = vld [vmem:[%s18420_s27 + $0x880] sm:$0xff]  ;;  %v688_v42 = vld [vmem:[%s18420_s27 + $0x988] sm:$0xff] }
  0xa0   : > { %v663_v23 = vld [vmem:[%s18420_s27 + $0x8c0] sm:$0xff]  ;;  %v696_v43 = vld [vmem:[%s18420_s27 + $0x9c8] sm:$0xff] }
  0xa1   : > { %v695_v41 = vld [vmem:[%s18420_s27 + $0x9c0] sm:$0xff]  ;;  %v704_v51 = vld [vmem:[%s18420_s27 + $0xa08] sm:$0xff] }
  0xa2   : > { %6630 = vmatpush1.bf16.msra.mxu0 %v15798_v28  ;;  %6794 = vmatpush1.bf16.msra.mxu1 %v15800_v29  ;;  %v15910_v28 = vcombine.low %v639_v14, %v647_v15  ;;  %v15912_v29 = vcombine.low %v640_v59, %v648_v17  ;;  %v703_v49 = vld [vmem:[%s18420_s27 + $0xa00] sm:$0xff]  ;;  %v712_v52 = vld [vmem:[%s18420_s27 + $0xa48] sm:$0xff] }
  0xa3   : > { %6631 = vmatprep.subr.bf16.mxu0 %v15815_v30  ;;  %6795 = vmatprep.subr.bf16.mxu1 %v15817_v31  ;;  %v15927_v30 = vcombine.high %v655_v22, %v663_v23  ;;  %v15929_v31 = vcombine.high %v656_v26, %v664_v27  ;;  %v711_v50 = vld [vmem:[%s18420_s27 + $0xa40] sm:$0xff]  ;;  %v720_v61 = vld [vmem:[%s18420_s27 + $0xa88] sm:$0xff] }
  0xa4   : > { %v719_v58 = vld [vmem:[%s18420_s27 + $0xa80] sm:$0xff]  ;;  %v728_v62 = vld [vmem:[%s18420_s27 + $0xac8] sm:$0xff] }
  0xa5   : > { %v727_v60 = vld [vmem:[%s18420_s27 + $0xac0] sm:$0xff]  ;;  %v736_v6 = vld [vmem:[%s18420_s27 + $0xb08] sm:$0xff] }
  0xa6   : > { %6632 = vmatpush1.bf16.msra.mxu0 %v15814_v36  ;;  %6796 = vmatpush1.bf16.msra.mxu1 %v15816_v37  ;;  %v15926_v36 = vcombine.low %v655_v22, %v663_v23  ;;  %v15928_v37 = vcombine.low %v656_v26, %v664_v27  ;;  %v735_v4 = vld [vmem:[%s18420_s27 + $0xb00] sm:$0xff]  ;;  %v744_v7 = vld [vmem:[%s18420_s27 + $0xb48] sm:$0xff]  ;;  %v15990_v8 = vcombine.low %v719_v58, %v727_v60 }
  0xa7   : > { %6633 = vmatprep.subr.bf16.mxu0 %v15831_v38  ;;  %6797 = vmatprep.subr.bf16.mxu1 %v15833_v39  ;;  %v15943_v38 = vcombine.high %v671_v32, %v679_v33  ;;  %v15945_v39 = vcombine.high %v672_v63, %v680_v35  ;;  %v743_v5 = vld [vmem:[%s18420_s27 + $0xb40] sm:$0xff]  ;;  %v752_v15 = vld [vmem:[%s18420_s27 + $0xb88] sm:$0xff] }
  0xa8   : > { %v759_v14 = vld [vmem:[%s18420_s27 + $0xbc0] sm:$0xff]  ;;  %v760_v59 = vld [vmem:[%s18420_s27 + $0xbc8] sm:$0xff]  ;;  %v16006_v17 = vcombine.low %v735_v4, %v743_v5 }
  0xa9   : > { %v775_v22 = vld [vmem:[%s18420_s27 + $0xc40] sm:$0xff]  ;;  %v768_v23 = vld [vmem:[%s18420_s27 + $0xc08] sm:$0xff]  ;;  %v16024_v27 = vcombine.low %v752_v15, %v760_v59 }
  0xaa   : > { %6634 = vmatpush1.bf16.msra.mxu0 %v15830_v45  ;;  %6798 = vmatpush1.bf16.msra.mxu1 %v15832_v46  ;;  %v15942_v45 = vcombine.low %v671_v32, %v679_v33  ;;  %v15944_v46 = vcombine.low %v672_v63, %v680_v35  ;;  %v776_v24 = vld [vmem:[%s18420_s27 + $0xc48] sm:$0xff] }
  0xab   : > { %6635 = vmatprep.subr.bf16.mxu0 %v15847_v47  ;;  %6799 = vmatprep.subr.bf16.mxu1 %v15849_v48  ;;  %v15959_v47 = vcombine.high %v687_v40, %v695_v41  ;;  %v15961_v48 = vcombine.high %v688_v42, %v696_v43  ;;  %v784_v32 = vld [vmem:[%s18420_s27 + $0xc88] sm:$0xff]  ;;  %v16040_v35 = vcombine.low %v768_v23, %v776_v24 }
  0xac   : > { %v792_v33 = vld [vmem:[%s18420_s27 + $0xcc8] sm:$0xff] }
  0xae   : > { %6636 = vmatpush1.bf16.msra.mxu0 %v15846_v54  ;;  %6800 = vmatpush1.bf16.msra.mxu1 %v15848_v55  ;;  %v15958_v54 = vcombine.low %v687_v40, %v695_v41  ;;  %v15960_v55 = vcombine.low %v688_v42, %v696_v43  ;;  %v800_v40 = vld [vmem:[%s18420_s27 + $0xd08] sm:$0xff]  ;;  %v16056_v43 = vcombine.low %v784_v32, %v792_v33 }
  0xaf   : > { %6637 = vmatprep.subr.bf16.mxu0 %v15863_v56  ;;  %6801 = vmatprep.subr.bf16.mxu1 %v15865_v57  ;;  %v15975_v56 = vcombine.high %v703_v49, %v711_v50  ;;  %v15977_v57 = vcombine.high %v704_v51, %v712_v52  ;;  %v808_v41 = vld [vmem:[%s18420_s27 + $0xd48] sm:$0xff] }
  0xb2   : > { %6638 = vmatpush1.bf16.msra.mxu0 %v15862_v0  ;;  %6802 = vmatpush1.bf16.msra.mxu1 %v15864_v1  ;;  %v15974_v0 = vcombine.low %v703_v49, %v711_v50  ;;  %v15976_v1 = vcombine.low %v704_v51, %v712_v52  ;;  %v816_v49 = vld [vmem:[%s18420_s27 + $0xd88] sm:$0xff]  ;;  %v16072_v52 = vcombine.low %v800_v40, %v808_v41 }
  0xb3   : > { %6639 = vmatprep.subr.bf16.mxu0 %v15879_v2  ;;  %6803 = vmatprep.subr.bf16.mxu1 %v15881_v3  ;;  %v15991_v2 = vcombine.high %v719_v58, %v727_v60  ;;  %v15993_v3 = vcombine.high %v720_v61, %v728_v62  ;;  %v824_v50 = vld [vmem:[%s18420_s27 + $0xdc8] sm:$0xff] }
  0xb4   : > { %v832_v58 = vld [vmem:[%s18420_s27 + $0xe08] sm:$0xff] }
  0xb5   : > { %v840_v60 = vld [vmem:[%s18420_s27 + $0xe48] sm:$0xff] }
  0xb6   : > { %6640 = vmatpush1.bf16.msra.mxu0 %v15878_v10  ;;  %6804 = vmatpush1.bf16.msra.mxu1 %v15880_v11  ;;  %v15992_v10 = vcombine.low %v720_v61, %v728_v62  ;;  %v16007_v11 = vcombine.high %v735_v4, %v743_v5  ;;  %v16088_v62 = vcombine.low %v816_v49, %v824_v50  ;;  %v848_v4 = vld [vmem:[%s18420_s27 + $0xe88] sm:$0xff] }
  0xb7   : > { %6641 = vmatprep.subr.bf16.mxu0 %v15895_v12  ;;  %6805 = vmatprep.subr.bf16.mxu1 %v15897_v13  ;;  %v16009_v12 = vcombine.high %v736_v6, %v744_v7  ;;  %v751_v13 = vld [vmem:[%s18420_s27 + $0xb80] sm:$0xff]  ;;  %v856_v5 = vld [vmem:[%s18420_s27 + $0xec8] sm:$0xff] }
  0xb8   : > { %v16022_v26 = vcombine.low %v751_v13, %v759_v14 }
  0xba   : > { %6642 = vmatpush1.bf16.msra.mxu0 %v15894_v18  ;;  %6806 = vmatpush1.bf16.msra.mxu1 %v15896_v19  ;;  %v16008_v18 = vcombine.low %v736_v6, %v744_v7  ;;  %v16023_v19 = vcombine.high %v751_v13, %v759_v14  ;;  %v16104_v7 = vcombine.low %v832_v58, %v840_v60  ;;  %v864_v13 = vld [vmem:[%s18420_s27 + $0xf08] sm:$0xff] }
  0xbb   : > { %6652 = vmatprep.subr.bf16.mxu0 %v15911_v20  ;;  %6816 = vmatprep.subr.bf16.mxu1 %v15913_v21  ;;  %v16025_v20 = vcombine.high %v752_v15, %v760_v59  ;;  %v767_v21 = vld [vmem:[%s18420_s27 + $0xc00] sm:$0xff]  ;;  %v872_v14 = vld [vmem:[%s18420_s27 + $0xf48] sm:$0xff]  ;;  %v16120_v59 = vcombine.low %v848_v4, %v856_v5 }
  0xbc   : > { %v16038_v63 = vcombine.low %v767_v21, %v775_v22 }
  0xbd   : > { %6644 = vmatmul.mubr.bf16.vlgmr.msra.gmra.mrb[0].mxu0 %v18541_v25  ;;  %6808 = vmatmul.mubr.bf16.vlgmr.msra.gmra.mrb[0].mxu1 %v18541_v25 }
  0xbe   : > { %6653 = vmatpush1.bf16.msra.mxu0 %v15910_v28  ;;  %6817 = vmatpush1.bf16.msra.mxu1 %v15912_v29  ;;  %v16039_v28 = vcombine.high %v767_v21, %v775_v22  ;;  %v16041_v29 = vcombine.high %v768_v23, %v776_v24  ;;  %v880_v21 = vld [vmem:[%s18420_s27 + $0xf88] sm:$0xff] }
  0xbf   : > { %6654 = vmatprep.subr.bf16.mxu0 %v15927_v30  ;;  %6818 = vmatprep.subr.bf16.mxu1 %v15929_v31  ;;  %v783_v30 = vld [vmem:[%s18420_s27 + $0xc80] sm:$0xff]  ;;  %v888_v22 = vld [vmem:[%s18420_s27 + $0xfc8] sm:$0xff] }
  0xc0   : > { %6684 = vmatprep.mubr.bf16.mxu0 %v18547_v34  ;;  %6848 = vmatprep.mubr.bf16.mxu1 %v18547_v34  ;;  %v791_v31 = vld [vmem:[%s18420_s27 + $0xcc0] sm:$0xff]  ;;  %v18610_v23 = vld [vmem:[%s20882_s0 + $0x8] sm:$0xff] }
  0xc1   : > { %v16054_v42 = vcombine.low %v783_v30, %v791_v31 }
  0xc2   : > { %6655 = vmatpush1.bf16.msra.mxu0 %v15926_v36  ;;  %6819 = vmatpush1.bf16.msra.mxu1 %v15928_v37  ;;  %v16055_v36 = vcombine.high %v783_v30, %v791_v31  ;;  %v16057_v37 = vcombine.high %v784_v32, %v792_v33  ;;  %v903_v30 = vld [vmem:[%s18420_s27 + $0x1040] sm:$0xff]  ;;  %v18616_v31 = vrot.slane %v18610_v23, %v18471_v53  ;;  %v896_v32 = vld [vmem:[%s18420_s27 + $0x1008] sm:$0xff] }
  0xc3   : > { %6656 = vmatprep.subr.bf16.mxu0 %v15943_v38  ;;  %6820 = vmatprep.subr.bf16.mxu1 %v15945_v39  ;;  %v799_v38 = vld [vmem:[%s18420_s27 + $0xd00] sm:$0xff]  ;;  %v904_v33 = vld [vmem:[%s18420_s27 + $0x1048] sm:$0xff] }
  0xc4   : > { %v807_v39 = vld [vmem:[%s18420_s27 + $0xd40] sm:$0xff] }
  0xc5   : > { %v16070_v51 = vcombine.low %v799_v38, %v807_v39 }
  0xc6   : > { %6657 = vmatpush1.bf16.msra.mxu0 %v15942_v45  ;;  %6821 = vmatpush1.bf16.msra.mxu1 %v15944_v46  ;;  %v16071_v45 = vcombine.high %v799_v38, %v807_v39  ;;  %v16073_v46 = vcombine.high %v800_v40, %v808_v41  ;;  %v911_v38 = vld [vmem:[%s18420_s27 + $0x1080] sm:$0xff]  ;;  %v365_v40 = vcombine.high %v18616_v31, %v18616_v31 }
  0xc7   : > { %6658 = vmatprep.subr.bf16.mxu0 %v15959_v47  ;;  %6822 = vmatprep.subr.bf16.mxu1 %v15961_v48  ;;  %v815_v47 = vld [vmem:[%s18420_s27 + $0xd80] sm:$0xff]  ;;  %v18626_v41 = vpack.c.bf16 %v18531_v16, %v18531_v16  ;;  %v928_v16 = vld [vmem:[%s18420_s27 + $0x1108] sm:$0xff] }
  0xc8   : > { %v823_v48 = vld [vmem:[%s18420_s27 + $0xdc0] sm:$0xff] }
  0xc9   : > { %v16086_v61 = vcombine.low %v815_v47, %v823_v48  ;;  %v919_v39 = vld [vmem:[%s18420_s27 + $0x10c0] sm:$0xff] }
  0xca   : > { %6659 = vmatpush1.bf16.msra.mxu0 %v15958_v54  ;;  %6823 = vmatpush1.bf16.msra.mxu1 %v15960_v55  ;;  %v16087_v54 = vcombine.high %v815_v47, %v823_v48  ;;  %v16089_v55 = vcombine.high %v816_v49, %v824_v50  ;;  %v16183_v47 = vcombine.high %v911_v38, %v919_v39  ;;  %v927_v49 = vld [vmem:[%s18420_s27 + $0x1100] sm:$0xff] }
  0xcb   : > { %6660 = vmatprep.subr.bf16.mxu0 %v15975_v56  ;;  %6824 = vmatprep.subr.bf16.mxu1 %v15977_v57  ;;  %v831_v56 = vld [vmem:[%s18420_s27 + $0xe00] sm:$0xff] }
  0xcc   : > { %v839_v57 = vld [vmem:[%s18420_s27 + $0xe40] sm:$0xff] }
  0xcd   : > { %v16102_v6 = vcombine.low %v831_v56, %v839_v57  ;;  %v935_v50 = vld [vmem:[%s18420_s27 + $0x1140] sm:$0xff] }
  0xce   : > { %6661 = vmatpush1.bf16.msra.mxu0 %v15974_v0  ;;  %6825 = vmatpush1.bf16.msra.mxu1 %v15976_v1  ;;  %v16103_v0 = vcombine.high %v831_v56, %v839_v57  ;;  %v16105_v1 = vcombine.high %v832_v58, %v840_v60  ;;  %v16199_v56 = vcombine.high %v927_v49, %v935_v50  ;;  %v943_v58 = vld [vmem:[%s18420_s27 + $0x1180] sm:$0xff] }
  0xcf   : > { %6662 = vmatprep.subr.bf16.mxu0 %v15991_v2  ;;  %6826 = vmatprep.subr.bf16.mxu1 %v15993_v3  ;;  %v847_v2 = vld [vmem:[%s18420_s27 + $0xe80] sm:$0xff] }
  0xd0   : > { %v855_v3 = vld [vmem:[%s18420_s27 + $0xec0] sm:$0xff] }
  0xd1   : > { %v16118_v15 = vcombine.low %v847_v2, %v855_v3  ;;  %v951_v60 = vld [vmem:[%s18420_s27 + $0x11c0] sm:$0xff] }
  0xd2   : > { %6663 = vmatpush1.bf16.msra.mxu0 %v15990_v8  ;;  %6827 = vmatpush1.bf16.msra.mxu1 %v15992_v10  ;;  %v16119_v8 = vcombine.high %v847_v2, %v855_v3  ;;  %v16121_v10 = vcombine.high %v848_v4, %v856_v5  ;;  %v16215_v2 = vcombine.high %v943_v58, %v951_v60  ;;  %v959_v4 = vld [vmem:[%s18420_s27 + $0x1200] sm:$0xff] }
  0xd3   : > { %6664 = vmatprep.subr.bf16.mxu0 %v16007_v11  ;;  %6828 = vmatprep.subr.bf16.mxu1 %v16009_v12  ;;  %v863_v11 = vld [vmem:[%s18420_s27 + $0xf00] sm:$0xff] }
  0xd4   : > { %v871_v12 = vld [vmem:[%s18420_s27 + $0xf40] sm:$0xff] }
  0xd5   : > { %v16134_v24 = vcombine.low %v863_v11, %v871_v12  ;;  %v967_v5 = vld [vmem:[%s18420_s27 + $0x1240] sm:$0xff] }
  0xd6   : > { %6665 = vmatpush1.bf16.msra.mxu0 %v16006_v17  ;;  %6829 = vmatpush1.bf16.msra.mxu1 %v16008_v18  ;;  %v16135_v17 = vcombine.high %v863_v11, %v871_v12  ;;  %v16137_v18 = vcombine.high %v864_v13, %v872_v14  ;;  %v16231_v11 = vcombine.high %v959_v4, %v967_v5 }
  0xd7   : > { %6666 = vmatprep.subr.bf16.mxu0 %v16023_v19  ;;  %6830 = vmatprep.subr.bf16.mxu1 %v16025_v20  ;;  %v879_v19 = vld [vmem:[%s18420_s27 + $0xf80] sm:$0xff] }
  0xd8   : > { %v887_v20 = vld [vmem:[%s18420_s27 + $0xfc0] sm:$0xff] }
  0xda   : > { %6667 = vmatpush1.bf16.msra.mxu0 %v16022_v26  ;;  %6831 = vmatpush1.bf16.msra.mxu1 %v16024_v27  ;;  %v16136_v26 = vcombine.low %v864_v13, %v872_v14  ;;  %v16151_v27 = vcombine.high %v879_v19, %v887_v20  ;;  %v975_v13 = vld [vmem:[%s18420_s27 + $0x1280] sm:$0xff] }
  0xdb   : > { %6668 = vmatprep.subr.bf16.mxu0 %v16039_v28  ;;  %6832 = vmatprep.subr.bf16.mxu1 %v16041_v29  ;;  %v16153_v28 = vcombine.high %v880_v21, %v888_v22  ;;  %v895_v29 = vld [vmem:[%s18420_s27 + $0x1000] sm:$0xff] }
  0xdc   : > { %v983_v14 = vld [vmem:[%s18420_s27 + $0x12c0] sm:$0xff] }
  0xde   : > { %6669 = vmatpush1.bf16.msra.mxu0 %v16038_v63  ;;  %6833 = vmatpush1.bf16.msra.mxu1 %v16040_v35  ;;  %v16150_v63 = vcombine.low %v879_v19, %v887_v20  ;;  %v16152_v35 = vcombine.low %v880_v21, %v888_v22  ;;  %v16247_v19 = vcombine.high %v975_v13, %v983_v14  ;;  %v991_v21 = vld [vmem:[%s18420_s27 + $0x1300] sm:$0xff] }
  0xdf   : > { %6670 = vmatprep.subr.bf16.mxu0 %v16055_v36  ;;  %6834 = vmatprep.subr.bf16.mxu1 %v16057_v37  ;;  %v16167_v36 = vcombine.high %v895_v29, %v903_v30  ;;  %v16169_v37 = vcombine.high %v896_v32, %v904_v33  ;;  %v999_v22 = vld [vmem:[%s18420_s27 + $0x1340] sm:$0xff] }
  0xe2   : > { %6671 = vmatpush1.bf16.msra.mxu0 %v16054_v42  ;;  %6835 = vmatpush1.bf16.msra.mxu1 %v16056_v43  ;;  %v912_v42 = vld [vmem:[%s18420_s27 + $0x1088] sm:$0xff] }
  0xe3   : > { %6672 = vmatprep.subr.bf16.mxu0 %v16071_v45  ;;  %6836 = vmatprep.subr.bf16.mxu1 %v16073_v46  ;;  %v920_v43 = vld [vmem:[%s18420_s27 + $0x10c8] sm:$0xff]  ;;  %v16166_v45 = vcombine.low %v895_v29, %v903_v30  ;;  %v16168_v46 = vcombine.low %v896_v32, %v904_v33  ;;  %v16263_v29 = vcombine.high %v991_v21, %v999_v22  ;;  %v1007_v32 = vld [vmem:[%s18420_s27 + $0x1380] sm:$0xff] }
  0xe4   : > { %v16185_v48 = vcombine.high %v912_v42, %v920_v43  ;;  %v1015_v33 = vld [vmem:[%s18420_s27 + $0x13c0] sm:$0xff] }
  0xe6   : > { %6673 = vmatpush1.bf16.msra.mxu0 %v16070_v51  ;;  %6837 = vmatpush1.bf16.msra.mxu1 %v16072_v52  ;;  %v18632_v51 = vpack.c.bf16 %v365_v40, %v365_v40  ;;  %v936_v52 = vld [vmem:[%s18420_s27 + $0x1148] sm:$0xff]  ;;  %v1023_v40 = vld [vmem:[%s18420_s27 + $0x1400] sm:$0xff] }
  0xe7   : > { %6674 = vmatprep.subr.bf16.mxu0 %v16087_v54  ;;  %6838 = vmatprep.subr.bf16.mxu1 %v16089_v55  ;;  %v16182_v54 = vcombine.low %v911_v38, %v919_v39  ;;  %v16184_v55 = vcombine.low %v912_v42, %v920_v43  ;;  %v16201_v57 = vcombine.high %v928_v16, %v936_v52  ;;  %v1031_v42 = vld [vmem:[%s18420_s27 + $0x1440] sm:$0xff]  ;;  %v1024_v43 = vld [vmem:[%s18420_s27 + $0x1408] sm:$0xff] }
  0xe8   : > { %v16279_v38 = vcombine.high %v1007_v32, %v1015_v33 }
  0xea   : > { %6675 = vmatpush1.bf16.msra.mxu0 %v16086_v61  ;;  %6839 = vmatpush1.bf16.msra.mxu1 %v16088_v62  ;;  %v944_v61 = vld [vmem:[%s18420_s27 + $0x1188] sm:$0xff] }
  0xeb   : > { %6676 = vmatprep.subr.bf16.mxu0 %v16103_v0  ;;  %6840 = vmatprep.subr.bf16.mxu1 %v16105_v1  ;;  %v952_v62 = vld [vmem:[%s18420_s27 + $0x11c8] sm:$0xff]  ;;  %v16198_v0 = vcombine.low %v927_v49, %v935_v50  ;;  %v16200_v1 = vcombine.low %v928_v16, %v936_v52  ;;  %v1039_v50 = vld [vmem:[%s18420_s27 + $0x1480] sm:$0xff] }
  0xec   : > { %v16217_v3 = vcombine.high %v944_v61, %v952_v62  ;;  %v1047_v16 = vld [vmem:[%s18420_s27 + $0x14c0] sm:$0xff]  ;;  %v1040_v52 = vld [vmem:[%s18420_s27 + $0x1488] sm:$0xff] }
  0xee   : > { %6677 = vmatpush1.bf16.msra.mxu0 %v16102_v6  ;;  %6841 = vmatpush1.bf16.msra.mxu1 %v16104_v7  ;;  %v960_v6 = vld [vmem:[%s18420_s27 + $0x1208] sm:$0xff] }
  0xef   : > { %6678 = vmatprep.subr.bf16.mxu0 %v16119_v8  ;;  %6842 = vmatprep.subr.bf16.mxu1 %v16121_v10  ;;  %v968_v7 = vld [vmem:[%s18420_s27 + $0x1248] sm:$0xff]  ;;  %v16214_v8 = vcombine.low %v943_v58, %v951_v60  ;;  %v16216_v10 = vcombine.low %v944_v61, %v952_v62  ;;  %v1055_v60 = vld [vmem:[%s18420_s27 + $0x1500] sm:$0xff] }
  0xf0   : > { %v16233_v12 = vcombine.high %v960_v6, %v968_v7  ;;  %v1063_v61 = vld [vmem:[%s18420_s27 + $0x1540] sm:$0xff]  ;;  %v1056_v62 = vld [vmem:[%s18420_s27 + $0x1508] sm:$0xff] }
  0xf2   : > { %6679 = vmatpush1.bf16.msra.mxu0 %v16118_v15  ;;  %6843 = vmatpush1.bf16.msra.mxu1 %v16120_v59  ;;  %v976_v15 = vld [vmem:[%s18420_s27 + $0x1288] sm:$0xff] }
  0xf3   : > { %6680 = vmatprep.subr.bf16.mxu0 %v16135_v17  ;;  %6844 = vmatprep.subr.bf16.mxu1 %v16137_v18  ;;  %v984_v59 = vld [vmem:[%s18420_s27 + $0x12c8] sm:$0xff]  ;;  %v16230_v17 = vcombine.low %v959_v4, %v967_v5  ;;  %v16232_v18 = vcombine.low %v960_v6, %v968_v7  ;;  %v1071_v5 = vld [vmem:[%s18420_s27 + $0x1580] sm:$0xff] }
  0xf4   : > { %v16249_v20 = vcombine.high %v976_v15, %v984_v59  ;;  %v1079_v6 = vld [vmem:[%s18420_s27 + $0x15c0] sm:$0xff]  ;;  %v1072_v7 = vld [vmem:[%s18420_s27 + $0x1588] sm:$0xff] }
  0xf6   : > { %6681 = vmatpush1.bf16.msra.mxu0 %v16134_v24  ;;  %6845 = vmatpush1.bf16.msra.mxu1 %v16136_v26  ;;  %v992_v24 = vld [vmem:[%s18420_s27 + $0x1308] sm:$0xff] }
  0xf7   : > { %6682 = vmatprep.subr.bf16.mxu0 %v16151_v27  ;;  %6846 = vmatprep.subr.bf16.mxu1 %v16153_v28  ;;  %v1000_v26 = vld [vmem:[%s18420_s27 + $0x1348] sm:$0xff]  ;;  %v16246_v27 = vcombine.low %v975_v13, %v983_v14  ;;  %v16248_v28 = vcombine.low %v976_v15, %v984_v59  ;;  %v1087_v14 = vld [vmem:[%s18420_s27 + $0x1600] sm:$0xff] }
  0xf8   : > { %v16265_v30 = vcombine.high %v992_v24, %v1000_v26  ;;  %v1095_v15 = vld [vmem:[%s18420_s27 + $0x1640] sm:$0xff]  ;;  %v1088_v59 = vld [vmem:[%s18420_s27 + $0x1608] sm:$0xff] }
  0xfa   : > { %6683 = vmatpush1.bf16.msra.mxu0 %v16150_v63  ;;  %6847 = vmatpush1.bf16.msra.mxu1 %v16152_v35  ;;  %v1008_v63 = vld [vmem:[%s18420_s27 + $0x1388] sm:$0xff] }
  0xfb   : > { %6693 = vmatprep.subr.bf16.mxu0 %v16167_v36  ;;  %6857 = vmatprep.subr.bf16.mxu1 %v16169_v37  ;;  %v1016_v35 = vld [vmem:[%s18420_s27 + $0x13c8] sm:$0xff]  ;;  %v16262_v36 = vcombine.low %v991_v21, %v999_v22  ;;  %v16264_v37 = vcombine.low %v992_v24, %v1000_v26  ;;  %v1103_v22 = vld [vmem:[%s18420_s27 + $0x1680] sm:$0xff] }
  0xfc   : > { %v16281_v39 = vcombine.high %v1008_v63, %v1016_v35  ;;  %v1111_v24 = vld [vmem:[%s18420_s27 + $0x16c0] sm:$0xff]  ;;  %v1104_v26 = vld [vmem:[%s18420_s27 + $0x1688] sm:$0xff] }
  0xfd   : > { %6685 = vmatmul.mubr.bf16.vlgmr.msra.gmra.mrb[0].mxu0 %v18626_v41  ;;  %6849 = vmatmul.mubr.bf16.vlgmr.msra.gmra.mrb[0].mxu1 %v18626_v41 }
  0xfe   : > { %6694 = vmatpush1.bf16.msra.mxu0 %v16166_v45  ;;  %6858 = vmatpush1.bf16.msra.mxu1 %v16168_v46  ;;  %v1032_v45 = vld [vmem:[%s18420_s27 + $0x1448] sm:$0xff]  ;;  %v16278_v46 = vcombine.low %v1007_v32, %v1015_v33  ;;  %v1119_v33 = vld [vmem:[%s18420_s27 + $0x1700] sm:$0xff] }
  0xff   : > { %6695 = vmatprep.subr.bf16.mxu0 %v16183_v47  ;;  %6859 = vmatprep.subr.bf16.mxu1 %v16185_v48  ;;  %v16280_v47 = vcombine.low %v1008_v63, %v1016_v35  ;;  %v16295_v48 = vcombine.high %v1023_v40, %v1031_v42  ;;  %v16297_v49 = vcombine.high %v1024_v43, %v1032_v45  ;;  %v1127_v63 = vld [vmem:[%s18420_s27 + $0x1740] sm:$0xff]  ;;  %v1120_v35 = vld [vmem:[%s18420_s27 + $0x1708] sm:$0xff] }
 0x100   : > { %6725 = vmatprep.mubr.bf16.mxu0 %v18632_v51  ;;  %6889 = vmatprep.mubr.bf16.mxu1 %v18632_v51 }
 0x102   : > { %6696 = vmatpush1.bf16.msra.mxu0 %v16182_v54  ;;  %6860 = vmatpush1.bf16.msra.mxu1 %v16184_v55  ;;  %v1048_v54 = vld [vmem:[%s18420_s27 + $0x14c8] sm:$0xff]  ;;  %v16294_v55 = vcombine.low %v1023_v40, %v1031_v42  ;;  %v1135_v42 = vld [vmem:[%s18420_s27 + $0x1780] sm:$0xff] }
 0x103   : > { %6697 = vmatprep.subr.bf16.mxu0 %v16199_v56  ;;  %6861 = vmatprep.subr.bf16.mxu1 %v16201_v57  ;;  %v16296_v56 = vcombine.low %v1024_v43, %v1032_v45  ;;  %v16311_v57 = vcombine.high %v1039_v50, %v1047_v16  ;;  %v16313_v58 = vcombine.high %v1040_v52, %v1048_v54  ;;  %v1143_v43 = vld [vmem:[%s18420_s27 + $0x17c0] sm:$0xff] }
 0x104   : > { %v350_v45 = vcombine.high %v18610_v23, %v18610_v23  ;;  %v1152_v23 = vld [vmem:[%s18420_s27 + $0x1808] sm:$0xff] }
 0x106   : > { %6698 = vmatpush1.bf16.msra.mxu0 %v16198_v0  ;;  %6862 = vmatpush1.bf16.msra.mxu1 %v16200_v1  ;;  %v1064_v0 = vld [vmem:[%s18420_s27 + $0x1548] sm:$0xff]  ;;  %v16310_v1 = vcombine.low %v1039_v50, %v1047_v16  ;;  %v16407_v50 = vcombine.high %v1135_v42, %v1143_v43 }
 0x107   : > { %6699 = vmatprep.subr.bf16.mxu0 %v16215_v2  ;;  %6863 = vmatprep.subr.bf16.mxu1 %v16217_v3  ;;  %v16312_v2 = vcombine.low %v1040_v52, %v1048_v54  ;;  %v16327_v3 = vcombine.high %v1055_v60, %v1063_v61  ;;  %v16329_v4 = vcombine.high %v1056_v62, %v1064_v0  ;;  %v1151_v52 = vld [vmem:[%s18420_s27 + $0x1800] sm:$0xff] }
 0x108   : > { %v1159_v54 = vld [vmem:[%s18420_s27 + $0x1840] sm:$0xff] }
 0x10a   : > { %6700 = vmatpush1.bf16.msra.mxu0 %v16214_v8  ;;  %6864 = vmatpush1.bf16.msra.mxu1 %v16216_v10  ;;  %v1080_v8 = vld [vmem:[%s18420_s27 + $0x15c8] sm:$0xff]  ;;  %v16326_v10 = vcombine.low %v1055_v60, %v1063_v61  ;;  %v16423_v60 = vcombine.high %v1151_v52, %v1159_v54 }
 0x10b   : > { %6701 = vmatprep.subr.bf16.mxu0 %v16231_v11  ;;  %6865 = vmatprep.subr.bf16.mxu1 %v16233_v12  ;;  %v16328_v11 = vcombine.low %v1056_v62, %v1064_v0  ;;  %v16343_v12 = vcombine.high %v1071_v5, %v1079_v6  ;;  %v16345_v13 = vcombine.high %v1072_v7, %v1080_v8  ;;  %v1167_v62 = vld [vmem:[%s18420_s27 + $0x1880] sm:$0xff] }
 0x10c   : > { %v1175_v0 = vld [vmem:[%s18420_s27 + $0x18c0] sm:$0xff] }
 0x10e   : > { %6702 = vmatpush1.bf16.msra.mxu0 %v16230_v17  ;;  %6866 = vmatpush1.bf16.msra.mxu1 %v16232_v18  ;;  %v1096_v17 = vld [vmem:[%s18420_s27 + $0x1648] sm:$0xff]  ;;  %v16342_v18 = vcombine.low %v1071_v5, %v1079_v6  ;;  %v16422_v5 = vcombine.low %v1151_v52, %v1159_v54 }
 0x10f   : > { %6703 = vmatprep.subr.bf16.mxu0 %v16247_v19  ;;  %6867 = vmatprep.subr.bf16.mxu1 %v16249_v20  ;;  %v16344_v19 = vcombine.low %v1072_v7, %v1080_v8  ;;  %v16359_v20 = vcombine.high %v1087_v14, %v1095_v15  ;;  %v16361_v21 = vcombine.high %v1088_v59, %v1096_v17 }
 0x110   : > { %v16439_v7 = vcombine.high %v1167_v62, %v1175_v0 }
 0x112   : > { %6704 = vmatpush1.bf16.msra.mxu0 %v16246_v27  ;;  %6868 = vmatpush1.bf16.msra.mxu1 %v16248_v28  ;;  %v1112_v27 = vld [vmem:[%s18420_s27 + $0x16c8] sm:$0xff]  ;;  %v16358_v28 = vcombine.low %v1087_v14, %v1095_v15  ;;  %v16438_v14 = vcombine.low %v1167_v62, %v1175_v0 }
 0x113   : > { %6705 = vmatprep.subr.bf16.mxu0 %v16263_v29  ;;  %6869 = vmatprep.subr.bf16.mxu1 %v16265_v30  ;;  %v16360_v29 = vcombine.low %v1088_v59, %v1096_v17  ;;  %v16375_v30 = vcombine.high %v1103_v22, %v1111_v24  ;;  %v16377_v32 = vcombine.high %v1104_v26, %v1112_v27 }
 0x116   : > { %6706 = vmatpush1.bf16.msra.mxu0 %v16262_v36  ;;  %6870 = vmatpush1.bf16.msra.mxu1 %v16264_v37  ;;  %v1128_v36 = vld [vmem:[%s18420_s27 + $0x1748] sm:$0xff]  ;;  %v16374_v37 = vcombine.low %v1103_v22, %v1111_v24 }
 0x117   : > { %6707 = vmatprep.subr.bf16.mxu0 %v16279_v38  ;;  %6871 = vmatprep.subr.bf16.mxu1 %v16281_v39  ;;  %v16376_v38 = vcombine.low %v1104_v26, %v1112_v27  ;;  %v16391_v39 = vcombine.high %v1119_v33, %v1127_v63  ;;  %v16393_v40 = vcombine.high %v1120_v35, %v1128_v36 }
 0x11a   : > { %6708 = vmatpush1.bf16.msra.mxu0 %v16278_v46  ;;  %6872 = vmatpush1.bf16.msra.mxu1 %v16280_v47  ;;  %v1136_v46 = vld [vmem:[%s18420_s27 + $0x1788] sm:$0xff] }
 0x11b   : > { %6709 = vmatprep.subr.bf16.mxu0 %v16295_v48  ;;  %6873 = vmatprep.subr.bf16.mxu1 %v16297_v49  ;;  %v1144_v47 = vld [vmem:[%s18420_s27 + $0x17c8] sm:$0xff]  ;;  %v16390_v48 = vcombine.low %v1119_v33, %v1127_v63  ;;  %v16392_v49 = vcombine.low %v1120_v35, %v1128_v36 }
 0x11c   : > { %v16409_v16 = vcombine.high %v1136_v46, %v1144_v47 }
 0x11e   : > { %6710 = vmatpush1.bf16.msra.mxu0 %v16294_v55  ;;  %6874 = vmatpush1.bf16.msra.mxu1 %v16296_v56  ;;  %v18697_v55 = vrot.slane %v350_v45, %v18471_v53  ;;  %v1160_v56 = vld [vmem:[%s18420_s27 + $0x1848] sm:$0xff] }
 0x11f   : > { %6711 = vmatprep.subr.bf16.mxu0 %v16311_v57  ;;  %6875 = vmatprep.subr.bf16.mxu1 %v16313_v58  ;;  %v16406_v57 = vcombine.low %v1135_v42, %v1143_v43  ;;  %v16408_v58 = vcombine.low %v1136_v46, %v1144_v47  ;;  %v16425_v61 = vcombine.high %v1152_v23, %v1160_v56  ;;  %v1247_v47 = vld [vmem:[%s18420_s27 + $0x1b00] sm:$0xff] }
 0x120   : > { %v16424_v6 = vcombine.low %v1152_v23, %v1160_v56  ;;  %v1263_v56 = vld [vmem:[%s18420_s27 + $0x1b80] sm:$0xff] }
 0x122   : > { %6712 = vmatpush1.bf16.msra.mxu0 %v16310_v1  ;;  %6876 = vmatpush1.bf16.msra.mxu1 %v16312_v2  ;;  %v366_v1 = vcombine.high %v18697_v55, %v18697_v55  ;;  %v18707_v2 = vpack.c.bf16 %v18616_v31, %v18616_v31  ;;  %v1184_v31 = vld [vmem:[%s18420_s27 + $0x1908] sm:$0xff] }
 0x123   : > { %6713 = vmatprep.subr.bf16.mxu0 %v16327_v3  ;;  %6877 = vmatprep.subr.bf16.mxu1 %v16329_v4  ;;  %v1168_v3 = vld [vmem:[%s18420_s27 + $0x1888] sm:$0xff] }
 0x124   : > { %v1176_v4 = vld [vmem:[%s18420_s27 + $0x18c8] sm:$0xff] }
 0x125   : > { %v16441_v8 = vcombine.high %v1168_v3, %v1176_v4  ;;  %v16440_v15 = vcombine.low %v1168_v3, %v1176_v4  ;;  %v1279_v3 = vld [vmem:[%s18420_s27 + $0x1c00] sm:$0xff] }
 0x126   : > { %6714 = vmatpush1.bf16.msra.mxu0 %v16326_v10  ;;  %6878 = vmatpush1.bf16.msra.mxu1 %v16328_v11  ;;  %v1183_v10 = vld [vmem:[%s18420_s27 + $0x1900] sm:$0xff] }
 0x127   : > { %6715 = vmatprep.subr.bf16.mxu0 %v16343_v12  ;;  %6879 = vmatprep.subr.bf16.mxu1 %v16345_v13  ;;  %v1191_v11 = vld [vmem:[%s18420_s27 + $0x1940] sm:$0xff]  ;;  %v18713_v12 = vpack.c.bf16 %v366_v1, %v366_v1  ;;  %v1192_v13 = vld [vmem:[%s18420_s27 + $0x1948] sm:$0xff] }
 0x128   : > { %v16455_v59 = vcombine.high %v1183_v10, %v1191_v11  ;;  %v16457_v17 = vcombine.high %v1184_v31, %v1192_v13  ;;  %v16454_v22 = vcombine.low %v1183_v10, %v1191_v11  ;;  %v16456_v24 = vcombine.low %v1184_v31, %v1192_v13  ;;  %v1287_v4 = vld [vmem:[%s18420_s27 + $0x1c40] sm:$0xff] }
 0x129   : > { %v16551_v10 = vcombine.high %v1279_v3, %v1287_v4  ;;  %v1295_v31 = vld [vmem:[%s18420_s27 + $0x1c80] sm:$0xff] }
 0x12a   : > { %6716 = vmatpush1.bf16.msra.mxu0 %v16342_v18  ;;  %6880 = vmatpush1.bf16.msra.mxu1 %v16344_v19  ;;  %v1199_v18 = vld [vmem:[%s18420_s27 + $0x1980] sm:$0xff] }
 0x12b   : > { %6717 = vmatprep.subr.bf16.mxu0 %v16359_v20  ;;  %6881 = vmatprep.subr.bf16.mxu1 %v16361_v21  ;;  %v1207_v19 = vld [vmem:[%s18420_s27 + $0x19c0] sm:$0xff]  ;;  %v1200_v20 = vld [vmem:[%s18420_s27 + $0x1988] sm:$0xff] }
 0x12c   : > { %v1208_v21 = vld [vmem:[%s18420_s27 + $0x19c8] sm:$0xff]  ;;  %v16471_v26 = vcombine.high %v1199_v18, %v1207_v19  ;;  %v16470_v33 = vcombine.low %v1199_v18, %v1207_v19  ;;  %v1303_v13 = vld [vmem:[%s18420_s27 + $0x1cc0] sm:$0xff] }
 0x12d   : > { %v16473_v27 = vcombine.high %v1200_v20, %v1208_v21  ;;  %v16472_v63 = vcombine.low %v1200_v20, %v1208_v21  ;;  %v16567_v18 = vcombine.high %v1295_v31, %v1303_v13  ;;  %v1311_v20 = vld [vmem:[%s18420_s27 + $0x1d00] sm:$0xff] }
 0x12e   : > { %6718 = vmatpush1.bf16.msra.mxu0 %v16358_v28  ;;  %6882 = vmatpush1.bf16.msra.mxu1 %v16360_v29  ;;  %v1215_v28 = vld [vmem:[%s18420_s27 + $0x1a00] sm:$0xff] }
 0x12f   : > { %6719 = vmatprep.subr.bf16.mxu0 %v16375_v30  ;;  %6883 = vmatprep.subr.bf16.mxu1 %v16377_v32  ;;  %v1223_v29 = vld [vmem:[%s18420_s27 + $0x1a40] sm:$0xff]  ;;  %v1216_v30 = vld [vmem:[%s18420_s27 + $0x1a08] sm:$0xff] }
 0x130   : > { %v1224_v32 = vld [vmem:[%s18420_s27 + $0x1a48] sm:$0xff]  ;;  %v16487_v35 = vcombine.high %v1215_v28, %v1223_v29  ;;  %v16486_v42 = vcombine.low %v1215_v28, %v1223_v29  ;;  %v1319_v21 = vld [vmem:[%s18420_s27 + $0x1d40] sm:$0xff] }
 0x131   : > { %v16489_v36 = vcombine.high %v1216_v30, %v1224_v32  ;;  %v16488_v43 = vcombine.low %v1216_v30, %v1224_v32  ;;  %v16583_v28 = vcombine.high %v1311_v20, %v1319_v21  ;;  %v1327_v30 = vld [vmem:[%s18420_s27 + $0x1d80] sm:$0xff] }
 0x132   : > { %6720 = vmatpush1.bf16.msra.mxu0 %v16374_v37  ;;  %6884 = vmatpush1.bf16.msra.mxu1 %v16376_v38  ;;  %v1231_v37 = vld [vmem:[%s18420_s27 + $0x1a80] sm:$0xff] }
 0x133   : > { %6721 = vmatprep.subr.bf16.mxu0 %v16391_v39  ;;  %6885 = vmatprep.subr.bf16.mxu1 %v16393_v40  ;;  %v1239_v38 = vld [vmem:[%s18420_s27 + $0x1ac0] sm:$0xff]  ;;  %v1232_v39 = vld [vmem:[%s18420_s27 + $0x1a88] sm:$0xff] }
 0x134   : > { %v1240_v40 = vld [vmem:[%s18420_s27 + $0x1ac8] sm:$0xff]  ;;  %v16503_v45 = vcombine.high %v1231_v37, %v1239_v38  ;;  %v1335_v32 = vld [vmem:[%s18420_s27 + $0x1dc0] sm:$0xff] }
 0x135   : > { %v16505_v46 = vcombine.high %v1232_v39, %v1240_v40  ;;  %v16504_v52 = vcombine.low %v1232_v39, %v1240_v40  ;;  %v1343_v39 = vld [vmem:[%s18420_s27 + $0x1e00] sm:$0xff] }
 0x136   : > { %6722 = vmatpush1.bf16.msra.mxu0 %v16390_v48  ;;  %6886 = vmatpush1.bf16.msra.mxu1 %v16392_v49  ;;  %v1255_v48 = vld [vmem:[%s18420_s27 + $0x1b40] sm:$0xff]  ;;  %v1248_v49 = vld [vmem:[%s18420_s27 + $0x1b08] sm:$0xff] }
 0x137   : > { %6723 = vmatprep.subr.bf16.mxu0 %v16407_v50  ;;  %6887 = vmatprep.subr.bf16.mxu1 %v16409_v16  ;;  %v1256_v50 = vld [vmem:[%s18420_s27 + $0x1b48] sm:$0xff]  ;;  %v16502_v16 = vcombine.low %v1231_v37, %v1239_v38  ;;  %v16519_v54 = vcombine.high %v1247_v47, %v1255_v48  ;;  %v16599_v37 = vcombine.high %v1327_v30, %v1335_v32  ;;  %v1351_v40 = vld [vmem:[%s18420_s27 + $0x1e40] sm:$0xff] }
 0x138   : > { %v16521_v23 = vcombine.high %v1248_v49, %v1256_v50  ;;  %v16520_v62 = vcombine.low %v1248_v49, %v1256_v50  ;;  %v1359_v49 = vld [vmem:[%s18420_s27 + $0x1e80] sm:$0xff] }
 0x139   : > { %v1367_v50 = vld [vmem:[%s18420_s27 + $0x1ec0] sm:$0xff] }
 0x13a   : > { %6724 = vmatpush1.bf16.msra.mxu0 %v16406_v57  ;;  %6888 = vmatpush1.bf16.msra.mxu1 %v16408_v58  ;;  %v1271_v57 = vld [vmem:[%s18420_s27 + $0x1bc0] sm:$0xff]  ;;  %v1264_v58 = vld [vmem:[%s18420_s27 + $0x1b88] sm:$0xff] }
 0x13b   : > { %6734 = vmatprep.subr.bf16.mxu0 %v16423_v60  ;;  %6898 = vmatprep.subr.bf16.mxu1 %v16425_v61  ;;  %v1272_v60 = vld [vmem:[%s18420_s27 + $0x1bc8] sm:$0xff]  ;;  %v16518_v61 = vcombine.low %v1247_v47, %v1255_v48  ;;  %v16535_v0 = vcombine.high %v1263_v56, %v1271_v57  ;;  %v16615_v47 = vcombine.high %v1343_v39, %v1351_v40 }
 0x13c   : > { %v16537_v1 = vcombine.high %v1264_v58, %v1272_v60 }
 0x13d   : > { %6726 = vmatmul.mubr.bf16.vlgmr.msra.gmra.mrb[0].mxu0 %v18707_v2  ;;  %6890 = vmatmul.mubr.bf16.vlgmr.msra.gmra.mrb[0].mxu1 %v18707_v2 }
 0x13e   : > { %6735 = vmatpush1.bf16.msra.mxu0 %v16422_v5  ;;  %6899 = vmatpush1.bf16.msra.mxu1 %v16424_v6  ;;  %v1280_v5 = vld [vmem:[%s18420_s27 + $0x1c08] sm:$0xff] }
 0x13f   : > { %6736 = vmatprep.subr.bf16.mxu0 %v16439_v7  ;;  %6900 = vmatprep.subr.bf16.mxu1 %v16441_v8  ;;  %v1288_v6 = vld [vmem:[%s18420_s27 + $0x1c48] sm:$0xff]  ;;  %v16534_v7 = vcombine.low %v1263_v56, %v1271_v57  ;;  %v16536_v8 = vcombine.low %v1264_v58, %v1272_v60  ;;  %v16631_v56 = vcombine.high %v1359_v49, %v1367_v50  ;;  %v1375_v58 = vld [vmem:[%s18420_s27 + $0x1f00] sm:$0xff] }
 0x140   : > { %6766 = vmatprep.mubr.bf16.mxu0 %v18713_v12  ;;  %6930 = vmatprep.mubr.bf16.mxu1 %v18713_v12  ;;  %v16553_v11 = vcombine.high %v1280_v5, %v1288_v6  ;;  %v1383_v60 = vld [vmem:[%s18420_s27 + $0x1f40] sm:$0xff] }
 0x142   : > { %6737 = vmatpush1.bf16.msra.mxu0 %v16438_v14  ;;  %6901 = vmatpush1.bf16.msra.mxu1 %v16440_v15  ;;  %v1296_v14 = vld [vmem:[%s18420_s27 + $0x1c88] sm:$0xff] }
 0x143   : > { %6738 = vmatprep.subr.bf16.mxu0 %v16455_v59  ;;  %6902 = vmatprep.subr.bf16.mxu1 %v16457_v17  ;;  %v1304_v15 = vld [vmem:[%s18420_s27 + $0x1cc8] sm:$0xff]  ;;  %v16550_v59 = vcombine.low %v1279_v3, %v1287_v4  ;;  %v16552_v17 = vcombine.low %v1280_v5, %v1288_v6  ;;  %v16647_v3 = vcombine.high %v1375_v58, %v1383_v60  ;;  %v1391_v5 = vld [vmem:[%s18420_s27 + $0x1f80] sm:$0xff] }
 0x144   : > { %v16569_v19 = vcombine.high %v1296_v14, %v1304_v15  ;;  %v1399_v6 = vld [vmem:[%s18420_s27 + $0x1fc0] sm:$0xff] }
 0x146   : > { %6739 = vmatpush1.bf16.msra.mxu0 %v16454_v22  ;;  %6903 = vmatpush1.bf16.msra.mxu1 %v16456_v24  ;;  %v1312_v22 = vld [vmem:[%s18420_s27 + $0x1d08] sm:$0xff] }
 0x147   : > { %6740 = vmatprep.subr.bf16.mxu0 %v16471_v26  ;;  %6904 = vmatprep.subr.bf16.mxu1 %v16473_v27  ;;  %v1320_v24 = vld [vmem:[%s18420_s27 + $0x1d48] sm:$0xff]  ;;  %v16566_v26 = vcombine.low %v1295_v31, %v1303_v13  ;;  %v16568_v27 = vcombine.low %v1296_v14, %v1304_v15  ;;  %v16663_v31 = vcombine.high %v1391_v5, %v1399_v6  ;;  %v385_v14 = vld [vmem:[%s18420_s27 + $0x10] sm:$0xff] }
 0x148   : > { %v16585_v29 = vcombine.high %v1312_v22, %v1320_v24  ;;  %v393_v15 = vld [vmem:[%s18420_s27 + $0x50] sm:$0xff] }
 0x14a   : > { %6741 = vmatpush1.bf16.msra.mxu0 %v16470_v33  ;;  %6905 = vmatpush1.bf16.msra.mxu1 %v16472_v63  ;;  %v1328_v33 = vld [vmem:[%s18420_s27 + $0x1d88] sm:$0xff] }
 0x14b   : > { %6742 = vmatprep.subr.bf16.mxu0 %v16487_v35  ;;  %6906 = vmatprep.subr.bf16.mxu1 %v16489_v36  ;;  %v1336_v63 = vld [vmem:[%s18420_s27 + $0x1dc8] sm:$0xff]  ;;  %v16582_v35 = vcombine.low %v1311_v20, %v1319_v21  ;;  %v16584_v36 = vcombine.low %v1312_v22, %v1320_v24  ;;  %v15659_v20 = vcombine.high %v385_v14, %v393_v15  ;;  %v401_v22 = vld [vmem:[%s18420_s27 + $0x90] sm:$0xff] }
 0x14c   : > { %v16601_v38 = vcombine.high %v1328_v33, %v1336_v63  ;;  %v409_v24 = vld [vmem:[%s18420_s27 + $0xd0] sm:$0xff] }
 0x14e   : > { %6743 = vmatpush1.bf16.msra.mxu0 %v16486_v42  ;;  %6907 = vmatpush1.bf16.msra.mxu1 %v16488_v43  ;;  %v1344_v42 = vld [vmem:[%s18420_s27 + $0x1e08] sm:$0xff] }
 0x14f   : > { %6744 = vmatprep.subr.bf16.mxu0 %v16503_v45  ;;  %6908 = vmatprep.subr.bf16.mxu1 %v16505_v46  ;;  %v1352_v43 = vld [vmem:[%s18420_s27 + $0x1e48] sm:$0xff]  ;;  %v16598_v45 = vcombine.low %v1327_v30, %v1335_v32  ;;  %v16600_v46 = vcombine.low %v1328_v33, %v1336_v63  ;;  %v15675_v32 = vcombine.high %v401_v22, %v409_v24  ;;  %v417_v63 = vld [vmem:[%s18420_s27 + $0x110] sm:$0xff] }
 0x150   : > { %v16617_v48 = vcombine.high %v1344_v42, %v1352_v43 }
 0x152   : > { %6745 = vmatpush1.bf16.msra.mxu0 %v16502_v16  ;;  %6909 = vmatpush1.bf16.msra.mxu1 %v16504_v52  ;;  %v1360_v16 = vld [vmem:[%s18420_s27 + $0x1e88] sm:$0xff] }
 0x153   : > { %6746 = vmatprep.subr.bf16.mxu0 %v16519_v54  ;;  %6910 = vmatprep.subr.bf16.mxu1 %v16521_v23  ;;  %v1368_v52 = vld [vmem:[%s18420_s27 + $0x1ec8] sm:$0xff]  ;;  %v16614_v54 = vcombine.low %v1343_v39, %v1351_v40  ;;  %v16616_v23 = vcombine.low %v1344_v42, %v1352_v43  ;;  %v433_v42 = vld [vmem:[%s18420_s27 + $0x190] sm:$0xff] }
 0x154   : > { %v16633_v57 = vcombine.high %v1360_v16, %v1368_v52  ;;  %v441_v43 = vld [vmem:[%s18420_s27 + $0x1d0] sm:$0xff] }
 0x156   : > { %6747 = vmatpush1.bf16.msra.mxu0 %v16518_v61  ;;  %6911 = vmatpush1.bf16.msra.mxu1 %v16520_v62  ;;  %v1376_v61 = vld [vmem:[%s18420_s27 + $0x1f08] sm:$0xff] }
 0x157   : > { %6748 = vmatprep.subr.bf16.mxu0 %v16535_v0  ;;  %6912 = vmatprep.subr.bf16.mxu1 %v16537_v1  ;;  %v1384_v62 = vld [vmem:[%s18420_s27 + $0x1f48] sm:$0xff]  ;;  %v16630_v0 = vcombine.low %v1359_v49, %v1367_v50  ;;  %v16632_v1 = vcombine.low %v1360_v16, %v1368_v52  ;;  %v15707_v49 = vcombine.high %v433_v42, %v441_v43  ;;  %v449_v16 = vld [vmem:[%s18420_s27 + $0x210] sm:$0xff] }
 0x158   : > { %v16649_v4 = vcombine.high %v1376_v61, %v1384_v62  ;;  %v457_v52 = vld [vmem:[%s18420_s27 + $0x250] sm:$0xff] }
 0x15a   : > { %6749 = vmatpush1.bf16.msra.mxu0 %v16534_v7  ;;  %6913 = vmatpush1.bf16.msra.mxu1 %v16536_v8  ;;  %v1392_v7 = vld [vmem:[%s18420_s27 + $0x1f88] sm:$0xff] }
 0x15b   : > { %6750 = vmatprep.subr.bf16.mxu0 %v16551_v10  ;;  %6914 = vmatprep.subr.bf16.mxu1 %v16553_v11  ;;  %v1400_v8 = vld [vmem:[%s18420_s27 + $0x1fc8] sm:$0xff]  ;;  %v16646_v10 = vcombine.low %v1375_v58, %v1383_v60  ;;  %v16648_v11 = vcombine.low %v1376_v61, %v1384_v62  ;;  %v15723_v58 = vcombine.high %v449_v16, %v457_v52  ;;  %v465_v61 = vld [vmem:[%s18420_s27 + $0x290] sm:$0xff] }
 0x15c   : > { %v16665_v13 = vcombine.high %v1392_v7, %v1400_v8  ;;  %v473_v62 = vld [vmem:[%s18420_s27 + $0x2d0] sm:$0xff] }
 0x15e   : > { %6751 = vmatpush1.bf16.msra.mxu0 %v16550_v59  ;;  %6915 = vmatpush1.bf16.msra.mxu1 %v16552_v17  ;;  %v386_v59 = vld [vmem:[%s18420_s27 + $0x18] sm:$0xff] }
 0x15f   : > { %6752 = vmatprep.subr.bf16.mxu0 %v16567_v18  ;;  %6916 = vmatprep.subr.bf16.mxu1 %v16569_v19  ;;  %v394_v17 = vld [vmem:[%s18420_s27 + $0x58] sm:$0xff]  ;;  %v16662_v18 = vcombine.low %v1391_v5, %v1399_v6  ;;  %v16664_v19 = vcombine.low %v1392_v7, %v1400_v8  ;;  %v15739_v5 = vcombine.high %v465_v61, %v473_v62  ;;  %v481_v7 = vld [vmem:[%s18420_s27 + $0x310] sm:$0xff] }
 0x160   : > { %v15661_v21 = vcombine.high %v386_v59, %v394_v17  ;;  %v15660_v30 = vcombine.low %v386_v59, %v394_v17  ;;  %v489_v8 = vld [vmem:[%s18420_s27 + $0x350] sm:$0xff] }
 0x161   : > { %v497_v59 = vld [vmem:[%s18420_s27 + $0x390] sm:$0xff] }
 0x162   : > { %6753 = vmatpush1.bf16.msra.mxu0 %v16566_v26  ;;  %6917 = vmatpush1.bf16.msra.mxu1 %v16568_v27  ;;  %v18781_v26 = vpack.c.bf16 %v18697_v55, %v18697_v55  ;;  %v402_v27 = vld [vmem:[%s18420_s27 + $0x98] sm:$0xff]  ;;  %v505_v17 = vld [vmem:[%s18420_s27 + $0x3d0] sm:$0xff] }
 0x163   : > { %6754 = vmatprep.subr.bf16.mxu0 %v16583_v28  ;;  %6918 = vmatprep.subr.bf16.mxu1 %v16585_v29  ;;  %v410_v28 = vld [vmem:[%s18420_s27 + $0xd8] sm:$0xff]  ;;  %v15658_v29 = vcombine.low %v385_v14, %v393_v15  ;;  %v15755_v14 = vcombine.high %v481_v7, %v489_v8 }
 0x164   : > { %v15677_v33 = vcombine.high %v402_v27, %v410_v28  ;;  %v418_v55 = vld [vmem:[%s18420_s27 + $0x118] sm:$0xff] }
 0x166   : > { %6755 = vmatpush1.bf16.msra.mxu0 %v16582_v35  ;;  %6919 = vmatpush1.bf16.msra.mxu1 %v16584_v36  ;;  %v425_v35 = vld [vmem:[%s18420_s27 + $0x150] sm:$0xff]  ;;  %v426_v36 = vld [vmem:[%s18420_s27 + $0x158] sm:$0xff] }
 0x167   : > { %6756 = vmatprep.subr.bf16.mxu0 %v16599_v37  ;;  %6920 = vmatprep.subr.bf16.mxu1 %v16601_v38  ;;  %v15674_v37 = vcombine.low %v401_v22, %v409_v24  ;;  %v15676_v38 = vcombine.low %v402_v27, %v410_v28  ;;  %v15691_v39 = vcombine.high %v417_v63, %v425_v35  ;;  %v513_v27 = vld [vmem:[%s18420_s27 + $0x410] sm:$0xff] }
 0x168   : > { %v15693_v40 = vcombine.high %v418_v55, %v426_v36  ;;  %v15771_v22 = vcombine.high %v497_v59, %v505_v17  ;;  %v521_v28 = vld [vmem:[%s18420_s27 + $0x450] sm:$0xff] }
 0x16a   : > { %6757 = vmatpush1.bf16.msra.mxu0 %v16598_v45  ;;  %6921 = vmatpush1.bf16.msra.mxu1 %v16600_v46  ;;  %v434_v45 = vld [vmem:[%s18420_s27 + $0x198] sm:$0xff] }
 0x16b   : > { %6758 = vmatprep.subr.bf16.mxu0 %v16615_v47  ;;  %6922 = vmatprep.subr.bf16.mxu1 %v16617_v48  ;;  %v442_v46 = vld [vmem:[%s18420_s27 + $0x1d8] sm:$0xff]  ;;  %v15690_v47 = vcombine.low %v417_v63, %v425_v35  ;;  %v15692_v48 = vcombine.low %v418_v55, %v426_v36  ;;  %v15787_v63 = vcombine.high %v513_v27, %v521_v28  ;;  %v529_v55 = vld [vmem:[%s18420_s27 + $0x490] sm:$0xff] }
 0x16c   : > { %v15709_v50 = vcombine.high %v434_v45, %v442_v46  ;;  %v537_v36 = vld [vmem:[%s18420_s27 + $0x4d0] sm:$0xff] }
 0x16e   : > { %6759 = vmatpush1.bf16.msra.mxu0 %v16614_v54  ;;  %6923 = vmatpush1.bf16.msra.mxu1 %v16616_v23  ;;  %v450_v54 = vld [vmem:[%s18420_s27 + $0x218] sm:$0xff] }
 0x16f   : > { %6760 = vmatprep.subr.bf16.mxu0 %v16631_v56  ;;  %6924 = vmatprep.subr.bf16.mxu1 %v16633_v57  ;;  %v458_v23 = vld [vmem:[%s18420_s27 + $0x258] sm:$0xff]  ;;  %v15706_v56 = vcombine.low %v433_v42, %v441_v43  ;;  %v15708_v57 = vcombine.low %v434_v45, %v442_v46  ;;  %v15803_v42 = vcombine.high %v529_v55, %v537_v36  ;;  %v545_v45 = vld [vmem:[%s18420_s27 + $0x510] sm:$0xff] }
 0x170   : > { %v15725_v60 = vcombine.high %v450_v54, %v458_v23  ;;  %v553_v46 = vld [vmem:[%s18420_s27 + $0x550] sm:$0xff] }
 0x172   : > { %6761 = vmatpush1.bf16.msra.mxu0 %v16630_v0  ;;  %6925 = vmatpush1.bf16.msra.mxu1 %v16632_v1  ;;  %v466_v0 = vld [vmem:[%s18420_s27 + $0x298] sm:$0xff] }
 0x173   : > { %6762 = vmatprep.subr.bf16.mxu0 %v16647_v3  ;;  %6926 = vmatprep.subr.bf16.mxu1 %v16649_v4  ;;  %v474_v1 = vld [vmem:[%s18420_s27 + $0x2d8] sm:$0xff]  ;;  %v15722_v3 = vcombine.low %v449_v16, %v457_v52  ;;  %v15724_v4 = vcombine.low %v450_v54, %v458_v23  ;;  %v15819_v16 = vcombine.high %v545_v45, %v553_v46  ;;  %v561_v54 = vld [vmem:[%s18420_s27 + $0x590] sm:$0xff] }
 0x174   : > { %v15741_v6 = vcombine.high %v466_v0, %v474_v1  ;;  %v569_v23 = vld [vmem:[%s18420_s27 + $0x5d0] sm:$0xff] }
 0x176   : > { %6763 = vmatpush1.bf16.msra.mxu0 %v16646_v10  ;;  %6927 = vmatpush1.bf16.msra.mxu1 %v16648_v11  ;;  %v482_v10 = vld [vmem:[%s18420_s27 + $0x318] sm:$0xff] }
 0x177   : > { %6764 = vmatprep.subr.bf16.mxu0 %v16663_v31  ;;  %6928 = vmatprep.subr.bf16.mxu1 %v16665_v13  ;;  %v490_v11 = vld [vmem:[%s18420_s27 + $0x358] sm:$0xff]  ;;  %v15738_v31 = vcombine.low %v465_v61, %v473_v62  ;;  %v15740_v13 = vcombine.low %v466_v0, %v474_v1  ;;  %v15835_v61 = vcombine.high %v561_v54, %v569_v23  ;;  %v577_v0 = vld [vmem:[%s18420_s27 + $0x610] sm:$0xff] }
 0x178   : > { %v15757_v15 = vcombine.high %v482_v10, %v490_v11  ;;  %v585_v1 = vld [vmem:[%s18420_s27 + $0x650] sm:$0xff] }
 0x17a   : > { %6765 = vmatpush1.bf16.msra.mxu0 %v16662_v18  ;;  %6929 = vmatpush1.bf16.msra.mxu1 %v16664_v19  ;;  %v498_v18 = vld [vmem:[%s18420_s27 + $0x398] sm:$0xff] }
 0x17b   : > { %6939 = vmatprep.subr.bf16.mxu0 %v15659_v20  ;;  %7103 = vmatprep.subr.bf16.mxu1 %v15661_v21  ;;  %v506_v19 = vld [vmem:[%s18420_s27 + $0x3d8] sm:$0xff]  ;;  %v15754_v20 = vcombine.low %v481_v7, %v489_v8  ;;  %v15756_v21 = vcombine.low %v482_v10, %v490_v11  ;;  %v15851_v7 = vcombine.high %v577_v0, %v585_v1  ;;  %v593_v10 = vld [vmem:[%s18420_s27 + $0x690] sm:$0xff] }
 0x17c   : > { %v15773_v24 = vcombine.high %v498_v18, %v506_v19  ;;  %v601_v11 = vld [vmem:[%s18420_s27 + $0x6d0] sm:$0xff] }
 0x17d   : > { %6767 = vmatmul.mubr.bf16.vlgmr.msra.gmra.mrb[0].mxu0 %v18781_v26  ;;  %6931 = vmatmul.mubr.bf16.vlgmr.msra.gmra.mrb[0].mxu1 %v18781_v26 }
 0x17e   : > { %6940 = vmatpush1.bf16.msra.mxu0 %v15658_v29  ;;  %7104 = vmatpush1.bf16.msra.mxu1 %v15660_v30  ;;  %v514_v29 = vld [vmem:[%s18420_s27 + $0x418] sm:$0xff] }
 0x17f   : > { %6941 = vmatprep.subr.bf16.mxu0 %v15675_v32  ;;  %7105 = vmatprep.subr.bf16.mxu1 %v15677_v33  ;;  %v522_v30 = vld [vmem:[%s18420_s27 + $0x458] sm:$0xff]  ;;  %v15770_v32 = vcombine.low %v497_v59, %v505_v17  ;;  %v15772_v33 = vcombine.low %v498_v18, %v506_v19  ;;  %v15867_v59 = vcombine.high %v593_v10, %v601_v11  ;;  %v609_v18 = vld [vmem:[%s18420_s27 + $0x710] sm:$0xff] }
 0x180   : > { %6971 = vmatprep.mubr.bf16.mxu0 %v18492_v9  ;;  %7135 = vmatprep.mubr.bf16.mxu1 %v18492_v9  ;;  %v15789_v35 = vcombine.high %v514_v29, %v522_v30  ;;  %v617_v19 = vld [vmem:[%s18420_s27 + $0x750] sm:$0xff] }
 0x182   : > { %6942 = vmatpush1.bf16.msra.mxu0 %v15674_v37  ;;  %7106 = vmatpush1.bf16.msra.mxu1 %v15676_v38  ;;  %v530_v37 = vld [vmem:[%s18420_s27 + $0x498] sm:$0xff] }
 0x183   : > { %6943 = vmatprep.subr.bf16.mxu0 %v15691_v39  ;;  %7107 = vmatprep.subr.bf16.mxu1 %v15693_v40  ;;  %v538_v38 = vld [vmem:[%s18420_s27 + $0x4d8] sm:$0xff]  ;;  %v15786_v39 = vcombine.low %v513_v27, %v521_v28  ;;  %v15788_v40 = vcombine.low %v514_v29, %v522_v30  ;;  %v15883_v27 = vcombine.high %v609_v18, %v617_v19  ;;  %v625_v29 = vld [vmem:[%s18420_s27 + $0x790] sm:$0xff] }
 0x184   : > { %v15805_v43 = vcombine.high %v530_v37, %v538_v38  ;;  %v633_v30 = vld [vmem:[%s18420_s27 + $0x7d0] sm:$0xff] }
 0x186   : > { %6944 = vmatpush1.bf16.msra.mxu0 %v15690_v47  ;;  %7108 = vmatpush1.bf16.msra.mxu1 %v15692_v48  ;;  %v546_v47 = vld [vmem:[%s18420_s27 + $0x518] sm:$0xff] }
 0x187   : > { %6945 = vmatprep.subr.bf16.mxu0 %v15707_v49  ;;  %7109 = vmatprep.subr.bf16.mxu1 %v15709_v50  ;;  %v554_v48 = vld [vmem:[%s18420_s27 + $0x558] sm:$0xff]  ;;  %v15802_v49 = vcombine.low %v529_v55, %v537_v36  ;;  %v15804_v50 = vcombine.low %v530_v37, %v538_v38  ;;  %v15899_v55 = vcombine.high %v625_v29, %v633_v30  ;;  %v641_v37 = vld [vmem:[%s18420_s27 + $0x810] sm:$0xff] }
 0x188   : > { %v15821_v52 = vcombine.high %v546_v47, %v554_v48  ;;  %v649_v38 = vld [vmem:[%s18420_s27 + $0x850] sm:$0xff] }
 0x18a   : > { %6946 = vmatpush1.bf16.msra.mxu0 %v15706_v56  ;;  %7110 = vmatpush1.bf16.msra.mxu1 %v15708_v57  ;;  %v562_v56 = vld [vmem:[%s18420_s27 + $0x598] sm:$0xff] }
 0x18b   : > { %6947 = vmatprep.subr.bf16.mxu0 %v15723_v58  ;;  %7111 = vmatprep.subr.bf16.mxu1 %v15725_v60  ;;  %v570_v57 = vld [vmem:[%s18420_s27 + $0x5d8] sm:$0xff]  ;;  %v15818_v58 = vcombine.low %v545_v45, %v553_v46  ;;  %v15820_v60 = vcombine.low %v546_v47, %v554_v48  ;;  %v15915_v45 = vcombine.high %v641_v37, %v649_v38  ;;  %v657_v47 = vld [vmem:[%s18420_s27 + $0x890] sm:$0xff] }
 0x18c   : > { %v15837_v62 = vcombine.high %v562_v56, %v570_v57  ;;  %v665_v48 = vld [vmem:[%s18420_s27 + $0x8d0] sm:$0xff] }
 0x18e   : > { %6948 = vmatpush1.bf16.msra.mxu0 %v15722_v3  ;;  %7112 = vmatpush1.bf16.msra.mxu1 %v15724_v4  ;;  %v578_v3 = vld [vmem:[%s18420_s27 + $0x618] sm:$0xff] }
 0x18f   : > { %6949 = vmatprep.subr.bf16.mxu0 %v15739_v5  ;;  %7113 = vmatprep.subr.bf16.mxu1 %v15741_v6  ;;  %v586_v4 = vld [vmem:[%s18420_s27 + $0x658] sm:$0xff]  ;;  %v15834_v5 = vcombine.low %v561_v54, %v569_v23  ;;  %v15836_v6 = vcombine.low %v562_v56, %v570_v57  ;;  %v15931_v54 = vcombine.high %v657_v47, %v665_v48  ;;  %v673_v56 = vld [vmem:[%s18420_s27 + $0x910] sm:$0xff] }
 0x190   : > { %v15853_v8 = vcombine.high %v578_v3, %v586_v4  ;;  %v681_v57 = vld [vmem:[%s18420_s27 + $0x950] sm:$0xff] }
 0x192   : > { %6950 = vmatpush1.bf16.msra.mxu0 %v15738_v31  ;;  %7114 = vmatpush1.bf16.msra.mxu1 %v15740_v13  ;;  %v594_v31 = vld [vmem:[%s18420_s27 + $0x698] sm:$0xff] }
 0x193   : > { %6951 = vmatprep.subr.bf16.mxu0 %v15755_v14  ;;  %7115 = vmatprep.subr.bf16.mxu1 %v15757_v15  ;;  %v602_v13 = vld [vmem:[%s18420_s27 + $0x6d8] sm:$0xff]  ;;  %v15850_v14 = vcombine.low %v577_v0, %v585_v1  ;;  %v15852_v15 = vcombine.low %v578_v3, %v586_v4  ;;  %v15947_v0 = vcombine.high %v673_v56, %v681_v57  ;;  %v689_v3 = vld [vmem:[%s18420_s27 + $0x990] sm:$0xff] }
 0x194   : > { %v15869_v17 = vcombine.high %v594_v31, %v602_v13  ;;  %v697_v4 = vld [vmem:[%s18420_s27 + $0x9d0] sm:$0xff] }
 0x196   : > { %6952 = vmatpush1.bf16.msra.mxu0 %v15754_v20  ;;  %7116 = vmatpush1.bf16.msra.mxu1 %v15756_v21  ;;  %v610_v20 = vld [vmem:[%s18420_s27 + $0x718] sm:$0xff] }
 0x197   : > { %6953 = vmatprep.subr.bf16.mxu0 %v15771_v22  ;;  %7117 = vmatprep.subr.bf16.mxu1 %v15773_v24  ;;  %v618_v21 = vld [vmem:[%s18420_s27 + $0x758] sm:$0xff]  ;;  %v15866_v22 = vcombine.low %v593_v10, %v601_v11  ;;  %v15868_v24 = vcombine.low %v594_v31, %v602_v13  ;;  %v15963_v10 = vcombine.high %v689_v3, %v697_v4  ;;  %v705_v31 = vld [vmem:[%s18420_s27 + $0xa10] sm:$0xff] }
 0x198   : > { %v15885_v28 = vcombine.high %v610_v20, %v618_v21  ;;  %v713_v13 = vld [vmem:[%s18420_s27 + $0xa50] sm:$0xff] }
 0x19a   : > { %6954 = vmatpush1.bf16.msra.mxu0 %v15770_v32  ;;  %7118 = vmatpush1.bf16.msra.mxu1 %v15772_v33  ;;  %v626_v32 = vld [vmem:[%s18420_s27 + $0x798] sm:$0xff] }
 0x19b   : > { %6955 = vmatprep.subr.bf16.mxu0 %v15787_v63  ;;  %7119 = vmatprep.subr.bf16.mxu1 %v15789_v35  ;;  %v634_v33 = vld [vmem:[%s18420_s27 + $0x7d8] sm:$0xff]  ;;  %v15882_v63 = vcombine.low %v609_v18, %v617_v19  ;;  %v15884_v35 = vcombine.low %v610_v20, %v618_v21  ;;  %v15979_v18 = vcombine.high %v705_v31, %v713_v13  ;;  %v721_v20 = vld [vmem:[%s18420_s27 + $0xa90] sm:$0xff] }
 0x19c   : > { %v15901_v36 = vcombine.high %v626_v32, %v634_v33  ;;  %v729_v21 = vld [vmem:[%s18420_s27 + $0xad0] sm:$0xff] }
 0x19e   : > { %6956 = vmatpush1.bf16.msra.mxu0 %v15786_v39  ;;  %7120 = vmatpush1.bf16.msra.mxu1 %v15788_v40  ;;  %v642_v39 = vld [vmem:[%s18420_s27 + $0x818] sm:$0xff] }
 0x19f   : > { %6957 = vmatprep.subr.bf16.mxu0 %v15803_v42  ;;  %7121 = vmatprep.subr.bf16.mxu1 %v15805_v43  ;;  %v650_v40 = vld [vmem:[%s18420_s27 + $0x858] sm:$0xff]  ;;  %v15898_v42 = vcombine.low %v625_v29, %v633_v30  ;;  %v15900_v43 = vcombine.low %v626_v32, %v634_v33  ;;  %v15995_v29 = vcombine.high %v721_v20, %v729_v21  ;;  %v737_v32 = vld [vmem:[%s18420_s27 + $0xb10] sm:$0xff] }
 0x1a0   : > { %v15917_v46 = vcombine.high %v642_v39, %v650_v40  ;;  %v745_v33 = vld [vmem:[%s18420_s27 + $0xb50] sm:$0xff] }
 0x1a2   : > { %6958 = vmatpush1.bf16.msra.mxu0 %v15802_v49  ;;  %7122 = vmatpush1.bf16.msra.mxu1 %v15804_v50  ;;  %v658_v49 = vld [vmem:[%s18420_s27 + $0x898] sm:$0xff] }
 0x1a3   : > { %6959 = vmatprep.subr.bf16.mxu0 %v15819_v16  ;;  %7123 = vmatprep.subr.bf16.mxu1 %v15821_v52  ;;  %v666_v50 = vld [vmem:[%s18420_s27 + $0x8d8] sm:$0xff]  ;;  %v15914_v16 = vcombine.low %v641_v37, %v649_v38  ;;  %v15916_v52 = vcombine.low %v642_v39, %v650_v40  ;;  %v16011_v37 = vcombine.high %v737_v32, %v745_v33  ;;  %v753_v39 = vld [vmem:[%s18420_s27 + $0xb90] sm:$0xff] }
 0x1a4   : > { %v15933_v23 = vcombine.high %v658_v49, %v666_v50  ;;  %v761_v40 = vld [vmem:[%s18420_s27 + $0xbd0] sm:$0xff] }
 0x1a6   : > { %6960 = vmatpush1.bf16.msra.mxu0 %v15818_v58  ;;  %7124 = vmatpush1.bf16.msra.mxu1 %v15820_v60  ;;  %v674_v58 = vld [vmem:[%s18420_s27 + $0x918] sm:$0xff] }
 0x1a7   : > { %6961 = vmatprep.subr.bf16.mxu0 %v15835_v61  ;;  %7125 = vmatprep.subr.bf16.mxu1 %v15837_v62  ;;  %v682_v60 = vld [vmem:[%s18420_s27 + $0x958] sm:$0xff]  ;;  %v15930_v61 = vcombine.low %v657_v47, %v665_v48  ;;  %v15932_v62 = vcombine.low %v658_v49, %v666_v50  ;;  %v16027_v47 = vcombine.high %v753_v39, %v761_v40  ;;  %v769_v49 = vld [vmem:[%s18420_s27 + $0xc10] sm:$0xff] }
 0x1a8   : > { %v15949_v1 = vcombine.high %v674_v58, %v682_v60  ;;  %v777_v50 = vld [vmem:[%s18420_s27 + $0xc50] sm:$0xff] }
 0x1aa   : > { %6962 = vmatpush1.bf16.msra.mxu0 %v15834_v5  ;;  %7126 = vmatpush1.bf16.msra.mxu1 %v15836_v6  ;;  %v690_v5 = vld [vmem:[%s18420_s27 + $0x998] sm:$0xff] }
 0x1ab   : > { %6963 = vmatprep.subr.bf16.mxu0 %v15851_v7  ;;  %7127 = vmatprep.subr.bf16.mxu1 %v15853_v8  ;;  %v698_v6 = vld [vmem:[%s18420_s27 + $0x9d8] sm:$0xff]  ;;  %v15946_v7 = vcombine.low %v673_v56, %v681_v57  ;;  %v15948_v8 = vcombine.low %v674_v58, %v682_v60  ;;  %v16043_v56 = vcombine.high %v769_v49, %v777_v50  ;;  %v785_v58 = vld [vmem:[%s18420_s27 + $0xc90] sm:$0xff] }
 0x1ac   : > { %v15965_v11 = vcombine.high %v690_v5, %v698_v6  ;;  %v793_v60 = vld [vmem:[%s18420_s27 + $0xcd0] sm:$0xff] }
 0x1ae   : > { %6964 = vmatpush1.bf16.msra.mxu0 %v15850_v14  ;;  %7128 = vmatpush1.bf16.msra.mxu1 %v15852_v15  ;;  %v706_v14 = vld [vmem:[%s18420_s27 + $0xa18] sm:$0xff] }
 0x1af   : > { %6965 = vmatprep.subr.bf16.mxu0 %v15867_v59  ;;  %7129 = vmatprep.subr.bf16.mxu1 %v15869_v17  ;;  %v714_v15 = vld [vmem:[%s18420_s27 + $0xa58] sm:$0xff]  ;;  %v15962_v59 = vcombine.low %v689_v3, %v697_v4  ;;  %v15964_v17 = vcombine.low %v690_v5, %v698_v6  ;;  %v16059_v3 = vcombine.high %v785_v58, %v793_v60  ;;  %v801_v5 = vld [vmem:[%s18420_s27 + $0xd10] sm:$0xff] }
 0x1b0   : > { %v15981_v19 = vcombine.high %v706_v14, %v714_v15  ;;  %v809_v6 = vld [vmem:[%s18420_s27 + $0xd50] sm:$0xff] }
 0x1b2   : > { %6966 = vmatpush1.bf16.msra.mxu0 %v15866_v22  ;;  %7130 = vmatpush1.bf16.msra.mxu1 %v15868_v24  ;;  %v722_v22 = vld [vmem:[%s18420_s27 + $0xa98] sm:$0xff] }
 0x1b3   : > { %6967 = vmatprep.subr.bf16.mxu0 %v15883_v27  ;;  %7131 = vmatprep.subr.bf16.mxu1 %v15885_v28  ;;  %v730_v24 = vld [vmem:[%s18420_s27 + $0xad8] sm:$0xff]  ;;  %v15978_v27 = vcombine.low %v705_v31, %v713_v13  ;;  %v15980_v28 = vcombine.low %v706_v14, %v714_v15  ;;  %v16075_v31 = vcombine.high %v801_v5, %v809_v6  ;;  %v817_v14 = vld [vmem:[%s18420_s27 + $0xd90] sm:$0xff] }
 0x1b4   : > { %v15997_v30 = vcombine.high %v722_v22, %v730_v24  ;;  %v825_v15 = vld [vmem:[%s18420_s27 + $0xdd0] sm:$0xff] }
 0x1b6   : > { %6968 = vmatpush1.bf16.msra.mxu0 %v15882_v63  ;;  %7132 = vmatpush1.bf16.msra.mxu1 %v15884_v35  ;;  %v738_v63 = vld [vmem:[%s18420_s27 + $0xb18] sm:$0xff] }
 0x1b7   : > { %6969 = vmatprep.subr.bf16.mxu0 %v15899_v55  ;;  %7133 = vmatprep.subr.bf16.mxu1 %v15901_v36  ;;  %v746_v35 = vld [vmem:[%s18420_s27 + $0xb58] sm:$0xff]  ;;  %v15994_v55 = vcombine.low %v721_v20, %v729_v21  ;;  %v15996_v36 = vcombine.low %v722_v22, %v730_v24  ;;  %v16091_v20 = vcombine.high %v817_v14, %v825_v15  ;;  %v833_v22 = vld [vmem:[%s18420_s27 + $0xe10] sm:$0xff] }
 0x1b8   : > { %v16013_v38 = vcombine.high %v738_v63, %v746_v35  ;;  %v841_v24 = vld [vmem:[%s18420_s27 + $0xe50] sm:$0xff] }
 0x1ba   : > { %6970 = vmatpush1.bf16.msra.mxu0 %v15898_v42  ;;  %7134 = vmatpush1.bf16.msra.mxu1 %v15900_v43  ;;  %v754_v42 = vld [vmem:[%s18420_s27 + $0xb98] sm:$0xff] }
 0x1bb   : > { %6980 = vmatprep.subr.bf16.mxu0 %v15915_v45  ;;  %7144 = vmatprep.subr.bf16.mxu1 %v15917_v46  ;;  %v762_v43 = vld [vmem:[%s18420_s27 + $0xbd8] sm:$0xff]  ;;  %v16010_v45 = vcombine.low %v737_v32, %v745_v33  ;;  %v16012_v46 = vcombine.low %v738_v63, %v746_v35  ;;  %v16107_v32 = vcombine.high %v833_v22, %v841_v24  ;;  %v849_v63 = vld [vmem:[%s18420_s27 + $0xe90] sm:$0xff] }
 0x1bc   : > { %v16029_v48 = vcombine.high %v754_v42, %v762_v43  ;;  %v857_v35 = vld [vmem:[%s18420_s27 + $0xed0] sm:$0xff] }
 0x1bd   : > { %6972 = vmatmul.mubr.bf16.vlgmr.msra.gmra.mrb[4].mxu0 %v18541_v25  ;;  %7136 = vmatmul.mubr.bf16.vlgmr.msra.gmra.mrb[4].mxu1 %v18541_v25 }
 0x1be   : > { %6981 = vmatpush1.bf16.msra.mxu0 %v15914_v16  ;;  %7145 = vmatpush1.bf16.msra.mxu1 %v15916_v52  ;;  %v770_v16 = vld [vmem:[%s18420_s27 + $0xc18] sm:$0xff] }
 0x1bf   : > { %6982 = vmatprep.subr.bf16.mxu0 %v15931_v54  ;;  %7146 = vmatprep.subr.bf16.mxu1 %v15933_v23  ;;  %v778_v52 = vld [vmem:[%s18420_s27 + $0xc58] sm:$0xff]  ;;  %v16026_v54 = vcombine.low %v753_v39, %v761_v40  ;;  %v16028_v23 = vcombine.low %v754_v42, %v762_v43  ;;  %v16123_v39 = vcombine.high %v849_v63, %v857_v35  ;;  %v865_v42 = vld [vmem:[%s18420_s27 + $0xf10] sm:$0xff] }
 0x1c0   : > { %7012 = vmatprep.mubr.bf16.mxu0 %v18547_v34  ;;  %7176 = vmatprep.mubr.bf16.mxu1 %v18547_v34  ;;  %v16045_v57 = vcombine.high %v770_v16, %v778_v52  ;;  %v873_v43 = vld [vmem:[%s18420_s27 + $0xf50] sm:$0xff] }
 0x1c2   : > { %6983 = vmatpush1.bf16.msra.mxu0 %v15930_v61  ;;  %7147 = vmatpush1.bf16.msra.mxu1 %v15932_v62  ;;  %v786_v61 = vld [vmem:[%s18420_s27 + $0xc98] sm:$0xff] }
 0x1c3   : > { %6984 = vmatprep.subr.bf16.mxu0 %v15947_v0  ;;  %7148 = vmatprep.subr.bf16.mxu1 %v15949_v1  ;;  %v794_v62 = vld [vmem:[%s18420_s27 + $0xcd8] sm:$0xff]  ;;  %v16042_v0 = vcombine.low %v769_v49, %v777_v50  ;;  %v16044_v1 = vcombine.low %v770_v16, %v778_v52  ;;  %v16139_v49 = vcombine.high %v865_v42, %v873_v43  ;;  %v881_v16 = vld [vmem:[%s18420_s27 + $0xf90] sm:$0xff] }
 0x1c4   : > { %v16061_v4 = vcombine.high %v786_v61, %v794_v62  ;;  %v889_v52 = vld [vmem:[%s18420_s27 + $0xfd0] sm:$0xff] }
 0x1c6   : > { %6985 = vmatpush1.bf16.msra.mxu0 %v15946_v7  ;;  %7149 = vmatpush1.bf16.msra.mxu1 %v15948_v8  ;;  %v802_v7 = vld [vmem:[%s18420_s27 + $0xd18] sm:$0xff] }
 0x1c7   : > { %6986 = vmatprep.subr.bf16.mxu0 %v15963_v10  ;;  %7150 = vmatprep.subr.bf16.mxu1 %v15965_v11  ;;  %v810_v8 = vld [vmem:[%s18420_s27 + $0xd58] sm:$0xff]  ;;  %v16058_v10 = vcombine.low %v785_v58, %v793_v60  ;;  %v16060_v11 = vcombine.low %v786_v61, %v794_v62  ;;  %v16155_v58 = vcombine.high %v881_v16, %v889_v52  ;;  %v897_v61 = vld [vmem:[%s18420_s27 + $0x1010] sm:$0xff] }
 0x1c8   : > { %v16077_v13 = vcombine.high %v802_v7, %v810_v8  ;;  %v905_v62 = vld [vmem:[%s18420_s27 + $0x1050] sm:$0xff] }
 0x1ca   : > { %6987 = vmatpush1.bf16.msra.mxu0 %v15962_v59  ;;  %7151 = vmatpush1.bf16.msra.mxu1 %v15964_v17  ;;  %v818_v59 = vld [vmem:[%s18420_s27 + $0xd98] sm:$0xff] }
 0x1cb   : > { %6988 = vmatprep.subr.bf16.mxu0 %v15979_v18  ;;  %7152 = vmatprep.subr.bf16.mxu1 %v15981_v19  ;;  %v826_v17 = vld [vmem:[%s18420_s27 + $0xdd8] sm:$0xff]  ;;  %v16074_v18 = vcombine.low %v801_v5, %v809_v6  ;;  %v16076_v19 = vcombine.low %v802_v7, %v810_v8  ;;  %v16171_v5 = vcombine.high %v897_v61, %v905_v62  ;;  %v913_v7 = vld [vmem:[%s18420_s27 + $0x1090] sm:$0xff] }
 0x1cc   : > { %v16093_v21 = vcombine.high %v818_v59, %v826_v17  ;;  %v921_v8 = vld [vmem:[%s18420_s27 + $0x10d0] sm:$0xff] }
 0x1ce   : > { %6989 = vmatpush1.bf16.msra.mxu0 %v15978_v27  ;;  %7153 = vmatpush1.bf16.msra.mxu1 %v15980_v28  ;;  %v834_v27 = vld [vmem:[%s18420_s27 + $0xe18] sm:$0xff] }
 0x1cf   : > { %6990 = vmatprep.subr.bf16.mxu0 %v15995_v29  ;;  %7154 = vmatprep.subr.bf16.mxu1 %v15997_v30  ;;  %v842_v28 = vld [vmem:[%s18420_s27 + $0xe58] sm:$0xff]  ;;  %v16090_v29 = vcombine.low %v817_v14, %v825_v15  ;;  %v16092_v30 = vcombine.low %v818_v59, %v826_v17  ;;  %v16187_v14 = vcombine.high %v913_v7, %v921_v8  ;;  %v929_v59 = vld [vmem:[%s18420_s27 + $0x1110] sm:$0xff] }
 0x1d0   : > { %v16109_v33 = vcombine.high %v834_v27, %v842_v28  ;;  %v937_v17 = vld [vmem:[%s18420_s27 + $0x1150] sm:$0xff] }
 0x1d2   : > { %6991 = vmatpush1.bf16.msra.mxu0 %v15994_v55  ;;  %7155 = vmatpush1.bf16.msra.mxu1 %v15996_v36  ;;  %v850_v55 = vld [vmem:[%s18420_s27 + $0xe98] sm:$0xff] }
 0x1d3   : > { %6992 = vmatprep.subr.bf16.mxu0 %v16011_v37  ;;  %7156 = vmatprep.subr.bf16.mxu1 %v16013_v38  ;;  %v858_v36 = vld [vmem:[%s18420_s27 + $0xed8] sm:$0xff]  ;;  %v16106_v37 = vcombine.low %v833_v22, %v841_v24  ;;  %v16108_v38 = vcombine.low %v834_v27, %v842_v28  ;;  %v16203_v22 = vcombine.high %v929_v59, %v937_v17  ;;  %v945_v27 = vld [vmem:[%s18420_s27 + $0x1190] sm:$0xff] }
 0x1d4   : > { %v16125_v40 = vcombine.high %v850_v55, %v858_v36  ;;  %v953_v28 = vld [vmem:[%s18420_s27 + $0x11d0] sm:$0xff] }
 0x1d6   : > { %6993 = vmatpush1.bf16.msra.mxu0 %v16010_v45  ;;  %7157 = vmatpush1.bf16.msra.mxu1 %v16012_v46  ;;  %v866_v45 = vld [vmem:[%s18420_s27 + $0xf18] sm:$0xff] }
 0x1d7   : > { %6994 = vmatprep.subr.bf16.mxu0 %v16027_v47  ;;  %7158 = vmatprep.subr.bf16.mxu1 %v16029_v48  ;;  %v874_v46 = vld [vmem:[%s18420_s27 + $0xf58] sm:$0xff]  ;;  %v16122_v47 = vcombine.low %v849_v63, %v857_v35  ;;  %v16124_v48 = vcombine.low %v850_v55, %v858_v36  ;;  %v16219_v63 = vcombine.high %v945_v27, %v953_v28  ;;  %v961_v55 = vld [vmem:[%s18420_s27 + $0x1210] sm:$0xff] }
 0x1d8   : > { %v16141_v50 = vcombine.high %v866_v45, %v874_v46  ;;  %v969_v36 = vld [vmem:[%s18420_s27 + $0x1250] sm:$0xff] }
 0x1da   : > { %6995 = vmatpush1.bf16.msra.mxu0 %v16026_v54  ;;  %7159 = vmatpush1.bf16.msra.mxu1 %v16028_v23  ;;  %v882_v54 = vld [vmem:[%s18420_s27 + $0xf98] sm:$0xff] }
 0x1db   : > { %6996 = vmatprep.subr.bf16.mxu0 %v16043_v56  ;;  %7160 = vmatprep.subr.bf16.mxu1 %v16045_v57  ;;  %v890_v23 = vld [vmem:[%s18420_s27 + $0xfd8] sm:$0xff]  ;;  %v16138_v56 = vcombine.low %v865_v42, %v873_v43  ;;  %v16140_v57 = vcombine.low %v866_v45, %v874_v46  ;;  %v16235_v42 = vcombine.high %v961_v55, %v969_v36  ;;  %v977_v45 = vld [vmem:[%s18420_s27 + $0x1290] sm:$0xff] }
 0x1dc   : > { %v16157_v60 = vcombine.high %v882_v54, %v890_v23  ;;  %v985_v46 = vld [vmem:[%s18420_s27 + $0x12d0] sm:$0xff] }
 0x1de   : > { %6997 = vmatpush1.bf16.msra.mxu0 %v16042_v0  ;;  %7161 = vmatpush1.bf16.msra.mxu1 %v16044_v1  ;;  %v898_v0 = vld [vmem:[%s18420_s27 + $0x1018] sm:$0xff] }
 0x1df   : > { %6998 = vmatprep.subr.bf16.mxu0 %v16059_v3  ;;  %7162 = vmatprep.subr.bf16.mxu1 %v16061_v4  ;;  %v906_v1 = vld [vmem:[%s18420_s27 + $0x1058] sm:$0xff]  ;;  %v16154_v3 = vcombine.low %v881_v16, %v889_v52  ;;  %v16156_v4 = vcombine.low %v882_v54, %v890_v23  ;;  %v16251_v16 = vcombine.high %v977_v45, %v985_v46  ;;  %v993_v54 = vld [vmem:[%s18420_s27 + $0x1310] sm:$0xff] }
 0x1e0   : > { %v16173_v6 = vcombine.high %v898_v0, %v906_v1  ;;  %v1001_v23 = vld [vmem:[%s18420_s27 + $0x1350] sm:$0xff] }
 0x1e2   : > { %6999 = vmatpush1.bf16.msra.mxu0 %v16058_v10  ;;  %7163 = vmatpush1.bf16.msra.mxu1 %v16060_v11  ;;  %v914_v10 = vld [vmem:[%s18420_s27 + $0x1098] sm:$0xff] }
 0x1e3   : > { %7000 = vmatprep.subr.bf16.mxu0 %v16075_v31  ;;  %7164 = vmatprep.subr.bf16.mxu1 %v16077_v13  ;;  %v922_v11 = vld [vmem:[%s18420_s27 + $0x10d8] sm:$0xff]  ;;  %v16170_v31 = vcombine.low %v897_v61, %v905_v62  ;;  %v16172_v13 = vcombine.low %v898_v0, %v906_v1  ;;  %v16267_v61 = vcombine.high %v993_v54, %v1001_v23  ;;  %v1009_v0 = vld [vmem:[%s18420_s27 + $0x1390] sm:$0xff] }
 0x1e4   : > { %v16189_v15 = vcombine.high %v914_v10, %v922_v11  ;;  %v1017_v1 = vld [vmem:[%s18420_s27 + $0x13d0] sm:$0xff] }
 0x1e6   : > { %7001 = vmatpush1.bf16.msra.mxu0 %v16074_v18  ;;  %7165 = vmatpush1.bf16.msra.mxu1 %v16076_v19  ;;  %v930_v18 = vld [vmem:[%s18420_s27 + $0x1118] sm:$0xff] }
 0x1e7   : > { %7002 = vmatprep.subr.bf16.mxu0 %v16091_v20  ;;  %7166 = vmatprep.subr.bf16.mxu1 %v16093_v21  ;;  %v938_v19 = vld [vmem:[%s18420_s27 + $0x1158] sm:$0xff]  ;;  %v16186_v20 = vcombine.low %v913_v7, %v921_v8  ;;  %v16188_v21 = vcombine.low %v914_v10, %v922_v11  ;;  %v16283_v7 = vcombine.high %v1009_v0, %v1017_v1  ;;  %v1025_v10 = vld [vmem:[%s18420_s27 + $0x1410] sm:$0xff] }
 0x1e8   : > { %v16205_v24 = vcombine.high %v930_v18, %v938_v19  ;;  %v1033_v11 = vld [vmem:[%s18420_s27 + $0x1450] sm:$0xff] }
 0x1ea   : > { %7003 = vmatpush1.bf16.msra.mxu0 %v16090_v29  ;;  %7167 = vmatpush1.bf16.msra.mxu1 %v16092_v30  ;;  %v946_v29 = vld [vmem:[%s18420_s27 + $0x1198] sm:$0xff] }
 0x1eb   : > { %7004 = vmatprep.subr.bf16.mxu0 %v16107_v32  ;;  %7168 = vmatprep.subr.bf16.mxu1 %v16109_v33  ;;  %v954_v30 = vld [vmem:[%s18420_s27 + $0x11d8] sm:$0xff]  ;;  %v16202_v32 = vcombine.low %v929_v59, %v937_v17  ;;  %v16204_v33 = vcombine.low %v930_v18, %v938_v19  ;;  %v16299_v59 = vcombine.high %v1025_v10, %v1033_v11  ;;  %v1041_v18 = vld [vmem:[%s18420_s27 + $0x1490] sm:$0xff] }
 0x1ec   : > { %v16221_v35 = vcombine.high %v946_v29, %v954_v30  ;;  %v1049_v19 = vld [vmem:[%s18420_s27 + $0x14d0] sm:$0xff] }
 0x1ee   : > { %7005 = vmatpush1.bf16.msra.mxu0 %v16106_v37  ;;  %7169 = vmatpush1.bf16.msra.mxu1 %v16108_v38  ;;  %v962_v37 = vld [vmem:[%s18420_s27 + $0x1218] sm:$0xff] }
 0x1ef   : > { %7006 = vmatprep.subr.bf16.mxu0 %v16123_v39  ;;  %7170 = vmatprep.subr.bf16.mxu1 %v16125_v40  ;;  %v970_v38 = vld [vmem:[%s18420_s27 + $0x1258] sm:$0xff]  ;;  %v16218_v39 = vcombine.low %v945_v27, %v953_v28  ;;  %v16220_v40 = vcombine.low %v946_v29, %v954_v30  ;;  %v16315_v27 = vcombine.high %v1041_v18, %v1049_v19  ;;  %v1057_v29 = vld [vmem:[%s18420_s27 + $0x1510] sm:$0xff] }
 0x1f0   : > { %v16237_v43 = vcombine.high %v962_v37, %v970_v38  ;;  %v1065_v30 = vld [vmem:[%s18420_s27 + $0x1550] sm:$0xff] }
 0x1f2   : > { %7007 = vmatpush1.bf16.msra.mxu0 %v16122_v47  ;;  %7171 = vmatpush1.bf16.msra.mxu1 %v16124_v48  ;;  %v978_v47 = vld [vmem:[%s18420_s27 + $0x1298] sm:$0xff] }
 0x1f3   : > { %7008 = vmatprep.subr.bf16.mxu0 %v16139_v49  ;;  %7172 = vmatprep.subr.bf16.mxu1 %v16141_v50  ;;  %v986_v48 = vld [vmem:[%s18420_s27 + $0x12d8] sm:$0xff]  ;;  %v16234_v49 = vcombine.low %v961_v55, %v969_v36  ;;  %v16236_v50 = vcombine.low %v962_v37, %v970_v38  ;;  %v16331_v55 = vcombine.high %v1057_v29, %v1065_v30  ;;  %v1073_v37 = vld [vmem:[%s18420_s27 + $0x1590] sm:$0xff] }
 0x1f4   : > { %v16253_v52 = vcombine.high %v978_v47, %v986_v48  ;;  %v1081_v38 = vld [vmem:[%s18420_s27 + $0x15d0] sm:$0xff] }
 0x1f6   : > { %7009 = vmatpush1.bf16.msra.mxu0 %v16138_v56  ;;  %7173 = vmatpush1.bf16.msra.mxu1 %v16140_v57  ;;  %v994_v56 = vld [vmem:[%s18420_s27 + $0x1318] sm:$0xff] }
 0x1f7   : > { %7010 = vmatprep.subr.bf16.mxu0 %v16155_v58  ;;  %7174 = vmatprep.subr.bf16.mxu1 %v16157_v60  ;;  %v1002_v57 = vld [vmem:[%s18420_s27 + $0x1358] sm:$0xff]  ;;  %v16250_v58 = vcombine.low %v977_v45, %v985_v46  ;;  %v16252_v60 = vcombine.low %v978_v47, %v986_v48  ;;  %v16347_v45 = vcombine.high %v1073_v37, %v1081_v38  ;;  %v1089_v47 = vld [vmem:[%s18420_s27 + $0x1610] sm:$0xff] }
 0x1f8   : > { %v16269_v62 = vcombine.high %v994_v56, %v1002_v57  ;;  %v1097_v48 = vld [vmem:[%s18420_s27 + $0x1650] sm:$0xff] }
 0x1fa   : > { %7011 = vmatpush1.bf16.msra.mxu0 %v16154_v3  ;;  %7175 = vmatpush1.bf16.msra.mxu1 %v16156_v4  ;;  %v1010_v3 = vld [vmem:[%s18420_s27 + $0x1398] sm:$0xff] }
 0x1fb   : > { %7021 = vmatprep.subr.bf16.mxu0 %v16171_v5  ;;  %7185 = vmatprep.subr.bf16.mxu1 %v16173_v6  ;;  %v1018_v4 = vld [vmem:[%s18420_s27 + $0x13d8] sm:$0xff]  ;;  %v16266_v5 = vcombine.low %v993_v54, %v1001_v23  ;;  %v16268_v6 = vcombine.low %v994_v56, %v1002_v57  ;;  %v16363_v54 = vcombine.high %v1089_v47, %v1097_v48  ;;  %v1105_v56 = vld [vmem:[%s18420_s27 + $0x1690] sm:$0xff] }
 0x1fc   : > { %v16285_v8 = vcombine.high %v1010_v3, %v1018_v4  ;;  %v1113_v57 = vld [vmem:[%s18420_s27 + $0x16d0] sm:$0xff] }
 0x1fd   : > { %7013 = vmatmul.mubr.bf16.vlgmr.msra.gmra.mrb[4].mxu0 %v18626_v41  ;;  %7177 = vmatmul.mubr.bf16.vlgmr.msra.gmra.mrb[4].mxu1 %v18626_v41 }
 0x1fe   : > { %7022 = vmatpush1.bf16.msra.mxu0 %v16170_v31  ;;  %7186 = vmatpush1.bf16.msra.mxu1 %v16172_v13  ;;  %v1026_v31 = vld [vmem:[%s18420_s27 + $0x1418] sm:$0xff] }
 0x1ff   : > { %7023 = vmatprep.subr.bf16.mxu0 %v16187_v14  ;;  %7187 = vmatprep.subr.bf16.mxu1 %v16189_v15  ;;  %v1034_v13 = vld [vmem:[%s18420_s27 + $0x1458] sm:$0xff]  ;;  %v16282_v14 = vcombine.low %v1009_v0, %v1017_v1  ;;  %v16284_v15 = vcombine.low %v1010_v3, %v1018_v4  ;;  %v16379_v0 = vcombine.high %v1105_v56, %v1113_v57  ;;  %v1121_v3 = vld [vmem:[%s18420_s27 + $0x1710] sm:$0xff] }
 0x200   : > { %7053 = vmatprep.mubr.bf16.mxu0 %v18632_v51  ;;  %7217 = vmatprep.mubr.bf16.mxu1 %v18632_v51  ;;  %v16301_v17 = vcombine.high %v1026_v31, %v1034_v13  ;;  %v1129_v4 = vld [vmem:[%s18420_s27 + $0x1750] sm:$0xff] }
 0x202   : > { %7024 = vmatpush1.bf16.msra.mxu0 %v16186_v20  ;;  %7188 = vmatpush1.bf16.msra.mxu1 %v16188_v21  ;;  %v1042_v20 = vld [vmem:[%s18420_s27 + $0x1498] sm:$0xff] }
 0x203   : > { %7025 = vmatprep.subr.bf16.mxu0 %v16203_v22  ;;  %7189 = vmatprep.subr.bf16.mxu1 %v16205_v24  ;;  %v1050_v21 = vld [vmem:[%s18420_s27 + $0x14d8] sm:$0xff]  ;;  %v16298_v22 = vcombine.low %v1025_v10, %v1033_v11  ;;  %v16300_v24 = vcombine.low %v1026_v31, %v1034_v13  ;;  %v16395_v10 = vcombine.high %v1121_v3, %v1129_v4  ;;  %v1137_v31 = vld [vmem:[%s18420_s27 + $0x1790] sm:$0xff] }
 0x204   : > { %v16317_v28 = vcombine.high %v1042_v20, %v1050_v21  ;;  %v1145_v13 = vld [vmem:[%s18420_s27 + $0x17d0] sm:$0xff] }
 0x206   : > { %7026 = vmatpush1.bf16.msra.mxu0 %v16202_v32  ;;  %7190 = vmatpush1.bf16.msra.mxu1 %v16204_v33  ;;  %v1058_v32 = vld [vmem:[%s18420_s27 + $0x1518] sm:$0xff] }
 0x207   : > { %7027 = vmatprep.subr.bf16.mxu0 %v16219_v63  ;;  %7191 = vmatprep.subr.bf16.mxu1 %v16221_v35  ;;  %v1066_v33 = vld [vmem:[%s18420_s27 + $0x1558] sm:$0xff]  ;;  %v16314_v63 = vcombine.low %v1041_v18, %v1049_v19  ;;  %v16316_v35 = vcombine.low %v1042_v20, %v1050_v21  ;;  %v16411_v18 = vcombine.high %v1137_v31, %v1145_v13  ;;  %v1153_v20 = vld [vmem:[%s18420_s27 + $0x1810] sm:$0xff] }
 0x208   : > { %v16333_v36 = vcombine.high %v1058_v32, %v1066_v33  ;;  %v1161_v21 = vld [vmem:[%s18420_s27 + $0x1850] sm:$0xff] }
 0x20a   : > { %7028 = vmatpush1.bf16.msra.mxu0 %v16218_v39  ;;  %7192 = vmatpush1.bf16.msra.mxu1 %v16220_v40  ;;  %v1074_v39 = vld [vmem:[%s18420_s27 + $0x1598] sm:$0xff] }
 0x20b   : > { %7029 = vmatprep.subr.bf16.mxu0 %v16235_v42  ;;  %7193 = vmatprep.subr.bf16.mxu1 %v16237_v43  ;;  %v1082_v40 = vld [vmem:[%s18420_s27 + $0x15d8] sm:$0xff]  ;;  %v16330_v42 = vcombine.low %v1057_v29, %v1065_v30  ;;  %v16332_v43 = vcombine.low %v1058_v32, %v1066_v33  ;;  %v16427_v29 = vcombine.high %v1153_v20, %v1161_v21  ;;  %v1169_v32 = vld [vmem:[%s18420_s27 + $0x1890] sm:$0xff] }
 0x20c   : > { %v16349_v46 = vcombine.high %v1074_v39, %v1082_v40  ;;  %v1177_v33 = vld [vmem:[%s18420_s27 + $0x18d0] sm:$0xff] }
 0x20e   : > { %7030 = vmatpush1.bf16.msra.mxu0 %v16234_v49  ;;  %7194 = vmatpush1.bf16.msra.mxu1 %v16236_v50  ;;  %v1090_v49 = vld [vmem:[%s18420_s27 + $0x1618] sm:$0xff] }
 0x20f   : > { %7031 = vmatprep.subr.bf16.mxu0 %v16251_v16  ;;  %7195 = vmatprep.subr.bf16.mxu1 %v16253_v52  ;;  %v1098_v50 = vld [vmem:[%s18420_s27 + $0x1658] sm:$0xff]  ;;  %v16346_v16 = vcombine.low %v1073_v37, %v1081_v38  ;;  %v16348_v52 = vcombine.low %v1074_v39, %v1082_v40  ;;  %v16443_v37 = vcombine.high %v1169_v32, %v1177_v33  ;;  %v1185_v39 = vld [vmem:[%s18420_s27 + $0x1910] sm:$0xff] }
 0x210   : > { %v16365_v23 = vcombine.high %v1090_v49, %v1098_v50  ;;  %v1193_v40 = vld [vmem:[%s18420_s27 + $0x1950] sm:$0xff] }
 0x212   : > { %7032 = vmatpush1.bf16.msra.mxu0 %v16250_v58  ;;  %7196 = vmatpush1.bf16.msra.mxu1 %v16252_v60  ;;  %v1106_v58 = vld [vmem:[%s18420_s27 + $0x1698] sm:$0xff] }
 0x213   : > { %7033 = vmatprep.subr.bf16.mxu0 %v16267_v61  ;;  %7197 = vmatprep.subr.bf16.mxu1 %v16269_v62  ;;  %v1114_v60 = vld [vmem:[%s18420_s27 + $0x16d8] sm:$0xff]  ;;  %v16362_v61 = vcombine.low %v1089_v47, %v1097_v48  ;;  %v16364_v62 = vcombine.low %v1090_v49, %v1098_v50  ;;  %v16459_v47 = vcombine.high %v1185_v39, %v1193_v40  ;;  %v1201_v49 = vld [vmem:[%s18420_s27 + $0x1990] sm:$0xff] }
 0x214   : > { %v16381_v1 = vcombine.high %v1106_v58, %v1114_v60  ;;  %v1209_v50 = vld [vmem:[%s18420_s27 + $0x19d0] sm:$0xff] }
 0x216   : > { %7034 = vmatpush1.bf16.msra.mxu0 %v16266_v5  ;;  %7198 = vmatpush1.bf16.msra.mxu1 %v16268_v6  ;;  %v1122_v5 = vld [vmem:[%s18420_s27 + $0x1718] sm:$0xff] }
 0x217   : > { %7035 = vmatprep.subr.bf16.mxu0 %v16283_v7  ;;  %7199 = vmatprep.subr.bf16.mxu1 %v16285_v8  ;;  %v1130_v6 = vld [vmem:[%s18420_s27 + $0x1758] sm:$0xff]  ;;  %v16378_v7 = vcombine.low %v1105_v56, %v1113_v57  ;;  %v16380_v8 = vcombine.low %v1106_v58, %v1114_v60  ;;  %v16475_v56 = vcombine.high %v1201_v49, %v1209_v50  ;;  %v1217_v58 = vld [vmem:[%s18420_s27 + $0x1a10] sm:$0xff] }
 0x218   : > { %v16397_v11 = vcombine.high %v1122_v5, %v1130_v6  ;;  %v1225_v60 = vld [vmem:[%s18420_s27 + $0x1a50] sm:$0xff] }
 0x21a   : > { %7036 = vmatpush1.bf16.msra.mxu0 %v16282_v14  ;;  %7200 = vmatpush1.bf16.msra.mxu1 %v16284_v15  ;;  %v1138_v14 = vld [vmem:[%s18420_s27 + $0x1798] sm:$0xff] }
 0x21b   : > { %7037 = vmatprep.subr.bf16.mxu0 %v16299_v59  ;;  %7201 = vmatprep.subr.bf16.mxu1 %v16301_v17  ;;  %v1146_v15 = vld [vmem:[%s18420_s27 + $0x17d8] sm:$0xff]  ;;  %v16394_v59 = vcombine.low %v1121_v3, %v1129_v4  ;;  %v16396_v17 = vcombine.low %v1122_v5, %v1130_v6  ;;  %v16491_v3 = vcombine.high %v1217_v58, %v1225_v60  ;;  %v1233_v5 = vld [vmem:[%s18420_s27 + $0x1a90] sm:$0xff] }
 0x21c   : > { %v16413_v19 = vcombine.high %v1138_v14, %v1146_v15  ;;  %v1241_v6 = vld [vmem:[%s18420_s27 + $0x1ad0] sm:$0xff] }
 0x21e   : > { %7038 = vmatpush1.bf16.msra.mxu0 %v16298_v22  ;;  %7202 = vmatpush1.bf16.msra.mxu1 %v16300_v24  ;;  %v1154_v22 = vld [vmem:[%s18420_s27 + $0x1818] sm:$0xff] }
 0x21f   : > { %7039 = vmatprep.subr.bf16.mxu0 %v16315_v27  ;;  %7203 = vmatprep.subr.bf16.mxu1 %v16317_v28  ;;  %v1162_v24 = vld [vmem:[%s18420_s27 + $0x1858] sm:$0xff]  ;;  %v16410_v27 = vcombine.low %v1137_v31, %v1145_v13  ;;  %v16412_v28 = vcombine.low %v1138_v14, %v1146_v15  ;;  %v16507_v31 = vcombine.high %v1233_v5, %v1241_v6  ;;  %v1249_v14 = vld [vmem:[%s18420_s27 + $0x1b10] sm:$0xff] }
 0x220   : > { %v16429_v30 = vcombine.high %v1154_v22, %v1162_v24  ;;  %v1257_v15 = vld [vmem:[%s18420_s27 + $0x1b50] sm:$0xff] }
 0x222   : > { %7040 = vmatpush1.bf16.msra.mxu0 %v16314_v63  ;;  %7204 = vmatpush1.bf16.msra.mxu1 %v16316_v35  ;;  %v1170_v63 = vld [vmem:[%s18420_s27 + $0x1898] sm:$0xff] }
 0x223   : > { %7041 = vmatprep.subr.bf16.mxu0 %v16331_v55  ;;  %7205 = vmatprep.subr.bf16.mxu1 %v16333_v36  ;;  %v1178_v35 = vld [vmem:[%s18420_s27 + $0x18d8] sm:$0xff]  ;;  %v16426_v55 = vcombine.low %v1153_v20, %v1161_v21  ;;  %v16428_v36 = vcombine.low %v1154_v22, %v1162_v24  ;;  %v16523_v20 = vcombine.high %v1249_v14, %v1257_v15  ;;  %v1265_v24 = vld [vmem:[%s18420_s27 + $0x1b90] sm:$0xff] }
 0x224   : > { %v16445_v38 = vcombine.high %v1170_v63, %v1178_v35 }
 0x226   : > { %7042 = vmatpush1.bf16.msra.mxu0 %v16330_v42  ;;  %7206 = vmatpush1.bf16.msra.mxu1 %v16332_v43  ;;  %v1186_v42 = vld [vmem:[%s18420_s27 + $0x1918] sm:$0xff] }
 0x227   : > { %7043 = vmatprep.subr.bf16.mxu0 %v16347_v45  ;;  %7207 = vmatprep.subr.bf16.mxu1 %v16349_v46  ;;  %v1194_v43 = vld [vmem:[%s18420_s27 + $0x1958] sm:$0xff]  ;;  %v16442_v45 = vcombine.low %v1169_v32, %v1177_v33  ;;  %v16444_v46 = vcombine.low %v1170_v63, %v1178_v35  ;;  %v16522_v35 = vcombine.low %v1249_v14, %v1257_v15 }
 0x228   : > { %v16461_v48 = vcombine.high %v1186_v42, %v1194_v43  ;;  %v1274_v32 = vld [vmem:[%s18420_s27 + $0x1bd8] sm:$0xff] }
 0x22a   : > { %7044 = vmatpush1.bf16.msra.mxu0 %v16346_v16  ;;  %7208 = vmatpush1.bf16.msra.mxu1 %v16348_v52  ;;  %v1202_v16 = vld [vmem:[%s18420_s27 + $0x1998] sm:$0xff] }
 0x22b   : > { %7045 = vmatprep.subr.bf16.mxu0 %v16363_v54  ;;  %7209 = vmatprep.subr.bf16.mxu1 %v16365_v23  ;;  %v1210_v52 = vld [vmem:[%s18420_s27 + $0x19d8] sm:$0xff]  ;;  %v16458_v54 = vcombine.low %v1185_v39, %v1193_v40  ;;  %v16460_v23 = vcombine.low %v1186_v42, %v1194_v43  ;;  %v1281_v40 = vld [vmem:[%s18420_s27 + $0x1c10] sm:$0xff] }
 0x22c   : > { %v16477_v57 = vcombine.high %v1202_v16, %v1210_v52  ;;  %v1289_v42 = vld [vmem:[%s18420_s27 + $0x1c50] sm:$0xff] }
 0x22e   : > { %7046 = vmatpush1.bf16.msra.mxu0 %v16362_v61  ;;  %7210 = vmatpush1.bf16.msra.mxu1 %v16364_v62  ;;  %v1218_v61 = vld [vmem:[%s18420_s27 + $0x1a18] sm:$0xff] }
 0x22f   : > { %7047 = vmatprep.subr.bf16.mxu0 %v16379_v0  ;;  %7211 = vmatprep.subr.bf16.mxu1 %v16381_v1  ;;  %v1226_v62 = vld [vmem:[%s18420_s27 + $0x1a58] sm:$0xff]  ;;  %v16474_v0 = vcombine.low %v1201_v49, %v1209_v50  ;;  %v16476_v1 = vcombine.low %v1202_v16, %v1210_v52  ;;  %v16555_v49 = vcombine.high %v1281_v40, %v1289_v42  ;;  %v1297_v16 = vld [vmem:[%s18420_s27 + $0x1c90] sm:$0xff] }
 0x230   : > { %v16493_v4 = vcombine.high %v1218_v61, %v1226_v62  ;;  %v1305_v52 = vld [vmem:[%s18420_s27 + $0x1cd0] sm:$0xff] }
 0x232   : > { %7048 = vmatpush1.bf16.msra.mxu0 %v16378_v7  ;;  %7212 = vmatpush1.bf16.msra.mxu1 %v16380_v8  ;;  %v1234_v7 = vld [vmem:[%s18420_s27 + $0x1a98] sm:$0xff] }
 0x233   : > { %7049 = vmatprep.subr.bf16.mxu0 %v16395_v10  ;;  %7213 = vmatprep.subr.bf16.mxu1 %v16397_v11  ;;  %v1242_v8 = vld [vmem:[%s18420_s27 + $0x1ad8] sm:$0xff]  ;;  %v16490_v10 = vcombine.low %v1217_v58, %v1225_v60  ;;  %v16492_v11 = vcombine.low %v1218_v61, %v1226_v62  ;;  %v16571_v58 = vcombine.high %v1297_v16, %v1305_v52  ;;  %v1313_v61 = vld [vmem:[%s18420_s27 + $0x1d10] sm:$0xff] }
 0x234   : > { %v16509_v13 = vcombine.high %v1234_v7, %v1242_v8  ;;  %v1321_v62 = vld [vmem:[%s18420_s27 + $0x1d50] sm:$0xff] }
 0x236   : > { %7050 = vmatpush1.bf16.msra.mxu0 %v16394_v59  ;;  %7214 = vmatpush1.bf16.msra.mxu1 %v16396_v17  ;;  %v1250_v59 = vld [vmem:[%s18420_s27 + $0x1b18] sm:$0xff] }
 0x237   : > { %7051 = vmatprep.subr.bf16.mxu0 %v16411_v18  ;;  %7215 = vmatprep.subr.bf16.mxu1 %v16413_v19  ;;  %v1258_v17 = vld [vmem:[%s18420_s27 + $0x1b58] sm:$0xff]  ;;  %v16506_v18 = vcombine.low %v1233_v5, %v1241_v6  ;;  %v16508_v19 = vcombine.low %v1234_v7, %v1242_v8  ;;  %v16587_v5 = vcombine.high %v1313_v61, %v1321_v62  ;;  %v1329_v7 = vld [vmem:[%s18420_s27 + $0x1d90] sm:$0xff] }
 0x238   : > { %v16525_v22 = vcombine.high %v1250_v59, %v1258_v17  ;;  %v1337_v8 = vld [vmem:[%s18420_s27 + $0x1dd0] sm:$0xff] }
 0x239   : > { %v16603_v14 = vcombine.high %v1329_v7, %v1337_v8 }
 0x23a   : > { %7052 = vmatpush1.bf16.msra.mxu0 %v16410_v27  ;;  %7216 = vmatpush1.bf16.msra.mxu1 %v16412_v28  ;;  %v1273_v27 = vld [vmem:[%s18420_s27 + $0x1bd0] sm:$0xff] }
 0x23b   : > { %7062 = vmatprep.subr.bf16.mxu0 %v16427_v29  ;;  %7226 = vmatprep.subr.bf16.mxu1 %v16429_v30  ;;  %v1266_v30 = vld [vmem:[%s18420_s27 + $0x1b98] sm:$0xff] }
 0x23c   : > { %v16541_v39 = vcombine.high %v1266_v30, %v1274_v32 }
 0x23d   : > { %7054 = vmatmul.mubr.bf16.vlgmr.msra.gmra.mrb[4].mxu0 %v18707_v2  ;;  %7218 = vmatmul.mubr.bf16.vlgmr.msra.gmra.mrb[4].mxu1 %v18707_v2 }
 0x23e   : > { %7063 = vmatpush1.bf16.msra.mxu0 %v16426_v55  ;;  %7227 = vmatpush1.bf16.msra.mxu1 %v16428_v36 }
 0x23f   : > { %7064 = vmatprep.subr.bf16.mxu0 %v16443_v37  ;;  %7228 = vmatprep.subr.bf16.mxu1 %v16445_v38  ;;  %v16524_v37 = vcombine.low %v1250_v59, %v1258_v17  ;;  %v16539_v38 = vcombine.high %v1265_v24, %v1273_v27  ;;  %v1345_v59 = vld [vmem:[%s18420_s27 + $0x1e10] sm:$0xff] }
 0x240   : > { %7094 = vmatprep.mubr.bf16.mxu0 %v18713_v12  ;;  %7258 = vmatprep.mubr.bf16.mxu1 %v18713_v12  ;;  %v1353_v17 = vld [vmem:[%s18420_s27 + $0x1e50] sm:$0xff] }
 0x242   : > { %7065 = vmatpush1.bf16.msra.mxu0 %v16442_v45  ;;  %7229 = vmatpush1.bf16.msra.mxu1 %v16444_v46  ;;  %v1282_v45 = vld [vmem:[%s18420_s27 + $0x1c18] sm:$0xff] }
 0x243   : > { %7066 = vmatprep.subr.bf16.mxu0 %v16459_v47  ;;  %7230 = vmatprep.subr.bf16.mxu1 %v16461_v48  ;;  %v1290_v46 = vld [vmem:[%s18420_s27 + $0x1c58] sm:$0xff]  ;;  %v16538_v47 = vcombine.low %v1265_v24, %v1273_v27  ;;  %v16540_v48 = vcombine.low %v1266_v30, %v1274_v32  ;;  %v16619_v24 = vcombine.high %v1345_v59, %v1353_v17  ;;  %v1361_v30 = vld [vmem:[%s18420_s27 + $0x1e90] sm:$0xff] }
 0x244   : > { %v16557_v50 = vcombine.high %v1282_v45, %v1290_v46  ;;  %v1369_v32 = vld [vmem:[%s18420_s27 + $0x1ed0] sm:$0xff] }
 0x246   : > { %7067 = vmatpush1.bf16.msra.mxu0 %v16458_v54  ;;  %7231 = vmatpush1.bf16.msra.mxu1 %v16460_v23  ;;  %v1298_v54 = vld [vmem:[%s18420_s27 + $0x1c98] sm:$0xff] }
 0x247   : > { %7068 = vmatprep.subr.bf16.mxu0 %v16475_v56  ;;  %7232 = vmatprep.subr.bf16.mxu1 %v16477_v57  ;;  %v1306_v23 = vld [vmem:[%s18420_s27 + $0x1cd8] sm:$0xff]  ;;  %v16554_v56 = vcombine.low %v1281_v40, %v1289_v42  ;;  %v16556_v57 = vcombine.low %v1282_v45, %v1290_v46  ;;  %v1385_v40 = vld [vmem:[%s18420_s27 + $0x1f50] sm:$0xff]  ;;  %v16634_v45 = vcombine.low %v1361_v30, %v1369_v32 }
 0x248   : > { %v16573_v60 = vcombine.high %v1298_v54, %v1306_v23  ;;  %v1378_v42 = vld [vmem:[%s18420_s27 + $0x1f18] sm:$0xff] }
 0x24a   : > { %7069 = vmatpush1.bf16.msra.mxu0 %v16474_v0  ;;  %7233 = vmatpush1.bf16.msra.mxu1 %v16476_v1  ;;  %v1314_v0 = vld [vmem:[%s18420_s27 + $0x1d18] sm:$0xff] }
 0x24b   : > { %7070 = vmatprep.subr.bf16.mxu0 %v16491_v3  ;;  %7234 = vmatprep.subr.bf16.mxu1 %v16493_v4  ;;  %v1322_v1 = vld [vmem:[%s18420_s27 + $0x1d58] sm:$0xff]  ;;  %v16570_v3 = vcombine.low %v1297_v16, %v1305_v52  ;;  %v16572_v4 = vcombine.low %v1298_v54, %v1306_v23 }
 0x24c   : > { %v16589_v6 = vcombine.high %v1314_v0, %v1322_v1  ;;  %v1394_v16 = vld [vmem:[%s18420_s27 + $0x1f98] sm:$0xff] }
 0x24d   : > { %v1402_v52 = vld [vmem:[%s18420_s27 + $0x1fd8] sm:$0xff] }
 0x24e   : > { %7071 = vmatpush1.bf16.msra.mxu0 %v16490_v10  ;;  %7235 = vmatpush1.bf16.msra.mxu1 %v16492_v11  ;;  %v1330_v10 = vld [vmem:[%s18420_s27 + $0x1d98] sm:$0xff] }
 0x24f   : > { %7072 = vmatprep.subr.bf16.mxu0 %v16507_v31  ;;  %7236 = vmatprep.subr.bf16.mxu1 %v16509_v13  ;;  %v1338_v11 = vld [vmem:[%s18420_s27 + $0x1dd8] sm:$0xff]  ;;  %v16586_v31 = vcombine.low %v1313_v61, %v1321_v62  ;;  %v16588_v13 = vcombine.low %v1314_v0, %v1322_v1  ;;  %v388_v61 = vld [vmem:[%s18420_s27 + $0x28] sm:$0xff]  ;;  %v16668_v1 = vcombine.low %v1394_v16, %v1402_v52 }
 0x250   : > { %v19013_v21 = vpop.f32.mrb[0].mxu0  ;;  %v19017_v28 = vpop.f32.mrb[0].mxu1  ;;  %v16605_v15 = vcombine.high %v1330_v10, %v1338_v11  ;;  %v396_v62 = vld [vmem:[%s18420_s27 + $0x68] sm:$0xff] }
 0x251   : > { %v19019_v29 = vpop.f32.mrb[1].mxu0  ;;  %v19023_v33 = vpop.f32.mrb[1].mxu1 }
 0x252   : > { %v6772_v63 = vpop.f32.mrb[2].mxu0  ;;  %7073 = vmatpush1.bf16.msra.mxu0 %v16506_v18  ;;  %v6936_v55 = vpop.f32.mrb[2].mxu1  ;;  %7237 = vmatpush1.bf16.msra.mxu1 %v16508_v19  ;;  %v1346_v18 = vld [vmem:[%s18420_s27 + $0x1e18] sm:$0xff] }
 0x253   : > { %v6773_v36 = vpop.f32.mrb[3].mxu0  ;;  %7074 = vmatprep.subr.bf16.mxu0 %v16523_v20  ;;  %7238 = vmatprep.subr.bf16.mxu1 %v16525_v22  ;;  %v6937_v43 = vpop.f32.mrb[3].mxu1  ;;  %v1354_v19 = vld [vmem:[%s18420_s27 + $0x1e58] sm:$0xff]  ;;  %v16602_v20 = vcombine.low %v1329_v7, %v1337_v8  ;;  %v16604_v22 = vcombine.low %v1330_v10, %v1338_v11  ;;  %v16618_v55 = vcombine.low %v1345_v59, %v1353_v17  ;;  %v404_v7 = vld [vmem:[%s18420_s27 + $0xa8] sm:$0xff] }
 0x254   : > { %v16621_v27 = vcombine.high %v1346_v18, %v1354_v19  ;;  %v1362_v63 = vld [vmem:[%s18420_s27 + $0x1e98] sm:$0xff]  ;;  %v16620_v36 = vcombine.low %v1346_v18, %v1354_v19  ;;  %v412_v8 = vld [vmem:[%s18420_s27 + $0xe8] sm:$0xff]  ;;  %v15664_v11 = vcombine.low %v388_v61, %v396_v62 }
 0x255   : > { %v1386_v43 = vld [vmem:[%s18420_s27 + $0x1f58] sm:$0xff]  ;;  %v420_v59 = vld [vmem:[%s18420_s27 + $0x128] sm:$0xff]  ;;  %v15680_v19 = vcombine.low %v404_v7, %v412_v8 }
 0x256   : > { %7075 = vmatpush1.bf16.msra.mxu0 %v16522_v35  ;;  %7239 = vmatpush1.bf16.msra.mxu1 %v16524_v37  ;;  %v1370_v35 = vld [vmem:[%s18420_s27 + $0x1ed8] sm:$0xff]  ;;  %v16635_v37 = vcombine.high %v1361_v30, %v1369_v32  ;;  %v16652_v23 = vcombine.low %v1378_v42, %v1386_v43  ;;  %v428_v17 = vld [vmem:[%s18420_s27 + $0x168] sm:$0xff] }
 0x257   : > { %7076 = vmatprep.subr.bf16.mxu0 %v16539_v38  ;;  %7240 = vmatprep.subr.bf16.mxu1 %v16541_v39  ;;  %v16637_v38 = vcombine.high %v1362_v63, %v1370_v35  ;;  %v1377_v39 = vld [vmem:[%s18420_s27 + $0x1f10] sm:$0xff]  ;;  %v16636_v46 = vcombine.low %v1362_v63, %v1370_v35  ;;  %v436_v30 = vld [vmem:[%s18420_s27 + $0x1a8] sm:$0xff]  ;;  %v15696_v35 = vcombine.low %v420_v59, %v428_v17 }
 0x258   : > { %v16650_v54 = vcombine.low %v1377_v39, %v1385_v40  ;;  %v444_v32 = vld [vmem:[%s18420_s27 + $0x1e8] sm:$0xff] }
 0x25a   : > { %7077 = vmatpush1.bf16.msra.mxu0 %v16538_v47  ;;  %7241 = vmatpush1.bf16.msra.mxu1 %v16540_v48  ;;  %v16651_v47 = vcombine.high %v1377_v39, %v1385_v40  ;;  %v16653_v48 = vcombine.high %v1378_v42, %v1386_v43  ;;  %v452_v39 = vld [vmem:[%s18420_s27 + $0x228] sm:$0xff]  ;;  %v15712_v43 = vcombine.low %v436_v30, %v444_v32 }
 0x25b   : > { %7078 = vmatprep.subr.bf16.mxu0 %v16555_v49  ;;  %7242 = vmatprep.subr.bf16.mxu1 %v16557_v50  ;;  %v1393_v49 = vld [vmem:[%s18420_s27 + $0x1f90] sm:$0xff]  ;;  %v460_v40 = vld [vmem:[%s18420_s27 + $0x268] sm:$0xff] }
 0x25c   : > { %v1401_v50 = vld [vmem:[%s18420_s27 + $0x1fd0] sm:$0xff] }
 0x25d   : > { %v16666_v0 = vcombine.low %v1393_v49, %v1401_v50 }
 0x25e   : > { %7079 = vmatpush1.bf16.msra.mxu0 %v16554_v56  ;;  %7243 = vmatpush1.bf16.msra.mxu1 %v16556_v57  ;;  %v16667_v56 = vcombine.high %v1393_v49, %v1401_v50  ;;  %v16669_v57 = vcombine.high %v1394_v16, %v1402_v52  ;;  %v468_v49 = vld [vmem:[%s18420_s27 + $0x2a8] sm:$0xff]  ;;  %v15728_v52 = vcombine.low %v452_v39, %v460_v40 }
 0x25f   : > { %7080 = vmatprep.subr.bf16.mxu0 %v16571_v58  ;;  %7244 = vmatprep.subr.bf16.mxu1 %v16573_v60  ;;  %v387_v58 = vld [vmem:[%s18420_s27 + $0x20] sm:$0xff]  ;;  %v476_v50 = vld [vmem:[%s18420_s27 + $0x2e8] sm:$0xff] }
 0x260   : > { %v395_v60 = vld [vmem:[%s18420_s27 + $0x60] sm:$0xff] }
 0x261   : > { %v15662_v10 = vcombine.low %v387_v58, %v395_v60 }
 0x262   : > { %7081 = vmatpush1.bf16.msra.mxu0 %v16570_v3  ;;  %7245 = vmatpush1.bf16.msra.mxu1 %v16572_v4  ;;  %v15663_v3 = vcombine.high %v387_v58, %v395_v60  ;;  %v15665_v4 = vcombine.high %v388_v61, %v396_v62  ;;  %v484_v58 = vld [vmem:[%s18420_s27 + $0x328] sm:$0xff]  ;;  %v15744_v62 = vcombine.low %v468_v49, %v476_v50 }
 0x263   : > { %7082 = vmatprep.subr.bf16.mxu0 %v16587_v5  ;;  %7246 = vmatprep.subr.bf16.mxu1 %v16589_v6  ;;  %v403_v5 = vld [vmem:[%s18420_s27 + $0xa0] sm:$0xff]  ;;  %v492_v60 = vld [vmem:[%s18420_s27 + $0x368] sm:$0xff] }
 0x264   : > { %v411_v6 = vld [vmem:[%s18420_s27 + $0xe0] sm:$0xff] }
 0x265   : > { %v15678_v18 = vcombine.low %v403_v5, %v411_v6 }
 0x266   : > { %7083 = vmatpush1.bf16.msra.mxu0 %v16586_v31  ;;  %7247 = vmatpush1.bf16.msra.mxu1 %v16588_v13  ;;  %v15679_v31 = vcombine.high %v403_v5, %v411_v6  ;;  %v15681_v13 = vcombine.high %v404_v7, %v412_v8  ;;  %v500_v5 = vld [vmem:[%s18420_s27 + $0x3a8] sm:$0xff]  ;;  %v15760_v8 = vcombine.low %v484_v58, %v492_v60 }
 0x267   : > { %7084 = vmatprep.subr.bf16.mxu0 %v16603_v14  ;;  %7248 = vmatprep.subr.bf16.mxu1 %v16605_v15  ;;  %v419_v14 = vld [vmem:[%s18420_s27 + $0x120] sm:$0xff]  ;;  %v508_v6 = vld [vmem:[%s18420_s27 + $0x3e8] sm:$0xff] }
 0x268   : > { %v427_v15 = vld [vmem:[%s18420_s27 + $0x160] sm:$0xff] }
 0x269   : > { %v15694_v63 = vcombine.low %v419_v14, %v427_v15 }
 0x26a   : > { %7085 = vmatpush1.bf16.msra.mxu0 %v16602_v20  ;;  %7249 = vmatpush1.bf16.msra.mxu1 %v16604_v22  ;;  %v15695_v20 = vcombine.high %v419_v14, %v427_v15  ;;  %v15697_v22 = vcombine.high %v420_v59, %v428_v17  ;;  %v516_v14 = vld [vmem:[%s18420_s27 + $0x428] sm:$0xff]  ;;  %v15776_v17 = vcombine.low %v500_v5, %v508_v6 }
 0x26b   : > { %7086 = vmatprep.subr.bf16.mxu0 %v16619_v24  ;;  %7250 = vmatprep.subr.bf16.mxu1 %v16621_v27  ;;  %v435_v24 = vld [vmem:[%s18420_s27 + $0x1a0] sm:$0xff]  ;;  %v524_v15 = vld [vmem:[%s18420_s27 + $0x468] sm:$0xff] }
 0x26c   : > { %v443_v27 = vld [vmem:[%s18420_s27 + $0x1e0] sm:$0xff] }
 0x26d   : > { %v15710_v42 = vcombine.low %v435_v24, %v443_v27 }
 0x26e   : > { %7087 = vmatpush1.bf16.msra.mxu0 %v16618_v55  ;;  %7251 = vmatpush1.bf16.msra.mxu1 %v16620_v36  ;;  %v15711_v55 = vcombine.high %v435_v24, %v443_v27  ;;  %v15713_v36 = vcombine.high %v436_v30, %v444_v32  ;;  %v532_v24 = vld [vmem:[%s18420_s27 + $0x4a8] sm:$0xff]  ;;  %v15792_v32 = vcombine.low %v516_v14, %v524_v15 }
 0x26f   : > { %7088 = vmatprep.subr.bf16.mxu0 %v16635_v37  ;;  %7252 = vmatprep.subr.bf16.mxu1 %v16637_v38  ;;  %v451_v37 = vld [vmem:[%s18420_s27 + $0x220] sm:$0xff]  ;;  %v540_v27 = vld [vmem:[%s18420_s27 + $0x4e8] sm:$0xff] }
 0x270   : > { %v459_v38 = vld [vmem:[%s18420_s27 + $0x260] sm:$0xff] }
 0x271   : > { %v15726_v16 = vcombine.low %v451_v37, %v459_v38 }
 0x272   : > { %7089 = vmatpush1.bf16.msra.mxu0 %v16634_v45  ;;  %7253 = vmatpush1.bf16.msra.mxu1 %v16636_v46  ;;  %v15727_v45 = vcombine.high %v451_v37, %v459_v38  ;;  %v15729_v46 = vcombine.high %v452_v39, %v460_v40  ;;  %v548_v37 = vld [vmem:[%s18420_s27 + $0x528] sm:$0xff]  ;;  %v15808_v40 = vcombine.low %v532_v24, %v540_v27 }
 0x273   : > { %7090 = vmatprep.subr.bf16.mxu0 %v16651_v47  ;;  %7254 = vmatprep.subr.bf16.mxu1 %v16653_v48  ;;  %v467_v47 = vld [vmem:[%s18420_s27 + $0x2a0] sm:$0xff]  ;;  %v556_v38 = vld [vmem:[%s18420_s27 + $0x568] sm:$0xff] }
 0x274   : > { %v475_v48 = vld [vmem:[%s18420_s27 + $0x2e0] sm:$0xff] }
 0x275   : > { %v15742_v61 = vcombine.low %v467_v47, %v475_v48 }
 0x276   : > { %7091 = vmatpush1.bf16.msra.mxu0 %v16650_v54  ;;  %7255 = vmatpush1.bf16.msra.mxu1 %v16652_v23  ;;  %v15743_v54 = vcombine.high %v467_v47, %v475_v48  ;;  %v15745_v23 = vcombine.high %v468_v49, %v476_v50  ;;  %v564_v47 = vld [vmem:[%s18420_s27 + $0x5a8] sm:$0xff]  ;;  %v15824_v50 = vcombine.low %v548_v37, %v556_v38 }
 0x277   : > { %7092 = vmatprep.subr.bf16.mxu0 %v16667_v56  ;;  %7256 = vmatprep.subr.bf16.mxu1 %v16669_v57  ;;  %v483_v56 = vld [vmem:[%s18420_s27 + $0x320] sm:$0xff]  ;;  %v572_v48 = vld [vmem:[%s18420_s27 + $0x5e8] sm:$0xff] }
 0x278   : > { %v491_v57 = vld [vmem:[%s18420_s27 + $0x360] sm:$0xff] }
 0x279   : > { %v15758_v7 = vcombine.low %v483_v56, %v491_v57 }
 0x27a   : > { %7093 = vmatpush1.bf16.msra.mxu0 %v16666_v0  ;;  %7257 = vmatpush1.bf16.msra.mxu1 %v16668_v1  ;;  %v15759_v0 = vcombine.high %v483_v56, %v491_v57  ;;  %v15761_v1 = vcombine.high %v484_v58, %v492_v60  ;;  %v580_v56 = vld [vmem:[%s18420_s27 + $0x628] sm:$0xff]  ;;  %v15840_v60 = vcombine.low %v564_v47, %v572_v48 }
 0x27b   : > { %7267 = vmatprep.subr.bf16.mxu0 %v15663_v3  ;;  %7431 = vmatprep.subr.bf16.mxu1 %v15665_v4  ;;  %v499_v3 = vld [vmem:[%s18420_s27 + $0x3a0] sm:$0xff]  ;;  %v588_v57 = vld [vmem:[%s18420_s27 + $0x668] sm:$0xff] }
 0x27c   : > { %v507_v4 = vld [vmem:[%s18420_s27 + $0x3e0] sm:$0xff] }
 0x27d   : > { %7095 = vmatmul.mubr.bf16.vlgmr.msra.gmra.mrb[4].mxu0 %v18781_v26  ;;  %7259 = vmatmul.mubr.bf16.vlgmr.msra.gmra.mrb[4].mxu1 %v18781_v26  ;;  %v15774_v59 = vcombine.low %v499_v3, %v507_v4 }
 0x27e   : > { %7268 = vmatpush1.bf16.msra.mxu0 %v15662_v10  ;;  %7432 = vmatpush1.bf16.msra.mxu1 %v15664_v11  ;;  %v15775_v10 = vcombine.high %v499_v3, %v507_v4  ;;  %v15777_v11 = vcombine.high %v500_v5, %v508_v6  ;;  %v596_v3 = vld [vmem:[%s18420_s27 + $0x6a8] sm:$0xff]  ;;  %v15856_v6 = vcombine.low %v580_v56, %v588_v57 }
 0x27f   : > { %7269 = vmatprep.subr.bf16.mxu0 %v15679_v31  ;;  %7433 = vmatprep.subr.bf16.mxu1 %v15681_v13  ;;  %v515_v31 = vld [vmem:[%s18420_s27 + $0x420] sm:$0xff]  ;;  %v604_v4 = vld [vmem:[%s18420_s27 + $0x6e8] sm:$0xff] }
 0x280   : > { %7299 = vmatprep.mubr.bf16.mxu0 %v18492_v9  ;;  %7463 = vmatprep.mubr.bf16.mxu1 %v18492_v9  ;;  %v523_v13 = vld [vmem:[%s18420_s27 + $0x460] sm:$0xff] }
 0x281   : > { %v15790_v30 = vcombine.low %v515_v31, %v523_v13 }
 0x282   : > { %7270 = vmatpush1.bf16.msra.mxu0 %v15678_v18  ;;  %7434 = vmatpush1.bf16.msra.mxu1 %v15680_v19  ;;  %v15791_v18 = vcombine.high %v515_v31, %v523_v13  ;;  %v15793_v19 = vcombine.high %v516_v14, %v524_v15  ;;  %v612_v31 = vld [vmem:[%s18420_s27 + $0x728] sm:$0xff]  ;;  %v15872_v15 = vcombine.low %v596_v3, %v604_v4 }
 0x283   : > { %7271 = vmatprep.subr.bf16.mxu0 %v15695_v20  ;;  %7435 = vmatprep.subr.bf16.mxu1 %v15697_v22  ;;  %v531_v20 = vld [vmem:[%s18420_s27 + $0x4a0] sm:$0xff]  ;;  %v620_v13 = vld [vmem:[%s18420_s27 + $0x768] sm:$0xff] }
 0x284   : > { %v539_v22 = vld [vmem:[%s18420_s27 + $0x4e0] sm:$0xff] }
 0x285   : > { %v15806_v39 = vcombine.low %v531_v20, %v539_v22 }
 0x286   : > { %7272 = vmatpush1.bf16.msra.mxu0 %v15694_v63  ;;  %7436 = vmatpush1.bf16.msra.mxu1 %v15696_v35  ;;  %v15807_v63 = vcombine.high %v531_v20, %v539_v22  ;;  %v15809_v35 = vcombine.high %v532_v24, %v540_v27  ;;  %v628_v20 = vld [vmem:[%s18420_s27 + $0x7a8] sm:$0xff]  ;;  %v15888_v27 = vcombine.low %v612_v31, %v620_v13 }
 0x287   : > { %7273 = vmatprep.subr.bf16.mxu0 %v15711_v55  ;;  %7437 = vmatprep.subr.bf16.mxu1 %v15713_v36  ;;  %v547_v55 = vld [vmem:[%s18420_s27 + $0x520] sm:$0xff]  ;;  %v636_v22 = vld [vmem:[%s18420_s27 + $0x7e8] sm:$0xff] }
 0x288   : > { %v555_v36 = vld [vmem:[%s18420_s27 + $0x560] sm:$0xff] }
 0x289   : > { %v15822_v49 = vcombine.low %v547_v55, %v555_v36 }
 0x28a   : > { %7274 = vmatpush1.bf16.msra.mxu0 %v15710_v42  ;;  %7438 = vmatpush1.bf16.msra.mxu1 %v15712_v43  ;;  %v15823_v42 = vcombine.high %v547_v55, %v555_v36  ;;  %v15825_v43 = vcombine.high %v548_v37, %v556_v38  ;;  %v644_v55 = vld [vmem:[%s18420_s27 + $0x828] sm:$0xff]  ;;  %v15904_v38 = vcombine.low %v628_v20, %v636_v22 }
 0x28b   : > { %7275 = vmatprep.subr.bf16.mxu0 %v15727_v45  ;;  %7439 = vmatprep.subr.bf16.mxu1 %v15729_v46  ;;  %v563_v45 = vld [vmem:[%s18420_s27 + $0x5a0] sm:$0xff]  ;;  %v652_v36 = vld [vmem:[%s18420_s27 + $0x868] sm:$0xff] }
 0x28c   : > { %v571_v46 = vld [vmem:[%s18420_s27 + $0x5e0] sm:$0xff] }
 0x28d   : > { %v15838_v58 = vcombine.low %v563_v45, %v571_v46 }
 0x28e   : > { %7276 = vmatpush1.bf16.msra.mxu0 %v15726_v16  ;;  %7440 = vmatpush1.bf16.msra.mxu1 %v15728_v52  ;;  %v15839_v16 = vcombine.high %v563_v45, %v571_v46  ;;  %v15841_v52 = vcombine.high %v564_v47, %v572_v48  ;;  %v660_v45 = vld [vmem:[%s18420_s27 + $0x8a8] sm:$0xff]  ;;  %v15920_v48 = vcombine.low %v644_v55, %v652_v36 }
 0x28f   : > { %7277 = vmatprep.subr.bf16.mxu0 %v15743_v54  ;;  %7441 = vmatprep.subr.bf16.mxu1 %v15745_v23  ;;  %v579_v54 = vld [vmem:[%s18420_s27 + $0x620] sm:$0xff]  ;;  %v668_v46 = vld [vmem:[%s18420_s27 + $0x8e8] sm:$0xff] }
 0x290   : > { %v587_v23 = vld [vmem:[%s18420_s27 + $0x660] sm:$0xff] }
 0x291   : > { %v15854_v5 = vcombine.low %v579_v54, %v587_v23 }
 0x292   : > { %7278 = vmatpush1.bf16.msra.mxu0 %v15742_v61  ;;  %7442 = vmatpush1.bf16.msra.mxu1 %v15744_v62  ;;  %v15855_v61 = vcombine.high %v579_v54, %v587_v23  ;;  %v15857_v62 = vcombine.high %v580_v56, %v588_v57  ;;  %v676_v54 = vld [vmem:[%s18420_s27 + $0x928] sm:$0xff]  ;;  %v15936_v57 = vcombine.low %v660_v45, %v668_v46 }
 0x293   : > { %7279 = vmatprep.subr.bf16.mxu0 %v15759_v0  ;;  %7443 = vmatprep.subr.bf16.mxu1 %v15761_v1  ;;  %v595_v0 = vld [vmem:[%s18420_s27 + $0x6a0] sm:$0xff]  ;;  %v684_v23 = vld [vmem:[%s18420_s27 + $0x968] sm:$0xff] }
 0x294   : > { %v603_v1 = vld [vmem:[%s18420_s27 + $0x6e0] sm:$0xff] }
 0x295   : > { %v15870_v14 = vcombine.low %v595_v0, %v603_v1 }
 0x296   : > { %7280 = vmatpush1.bf16.msra.mxu0 %v15758_v7  ;;  %7444 = vmatpush1.bf16.msra.mxu1 %v15760_v8  ;;  %v15871_v7 = vcombine.high %v595_v0, %v603_v1  ;;  %v15873_v8 = vcombine.high %v596_v3, %v604_v4  ;;  %v692_v0 = vld [vmem:[%s18420_s27 + $0x9a8] sm:$0xff]  ;;  %v15952_v4 = vcombine.low %v676_v54, %v684_v23 }
 0x297   : > { %7281 = vmatprep.subr.bf16.mxu0 %v15775_v10  ;;  %7445 = vmatprep.subr.bf16.mxu1 %v15777_v11  ;;  %v611_v10 = vld [vmem:[%s18420_s27 + $0x720] sm:$0xff]  ;;  %v700_v1 = vld [vmem:[%s18420_s27 + $0x9e8] sm:$0xff] }
 0x298   : > { %v619_v11 = vld [vmem:[%s18420_s27 + $0x760] sm:$0xff] }
 0x299   : > { %v15886_v24 = vcombine.low %v611_v10, %v619_v11 }
 0x29a   : > { %7282 = vmatpush1.bf16.msra.mxu0 %v15774_v59  ;;  %7446 = vmatpush1.bf16.msra.mxu1 %v15776_v17  ;;  %v15887_v59 = vcombine.high %v611_v10, %v619_v11  ;;  %v15889_v17 = vcombine.high %v612_v31, %v620_v13  ;;  %v708_v10 = vld [vmem:[%s18420_s27 + $0xa28] sm:$0xff]  ;;  %v15968_v13 = vcombine.low %v692_v0, %v700_v1 }
 0x29b   : > { %7283 = vmatprep.subr.bf16.mxu0 %v15791_v18  ;;  %7447 = vmatprep.subr.bf16.mxu1 %v15793_v19  ;;  %v627_v18 = vld [vmem:[%s18420_s27 + $0x7a0] sm:$0xff]  ;;  %v716_v11 = vld [vmem:[%s18420_s27 + $0xa68] sm:$0xff] }
 0x29c   : > { %v635_v19 = vld [vmem:[%s18420_s27 + $0x7e0] sm:$0xff] }
 0x29d   : > { %v15902_v37 = vcombine.low %v627_v18, %v635_v19 }
 0x29e   : > { %7284 = vmatpush1.bf16.msra.mxu0 %v15790_v30  ;;  %7448 = vmatpush1.bf16.msra.mxu1 %v15792_v32  ;;  %v15903_v30 = vcombine.high %v627_v18, %v635_v19  ;;  %v15905_v32 = vcombine.high %v628_v20, %v636_v22  ;;  %v724_v18 = vld [vmem:[%s18420_s27 + $0xaa8] sm:$0xff]  ;;  %v15984_v22 = vcombine.low %v708_v10, %v716_v11 }
 0x29f   : > { %7285 = vmatprep.subr.bf16.mxu0 %v15807_v63  ;;  %7449 = vmatprep.subr.bf16.mxu1 %v15809_v35  ;;  %v643_v63 = vld [vmem:[%s18420_s27 + $0x820] sm:$0xff]  ;;  %v732_v19 = vld [vmem:[%s18420_s27 + $0xae8] sm:$0xff] }
 0x2a0   : > { %v651_v35 = vld [vmem:[%s18420_s27 + $0x860] sm:$0xff] }
 0x2a1   : > { %v15918_v47 = vcombine.low %v643_v63, %v651_v35 }
 0x2a2   : > { %7286 = vmatpush1.bf16.msra.mxu0 %v15806_v39  ;;  %7450 = vmatpush1.bf16.msra.mxu1 %v15808_v40  ;;  %v15919_v39 = vcombine.high %v643_v63, %v651_v35  ;;  %v15921_v40 = vcombine.high %v644_v55, %v652_v36  ;;  %v740_v63 = vld [vmem:[%s18420_s27 + $0xb28] sm:$0xff]  ;;  %v16000_v36 = vcombine.low %v724_v18, %v732_v19 }
 0x2a3   : > { %7287 = vmatprep.subr.bf16.mxu0 %v15823_v42  ;;  %7451 = vmatprep.subr.bf16.mxu1 %v15825_v43  ;;  %v659_v42 = vld [vmem:[%s18420_s27 + $0x8a0] sm:$0xff]  ;;  %v748_v35 = vld [vmem:[%s18420_s27 + $0xb68] sm:$0xff] }
 0x2a4   : > { %v667_v43 = vld [vmem:[%s18420_s27 + $0x8e0] sm:$0xff] }
 0x2a5   : > { %v15934_v56 = vcombine.low %v659_v42, %v667_v43 }
 0x2a6   : > { %7288 = vmatpush1.bf16.msra.mxu0 %v15822_v49  ;;  %7452 = vmatpush1.bf16.msra.mxu1 %v15824_v50  ;;  %v15935_v49 = vcombine.high %v659_v42, %v667_v43  ;;  %v15937_v50 = vcombine.high %v660_v45, %v668_v46  ;;  %v756_v42 = vld [vmem:[%s18420_s27 + $0xba8] sm:$0xff]  ;;  %v16016_v46 = vcombine.low %v740_v63, %v748_v35 }
 0x2a7   : > { %7289 = vmatprep.subr.bf16.mxu0 %v15839_v16  ;;  %7453 = vmatprep.subr.bf16.mxu1 %v15841_v52  ;;  %v675_v16 = vld [vmem:[%s18420_s27 + $0x920] sm:$0xff]  ;;  %v764_v43 = vld [vmem:[%s18420_s27 + $0xbe8] sm:$0xff] }
 0x2a8   : > { %v683_v52 = vld [vmem:[%s18420_s27 + $0x960] sm:$0xff] }
 0x2a9   : > { %v15950_v3 = vcombine.low %v675_v16, %v683_v52 }
 0x2aa   : > { %7290 = vmatpush1.bf16.msra.mxu0 %v15838_v58  ;;  %7454 = vmatpush1.bf16.msra.mxu1 %v15840_v60  ;;  %v15951_v58 = vcombine.high %v675_v16, %v683_v52  ;;  %v15953_v60 = vcombine.high %v676_v54, %v684_v23  ;;  %v772_v16 = vld [vmem:[%s18420_s27 + $0xc28] sm:$0xff]  ;;  %v16032_v23 = vcombine.low %v756_v42, %v764_v43 }
 0x2ab   : > { %7291 = vmatprep.subr.bf16.mxu0 %v15855_v61  ;;  %7455 = vmatprep.subr.bf16.mxu1 %v15857_v62  ;;  %v691_v61 = vld [vmem:[%s18420_s27 + $0x9a0] sm:$0xff]  ;;  %v780_v52 = vld [vmem:[%s18420_s27 + $0xc68] sm:$0xff] }
 0x2ac   : > { %v699_v62 = vld [vmem:[%s18420_s27 + $0x9e0] sm:$0xff] }
 0x2ad   : > { %v15966_v31 = vcombine.low %v691_v61, %v699_v62 }
 0x2ae   : > { %7292 = vmatpush1.bf16.msra.mxu0 %v15854_v5  ;;  %7456 = vmatpush1.bf16.msra.mxu1 %v15856_v6  ;;  %v15967_v5 = vcombine.high %v691_v61, %v699_v62  ;;  %v15969_v6 = vcombine.high %v692_v0, %v700_v1  ;;  %v788_v61 = vld [vmem:[%s18420_s27 + $0xca8] sm:$0xff]  ;;  %v16048_v1 = vcombine.low %v772_v16, %v780_v52 }
 0x2af   : > { %7293 = vmatprep.subr.bf16.mxu0 %v15871_v7  ;;  %7457 = vmatprep.subr.bf16.mxu1 %v15873_v8  ;;  %v707_v7 = vld [vmem:[%s18420_s27 + $0xa20] sm:$0xff]  ;;  %v796_v62 = vld [vmem:[%s18420_s27 + $0xce8] sm:$0xff] }
 0x2b0   : > { %v715_v8 = vld [vmem:[%s18420_s27 + $0xa60] sm:$0xff] }
 0x2b1   : > { %v15982_v20 = vcombine.low %v707_v7, %v715_v8 }
 0x2b2   : > { %7294 = vmatpush1.bf16.msra.mxu0 %v15870_v14  ;;  %7458 = vmatpush1.bf16.msra.mxu1 %v15872_v15  ;;  %v15983_v14 = vcombine.high %v707_v7, %v715_v8  ;;  %v15985_v15 = vcombine.high %v708_v10, %v716_v11  ;;  %v804_v7 = vld [vmem:[%s18420_s27 + $0xd28] sm:$0xff]  ;;  %v16064_v11 = vcombine.low %v788_v61, %v796_v62 }
 0x2b3   : > { %7295 = vmatprep.subr.bf16.mxu0 %v15887_v59  ;;  %7459 = vmatprep.subr.bf16.mxu1 %v15889_v17  ;;  %v723_v59 = vld [vmem:[%s18420_s27 + $0xaa0] sm:$0xff]  ;;  %v812_v8 = vld [vmem:[%s18420_s27 + $0xd68] sm:$0xff] }
 0x2b4   : > { %v731_v17 = vld [vmem:[%s18420_s27 + $0xae0] sm:$0xff] }
 0x2b5   : > { %v15998_v55 = vcombine.low %v723_v59, %v731_v17 }
 0x2b6   : > { %7296 = vmatpush1.bf16.msra.mxu0 %v15886_v24  ;;  %7460 = vmatpush1.bf16.msra.mxu1 %v15888_v27  ;;  %v15999_v24 = vcombine.high %v723_v59, %v731_v17  ;;  %v16001_v27 = vcombine.high %v724_v18, %v732_v19  ;;  %v820_v59 = vld [vmem:[%s18420_s27 + $0xda8] sm:$0xff]  ;;  %v16080_v19 = vcombine.low %v804_v7, %v812_v8 }
 0x2b7   : > { %7297 = vmatprep.subr.bf16.mxu0 %v15903_v30  ;;  %7461 = vmatprep.subr.bf16.mxu1 %v15905_v32  ;;  %v739_v30 = vld [vmem:[%s18420_s27 + $0xb20] sm:$0xff]  ;;  %v828_v17 = vld [vmem:[%s18420_s27 + $0xde8] sm:$0xff] }
 0x2b8   : > { %v747_v32 = vld [vmem:[%s18420_s27 + $0xb60] sm:$0xff] }
 0x2b9   : > { %v16014_v45 = vcombine.low %v739_v30, %v747_v32 }
 0x2ba   : > { %7298 = vmatpush1.bf16.msra.mxu0 %v15902_v37  ;;  %7462 = vmatpush1.bf16.msra.mxu1 %v15904_v38  ;;  %v16015_v37 = vcombine.high %v739_v30, %v747_v32  ;;  %v16017_v38 = vcombine.high %v740_v63, %v748_v35  ;;  %v836_v30 = vld [vmem:[%s18420_s27 + $0xe28] sm:$0xff]  ;;  %v16096_v35 = vcombine.low %v820_v59, %v828_v17 }
 0x2bb   : > { %7308 = vmatprep.subr.bf16.mxu0 %v15919_v39  ;;  %7472 = vmatprep.subr.bf16.mxu1 %v15921_v40  ;;  %v755_v39 = vld [vmem:[%s18420_s27 + $0xba0] sm:$0xff]  ;;  %v844_v32 = vld [vmem:[%s18420_s27 + $0xe68] sm:$0xff] }
 0x2bc   : > { %v763_v40 = vld [vmem:[%s18420_s27 + $0xbe0] sm:$0xff] }
 0x2bd   : > { %7300 = vmatmul.mubr.bf16.vlgmr.msra.gmra.mrb[8].mxu0 %v18541_v25  ;;  %7464 = vmatmul.mubr.bf16.vlgmr.msra.gmra.mrb[8].mxu1 %v18541_v25  ;;  %v16030_v54 = vcombine.low %v755_v39, %v763_v40 }
 0x2be   : > { %7309 = vmatpush1.bf16.msra.mxu0 %v15918_v47  ;;  %7473 = vmatpush1.bf16.msra.mxu1 %v15920_v48  ;;  %v16031_v47 = vcombine.high %v755_v39, %v763_v40  ;;  %v16033_v48 = vcombine.high %v756_v42, %v764_v43  ;;  %v852_v39 = vld [vmem:[%s18420_s27 + $0xea8] sm:$0xff]  ;;  %v16112_v43 = vcombine.low %v836_v30, %v844_v32 }
 0x2bf   : > { %7310 = vmatprep.subr.bf16.mxu0 %v15935_v49  ;;  %7474 = vmatprep.subr.bf16.mxu1 %v15937_v50  ;;  %v771_v49 = vld [vmem:[%s18420_s27 + $0xc20] sm:$0xff]  ;;  %v860_v40 = vld [vmem:[%s18420_s27 + $0xee8] sm:$0xff] }
 0x2c0   : > { %7340 = vmatprep.mubr.bf16.mxu0 %v18547_v34  ;;  %7504 = vmatprep.mubr.bf16.mxu1 %v18547_v34  ;;  %v779_v50 = vld [vmem:[%s18420_s27 + $0xc60] sm:$0xff] }
 0x2c1   : > { %v16046_v0 = vcombine.low %v771_v49, %v779_v50 }
 0x2c2   : > { %7311 = vmatpush1.bf16.msra.mxu0 %v15934_v56  ;;  %7475 = vmatpush1.bf16.msra.mxu1 %v15936_v57  ;;  %v16047_v56 = vcombine.high %v771_v49, %v779_v50  ;;  %v16049_v57 = vcombine.high %v772_v16, %v780_v52  ;;  %v868_v49 = vld [vmem:[%s18420_s27 + $0xf28] sm:$0xff]  ;;  %v16128_v52 = vcombine.low %v852_v39, %v860_v40 }
 0x2c3   : > { %7312 = vmatprep.subr.bf16.mxu0 %v15951_v58  ;;  %7476 = vmatprep.subr.bf16.mxu1 %v15953_v60  ;;  %v787_v58 = vld [vmem:[%s18420_s27 + $0xca0] sm:$0xff]  ;;  %v876_v50 = vld [vmem:[%s18420_s27 + $0xf68] sm:$0xff] }
 0x2c4   : > { %v795_v60 = vld [vmem:[%s18420_s27 + $0xce0] sm:$0xff] }
 0x2c5   : > { %v16062_v10 = vcombine.low %v787_v58, %v795_v60 }
 0x2c6   : > { %7313 = vmatpush1.bf16.msra.mxu0 %v15950_v3  ;;  %7477 = vmatpush1.bf16.msra.mxu1 %v15952_v4  ;;  %v16063_v3 = vcombine.high %v787_v58, %v795_v60  ;;  %v16065_v4 = vcombine.high %v788_v61, %v796_v62  ;;  %v884_v58 = vld [vmem:[%s18420_s27 + $0xfa8] sm:$0xff]  ;;  %v16144_v62 = vcombine.low %v868_v49, %v876_v50 }
 0x2c7   : > { %7314 = vmatprep.subr.bf16.mxu0 %v15967_v5  ;;  %7478 = vmatprep.subr.bf16.mxu1 %v15969_v6  ;;  %v803_v5 = vld [vmem:[%s18420_s27 + $0xd20] sm:$0xff]  ;;  %v892_v60 = vld [vmem:[%s18420_s27 + $0xfe8] sm:$0xff] }
 0x2c8   : > { %v811_v6 = vld [vmem:[%s18420_s27 + $0xd60] sm:$0xff] }
 0x2c9   : > { %v16078_v18 = vcombine.low %v803_v5, %v811_v6 }
 0x2ca   : > { %7315 = vmatpush1.bf16.msra.mxu0 %v15966_v31  ;;  %7479 = vmatpush1.bf16.msra.mxu1 %v15968_v13  ;;  %v16079_v31 = vcombine.high %v803_v5, %v811_v6  ;;  %v16081_v13 = vcombine.high %v804_v7, %v812_v8  ;;  %v900_v5 = vld [vmem:[%s18420_s27 + $0x1028] sm:$0xff]  ;;  %v16160_v8 = vcombine.low %v884_v58, %v892_v60 }
 0x2cb   : > { %7316 = vmatprep.subr.bf16.mxu0 %v15983_v14  ;;  %7480 = vmatprep.subr.bf16.mxu1 %v15985_v15  ;;  %v819_v14 = vld [vmem:[%s18420_s27 + $0xda0] sm:$0xff]  ;;  %v908_v6 = vld [vmem:[%s18420_s27 + $0x1068] sm:$0xff] }
 0x2cc   : > { %v827_v15 = vld [vmem:[%s18420_s27 + $0xde0] sm:$0xff] }
 0x2cd   : > { %v16094_v63 = vcombine.low %v819_v14, %v827_v15 }
 0x2ce   : > { %7317 = vmatpush1.bf16.msra.mxu0 %v15982_v20  ;;  %7481 = vmatpush1.bf16.msra.mxu1 %v15984_v22  ;;  %v16095_v20 = vcombine.high %v819_v14, %v827_v15  ;;  %v16097_v22 = vcombine.high %v820_v59, %v828_v17  ;;  %v916_v14 = vld [vmem:[%s18420_s27 + $0x10a8] sm:$0xff]  ;;  %v16176_v17 = vcombine.low %v900_v5, %v908_v6 }
 0x2cf   : > { %7318 = vmatprep.subr.bf16.mxu0 %v15999_v24  ;;  %7482 = vmatprep.subr.bf16.mxu1 %v16001_v27  ;;  %v835_v24 = vld [vmem:[%s18420_s27 + $0xe20] sm:$0xff]  ;;  %v924_v15 = vld [vmem:[%s18420_s27 + $0x10e8] sm:$0xff] }
 0x2d0   : > { %v843_v27 = vld [vmem:[%s18420_s27 + $0xe60] sm:$0xff] }
 0x2d1   : > { %v16110_v42 = vcombine.low %v835_v24, %v843_v27 }
 0x2d2   : > { %7319 = vmatpush1.bf16.msra.mxu0 %v15998_v55  ;;  %7483 = vmatpush1.bf16.msra.mxu1 %v16000_v36  ;;  %v16111_v55 = vcombine.high %v835_v24, %v843_v27  ;;  %v16113_v36 = vcombine.high %v836_v30, %v844_v32  ;;  %v932_v24 = vld [vmem:[%s18420_s27 + $0x1128] sm:$0xff]  ;;  %v16192_v32 = vcombine.low %v916_v14, %v924_v15 }
 0x2d3   : > { %7320 = vmatprep.subr.bf16.mxu0 %v16015_v37  ;;  %7484 = vmatprep.subr.bf16.mxu1 %v16017_v38  ;;  %v851_v37 = vld [vmem:[%s18420_s27 + $0xea0] sm:$0xff]  ;;  %v940_v27 = vld [vmem:[%s18420_s27 + $0x1168] sm:$0xff] }
 0x2d4   : > { %v859_v38 = vld [vmem:[%s18420_s27 + $0xee0] sm:$0xff] }
 0x2d5   : > { %v16126_v16 = vcombine.low %v851_v37, %v859_v38 }
 0x2d6   : > { %7321 = vmatpush1.bf16.msra.mxu0 %v16014_v45  ;;  %7485 = vmatpush1.bf16.msra.mxu1 %v16016_v46  ;;  %v16127_v45 = vcombine.high %v851_v37, %v859_v38  ;;  %v16129_v46 = vcombine.high %v852_v39, %v860_v40  ;;  %v948_v37 = vld [vmem:[%s18420_s27 + $0x11a8] sm:$0xff]  ;;  %v16208_v40 = vcombine.low %v932_v24, %v940_v27 }
 0x2d7   : > { %7322 = vmatprep.subr.bf16.mxu0 %v16031_v47  ;;  %7486 = vmatprep.subr.bf16.mxu1 %v16033_v48  ;;  %v867_v47 = vld [vmem:[%s18420_s27 + $0xf20] sm:$0xff]  ;;  %v956_v38 = vld [vmem:[%s18420_s27 + $0x11e8] sm:$0xff] }
 0x2d8   : > { %v875_v48 = vld [vmem:[%s18420_s27 + $0xf60] sm:$0xff] }
 0x2d9   : > { %v16142_v61 = vcombine.low %v867_v47, %v875_v48 }
 0x2da   : > { %7323 = vmatpush1.bf16.msra.mxu0 %v16030_v54  ;;  %7487 = vmatpush1.bf16.msra.mxu1 %v16032_v23  ;;  %v16143_v54 = vcombine.high %v867_v47, %v875_v48  ;;  %v16145_v23 = vcombine.high %v868_v49, %v876_v50  ;;  %v964_v47 = vld [vmem:[%s18420_s27 + $0x1228] sm:$0xff]  ;;  %v16224_v50 = vcombine.low %v948_v37, %v956_v38 }
 0x2db   : > { %7324 = vmatprep.subr.bf16.mxu0 %v16047_v56  ;;  %7488 = vmatprep.subr.bf16.mxu1 %v16049_v57  ;;  %v883_v56 = vld [vmem:[%s18420_s27 + $0xfa0] sm:$0xff]  ;;  %v972_v48 = vld [vmem:[%s18420_s27 + $0x1268] sm:$0xff] }
 0x2dc   : > { %v891_v57 = vld [vmem:[%s18420_s27 + $0xfe0] sm:$0xff] }
 0x2dd   : > { %v16158_v7 = vcombine.low %v883_v56, %v891_v57 }
 0x2de   : > { %7325 = vmatpush1.bf16.msra.mxu0 %v16046_v0  ;;  %7489 = vmatpush1.bf16.msra.mxu1 %v16048_v1  ;;  %v16159_v0 = vcombine.high %v883_v56, %v891_v57  ;;  %v16161_v1 = vcombine.high %v884_v58, %v892_v60  ;;  %v980_v56 = vld [vmem:[%s18420_s27 + $0x12a8] sm:$0xff]  ;;  %v16240_v60 = vcombine.low %v964_v47, %v972_v48 }
 0x2df   : > { %7326 = vmatprep.subr.bf16.mxu0 %v16063_v3  ;;  %7490 = vmatprep.subr.bf16.mxu1 %v16065_v4  ;;  %v899_v3 = vld [vmem:[%s18420_s27 + $0x1020] sm:$0xff]  ;;  %v988_v57 = vld [vmem:[%s18420_s27 + $0x12e8] sm:$0xff] }
 0x2e0   : > { %v907_v4 = vld [vmem:[%s18420_s27 + $0x1060] sm:$0xff] }
 0x2e1   : > { %v16174_v59 = vcombine.low %v899_v3, %v907_v4 }
 0x2e2   : > { %7327 = vmatpush1.bf16.msra.mxu0 %v16062_v10  ;;  %7491 = vmatpush1.bf16.msra.mxu1 %v16064_v11  ;;  %v16175_v10 = vcombine.high %v899_v3, %v907_v4  ;;  %v16177_v11 = vcombine.high %v900_v5, %v908_v6  ;;  %v996_v3 = vld [vmem:[%s18420_s27 + $0x1328] sm:$0xff]  ;;  %v16256_v6 = vcombine.low %v980_v56, %v988_v57 }
 0x2e3   : > { %7328 = vmatprep.subr.bf16.mxu0 %v16079_v31  ;;  %7492 = vmatprep.subr.bf16.mxu1 %v16081_v13  ;;  %v915_v31 = vld [vmem:[%s18420_s27 + $0x10a0] sm:$0xff]  ;;  %v1004_v4 = vld [vmem:[%s18420_s27 + $0x1368] sm:$0xff] }
 0x2e4   : > { %v923_v13 = vld [vmem:[%s18420_s27 + $0x10e0] sm:$0xff] }
 0x2e5   : > { %v16190_v30 = vcombine.low %v915_v31, %v923_v13 }
 0x2e6   : > { %7329 = vmatpush1.bf16.msra.mxu0 %v16078_v18  ;;  %7493 = vmatpush1.bf16.msra.mxu1 %v16080_v19  ;;  %v16191_v18 = vcombine.high %v915_v31, %v923_v13  ;;  %v16193_v19 = vcombine.high %v916_v14, %v924_v15  ;;  %v1012_v31 = vld [vmem:[%s18420_s27 + $0x13a8] sm:$0xff]  ;;  %v16272_v15 = vcombine.low %v996_v3, %v1004_v4 }
 0x2e7   : > { %7330 = vmatprep.subr.bf16.mxu0 %v16095_v20  ;;  %7494 = vmatprep.subr.bf16.mxu1 %v16097_v22  ;;  %v931_v20 = vld [vmem:[%s18420_s27 + $0x1120] sm:$0xff]  ;;  %v1020_v13 = vld [vmem:[%s18420_s27 + $0x13e8] sm:$0xff] }
 0x2e8   : > { %v939_v22 = vld [vmem:[%s18420_s27 + $0x1160] sm:$0xff] }
 0x2e9   : > { %v16206_v39 = vcombine.low %v931_v20, %v939_v22 }
 0x2ea   : > { %7331 = vmatpush1.bf16.msra.mxu0 %v16094_v63  ;;  %7495 = vmatpush1.bf16.msra.mxu1 %v16096_v35  ;;  %v16207_v63 = vcombine.high %v931_v20, %v939_v22  ;;  %v16209_v35 = vcombine.high %v932_v24, %v940_v27  ;;  %v1028_v20 = vld [vmem:[%s18420_s27 + $0x1428] sm:$0xff]  ;;  %v16288_v27 = vcombine.low %v1012_v31, %v1020_v13 }
 0x2eb   : > { %7332 = vmatprep.subr.bf16.mxu0 %v16111_v55  ;;  %7496 = vmatprep.subr.bf16.mxu1 %v16113_v36  ;;  %v947_v55 = vld [vmem:[%s18420_s27 + $0x11a0] sm:$0xff]  ;;  %v1036_v22 = vld [vmem:[%s18420_s27 + $0x1468] sm:$0xff] }
 0x2ec   : > { %v955_v36 = vld [vmem:[%s18420_s27 + $0x11e0] sm:$0xff] }
 0x2ed   : > { %v16222_v49 = vcombine.low %v947_v55, %v955_v36 }
 0x2ee   : > { %7333 = vmatpush1.bf16.msra.mxu0 %v16110_v42  ;;  %7497 = vmatpush1.bf16.msra.mxu1 %v16112_v43  ;;  %v16223_v42 = vcombine.high %v947_v55, %v955_v36  ;;  %v16225_v43 = vcombine.high %v948_v37, %v956_v38  ;;  %v1044_v55 = vld [vmem:[%s18420_s27 + $0x14a8] sm:$0xff]  ;;  %v16304_v38 = vcombine.low %v1028_v20, %v1036_v22 }
 0x2ef   : > { %7334 = vmatprep.subr.bf16.mxu0 %v16127_v45  ;;  %7498 = vmatprep.subr.bf16.mxu1 %v16129_v46  ;;  %v963_v45 = vld [vmem:[%s18420_s27 + $0x1220] sm:$0xff]  ;;  %v1052_v36 = vld [vmem:[%s18420_s27 + $0x14e8] sm:$0xff] }
 0x2f0   : > { %v971_v46 = vld [vmem:[%s18420_s27 + $0x1260] sm:$0xff] }
 0x2f1   : > { %v16238_v58 = vcombine.low %v963_v45, %v971_v46 }
 0x2f2   : > { %7335 = vmatpush1.bf16.msra.mxu0 %v16126_v16  ;;  %7499 = vmatpush1.bf16.msra.mxu1 %v16128_v52  ;;  %v16239_v16 = vcombine.high %v963_v45, %v971_v46  ;;  %v16241_v52 = vcombine.high %v964_v47, %v972_v48  ;;  %v1060_v45 = vld [vmem:[%s18420_s27 + $0x1528] sm:$0xff]  ;;  %v16320_v48 = vcombine.low %v1044_v55, %v1052_v36 }
 0x2f3   : > { %7336 = vmatprep.subr.bf16.mxu0 %v16143_v54  ;;  %7500 = vmatprep.subr.bf16.mxu1 %v16145_v23  ;;  %v979_v54 = vld [vmem:[%s18420_s27 + $0x12a0] sm:$0xff]  ;;  %v1068_v46 = vld [vmem:[%s18420_s27 + $0x1568] sm:$0xff] }
 0x2f4   : > { %v987_v23 = vld [vmem:[%s18420_s27 + $0x12e0] sm:$0xff] }
 0x2f5   : > { %v16254_v5 = vcombine.low %v979_v54, %v987_v23 }
 0x2f6   : > { %7337 = vmatpush1.bf16.msra.mxu0 %v16142_v61  ;;  %7501 = vmatpush1.bf16.msra.mxu1 %v16144_v62  ;;  %v16255_v61 = vcombine.high %v979_v54, %v987_v23  ;;  %v16257_v62 = vcombine.high %v980_v56, %v988_v57  ;;  %v1076_v54 = vld [vmem:[%s18420_s27 + $0x15a8] sm:$0xff]  ;;  %v16336_v57 = vcombine.low %v1060_v45, %v1068_v46 }
 0x2f7   : > { %7338 = vmatprep.subr.bf16.mxu0 %v16159_v0  ;;  %7502 = vmatprep.subr.bf16.mxu1 %v16161_v1  ;;  %v995_v0 = vld [vmem:[%s18420_s27 + $0x1320] sm:$0xff]  ;;  %v1084_v23 = vld [vmem:[%s18420_s27 + $0x15e8] sm:$0xff] }
 0x2f8   : > { %v1003_v1 = vld [vmem:[%s18420_s27 + $0x1360] sm:$0xff] }
 0x2f9   : > { %v16270_v14 = vcombine.low %v995_v0, %v1003_v1 }
 0x2fa   : > { %7339 = vmatpush1.bf16.msra.mxu0 %v16158_v7  ;;  %7503 = vmatpush1.bf16.msra.mxu1 %v16160_v8  ;;  %v16271_v7 = vcombine.high %v995_v0, %v1003_v1  ;;  %v16273_v8 = vcombine.high %v996_v3, %v1004_v4  ;;  %v1092_v0 = vld [vmem:[%s18420_s27 + $0x1628] sm:$0xff]  ;;  %v16352_v4 = vcombine.low %v1076_v54, %v1084_v23 }
 0x2fb   : > { %7349 = vmatprep.subr.bf16.mxu0 %v16175_v10  ;;  %7513 = vmatprep.subr.bf16.mxu1 %v16177_v11  ;;  %v1011_v10 = vld [vmem:[%s18420_s27 + $0x13a0] sm:$0xff]  ;;  %v1100_v1 = vld [vmem:[%s18420_s27 + $0x1668] sm:$0xff] }
 0x2fc   : > { %v1019_v11 = vld [vmem:[%s18420_s27 + $0x13e0] sm:$0xff] }
 0x2fd   : > { %7341 = vmatmul.mubr.bf16.vlgmr.msra.gmra.mrb[8].mxu0 %v18626_v41  ;;  %7505 = vmatmul.mubr.bf16.vlgmr.msra.gmra.mrb[8].mxu1 %v18626_v41  ;;  %v16286_v24 = vcombine.low %v1011_v10, %v1019_v11 }
 0x2fe   : > { %7350 = vmatpush1.bf16.msra.mxu0 %v16174_v59  ;;  %7514 = vmatpush1.bf16.msra.mxu1 %v16176_v17  ;;  %v16287_v59 = vcombine.high %v1011_v10, %v1019_v11  ;;  %v16289_v17 = vcombine.high %v1012_v31, %v1020_v13  ;;  %v1108_v10 = vld [vmem:[%s18420_s27 + $0x16a8] sm:$0xff]  ;;  %v16368_v13 = vcombine.low %v1092_v0, %v1100_v1 }
 0x2ff   : > { %7351 = vmatprep.subr.bf16.mxu0 %v16191_v18  ;;  %7515 = vmatprep.subr.bf16.mxu1 %v16193_v19  ;;  %v1027_v18 = vld [vmem:[%s18420_s27 + $0x1420] sm:$0xff]  ;;  %v1116_v11 = vld [vmem:[%s18420_s27 + $0x16e8] sm:$0xff] }
 0x300   : > { %7381 = vmatprep.mubr.bf16.mxu0 %v18632_v51  ;;  %7545 = vmatprep.mubr.bf16.mxu1 %v18632_v51  ;;  %v1035_v19 = vld [vmem:[%s18420_s27 + $0x1460] sm:$0xff] }
 0x301   : > { %v16302_v37 = vcombine.low %v1027_v18, %v1035_v19 }
 0x302   : > { %7352 = vmatpush1.bf16.msra.mxu0 %v16190_v30  ;;  %7516 = vmatpush1.bf16.msra.mxu1 %v16192_v32  ;;  %v16303_v30 = vcombine.high %v1027_v18, %v1035_v19  ;;  %v16305_v32 = vcombine.high %v1028_v20, %v1036_v22  ;;  %v1124_v18 = vld [vmem:[%s18420_s27 + $0x1728] sm:$0xff]  ;;  %v16384_v22 = vcombine.low %v1108_v10, %v1116_v11 }
 0x303   : > { %7353 = vmatprep.subr.bf16.mxu0 %v16207_v63  ;;  %7517 = vmatprep.subr.bf16.mxu1 %v16209_v35  ;;  %v1043_v63 = vld [vmem:[%s18420_s27 + $0x14a0] sm:$0xff]  ;;  %v1132_v19 = vld [vmem:[%s18420_s27 + $0x1768] sm:$0xff] }
 0x304   : > { %v1051_v35 = vld [vmem:[%s18420_s27 + $0x14e0] sm:$0xff] }
 0x305   : > { %v16318_v47 = vcombine.low %v1043_v63, %v1051_v35 }
 0x306   : > { %7354 = vmatpush1.bf16.msra.mxu0 %v16206_v39  ;;  %7518 = vmatpush1.bf16.msra.mxu1 %v16208_v40  ;;  %v16319_v39 = vcombine.high %v1043_v63, %v1051_v35  ;;  %v16321_v40 = vcombine.high %v1044_v55, %v1052_v36  ;;  %v1140_v63 = vld [vmem:[%s18420_s27 + $0x17a8] sm:$0xff]  ;;  %v16400_v36 = vcombine.low %v1124_v18, %v1132_v19 }
 0x307   : > { %7355 = vmatprep.subr.bf16.mxu0 %v16223_v42  ;;  %7519 = vmatprep.subr.bf16.mxu1 %v16225_v43  ;;  %v1059_v42 = vld [vmem:[%s18420_s27 + $0x1520] sm:$0xff]  ;;  %v1148_v35 = vld [vmem:[%s18420_s27 + $0x17e8] sm:$0xff] }
 0x308   : > { %v1067_v43 = vld [vmem:[%s18420_s27 + $0x1560] sm:$0xff] }
 0x309   : > { %v16334_v56 = vcombine.low %v1059_v42, %v1067_v43 }
 0x30a   : > { %7356 = vmatpush1.bf16.msra.mxu0 %v16222_v49  ;;  %7520 = vmatpush1.bf16.msra.mxu1 %v16224_v50  ;;  %v16335_v49 = vcombine.high %v1059_v42, %v1067_v43  ;;  %v16337_v50 = vcombine.high %v1060_v45, %v1068_v46  ;;  %v1156_v42 = vld [vmem:[%s18420_s27 + $0x1828] sm:$0xff]  ;;  %v16416_v46 = vcombine.low %v1140_v63, %v1148_v35 }
 0x30b   : > { %7357 = vmatprep.subr.bf16.mxu0 %v16239_v16  ;;  %7521 = vmatprep.subr.bf16.mxu1 %v16241_v52  ;;  %v1075_v16 = vld [vmem:[%s18420_s27 + $0x15a0] sm:$0xff]  ;;  %v1164_v43 = vld [vmem:[%s18420_s27 + $0x1868] sm:$0xff] }
 0x30c   : > { %v1083_v52 = vld [vmem:[%s18420_s27 + $0x15e0] sm:$0xff] }
 0x30d   : > { %v16350_v3 = vcombine.low %v1075_v16, %v1083_v52 }
 0x30e   : > { %7358 = vmatpush1.bf16.msra.mxu0 %v16238_v58  ;;  %7522 = vmatpush1.bf16.msra.mxu1 %v16240_v60  ;;  %v16351_v58 = vcombine.high %v1075_v16, %v1083_v52  ;;  %v16353_v60 = vcombine.high %v1076_v54, %v1084_v23  ;;  %v1172_v16 = vld [vmem:[%s18420_s27 + $0x18a8] sm:$0xff]  ;;  %v16432_v23 = vcombine.low %v1156_v42, %v1164_v43 }
 0x30f   : > { %7359 = vmatprep.subr.bf16.mxu0 %v16255_v61  ;;  %7523 = vmatprep.subr.bf16.mxu1 %v16257_v62  ;;  %v1091_v61 = vld [vmem:[%s18420_s27 + $0x1620] sm:$0xff]  ;;  %v1180_v52 = vld [vmem:[%s18420_s27 + $0x18e8] sm:$0xff] }
 0x310   : > { %v1099_v62 = vld [vmem:[%s18420_s27 + $0x1660] sm:$0xff] }
 0x311   : > { %v16366_v31 = vcombine.low %v1091_v61, %v1099_v62 }
 0x312   : > { %7360 = vmatpush1.bf16.msra.mxu0 %v16254_v5  ;;  %7524 = vmatpush1.bf16.msra.mxu1 %v16256_v6  ;;  %v16367_v5 = vcombine.high %v1091_v61, %v1099_v62  ;;  %v16369_v6 = vcombine.high %v1092_v0, %v1100_v1  ;;  %v1188_v61 = vld [vmem:[%s18420_s27 + $0x1928] sm:$0xff]  ;;  %v16448_v1 = vcombine.low %v1172_v16, %v1180_v52 }
 0x313   : > { %7361 = vmatprep.subr.bf16.mxu0 %v16271_v7  ;;  %7525 = vmatprep.subr.bf16.mxu1 %v16273_v8  ;;  %v1107_v7 = vld [vmem:[%s18420_s27 + $0x16a0] sm:$0xff]  ;;  %v1196_v62 = vld [vmem:[%s18420_s27 + $0x1968] sm:$0xff] }
 0x314   : > { %v1115_v8 = vld [vmem:[%s18420_s27 + $0x16e0] sm:$0xff] }
 0x315   : > { %v16382_v20 = vcombine.low %v1107_v7, %v1115_v8 }
 0x316   : > { %7362 = vmatpush1.bf16.msra.mxu0 %v16270_v14  ;;  %7526 = vmatpush1.bf16.msra.mxu1 %v16272_v15  ;;  %v16383_v14 = vcombine.high %v1107_v7, %v1115_v8  ;;  %v16385_v15 = vcombine.high %v1108_v10, %v1116_v11  ;;  %v1204_v7 = vld [vmem:[%s18420_s27 + $0x19a8] sm:$0xff]  ;;  %v16464_v11 = vcombine.low %v1188_v61, %v1196_v62 }
 0x317   : > { %7363 = vmatprep.subr.bf16.mxu0 %v16287_v59  ;;  %7527 = vmatprep.subr.bf16.mxu1 %v16289_v17  ;;  %v1123_v59 = vld [vmem:[%s18420_s27 + $0x1720] sm:$0xff]  ;;  %v1212_v8 = vld [vmem:[%s18420_s27 + $0x19e8] sm:$0xff] }
 0x318   : > { %v1131_v17 = vld [vmem:[%s18420_s27 + $0x1760] sm:$0xff] }
 0x319   : > { %v16398_v55 = vcombine.low %v1123_v59, %v1131_v17 }
 0x31a   : > { %7364 = vmatpush1.bf16.msra.mxu0 %v16286_v24  ;;  %7528 = vmatpush1.bf16.msra.mxu1 %v16288_v27  ;;  %v16399_v24 = vcombine.high %v1123_v59, %v1131_v17  ;;  %v16401_v27 = vcombine.high %v1124_v18, %v1132_v19  ;;  %v1220_v59 = vld [vmem:[%s18420_s27 + $0x1a28] sm:$0xff]  ;;  %v16480_v19 = vcombine.low %v1204_v7, %v1212_v8 }
 0x31b   : > { %7365 = vmatprep.subr.bf16.mxu0 %v16303_v30  ;;  %7529 = vmatprep.subr.bf16.mxu1 %v16305_v32  ;;  %v1139_v30 = vld [vmem:[%s18420_s27 + $0x17a0] sm:$0xff]  ;;  %v1228_v17 = vld [vmem:[%s18420_s27 + $0x1a68] sm:$0xff] }
 0x31c   : > { %v1147_v32 = vld [vmem:[%s18420_s27 + $0x17e0] sm:$0xff] }
 0x31d   : > { %v16414_v45 = vcombine.low %v1139_v30, %v1147_v32 }
 0x31e   : > { %7366 = vmatpush1.bf16.msra.mxu0 %v16302_v37  ;;  %7530 = vmatpush1.bf16.msra.mxu1 %v16304_v38  ;;  %v16415_v37 = vcombine.high %v1139_v30, %v1147_v32  ;;  %v16417_v38 = vcombine.high %v1140_v63, %v1148_v35  ;;  %v1236_v30 = vld [vmem:[%s18420_s27 + $0x1aa8] sm:$0xff]  ;;  %v16496_v35 = vcombine.low %v1220_v59, %v1228_v17 }
 0x31f   : > { %7367 = vmatprep.subr.bf16.mxu0 %v16319_v39  ;;  %7531 = vmatprep.subr.bf16.mxu1 %v16321_v40  ;;  %v1155_v39 = vld [vmem:[%s18420_s27 + $0x1820] sm:$0xff]  ;;  %v1244_v32 = vld [vmem:[%s18420_s27 + $0x1ae8] sm:$0xff] }
 0x320   : > { %v1163_v40 = vld [vmem:[%s18420_s27 + $0x1860] sm:$0xff] }
 0x321   : > { %v16430_v54 = vcombine.low %v1155_v39, %v1163_v40 }
 0x322   : > { %7368 = vmatpush1.bf16.msra.mxu0 %v16318_v47  ;;  %7532 = vmatpush1.bf16.msra.mxu1 %v16320_v48  ;;  %v16431_v47 = vcombine.high %v1155_v39, %v1163_v40  ;;  %v16433_v48 = vcombine.high %v1156_v42, %v1164_v43  ;;  %v1252_v39 = vld [vmem:[%s18420_s27 + $0x1b28] sm:$0xff]  ;;  %v16512_v43 = vcombine.low %v1236_v30, %v1244_v32 }
 0x323   : > { %7369 = vmatprep.subr.bf16.mxu0 %v16335_v49  ;;  %7533 = vmatprep.subr.bf16.mxu1 %v16337_v50  ;;  %v1171_v49 = vld [vmem:[%s18420_s27 + $0x18a0] sm:$0xff]  ;;  %v1260_v40 = vld [vmem:[%s18420_s27 + $0x1b68] sm:$0xff] }
 0x324   : > { %v1179_v50 = vld [vmem:[%s18420_s27 + $0x18e0] sm:$0xff] }
 0x325   : > { %v16446_v0 = vcombine.low %v1171_v49, %v1179_v50 }
 0x326   : > { %7370 = vmatpush1.bf16.msra.mxu0 %v16334_v56  ;;  %7534 = vmatpush1.bf16.msra.mxu1 %v16336_v57  ;;  %v16447_v56 = vcombine.high %v1171_v49, %v1179_v50  ;;  %v16449_v57 = vcombine.high %v1172_v16, %v1180_v52  ;;  %v1275_v49 = vld [vmem:[%s18420_s27 + $0x1be0] sm:$0xff]  ;;  %v1268_v52 = vld [vmem:[%s18420_s27 + $0x1ba8] sm:$0xff] }
 0x327   : > { %7371 = vmatprep.subr.bf16.mxu0 %v16351_v58  ;;  %7535 = vmatprep.subr.bf16.mxu1 %v16353_v60  ;;  %v1187_v58 = vld [vmem:[%s18420_s27 + $0x1920] sm:$0xff] }
 0x328   : > { %v1195_v60 = vld [vmem:[%s18420_s27 + $0x1960] sm:$0xff] }
 0x329   : > { %v16462_v10 = vcombine.low %v1187_v58, %v1195_v60 }
 0x32a   : > { %7372 = vmatpush1.bf16.msra.mxu0 %v16350_v3  ;;  %7536 = vmatpush1.bf16.msra.mxu1 %v16352_v4  ;;  %v16463_v3 = vcombine.high %v1187_v58, %v1195_v60  ;;  %v16465_v4 = vcombine.high %v1188_v61, %v1196_v62  ;;  %v16528_v61 = vcombine.low %v1252_v39, %v1260_v40 }
 0x32b   : > { %7373 = vmatprep.subr.bf16.mxu0 %v16367_v5  ;;  %7537 = vmatprep.subr.bf16.mxu1 %v16369_v6  ;;  %v1203_v5 = vld [vmem:[%s18420_s27 + $0x19a0] sm:$0xff] }
 0x32c   : > { %v1211_v6 = vld [vmem:[%s18420_s27 + $0x19e0] sm:$0xff] }
 0x32d   : > { %v16478_v18 = vcombine.low %v1203_v5, %v1211_v6 }
 0x32e   : > { %7374 = vmatpush1.bf16.msra.mxu0 %v16366_v31  ;;  %7538 = vmatpush1.bf16.msra.mxu1 %v16368_v13  ;;  %v16479_v31 = vcombine.high %v1203_v5, %v1211_v6  ;;  %v16481_v13 = vcombine.high %v1204_v7, %v1212_v8  ;;  %v1284_v5 = vld [vmem:[%s18420_s27 + $0x1c28] sm:$0xff] }
 0x32f   : > { %7375 = vmatprep.subr.bf16.mxu0 %v16383_v14  ;;  %7539 = vmatprep.subr.bf16.mxu1 %v16385_v15  ;;  %v1219_v14 = vld [vmem:[%s18420_s27 + $0x1a20] sm:$0xff]  ;;  %v1292_v6 = vld [vmem:[%s18420_s27 + $0x1c68] sm:$0xff] }
 0x330   : > { %v1227_v15 = vld [vmem:[%s18420_s27 + $0x1a60] sm:$0xff] }
 0x331   : > { %v16494_v63 = vcombine.low %v1219_v14, %v1227_v15 }
 0x332   : > { %7376 = vmatpush1.bf16.msra.mxu0 %v16382_v20  ;;  %7540 = vmatpush1.bf16.msra.mxu1 %v16384_v22  ;;  %v16495_v20 = vcombine.high %v1219_v14, %v1227_v15  ;;  %v16497_v22 = vcombine.high %v1220_v59, %v1228_v17  ;;  %v1300_v14 = vld [vmem:[%s18420_s27 + $0x1ca8] sm:$0xff]  ;;  %v16560_v17 = vcombine.low %v1284_v5, %v1292_v6 }
 0x333   : > { %7377 = vmatprep.subr.bf16.mxu0 %v16399_v24  ;;  %7541 = vmatprep.subr.bf16.mxu1 %v16401_v27  ;;  %v1235_v24 = vld [vmem:[%s18420_s27 + $0x1aa0] sm:$0xff]  ;;  %v1308_v15 = vld [vmem:[%s18420_s27 + $0x1ce8] sm:$0xff] }
 0x334   : > { %v1243_v27 = vld [vmem:[%s18420_s27 + $0x1ae0] sm:$0xff] }
 0x335   : > { %v16510_v42 = vcombine.low %v1235_v24, %v1243_v27 }
 0x336   : > { %7378 = vmatpush1.bf16.msra.mxu0 %v16398_v55  ;;  %7542 = vmatpush1.bf16.msra.mxu1 %v16400_v36  ;;  %v16511_v55 = vcombine.high %v1235_v24, %v1243_v27  ;;  %v16513_v36 = vcombine.high %v1236_v30, %v1244_v32  ;;  %v1316_v24 = vld [vmem:[%s18420_s27 + $0x1d28] sm:$0xff]  ;;  %v16576_v32 = vcombine.low %v1300_v14, %v1308_v15 }
 0x337   : > { %7379 = vmatprep.subr.bf16.mxu0 %v16415_v37  ;;  %7543 = vmatprep.subr.bf16.mxu1 %v16417_v38  ;;  %v1251_v37 = vld [vmem:[%s18420_s27 + $0x1b20] sm:$0xff]  ;;  %v1324_v27 = vld [vmem:[%s18420_s27 + $0x1d68] sm:$0xff] }
 0x338   : > { %v1259_v38 = vld [vmem:[%s18420_s27 + $0x1b60] sm:$0xff] }
 0x33a   : > { %7380 = vmatpush1.bf16.msra.mxu0 %v16414_v45  ;;  %7544 = vmatpush1.bf16.msra.mxu1 %v16416_v46  ;;  %v16527_v45 = vcombine.high %v1251_v37, %v1259_v38 }
 0x33b   : > { %7390 = vmatprep.subr.bf16.mxu0 %v16431_v47  ;;  %7554 = vmatprep.subr.bf16.mxu1 %v16433_v48  ;;  %v16529_v47 = vcombine.high %v1252_v39, %v1260_v40  ;;  %v1267_v48 = vld [vmem:[%s18420_s27 + $0x1ba0] sm:$0xff]  ;;  %v16592_v40 = vcombine.low %v1316_v24, %v1324_v27 }
 0x33c   : > { %v16543_v62 = vcombine.high %v1267_v48, %v1275_v49  ;;  %v16542_v7 = vcombine.low %v1267_v48, %v1275_v49  ;;  %v1348_v48 = vld [vmem:[%s18420_s27 + $0x1e28] sm:$0xff] }
 0x33d   : > { %7382 = vmatmul.mubr.bf16.vlgmr.msra.gmra.mrb[8].mxu0 %v18707_v2  ;;  %7546 = vmatmul.mubr.bf16.vlgmr.msra.gmra.mrb[8].mxu1 %v18707_v2  ;;  %v1356_v49 = vld [vmem:[%s18420_s27 + $0x1e68] sm:$0xff] }
 0x33e   : > { %7391 = vmatpush1.bf16.msra.mxu0 %v16430_v54  ;;  %7555 = vmatpush1.bf16.msra.mxu1 %v16432_v23  ;;  %v1276_v54 = vld [vmem:[%s18420_s27 + $0x1be8] sm:$0xff] }
 0x33f   : > { %7392 = vmatprep.subr.bf16.mxu0 %v16447_v56  ;;  %7556 = vmatprep.subr.bf16.mxu1 %v16449_v57  ;;  %v16526_v57 = vcombine.low %v1251_v37, %v1259_v38  ;;  %v16544_v8 = vcombine.low %v1268_v52, %v1276_v54  ;;  %v1332_v37 = vld [vmem:[%s18420_s27 + $0x1da8] sm:$0xff] }
 0x340   : > { %7422 = vmatprep.mubr.bf16.mxu0 %v18713_v12  ;;  %7586 = vmatprep.mubr.bf16.mxu1 %v18713_v12  ;;  %v1340_v38 = vld [vmem:[%s18420_s27 + $0x1de8] sm:$0xff] }
 0x342   : > { %7393 = vmatpush1.bf16.msra.mxu0 %v16446_v0  ;;  %7557 = vmatpush1.bf16.msra.mxu1 %v16448_v1  ;;  %v16545_v0 = vcombine.high %v1268_v52, %v1276_v54  ;;  %v1283_v1 = vld [vmem:[%s18420_s27 + $0x1c20] sm:$0xff]  ;;  %v16608_v54 = vcombine.low %v1332_v37, %v1340_v38 }
 0x343   : > { %7394 = vmatprep.subr.bf16.mxu0 %v16463_v3  ;;  %7558 = vmatprep.subr.bf16.mxu1 %v16465_v4  ;;  %v1291_v3 = vld [vmem:[%s18420_s27 + $0x1c60] sm:$0xff] }
 0x344   : > { %v16558_v59 = vcombine.low %v1283_v1, %v1291_v3 }
 0x346   : > { %7395 = vmatpush1.bf16.msra.mxu0 %v16462_v10  ;;  %7559 = vmatpush1.bf16.msra.mxu1 %v16464_v11  ;;  %v16559_v10 = vcombine.high %v1283_v1, %v1291_v3  ;;  %v16561_v11 = vcombine.high %v1284_v5, %v1292_v6  ;;  %v16624_v1 = vcombine.low %v1348_v48, %v1356_v49  ;;  %v1379_v5 = vld [vmem:[%s18420_s27 + $0x1f20] sm:$0xff] }
 0x347   : > { %7396 = vmatprep.subr.bf16.mxu0 %v16479_v31  ;;  %7560 = vmatprep.subr.bf16.mxu1 %v16481_v13  ;;  %v1299_v31 = vld [vmem:[%s18420_s27 + $0x1ca0] sm:$0xff] }
 0x348   : > { %v1307_v13 = vld [vmem:[%s18420_s27 + $0x1ce0] sm:$0xff] }
 0x349   : > { %v16574_v30 = vcombine.low %v1299_v31, %v1307_v13  ;;  %v1387_v6 = vld [vmem:[%s18420_s27 + $0x1f60] sm:$0xff] }
 0x34a   : > { %7397 = vmatpush1.bf16.msra.mxu0 %v16478_v18  ;;  %7561 = vmatpush1.bf16.msra.mxu1 %v16480_v19  ;;  %v16575_v18 = vcombine.high %v1299_v31, %v1307_v13  ;;  %v16577_v19 = vcombine.high %v1300_v14, %v1308_v15  ;;  %v16655_v31 = vcombine.high %v1379_v5, %v1387_v6  ;;  %v1395_v14 = vld [vmem:[%s18420_s27 + $0x1fa0] sm:$0xff] }
 0x34b   : > { %7398 = vmatprep.subr.bf16.mxu0 %v16495_v20  ;;  %7562 = vmatprep.subr.bf16.mxu1 %v16497_v22  ;;  %v1315_v20 = vld [vmem:[%s18420_s27 + $0x1d20] sm:$0xff] }
 0x34c   : > { %v1323_v22 = vld [vmem:[%s18420_s27 + $0x1d60] sm:$0xff] }
 0x34d   : > { %v16590_v39 = vcombine.low %v1315_v20, %v1323_v22  ;;  %v1403_v15 = vld [vmem:[%s18420_s27 + $0x1fe0] sm:$0xff] }
 0x34e   : > { %7399 = vmatpush1.bf16.msra.mxu0 %v16494_v63  ;;  %7563 = vmatpush1.bf16.msra.mxu1 %v16496_v35  ;;  %v16591_v63 = vcombine.high %v1315_v20, %v1323_v22  ;;  %v16593_v35 = vcombine.high %v1316_v24, %v1324_v27  ;;  %v16671_v20 = vcombine.high %v1395_v14, %v1403_v15  ;;  %v389_v24 = vld [vmem:[%s18420_s27 + $0x30] sm:$0xff] }
 0x34f   : > { %7400 = vmatprep.subr.bf16.mxu0 %v16511_v55  ;;  %7564 = vmatprep.subr.bf16.mxu1 %v16513_v36  ;;  %v1331_v55 = vld [vmem:[%s18420_s27 + $0x1da0] sm:$0xff]  ;;  %v397_v27 = vld [vmem:[%s18420_s27 + $0x70] sm:$0xff] }
 0x350   : > { %v19293_v46 = vpop.f32.mrb[4].mxu0  ;;  %v19297_v50 = vpop.f32.mrb[4].mxu1  ;;  %v1339_v36 = vld [vmem:[%s18420_s27 + $0x1de0] sm:$0xff] }
 0x351   : > { %v19299_v16 = vpop.f32.mrb[5].mxu0  ;;  %v19303_v23 = vpop.f32.mrb[5].mxu1  ;;  %v16606_v52 = vcombine.low %v1331_v55, %v1339_v36 }
 0x352   : > { %v7100_v56 = vpop.f32.mrb[6].mxu0  ;;  %7401 = vmatpush1.bf16.msra.mxu0 %v16510_v42  ;;  %v7264_v58 = vpop.f32.mrb[6].mxu1  ;;  %7565 = vmatpush1.bf16.msra.mxu1 %v16512_v43  ;;  %v16607_v42 = vcombine.high %v1331_v55, %v1339_v36  ;;  %v16609_v43 = vcombine.high %v1332_v37, %v1340_v38  ;;  %v15667_v55 = vcombine.high %v389_v24, %v397_v27  ;;  %v405_v37 = vld [vmem:[%s18420_s27 + $0xb0] sm:$0xff] }
 0x353   : > { %v7101_v60 = vpop.f32.mrb[7].mxu0  ;;  %7402 = vmatprep.subr.bf16.mxu0 %v16527_v45  ;;  %7566 = vmatprep.subr.bf16.mxu1 %v16529_v47  ;;  %v7265_v4 = vpop.f32.mrb[7].mxu1  ;;  %v1347_v45 = vld [vmem:[%s18420_s27 + $0x1e20] sm:$0xff]  ;;  %v413_v38 = vld [vmem:[%s18420_s27 + $0xf0] sm:$0xff] }
 0x354   : > { %v1355_v47 = vld [vmem:[%s18420_s27 + $0x1e60] sm:$0xff] }
 0x355   : > { %v16623_v56 = vcombine.high %v1347_v45, %v1355_v47  ;;  %v1363_v58 = vld [vmem:[%s18420_s27 + $0x1ea0] sm:$0xff] }
 0x356   : > { %7403 = vmatpush1.bf16.msra.mxu0 %v16526_v57  ;;  %7567 = vmatpush1.bf16.msra.mxu1 %v16528_v61  ;;  %v16625_v57 = vcombine.high %v1348_v48, %v1356_v49  ;;  %v1371_v60 = vld [vmem:[%s18420_s27 + $0x1ee0] sm:$0xff]  ;;  %v1364_v61 = vld [vmem:[%s18420_s27 + $0x1ea8] sm:$0xff]  ;;  %v421_v48 = vld [vmem:[%s18420_s27 + $0x130] sm:$0xff] }
 0x357   : > { %7404 = vmatprep.subr.bf16.mxu0 %v16543_v62  ;;  %7568 = vmatprep.subr.bf16.mxu1 %v16545_v0  ;;  %v1372_v62 = vld [vmem:[%s18420_s27 + $0x1ee8] sm:$0xff]  ;;  %v16622_v0 = vcombine.low %v1347_v45, %v1355_v47  ;;  %v16639_v3 = vcombine.high %v1363_v58, %v1371_v60  ;;  %v15683_v45 = vcombine.high %v405_v37, %v413_v38  ;;  %v429_v49 = vld [vmem:[%s18420_s27 + $0x170] sm:$0xff] }
 0x358   : > { %v16641_v4 = vcombine.high %v1364_v61, %v1372_v62 }
 0x35a   : > { %7405 = vmatpush1.bf16.msra.mxu0 %v16542_v7  ;;  %7569 = vmatpush1.bf16.msra.mxu1 %v16544_v8  ;;  %v1380_v7 = vld [vmem:[%s18420_s27 + $0x1f28] sm:$0xff] }
 0x35b   : > { %7406 = vmatprep.subr.bf16.mxu0 %v16559_v10  ;;  %7570 = vmatprep.subr.bf16.mxu1 %v16561_v11  ;;  %v1388_v8 = vld [vmem:[%s18420_s27 + $0x1f68] sm:$0xff]  ;;  %v16638_v10 = vcombine.low %v1363_v58, %v1371_v60  ;;  %v16640_v11 = vcombine.low %v1364_v61, %v1372_v62  ;;  %v15699_v58 = vcombine.high %v421_v48, %v429_v49  ;;  %v437_v61 = vld [vmem:[%s18420_s27 + $0x1b0] sm:$0xff] }
 0x35c   : > { %v16657_v13 = vcombine.high %v1380_v7, %v1388_v8  ;;  %v445_v62 = vld [vmem:[%s18420_s27 + $0x1f0] sm:$0xff] }
 0x35e   : > { %7407 = vmatpush1.bf16.msra.mxu0 %v16558_v59  ;;  %7571 = vmatpush1.bf16.msra.mxu1 %v16560_v17  ;;  %v1396_v59 = vld [vmem:[%s18420_s27 + $0x1fa8] sm:$0xff] }
 0x35f   : > { %7408 = vmatprep.subr.bf16.mxu0 %v16575_v18  ;;  %7572 = vmatprep.subr.bf16.mxu1 %v16577_v19  ;;  %v1404_v17 = vld [vmem:[%s18420_s27 + $0x1fe8] sm:$0xff]  ;;  %v16654_v18 = vcombine.low %v1379_v5, %v1387_v6  ;;  %v16656_v19 = vcombine.low %v1380_v7, %v1388_v8  ;;  %v15715_v5 = vcombine.high %v437_v61, %v445_v62  ;;  %v453_v7 = vld [vmem:[%s18420_s27 + $0x230] sm:$0xff] }
 0x360   : > { %v16673_v22 = vcombine.high %v1396_v59, %v1404_v17  ;;  %v461_v8 = vld [vmem:[%s18420_s27 + $0x270] sm:$0xff] }
 0x362   : > { %7409 = vmatpush1.bf16.msra.mxu0 %v16574_v30  ;;  %7573 = vmatpush1.bf16.msra.mxu1 %v16576_v32  ;;  %v390_v30 = vld [vmem:[%s18420_s27 + $0x38] sm:$0xff] }
 0x363   : > { %7410 = vmatprep.subr.bf16.mxu0 %v16591_v63  ;;  %7574 = vmatprep.subr.bf16.mxu1 %v16593_v35  ;;  %v398_v32 = vld [vmem:[%s18420_s27 + $0x78] sm:$0xff]  ;;  %v16670_v63 = vcombine.low %v1395_v14, %v1403_v15  ;;  %v16672_v35 = vcombine.low %v1396_v59, %v1404_v17  ;;  %v469_v15 = vld [vmem:[%s18420_s27 + $0x2b0] sm:$0xff] }
 0x364   : > { %v15669_v36 = vcombine.high %v390_v30, %v398_v32  ;;  %v477_v59 = vld [vmem:[%s18420_s27 + $0x2f0] sm:$0xff]  ;;  %v470_v17 = vld [vmem:[%s18420_s27 + $0x2b8] sm:$0xff] }
 0x366   : > { %7411 = vmatpush1.bf16.msra.mxu0 %v16590_v39  ;;  %7575 = vmatpush1.bf16.msra.mxu1 %v16592_v40  ;;  %v406_v39 = vld [vmem:[%s18420_s27 + $0xb8] sm:$0xff] }
 0x367   : > { %7412 = vmatprep.subr.bf16.mxu0 %v16607_v42  ;;  %7576 = vmatprep.subr.bf16.mxu1 %v16609_v43  ;;  %v414_v40 = vld [vmem:[%s18420_s27 + $0xf8] sm:$0xff]  ;;  %v15666_v42 = vcombine.low %v389_v24, %v397_v27  ;;  %v15668_v43 = vcombine.low %v390_v30, %v398_v32  ;;  %v485_v27 = vld [vmem:[%s18420_s27 + $0x330] sm:$0xff] }
 0x368   : > { %v15685_v47 = vcombine.high %v406_v39, %v414_v40  ;;  %v493_v30 = vld [vmem:[%s18420_s27 + $0x370] sm:$0xff]  ;;  %v486_v32 = vld [vmem:[%s18420_s27 + $0x338] sm:$0xff] }
 0x36a   : > { %7413 = vmatpush1.bf16.msra.mxu0 %v16606_v52  ;;  %7577 = vmatpush1.bf16.msra.mxu1 %v16608_v54  ;;  %v422_v52 = vld [vmem:[%s18420_s27 + $0x138] sm:$0xff] }
 0x36b   : > { %7414 = vmatprep.subr.bf16.mxu0 %v16623_v56  ;;  %7578 = vmatprep.subr.bf16.mxu1 %v16625_v57  ;;  %v430_v54 = vld [vmem:[%s18420_s27 + $0x178] sm:$0xff]  ;;  %v15682_v56 = vcombine.low %v405_v37, %v413_v38  ;;  %v15684_v57 = vcombine.low %v406_v39, %v414_v40  ;;  %v501_v38 = vld [vmem:[%s18420_s27 + $0x3b0] sm:$0xff] }
 0x36c   : > { %v15701_v60 = vcombine.high %v422_v52, %v430_v54  ;;  %v509_v39 = vld [vmem:[%s18420_s27 + $0x3f0] sm:$0xff]  ;;  %v502_v40 = vld [vmem:[%s18420_s27 + $0x3b8] sm:$0xff] }
 0x36e   : > { %7415 = vmatpush1.bf16.msra.mxu0 %v16622_v0  ;;  %7579 = vmatpush1.bf16.msra.mxu1 %v16624_v1  ;;  %v438_v0 = vld [vmem:[%s18420_s27 + $0x1b8] sm:$0xff] }
 0x36f   : > { %7416 = vmatprep.subr.bf16.mxu0 %v16639_v3  ;;  %7580 = vmatprep.subr.bf16.mxu1 %v16641_v4  ;;  %v446_v1 = vld [vmem:[%s18420_s27 + $0x1f8] sm:$0xff]  ;;  %v15698_v3 = vcombine.low %v421_v48, %v429_v49  ;;  %v15700_v4 = vcombine.low %v422_v52, %v430_v54  ;;  %v517_v49 = vld [vmem:[%s18420_s27 + $0x430] sm:$0xff] }
 0x370   : > { %v15717_v6 = vcombine.high %v438_v0, %v446_v1  ;;  %v525_v52 = vld [vmem:[%s18420_s27 + $0x470] sm:$0xff]  ;;  %v518_v54 = vld [vmem:[%s18420_s27 + $0x438] sm:$0xff] }
 0x372   : > { %7417 = vmatpush1.bf16.msra.mxu0 %v16638_v10  ;;  %7581 = vmatpush1.bf16.msra.mxu1 %v16640_v11  ;;  %v454_v10 = vld [vmem:[%s18420_s27 + $0x238] sm:$0xff] }
 0x373   : > { %7418 = vmatprep.subr.bf16.mxu0 %v16655_v31  ;;  %7582 = vmatprep.subr.bf16.mxu1 %v16657_v13  ;;  %v462_v11 = vld [vmem:[%s18420_s27 + $0x278] sm:$0xff]  ;;  %v15714_v31 = vcombine.low %v437_v61, %v445_v62  ;;  %v15731_v13 = vcombine.high %v453_v7, %v461_v8  ;;  %v533_v62 = vld [vmem:[%s18420_s27 + $0x4b0] sm:$0xff] }
 0x374   : > { %v15733_v14 = vcombine.high %v454_v10, %v462_v11 }
 0x376   : > { %7419 = vmatpush1.bf16.msra.mxu0 %v16654_v18  ;;  %7583 = vmatpush1.bf16.msra.mxu1 %v16656_v19  ;;  %v478_v18 = vld [vmem:[%s18420_s27 + $0x2f8] sm:$0xff]  ;;  %v15730_v19 = vcombine.low %v453_v7, %v461_v8  ;;  %v549_v8 = vld [vmem:[%s18420_s27 + $0x530] sm:$0xff] }
 0x377   : > { %7420 = vmatprep.subr.bf16.mxu0 %v16671_v20  ;;  %7584 = vmatprep.subr.bf16.mxu1 %v16673_v22  ;;  %v15732_v20 = vcombine.low %v454_v10, %v462_v11  ;;  %v15747_v22 = vcombine.high %v469_v15, %v477_v59  ;;  %v15749_v24 = vcombine.high %v470_v17, %v478_v18  ;;  %v557_v10 = vld [vmem:[%s18420_s27 + $0x570] sm:$0xff]  ;;  %v550_v11 = vld [vmem:[%s18420_s27 + $0x538] sm:$0xff] }
 0x37a   : > { %7421 = vmatpush1.bf16.msra.mxu0 %v16670_v63  ;;  %7585 = vmatpush1.bf16.msra.mxu1 %v16672_v35  ;;  %v494_v63 = vld [vmem:[%s18420_s27 + $0x378] sm:$0xff]  ;;  %v15746_v35 = vcombine.low %v469_v15, %v477_v59  ;;  %v565_v59 = vld [vmem:[%s18420_s27 + $0x5b0] sm:$0xff] }
 0x37b   : > { %7595 = vmatprep.subr.bf16.mxu0 %v15667_v55  ;;  %7759 = vmatprep.subr.bf16.mxu1 %v15669_v36  ;;  %v15748_v55 = vcombine.low %v470_v17, %v478_v18  ;;  %v15763_v36 = vcombine.high %v485_v27, %v493_v30  ;;  %v15765_v37 = vcombine.high %v486_v32, %v494_v63  ;;  %v573_v17 = vld [vmem:[%s18420_s27 + $0x5f0] sm:$0xff]  ;;  %v566_v18 = vld [vmem:[%s18420_s27 + $0x5b8] sm:$0xff] }
 0x37d   : > { %7423 = vmatmul.mubr.bf16.vlgmr.msra.gmra.mrb[8].mxu0 %v18781_v26  ;;  %7587 = vmatmul.mubr.bf16.vlgmr.msra.gmra.mrb[8].mxu1 %v18781_v26 }
 0x37e   : > { %7596 = vmatpush1.bf16.msra.mxu0 %v15666_v42  ;;  %7760 = vmatpush1.bf16.msra.mxu1 %v15668_v43  ;;  %v510_v42 = vld [vmem:[%s18420_s27 + $0x3f8] sm:$0xff]  ;;  %v15762_v43 = vcombine.low %v485_v27, %v493_v30  ;;  %v581_v30 = vld [vmem:[%s18420_s27 + $0x630] sm:$0xff] }
 0x37f   : > { %7597 = vmatprep.subr.bf16.mxu0 %v15683_v45  ;;  %7761 = vmatprep.subr.bf16.mxu1 %v15685_v47  ;;  %v15764_v45 = vcombine.low %v486_v32, %v494_v63  ;;  %v15779_v47 = vcombine.high %v501_v38, %v509_v39  ;;  %v15781_v48 = vcombine.high %v502_v40, %v510_v42  ;;  %v589_v32 = vld [vmem:[%s18420_s27 + $0x670] sm:$0xff]  ;;  %v582_v63 = vld [vmem:[%s18420_s27 + $0x638] sm:$0xff] }
 0x380   : > { %7627 = vmatprep.mubr.bf16.mxu0 %v18492_v9  ;;  %7791 = vmatprep.mubr.bf16.mxu1 %v18492_v9  ;;  %v15716_v9 = vcombine.low %v438_v0, %v446_v1  ;;  %v541_v0 = vld [vmem:[%s18420_s27 + $0x4f0] sm:$0xff]  ;;  %v534_v1 = vld [vmem:[%s18420_s27 + $0x4b8] sm:$0xff] }
 0x382   : > { %7598 = vmatpush1.bf16.msra.mxu0 %v15682_v56  ;;  %7762 = vmatpush1.bf16.msra.mxu1 %v15684_v57  ;;  %v526_v56 = vld [vmem:[%s18420_s27 + $0x478] sm:$0xff]  ;;  %v15778_v57 = vcombine.low %v501_v38, %v509_v39  ;;  %v597_v39 = vld [vmem:[%s18420_s27 + $0x6b0] sm:$0xff] }
 0x383   : > { %7599 = vmatprep.subr.bf16.mxu0 %v15699_v58  ;;  %7763 = vmatprep.subr.bf16.mxu1 %v15701_v60  ;;  %v15780_v58 = vcombine.low %v502_v40, %v510_v42  ;;  %v15795_v60 = vcombine.high %v517_v49, %v525_v52  ;;  %v15797_v61 = vcombine.high %v518_v54, %v526_v56  ;;  %v605_v40 = vld [vmem:[%s18420_s27 + $0x6f0] sm:$0xff]  ;;  %v598_v42 = vld [vmem:[%s18420_s27 + $0x6b8] sm:$0xff] }
 0x386   : > { %7600 = vmatpush1.bf16.msra.mxu0 %v15698_v3  ;;  %7764 = vmatpush1.bf16.msra.mxu1 %v15700_v4  ;;  %v542_v3 = vld [vmem:[%s18420_s27 + $0x4f8] sm:$0xff]  ;;  %v15794_v4 = vcombine.low %v517_v49, %v525_v52  ;;  %v613_v52 = vld [vmem:[%s18420_s27 + $0x730] sm:$0xff] }
 0x387   : > { %7601 = vmatprep.subr.bf16.mxu0 %v15715_v5  ;;  %7765 = vmatprep.subr.bf16.mxu1 %v15717_v6  ;;  %v15796_v5 = vcombine.low %v518_v54, %v526_v56  ;;  %v15811_v6 = vcombine.high %v533_v62, %v541_v0  ;;  %v15813_v7 = vcombine.high %v534_v1, %v542_v3  ;;  %v621_v54 = vld [vmem:[%s18420_s27 + $0x770] sm:$0xff]  ;;  %v614_v56 = vld [vmem:[%s18420_s27 + $0x738] sm:$0xff] }
 0x38a   : > { %7602 = vmatpush1.bf16.msra.mxu0 %v15714_v31  ;;  %7766 = vmatpush1.bf16.msra.mxu1 %v15716_v9  ;;  %v558_v31 = vld [vmem:[%s18420_s27 + $0x578] sm:$0xff]  ;;  %v15810_v9 = vcombine.low %v533_v62, %v541_v0  ;;  %v629_v0 = vld [vmem:[%s18420_s27 + $0x7b0] sm:$0xff] }
 0x38b   : > { %7603 = vmatprep.subr.bf16.mxu0 %v15731_v13  ;;  %7767 = vmatprep.subr.bf16.mxu1 %v15733_v14  ;;  %v15812_v13 = vcombine.low %v534_v1, %v542_v3  ;;  %v15827_v14 = vcombine.high %v549_v8, %v557_v10  ;;  %v15829_v15 = vcombine.high %v550_v11, %v558_v31  ;;  %v637_v1 = vld [vmem:[%s18420_s27 + $0x7f0] sm:$0xff]  ;;  %v630_v3 = vld [vmem:[%s18420_s27 + $0x7b8] sm:$0xff] }
 0x38e   : > { %7604 = vmatpush1.bf16.msra.mxu0 %v15730_v19  ;;  %7768 = vmatpush1.bf16.msra.mxu1 %v15732_v20  ;;  %v574_v19 = vld [vmem:[%s18420_s27 + $0x5f8] sm:$0xff]  ;;  %v15826_v20 = vcombine.low %v549_v8, %v557_v10  ;;  %v645_v10 = vld [vmem:[%s18420_s27 + $0x830] sm:$0xff] }
 0x38f   : > { %7605 = vmatprep.subr.bf16.mxu0 %v15747_v22  ;;  %7769 = vmatprep.subr.bf16.mxu1 %v15749_v24  ;;  %v15828_v22 = vcombine.low %v550_v11, %v558_v31  ;;  %v15843_v24 = vcombine.high %v565_v59, %v573_v17  ;;  %v15845_v27 = vcombine.high %v566_v18, %v574_v19  ;;  %v653_v11 = vld [vmem:[%s18420_s27 + $0x870] sm:$0xff]  ;;  %v646_v31 = vld [vmem:[%s18420_s27 + $0x838] sm:$0xff] }
 0x392   : > { %7606 = vmatpush1.bf16.msra.mxu0 %v15746_v35  ;;  %7770 = vmatpush1.bf16.msra.mxu1 %v15748_v55  ;;  %v590_v35 = vld [vmem:[%s18420_s27 + $0x678] sm:$0xff]  ;;  %v15842_v55 = vcombine.low %v565_v59, %v573_v17  ;;  %v661_v17 = vld [vmem:[%s18420_s27 + $0x8b0] sm:$0xff] }
 0x393   : > { %7607 = vmatprep.subr.bf16.mxu0 %v15763_v36  ;;  %7771 = vmatprep.subr.bf16.mxu1 %v15765_v37  ;;  %v15844_v36 = vcombine.low %v566_v18, %v574_v19  ;;  %v15859_v37 = vcombine.high %v581_v30, %v589_v32  ;;  %v15861_v38 = vcombine.high %v582_v63, %v590_v35  ;;  %v669_v18 = vld [vmem:[%s18420_s27 + $0x8f0] sm:$0xff]  ;;  %v662_v19 = vld [vmem:[%s18420_s27 + $0x8b8] sm:$0xff] }
 0x396   : > { %7608 = vmatpush1.bf16.msra.mxu0 %v15762_v43  ;;  %7772 = vmatpush1.bf16.msra.mxu1 %v15764_v45  ;;  %v606_v43 = vld [vmem:[%s18420_s27 + $0x6f8] sm:$0xff]  ;;  %v15858_v45 = vcombine.low %v581_v30, %v589_v32  ;;  %v677_v32 = vld [vmem:[%s18420_s27 + $0x930] sm:$0xff] }
 0x397   : > { %7609 = vmatprep.subr.bf16.mxu0 %v15779_v47  ;;  %7773 = vmatprep.subr.bf16.mxu1 %v15781_v48  ;;  %v15860_v47 = vcombine.low %v582_v63, %v590_v35  ;;  %v15875_v48 = vcombine.high %v597_v39, %v605_v40  ;;  %v15877_v49 = vcombine.high %v598_v42, %v606_v43  ;;  %v685_v63 = vld [vmem:[%s18420_s27 + $0x970] sm:$0xff]  ;;  %v678_v35 = vld [vmem:[%s18420_s27 + $0x938] sm:$0xff] }
 0x39a   : > { %7610 = vmatpush1.bf16.msra.mxu0 %v15778_v57  ;;  %7774 = vmatpush1.bf16.msra.mxu1 %v15780_v58  ;;  %v622_v57 = vld [vmem:[%s18420_s27 + $0x778] sm:$0xff]  ;;  %v15874_v58 = vcombine.low %v597_v39, %v605_v40  ;;  %v693_v40 = vld [vmem:[%s18420_s27 + $0x9b0] sm:$0xff] }
 0x39b   : > { %7611 = vmatprep.subr.bf16.mxu0 %v15795_v60  ;;  %7775 = vmatprep.subr.bf16.mxu1 %v15797_v61  ;;  %v15876_v60 = vcombine.low %v598_v42, %v606_v43  ;;  %v15891_v61 = vcombine.high %v613_v52, %v621_v54  ;;  %v15893_v62 = vcombine.high %v614_v56, %v622_v57  ;;  %v701_v42 = vld [vmem:[%s18420_s27 + $0x9f0] sm:$0xff]  ;;  %v694_v43 = vld [vmem:[%s18420_s27 + $0x9b8] sm:$0xff] }
 0x39e   : > { %7612 = vmatpush1.bf16.msra.mxu0 %v15794_v4  ;;  %7776 = vmatpush1.bf16.msra.mxu1 %v15796_v5  ;;  %v638_v4 = vld [vmem:[%s18420_s27 + $0x7f8] sm:$0xff]  ;;  %v15890_v5 = vcombine.low %v613_v52, %v621_v54  ;;  %v709_v52 = vld [vmem:[%s18420_s27 + $0xa30] sm:$0xff] }
 0x39f   : > { %7613 = vmatprep.subr.bf16.mxu0 %v15811_v6  ;;  %7777 = vmatprep.subr.bf16.mxu1 %v15813_v7  ;;  %v15892_v6 = vcombine.low %v614_v56, %v622_v57  ;;  %v15907_v7 = vcombine.high %v629_v0, %v637_v1  ;;  %v15909_v8 = vcombine.high %v630_v3, %v638_v4  ;;  %v717_v54 = vld [vmem:[%s18420_s27 + $0xa70] sm:$0xff]  ;;  %v710_v56 = vld [vmem:[%s18420_s27 + $0xa38] sm:$0xff] }
 0x3a0   : > { %v718_v57 = vld [vmem:[%s18420_s27 + $0xa78] sm:$0xff] }
 0x3a2   : > { %7614 = vmatpush1.bf16.msra.mxu0 %v15810_v9  ;;  %7778 = vmatpush1.bf16.msra.mxu1 %v15812_v13  ;;  %v654_v9 = vld [vmem:[%s18420_s27 + $0x878] sm:$0xff]  ;;  %v15906_v13 = vcombine.low %v629_v0, %v637_v1  ;;  %v733_v0 = vld [vmem:[%s18420_s27 + $0xaf0] sm:$0xff] }
 0x3a3   : > { %7615 = vmatprep.subr.bf16.mxu0 %v15827_v14  ;;  %7779 = vmatprep.subr.bf16.mxu1 %v15829_v15  ;;  %v15908_v14 = vcombine.low %v630_v3, %v638_v4  ;;  %v15923_v15 = vcombine.high %v645_v10, %v653_v11  ;;  %v15925_v59 = vcombine.high %v646_v31, %v654_v9  ;;  %v726_v1 = vld [vmem:[%s18420_s27 + $0xab8] sm:$0xff] }
 0x3a4   : > { %v734_v3 = vld [vmem:[%s18420_s27 + $0xaf8] sm:$0xff]  ;;  %v15986_v4 = vcombine.low %v709_v52, %v717_v54 }
 0x3a6   : > { %7616 = vmatpush1.bf16.msra.mxu0 %v15826_v20  ;;  %7780 = vmatpush1.bf16.msra.mxu1 %v15828_v22  ;;  %v670_v20 = vld [vmem:[%s18420_s27 + $0x8f8] sm:$0xff]  ;;  %v15922_v22 = vcombine.low %v645_v10, %v653_v11  ;;  %v749_v10 = vld [vmem:[%s18420_s27 + $0xb70] sm:$0xff] }
 0x3a7   : > { %7617 = vmatprep.subr.bf16.mxu0 %v15843_v24  ;;  %7781 = vmatprep.subr.bf16.mxu1 %v15845_v27  ;;  %v15924_v24 = vcombine.low %v646_v31, %v654_v9  ;;  %v15939_v27 = vcombine.high %v661_v17, %v669_v18  ;;  %v15941_v30 = vcombine.high %v662_v19, %v670_v20  ;;  %v742_v11 = vld [vmem:[%s18420_s27 + $0xb38] sm:$0xff] }
 0x3a8   : > { %v750_v31 = vld [vmem:[%s18420_s27 + $0xb78] sm:$0xff] }
 0x3aa   : > { %7618 = vmatpush1.bf16.msra.mxu0 %v15842_v55  ;;  %7782 = vmatpush1.bf16.msra.mxu1 %v15844_v36  ;;  %v686_v55 = vld [vmem:[%s18420_s27 + $0x978] sm:$0xff]  ;;  %v15938_v36 = vcombine.low %v661_v17, %v669_v18  ;;  %v765_v17 = vld [vmem:[%s18420_s27 + $0xbf0] sm:$0xff] }
 0x3ab   : > { %7619 = vmatprep.subr.bf16.mxu0 %v15859_v37  ;;  %7783 = vmatprep.subr.bf16.mxu1 %v15861_v38  ;;  %v15940_v37 = vcombine.low %v662_v19, %v670_v20  ;;  %v15955_v38 = vcombine.high %v677_v32, %v685_v63  ;;  %v15957_v39 = vcombine.high %v678_v35, %v686_v55  ;;  %v758_v18 = vld [vmem:[%s18420_s27 + $0xbb8] sm:$0xff] }
 0x3ac   : > { %v766_v19 = vld [vmem:[%s18420_s27 + $0xbf8] sm:$0xff] }
 0x3ae   : > { %7620 = vmatpush1.bf16.msra.mxu0 %v15858_v45  ;;  %7784 = vmatpush1.bf16.msra.mxu1 %v15860_v47  ;;  %v702_v45 = vld [vmem:[%s18420_s27 + $0x9f8] sm:$0xff]  ;;  %v15956_v47 = vcombine.low %v678_v35, %v686_v55 }
 0x3af   : > { %7621 = vmatprep.subr.bf16.mxu0 %v15875_v48  ;;  %7785 = vmatprep.subr.bf16.mxu1 %v15877_v49  ;;  %v15971_v48 = vcombine.high %v693_v40, %v701_v42  ;;  %v15973_v49 = vcombine.high %v694_v43, %v702_v45  ;;  %v782_v35 = vld [vmem:[%s18420_s27 + $0xc78] sm:$0xff] }
 0x3b2   : > { %7622 = vmatpush1.bf16.msra.mxu0 %v15874_v58  ;;  %7786 = vmatpush1.bf16.msra.mxu1 %v15876_v60  ;;  %v15970_v58 = vcombine.low %v693_v40, %v701_v42  ;;  %v15987_v60 = vcombine.high %v709_v52, %v717_v54  ;;  %v797_v40 = vld [vmem:[%s18420_s27 + $0xcf0] sm:$0xff]  ;;  %v790_v42 = vld [vmem:[%s18420_s27 + $0xcb8] sm:$0xff] }
 0x3b3   : > { %7623 = vmatprep.subr.bf16.mxu0 %v15891_v61  ;;  %7787 = vmatprep.subr.bf16.mxu1 %v15893_v62  ;;  %v15989_v61 = vcombine.high %v710_v56, %v718_v57  ;;  %v725_v62 = vld [vmem:[%s18420_s27 + $0xab0] sm:$0xff]  ;;  %v806_v54 = vld [vmem:[%s18420_s27 + $0xd38] sm:$0xff] }
 0x3b4   : > { %v16002_v9 = vcombine.low %v725_v62, %v733_v0  ;;  %v813_v52 = vld [vmem:[%s18420_s27 + $0xd70] sm:$0xff] }
 0x3b6   : > { %7624 = vmatpush1.bf16.msra.mxu0 %v15890_v5  ;;  %7788 = vmatpush1.bf16.msra.mxu1 %v15892_v6  ;;  %v15988_v5 = vcombine.low %v710_v56, %v718_v57  ;;  %v16003_v6 = vcombine.high %v725_v62, %v733_v0  ;;  %v814_v56 = vld [vmem:[%s18420_s27 + $0xd78] sm:$0xff]  ;;  %v829_v62 = vld [vmem:[%s18420_s27 + $0xdf0] sm:$0xff] }
 0x3b7   : > { %7625 = vmatprep.subr.bf16.mxu0 %v15907_v7  ;;  %7789 = vmatprep.subr.bf16.mxu1 %v15909_v8  ;;  %v16005_v7 = vcombine.high %v726_v1, %v734_v3  ;;  %v741_v8 = vld [vmem:[%s18420_s27 + $0xb30] sm:$0xff]  ;;  %v822_v0 = vld [vmem:[%s18420_s27 + $0xdb8] sm:$0xff] }
 0x3b8   : > { %v16018_v20 = vcombine.low %v741_v8, %v749_v10 }
 0x3ba   : > { %7626 = vmatpush1.bf16.msra.mxu0 %v15906_v13  ;;  %7790 = vmatpush1.bf16.msra.mxu1 %v15908_v14  ;;  %v16004_v13 = vcombine.low %v726_v1, %v734_v3  ;;  %v16019_v14 = vcombine.high %v741_v8, %v749_v10  ;;  %v830_v1 = vld [vmem:[%s18420_s27 + $0xdf8] sm:$0xff]  ;;  %v845_v8 = vld [vmem:[%s18420_s27 + $0xe70] sm:$0xff] }
 0x3bb   : > { %7636 = vmatprep.subr.bf16.mxu0 %v15923_v15  ;;  %7800 = vmatprep.subr.bf16.mxu1 %v15925_v59  ;;  %v16021_v15 = vcombine.high %v742_v11, %v750_v31  ;;  %v757_v59 = vld [vmem:[%s18420_s27 + $0xbb0] sm:$0xff]  ;;  %v838_v10 = vld [vmem:[%s18420_s27 + $0xe38] sm:$0xff] }
 0x3bc   : > { %v16034_v55 = vcombine.low %v757_v59, %v765_v17 }
 0x3bd   : > { %7628 = vmatmul.mubr.bf16.vlgmr.msra.gmra.mrb[12].mxu0 %v18541_v25  ;;  %7792 = vmatmul.mubr.bf16.vlgmr.msra.gmra.mrb[12].mxu1 %v18541_v25  ;;  %v15954_v25 = vcombine.low %v677_v32, %v685_v63  ;;  %v781_v32 = vld [vmem:[%s18420_s27 + $0xc70] sm:$0xff]  ;;  %v774_v63 = vld [vmem:[%s18420_s27 + $0xc38] sm:$0xff] }
 0x3be   : > { %7637 = vmatpush1.bf16.msra.mxu0 %v15922_v22  ;;  %7801 = vmatpush1.bf16.msra.mxu1 %v15924_v24  ;;  %v16020_v22 = vcombine.low %v742_v11, %v750_v31  ;;  %v16035_v24 = vcombine.high %v757_v59, %v765_v17  ;;  %v846_v11 = vld [vmem:[%s18420_s27 + $0xe78] sm:$0xff]  ;;  %v861_v59 = vld [vmem:[%s18420_s27 + $0xef0] sm:$0xff] }
 0x3bf   : > { %7638 = vmatprep.subr.bf16.mxu0 %v15939_v27  ;;  %7802 = vmatprep.subr.bf16.mxu1 %v15941_v30  ;;  %v16037_v27 = vcombine.high %v758_v18, %v766_v19  ;;  %v773_v30 = vld [vmem:[%s18420_s27 + $0xc30] sm:$0xff]  ;;  %v854_v17 = vld [vmem:[%s18420_s27 + $0xeb8] sm:$0xff] }
 0x3c0   : > { %7668 = vmatprep.mubr.bf16.mxu0 %v18547_v34  ;;  %7832 = vmatprep.mubr.bf16.mxu1 %v18547_v34  ;;  %v15972_v34 = vcombine.low %v694_v43, %v702_v45  ;;  %v798_v43 = vld [vmem:[%s18420_s27 + $0xcf8] sm:$0xff]  ;;  %v16050_v45 = vcombine.low %v773_v30, %v781_v32 }
 0x3c2   : > { %7639 = vmatpush1.bf16.msra.mxu0 %v15938_v36  ;;  %7803 = vmatpush1.bf16.msra.mxu1 %v15940_v37  ;;  %v16036_v36 = vcombine.low %v758_v18, %v766_v19  ;;  %v16051_v37 = vcombine.high %v773_v30, %v781_v32  ;;  %v862_v18 = vld [vmem:[%s18420_s27 + $0xef8] sm:$0xff]  ;;  %v877_v30 = vld [vmem:[%s18420_s27 + $0xf70] sm:$0xff] }
 0x3c3   : > { %7640 = vmatprep.subr.bf16.mxu0 %v15955_v38  ;;  %7804 = vmatprep.subr.bf16.mxu1 %v15957_v39  ;;  %v16053_v38 = vcombine.high %v774_v63, %v782_v35  ;;  %v789_v39 = vld [vmem:[%s18420_s27 + $0xcb0] sm:$0xff]  ;;  %v870_v32 = vld [vmem:[%s18420_s27 + $0xf38] sm:$0xff] }
 0x3c4   : > { %v16066_v57 = vcombine.low %v789_v39, %v797_v40 }
 0x3c6   : > { %7641 = vmatpush1.bf16.msra.mxu0 %v15954_v25  ;;  %7805 = vmatpush1.bf16.msra.mxu1 %v15956_v47  ;;  %v16052_v25 = vcombine.low %v774_v63, %v782_v35  ;;  %v16067_v47 = vcombine.high %v789_v39, %v797_v40  ;;  %v878_v63 = vld [vmem:[%s18420_s27 + $0xf78] sm:$0xff]  ;;  %v893_v39 = vld [vmem:[%s18420_s27 + $0xff0] sm:$0xff] }
 0x3c7   : > { %7642 = vmatprep.subr.bf16.mxu0 %v15971_v48  ;;  %7806 = vmatprep.subr.bf16.mxu1 %v15973_v49  ;;  %v16069_v48 = vcombine.high %v790_v42, %v798_v43  ;;  %v805_v49 = vld [vmem:[%s18420_s27 + $0xd30] sm:$0xff]  ;;  %v886_v40 = vld [vmem:[%s18420_s27 + $0xfb8] sm:$0xff] }
 0x3c8   : > { %v16082_v3 = vcombine.low %v805_v49, %v813_v52 }
 0x3ca   : > { %7643 = vmatpush1.bf16.msra.mxu0 %v15970_v58  ;;  %7807 = vmatpush1.bf16.msra.mxu1 %v15972_v34  ;;  %v16068_v58 = vcombine.low %v790_v42, %v798_v43  ;;  %v16083_v34 = vcombine.high %v805_v49, %v813_v52  ;;  %v894_v42 = vld [vmem:[%s18420_s27 + $0xff8] sm:$0xff]  ;;  %v909_v49 = vld [vmem:[%s18420_s27 + $0x1070] sm:$0xff] }
 0x3cb   : > { %7644 = vmatprep.subr.bf16.mxu0 %v15987_v60  ;;  %7808 = vmatprep.subr.bf16.mxu1 %v15989_v61  ;;  %v16085_v60 = vcombine.high %v806_v54, %v814_v56  ;;  %v821_v61 = vld [vmem:[%s18420_s27 + $0xdb0] sm:$0xff]  ;;  %v902_v52 = vld [vmem:[%s18420_s27 + $0x1038] sm:$0xff] }
 0x3cc   : > { %v16098_v31 = vcombine.low %v821_v61, %v829_v62 }
 0x3ce   : > { %7645 = vmatpush1.bf16.msra.mxu0 %v15986_v4  ;;  %7809 = vmatpush1.bf16.msra.mxu1 %v15988_v5  ;;  %v16084_v4 = vcombine.low %v806_v54, %v814_v56  ;;  %v16099_v5 = vcombine.high %v821_v61, %v829_v62  ;;  %v910_v54 = vld [vmem:[%s18420_s27 + $0x1078] sm:$0xff]  ;;  %v925_v61 = vld [vmem:[%s18420_s27 + $0x10f0] sm:$0xff] }
 0x3cf   : > { %7646 = vmatprep.subr.bf16.mxu0 %v16003_v6  ;;  %7810 = vmatprep.subr.bf16.mxu1 %v16005_v7  ;;  %v16101_v6 = vcombine.high %v822_v0, %v830_v1  ;;  %v837_v7 = vld [vmem:[%s18420_s27 + $0xe30] sm:$0xff]  ;;  %v918_v62 = vld [vmem:[%s18420_s27 + $0x10b8] sm:$0xff] }
 0x3d0   : > { %v16114_v19 = vcombine.low %v837_v7, %v845_v8 }
 0x3d2   : > { %7647 = vmatpush1.bf16.msra.mxu0 %v16002_v9  ;;  %7811 = vmatpush1.bf16.msra.mxu1 %v16004_v13  ;;  %v16100_v9 = vcombine.low %v822_v0, %v830_v1  ;;  %v16115_v13 = vcombine.high %v837_v7, %v845_v8  ;;  %v926_v0 = vld [vmem:[%s18420_s27 + $0x10f8] sm:$0xff]  ;;  %v941_v7 = vld [vmem:[%s18420_s27 + $0x1170] sm:$0xff] }
 0x3d3   : > { %7648 = vmatprep.subr.bf16.mxu0 %v16019_v14  ;;  %7812 = vmatprep.subr.bf16.mxu1 %v16021_v15  ;;  %v16117_v14 = vcombine.high %v838_v10, %v846_v11  ;;  %v853_v15 = vld [vmem:[%s18420_s27 + $0xeb0] sm:$0xff]  ;;  %v934_v8 = vld [vmem:[%s18420_s27 + $0x1138] sm:$0xff] }
 0x3d4   : > { %v16130_v35 = vcombine.low %v853_v15, %v861_v59 }
 0x3d6   : > { %7649 = vmatpush1.bf16.msra.mxu0 %v16018_v20  ;;  %7813 = vmatpush1.bf16.msra.mxu1 %v16020_v22  ;;  %v16116_v20 = vcombine.low %v838_v10, %v846_v11  ;;  %v16131_v22 = vcombine.high %v853_v15, %v861_v59  ;;  %v942_v10 = vld [vmem:[%s18420_s27 + $0x1178] sm:$0xff]  ;;  %v957_v15 = vld [vmem:[%s18420_s27 + $0x11f0] sm:$0xff] }
 0x3d7   : > { %7650 = vmatprep.subr.bf16.mxu0 %v16035_v24  ;;  %7814 = vmatprep.subr.bf16.mxu1 %v16037_v27  ;;  %v16133_v24 = vcombine.high %v854_v17, %v862_v18  ;;  %v869_v27 = vld [vmem:[%s18420_s27 + $0xf30] sm:$0xff]  ;;  %v950_v59 = vld [vmem:[%s18420_s27 + $0x11b8] sm:$0xff] }
 0x3d8   : > { %v16146_v43 = vcombine.low %v869_v27, %v877_v30 }
 0x3da   : > { %7651 = vmatpush1.bf16.msra.mxu0 %v16034_v55  ;;  %7815 = vmatpush1.bf16.msra.mxu1 %v16036_v36  ;;  %v16132_v55 = vcombine.low %v854_v17, %v862_v18  ;;  %v16147_v36 = vcombine.high %v869_v27, %v877_v30  ;;  %v958_v17 = vld [vmem:[%s18420_s27 + $0x11f8] sm:$0xff]  ;;  %v16212_v18 = vcombine.low %v934_v8, %v942_v10 }
 0x3db   : > { %7652 = vmatprep.subr.bf16.mxu0 %v16051_v37  ;;  %7816 = vmatprep.subr.bf16.mxu1 %v16053_v38  ;;  %v16149_v37 = vcombine.high %v870_v32, %v878_v63  ;;  %v885_v38 = vld [vmem:[%s18420_s27 + $0xfb0] sm:$0xff]  ;;  %v966_v27 = vld [vmem:[%s18420_s27 + $0x1238] sm:$0xff] }
 0x3dc   : > { %v16162_v56 = vcombine.low %v885_v38, %v893_v39  ;;  %v974_v30 = vld [vmem:[%s18420_s27 + $0x1278] sm:$0xff] }
 0x3de   : > { %7653 = vmatpush1.bf16.msra.mxu0 %v16050_v45  ;;  %7817 = vmatpush1.bf16.msra.mxu1 %v16052_v25  ;;  %v16148_v45 = vcombine.low %v870_v32, %v878_v63  ;;  %v16163_v25 = vcombine.high %v885_v38, %v893_v39  ;;  %v990_v38 = vld [vmem:[%s18420_s27 + $0x12f8] sm:$0xff] }
 0x3df   : > { %7654 = vmatprep.subr.bf16.mxu0 %v16067_v47  ;;  %7818 = vmatprep.subr.bf16.mxu1 %v16069_v48  ;;  %v16165_v47 = vcombine.high %v886_v40, %v894_v42  ;;  %v901_v48 = vld [vmem:[%s18420_s27 + $0x1030] sm:$0xff] }
 0x3e0   : > { %v16178_v1 = vcombine.low %v901_v48, %v909_v49 }
 0x3e2   : > { %7655 = vmatpush1.bf16.msra.mxu0 %v16066_v57  ;;  %7819 = vmatpush1.bf16.msra.mxu1 %v16068_v58  ;;  %v16164_v57 = vcombine.low %v886_v40, %v894_v42  ;;  %v16179_v58 = vcombine.high %v901_v48, %v909_v49  ;;  %v16244_v40 = vcombine.low %v966_v27, %v974_v30  ;;  %v1006_v48 = vld [vmem:[%s18420_s27 + $0x1378] sm:$0xff] }
 0x3e3   : > { %7656 = vmatprep.subr.bf16.mxu0 %v16083_v34  ;;  %7820 = vmatprep.subr.bf16.mxu1 %v16085_v60  ;;  %v16181_v34 = vcombine.high %v902_v52, %v910_v54  ;;  %v917_v60 = vld [vmem:[%s18420_s27 + $0x10b0] sm:$0xff] }
 0x3e4   : > { %v16194_v11 = vcombine.low %v917_v60, %v925_v61 }
 0x3e6   : > { %7657 = vmatpush1.bf16.msra.mxu0 %v16082_v3  ;;  %7821 = vmatpush1.bf16.msra.mxu1 %v16084_v4  ;;  %v16180_v3 = vcombine.low %v902_v52, %v910_v54  ;;  %v16195_v4 = vcombine.high %v917_v60, %v925_v61  ;;  %v1022_v60 = vld [vmem:[%s18420_s27 + $0x13f8] sm:$0xff] }
 0x3e7   : > { %7658 = vmatprep.subr.bf16.mxu0 %v16099_v5  ;;  %7822 = vmatprep.subr.bf16.mxu1 %v16101_v6  ;;  %v16197_v5 = vcombine.high %v918_v62, %v926_v0  ;;  %v933_v6 = vld [vmem:[%s18420_s27 + $0x1130] sm:$0xff] }
 0x3ea   : > { %7659 = vmatpush1.bf16.msra.mxu0 %v16098_v31  ;;  %7823 = vmatpush1.bf16.msra.mxu1 %v16100_v9  ;;  %v16196_v31 = vcombine.low %v918_v62, %v926_v0  ;;  %v16211_v9 = vcombine.high %v933_v6, %v941_v7 }
 0x3eb   : > { %7660 = vmatprep.subr.bf16.mxu0 %v16115_v13  ;;  %7824 = vmatprep.subr.bf16.mxu1 %v16117_v14  ;;  %v16213_v13 = vcombine.high %v934_v8, %v942_v10  ;;  %v949_v14 = vld [vmem:[%s18420_s27 + $0x11b0] sm:$0xff] }
 0x3ec   : > { %v16226_v32 = vcombine.low %v949_v14, %v957_v15 }
 0x3ee   : > { %7661 = vmatpush1.bf16.msra.mxu0 %v16114_v19  ;;  %7825 = vmatpush1.bf16.msra.mxu1 %v16116_v20  ;;  %v16227_v19 = vcombine.high %v949_v14, %v957_v15  ;;  %v16229_v20 = vcombine.high %v950_v59, %v958_v17  ;;  %v1054_v14 = vld [vmem:[%s18420_s27 + $0x14f8] sm:$0xff] }
 0x3ef   : > { %7662 = vmatprep.subr.bf16.mxu0 %v16131_v22  ;;  %7826 = vmatprep.subr.bf16.mxu1 %v16133_v24  ;;  %v965_v22 = vld [vmem:[%s18420_s27 + $0x1230] sm:$0xff] }
 0x3f0   : > { %v973_v24 = vld [vmem:[%s18420_s27 + $0x1270] sm:$0xff] }
 0x3f1   : > { %v16243_v63 = vcombine.high %v965_v22, %v973_v24  ;;  %v16242_v39 = vcombine.low %v965_v22, %v973_v24  ;;  %v1070_v22 = vld [vmem:[%s18420_s27 + $0x1578] sm:$0xff] }
 0x3f2   : > { %7663 = vmatpush1.bf16.msra.mxu0 %v16130_v35  ;;  %7827 = vmatpush1.bf16.msra.mxu1 %v16132_v55  ;;  %v16245_v35 = vcombine.high %v966_v27, %v974_v30  ;;  %v981_v55 = vld [vmem:[%s18420_s27 + $0x12b0] sm:$0xff] }
 0x3f3   : > { %7664 = vmatprep.subr.bf16.mxu0 %v16147_v36  ;;  %7828 = vmatprep.subr.bf16.mxu1 %v16149_v37  ;;  %v989_v36 = vld [vmem:[%s18420_s27 + $0x12f0] sm:$0xff]  ;;  %v982_v37 = vld [vmem:[%s18420_s27 + $0x12b8] sm:$0xff] }
 0x3f4   : > { %v16259_v42 = vcombine.high %v981_v55, %v989_v36  ;;  %v16258_v49 = vcombine.low %v981_v55, %v989_v36  ;;  %v16260_v52 = vcombine.low %v982_v37, %v990_v38  ;;  %v1086_v55 = vld [vmem:[%s18420_s27 + $0x15f8] sm:$0xff] }
 0x3f6   : > { %7665 = vmatpush1.bf16.msra.mxu0 %v16146_v43  ;;  %7829 = vmatpush1.bf16.msra.mxu1 %v16148_v45  ;;  %v16261_v43 = vcombine.high %v982_v37, %v990_v38  ;;  %v997_v45 = vld [vmem:[%s18420_s27 + $0x1330] sm:$0xff] }
 0x3f7   : > { %7666 = vmatprep.subr.bf16.mxu0 %v16163_v25  ;;  %7830 = vmatprep.subr.bf16.mxu1 %v16165_v47  ;;  %v1005_v25 = vld [vmem:[%s18420_s27 + $0x1370] sm:$0xff]  ;;  %v998_v47 = vld [vmem:[%s18420_s27 + $0x1338] sm:$0xff] }
 0x3f8   : > { %v16275_v54 = vcombine.high %v997_v45, %v1005_v25  ;;  %v16274_v61 = vcombine.low %v997_v45, %v1005_v25  ;;  %v16276_v62 = vcombine.low %v998_v47, %v1006_v48  ;;  %v1102_v45 = vld [vmem:[%s18420_s27 + $0x1678] sm:$0xff] }
 0x3fa   : > { %7667 = vmatpush1.bf16.msra.mxu0 %v16162_v56  ;;  %7831 = vmatpush1.bf16.msra.mxu1 %v16164_v57  ;;  %v16277_v56 = vcombine.high %v998_v47, %v1006_v48  ;;  %v1013_v57 = vld [vmem:[%s18420_s27 + $0x13b0] sm:$0xff] }
 0x3fb   : > { %7677 = vmatprep.subr.bf16.mxu0 %v16179_v58  ;;  %7841 = vmatprep.subr.bf16.mxu1 %v16181_v34  ;;  %v1021_v58 = vld [vmem:[%s18420_s27 + $0x13f0] sm:$0xff]  ;;  %v1014_v34 = vld [vmem:[%s18420_s27 + $0x13b8] sm:$0xff] }
 0x3fc   : > { %v16291_v0 = vcombine.high %v1013_v57, %v1021_v58  ;;  %v16292_v8 = vcombine.low %v1014_v34, %v1022_v60 }
 0x3fd   : > { %7669 = vmatmul.mubr.bf16.vlgmr.msra.gmra.mrb[12].mxu0 %v18626_v41  ;;  %7833 = vmatmul.mubr.bf16.vlgmr.msra.gmra.mrb[12].mxu1 %v18626_v41  ;;  %v16210_v41 = vcombine.low %v933_v6, %v941_v7  ;;  %v1038_v6 = vld [vmem:[%s18420_s27 + $0x1478] sm:$0xff]  ;;  %v16290_v7 = vcombine.low %v1013_v57, %v1021_v58 }
 0x3fe   : > { %7678 = vmatpush1.bf16.msra.mxu0 %v16178_v1  ;;  %7842 = vmatpush1.bf16.msra.mxu1 %v16180_v3  ;;  %v16293_v1 = vcombine.high %v1014_v34, %v1022_v60  ;;  %v1029_v3 = vld [vmem:[%s18420_s27 + $0x1430] sm:$0xff]  ;;  %v1118_v57 = vld [vmem:[%s18420_s27 + $0x16f8] sm:$0xff] }
 0x3ff   : > { %7679 = vmatprep.subr.bf16.mxu0 %v16195_v4  ;;  %7843 = vmatprep.subr.bf16.mxu1 %v16197_v5  ;;  %v1037_v4 = vld [vmem:[%s18420_s27 + $0x1470] sm:$0xff]  ;;  %v1030_v5 = vld [vmem:[%s18420_s27 + $0x1438] sm:$0xff] }
 0x400   : > { %7709 = vmatprep.mubr.bf16.mxu0 %v18632_v51  ;;  %7873 = vmatprep.mubr.bf16.mxu1 %v18632_v51  ;;  %v16228_v51 = vcombine.low %v950_v59, %v958_v17  ;;  %v16307_v10 = vcombine.high %v1029_v3, %v1037_v4  ;;  %v16306_v15 = vcombine.low %v1029_v3, %v1037_v4  ;;  %v1134_v3 = vld [vmem:[%s18420_s27 + $0x1778] sm:$0xff] }
 0x401   : > { %v16308_v59 = vcombine.low %v1030_v5, %v1038_v6 }
 0x402   : > { %7680 = vmatpush1.bf16.msra.mxu0 %v16194_v11  ;;  %7844 = vmatpush1.bf16.msra.mxu1 %v16196_v31  ;;  %v16309_v11 = vcombine.high %v1030_v5, %v1038_v6  ;;  %v1045_v31 = vld [vmem:[%s18420_s27 + $0x14b0] sm:$0xff] }
 0x403   : > { %7681 = vmatprep.subr.bf16.mxu0 %v16211_v9  ;;  %7845 = vmatprep.subr.bf16.mxu1 %v16213_v13  ;;  %v1053_v9 = vld [vmem:[%s18420_s27 + $0x14f0] sm:$0xff]  ;;  %v1046_v13 = vld [vmem:[%s18420_s27 + $0x14b8] sm:$0xff] }
 0x404   : > { %v16323_v17 = vcombine.high %v1045_v31, %v1053_v9  ;;  %v16322_v24 = vcombine.low %v1045_v31, %v1053_v9  ;;  %v16324_v27 = vcombine.low %v1046_v13, %v1054_v14  ;;  %v1150_v31 = vld [vmem:[%s18420_s27 + $0x17f8] sm:$0xff] }
 0x406   : > { %7682 = vmatpush1.bf16.msra.mxu0 %v16210_v41  ;;  %7846 = vmatpush1.bf16.msra.mxu1 %v16212_v18  ;;  %v16325_v41 = vcombine.high %v1046_v13, %v1054_v14  ;;  %v1061_v18 = vld [vmem:[%s18420_s27 + $0x1530] sm:$0xff] }
 0x407   : > { %7683 = vmatprep.subr.bf16.mxu0 %v16227_v19  ;;  %7847 = vmatprep.subr.bf16.mxu1 %v16229_v20  ;;  %v1069_v19 = vld [vmem:[%s18420_s27 + $0x1570] sm:$0xff]  ;;  %v1062_v20 = vld [vmem:[%s18420_s27 + $0x1538] sm:$0xff] }
 0x408   : > { %v16339_v30 = vcombine.high %v1061_v18, %v1069_v19  ;;  %v16338_v36 = vcombine.low %v1061_v18, %v1069_v19  ;;  %v16340_v37 = vcombine.low %v1062_v20, %v1070_v22  ;;  %v1166_v18 = vld [vmem:[%s18420_s27 + $0x1878] sm:$0xff] }
 0x40a   : > { %7684 = vmatpush1.bf16.msra.mxu0 %v16226_v32  ;;  %7848 = vmatpush1.bf16.msra.mxu1 %v16228_v51  ;;  %v16341_v32 = vcombine.high %v1062_v20, %v1070_v22  ;;  %v1077_v51 = vld [vmem:[%s18420_s27 + $0x15b0] sm:$0xff] }
 0x40b   : > { %7685 = vmatprep.subr.bf16.mxu0 %v16243_v63  ;;  %7849 = vmatprep.subr.bf16.mxu1 %v16245_v35  ;;  %v1085_v63 = vld [vmem:[%s18420_s27 + $0x15f0] sm:$0xff]  ;;  %v1078_v35 = vld [vmem:[%s18420_s27 + $0x15b8] sm:$0xff] }
 0x40c   : > { %v16355_v38 = vcombine.high %v1077_v51, %v1085_v63  ;;  %v16354_v25 = vcombine.low %v1077_v51, %v1085_v63  ;;  %v16356_v47 = vcombine.low %v1078_v35, %v1086_v55  ;;  %v1182_v51 = vld [vmem:[%s18420_s27 + $0x18f8] sm:$0xff] }
 0x40e   : > { %7686 = vmatpush1.bf16.msra.mxu0 %v16242_v39  ;;  %7850 = vmatpush1.bf16.msra.mxu1 %v16244_v40  ;;  %v16357_v39 = vcombine.high %v1078_v35, %v1086_v55  ;;  %v1093_v40 = vld [vmem:[%s18420_s27 + $0x1630] sm:$0xff] }
 0x40f   : > { %7687 = vmatprep.subr.bf16.mxu0 %v16259_v42  ;;  %7851 = vmatprep.subr.bf16.mxu1 %v16261_v43  ;;  %v1101_v42 = vld [vmem:[%s18420_s27 + $0x1670] sm:$0xff]  ;;  %v1094_v43 = vld [vmem:[%s18420_s27 + $0x1638] sm:$0xff] }
 0x410   : > { %v16371_v48 = vcombine.high %v1093_v40, %v1101_v42  ;;  %v16370_v58 = vcombine.low %v1093_v40, %v1101_v42  ;;  %v16372_v34 = vcombine.low %v1094_v43, %v1102_v45  ;;  %v1198_v40 = vld [vmem:[%s18420_s27 + $0x1978] sm:$0xff] }
 0x412   : > { %7688 = vmatpush1.bf16.msra.mxu0 %v16258_v49  ;;  %7852 = vmatpush1.bf16.msra.mxu1 %v16260_v52  ;;  %v16373_v49 = vcombine.high %v1094_v43, %v1102_v45  ;;  %v1109_v52 = vld [vmem:[%s18420_s27 + $0x16b0] sm:$0xff] }
 0x413   : > { %7689 = vmatprep.subr.bf16.mxu0 %v16275_v54  ;;  %7853 = vmatprep.subr.bf16.mxu1 %v16277_v56  ;;  %v1117_v54 = vld [vmem:[%s18420_s27 + $0x16f0] sm:$0xff]  ;;  %v1110_v56 = vld [vmem:[%s18420_s27 + $0x16b8] sm:$0xff] }
 0x414   : > { %v16387_v60 = vcombine.high %v1109_v52, %v1117_v54  ;;  %v16386_v4 = vcombine.low %v1109_v52, %v1117_v54  ;;  %v16388_v5 = vcombine.low %v1110_v56, %v1118_v57  ;;  %v1214_v52 = vld [vmem:[%s18420_s27 + $0x19f8] sm:$0xff] }
 0x416   : > { %7690 = vmatpush1.bf16.msra.mxu0 %v16274_v61  ;;  %7854 = vmatpush1.bf16.msra.mxu1 %v16276_v62  ;;  %v16389_v61 = vcombine.high %v1110_v56, %v1118_v57  ;;  %v1125_v62 = vld [vmem:[%s18420_s27 + $0x1730] sm:$0xff] }
 0x417   : > { %7691 = vmatprep.subr.bf16.mxu0 %v16291_v0  ;;  %7855 = vmatprep.subr.bf16.mxu1 %v16293_v1  ;;  %v1133_v0 = vld [vmem:[%s18420_s27 + $0x1770] sm:$0xff]  ;;  %v1126_v1 = vld [vmem:[%s18420_s27 + $0x1738] sm:$0xff] }
 0x418   : > { %v16403_v6 = vcombine.high %v1125_v62, %v1133_v0  ;;  %v16402_v9 = vcombine.low %v1125_v62, %v1133_v0  ;;  %v16404_v13 = vcombine.low %v1126_v1, %v1134_v3 }
 0x41a   : > { %7692 = vmatpush1.bf16.msra.mxu0 %v16290_v7  ;;  %7856 = vmatpush1.bf16.msra.mxu1 %v16292_v8  ;;  %v16405_v7 = vcombine.high %v1126_v1, %v1134_v3  ;;  %v1141_v8 = vld [vmem:[%s18420_s27 + $0x17b0] sm:$0xff] }
 0x41b   : > { %7693 = vmatprep.subr.bf16.mxu0 %v16307_v10  ;;  %7857 = vmatprep.subr.bf16.mxu1 %v16309_v11  ;;  %v1149_v10 = vld [vmem:[%s18420_s27 + $0x17f0] sm:$0xff]  ;;  %v1142_v11 = vld [vmem:[%s18420_s27 + $0x17b8] sm:$0xff] }
 0x41c   : > { %v16419_v14 = vcombine.high %v1141_v8, %v1149_v10  ;;  %v16418_v19 = vcombine.low %v1141_v8, %v1149_v10  ;;  %v16420_v20 = vcombine.low %v1142_v11, %v1150_v31  ;;  %v1237_v3 = vld [vmem:[%s18420_s27 + $0x1ab0] sm:$0xff] }
 0x41e   : > { %7694 = vmatpush1.bf16.msra.mxu0 %v16306_v15  ;;  %7858 = vmatpush1.bf16.msra.mxu1 %v16308_v59  ;;  %v16421_v15 = vcombine.high %v1142_v11, %v1150_v31  ;;  %v1157_v59 = vld [vmem:[%s18420_s27 + $0x1830] sm:$0xff] }
 0x41f   : > { %7695 = vmatprep.subr.bf16.mxu0 %v16323_v17  ;;  %7859 = vmatprep.subr.bf16.mxu1 %v16325_v41  ;;  %v1165_v17 = vld [vmem:[%s18420_s27 + $0x1870] sm:$0xff]  ;;  %v1158_v41 = vld [vmem:[%s18420_s27 + $0x1838] sm:$0xff] }
 0x420   : > { %v16435_v22 = vcombine.high %v1157_v59, %v1165_v17  ;;  %v16434_v63 = vcombine.low %v1157_v59, %v1165_v17  ;;  %v16436_v35 = vcombine.low %v1158_v41, %v1166_v18  ;;  %v1253_v31 = vld [vmem:[%s18420_s27 + $0x1b30] sm:$0xff] }
 0x422   : > { %7696 = vmatpush1.bf16.msra.mxu0 %v16322_v24  ;;  %7860 = vmatpush1.bf16.msra.mxu1 %v16324_v27  ;;  %v16437_v24 = vcombine.high %v1158_v41, %v1166_v18  ;;  %v1173_v27 = vld [vmem:[%s18420_s27 + $0x18b0] sm:$0xff] }
 0x423   : > { %7697 = vmatprep.subr.bf16.mxu0 %v16339_v30  ;;  %7861 = vmatprep.subr.bf16.mxu1 %v16341_v32  ;;  %v1181_v30 = vld [vmem:[%s18420_s27 + $0x18f0] sm:$0xff]  ;;  %v1174_v32 = vld [vmem:[%s18420_s27 + $0x18b8] sm:$0xff] }
 0x424   : > { %v16451_v55 = vcombine.high %v1173_v27, %v1181_v30  ;;  %v16450_v42 = vcombine.low %v1173_v27, %v1181_v30  ;;  %v16452_v43 = vcombine.low %v1174_v32, %v1182_v51  ;;  %v1270_v27 = vld [vmem:[%s18420_s27 + $0x1bb8] sm:$0xff] }
 0x425   : > { %v1278_v30 = vld [vmem:[%s18420_s27 + $0x1bf8] sm:$0xff] }
 0x426   : > { %7698 = vmatpush1.bf16.msra.mxu0 %v16338_v36  ;;  %7862 = vmatpush1.bf16.msra.mxu1 %v16340_v37  ;;  %v16453_v36 = vcombine.high %v1174_v32, %v1182_v51  ;;  %v1189_v37 = vld [vmem:[%s18420_s27 + $0x1930] sm:$0xff] }
 0x427   : > { %7699 = vmatprep.subr.bf16.mxu0 %v16355_v38  ;;  %7863 = vmatprep.subr.bf16.mxu1 %v16357_v39  ;;  %v1197_v38 = vld [vmem:[%s18420_s27 + $0x1970] sm:$0xff]  ;;  %v1190_v39 = vld [vmem:[%s18420_s27 + $0x1938] sm:$0xff] }
 0x428   : > { %v16467_v45 = vcombine.high %v1189_v37, %v1197_v38  ;;  %v16468_v54 = vcombine.low %v1190_v39, %v1198_v40 }
 0x42a   : > { %7700 = vmatpush1.bf16.msra.mxu0 %v16354_v25  ;;  %7864 = vmatpush1.bf16.msra.mxu1 %v16356_v47  ;;  %v16469_v25 = vcombine.high %v1190_v39, %v1198_v40  ;;  %v1205_v47 = vld [vmem:[%s18420_s27 + $0x19b0] sm:$0xff] }
 0x42b   : > { %7701 = vmatprep.subr.bf16.mxu0 %v16371_v48  ;;  %7865 = vmatprep.subr.bf16.mxu1 %v16373_v49  ;;  %v1213_v48 = vld [vmem:[%s18420_s27 + $0x19f0] sm:$0xff]  ;;  %v1206_v49 = vld [vmem:[%s18420_s27 + $0x19b8] sm:$0xff] }
 0x42c   : > { %v16483_v56 = vcombine.high %v1205_v47, %v1213_v48  ;;  %v16485_v57 = vcombine.high %v1206_v49, %v1214_v52  ;;  %v16482_v62 = vcombine.low %v1205_v47, %v1213_v48  ;;  %v1285_v39 = vld [vmem:[%s18420_s27 + $0x1c30] sm:$0xff]  ;;  %v16548_v47 = vcombine.low %v1270_v27, %v1278_v30 }
 0x42d   : > { %v1293_v40 = vld [vmem:[%s18420_s27 + $0x1c70] sm:$0xff] }
 0x42e   : > { %7702 = vmatpush1.bf16.msra.mxu0 %v16370_v58  ;;  %7866 = vmatpush1.bf16.msra.mxu1 %v16372_v34  ;;  %v1221_v58 = vld [vmem:[%s18420_s27 + $0x1a30] sm:$0xff]  ;;  %v16563_v48 = vcombine.high %v1285_v39, %v1293_v40 }
 0x42f   : > { %7703 = vmatprep.subr.bf16.mxu0 %v16387_v60  ;;  %7867 = vmatprep.subr.bf16.mxu1 %v16389_v61  ;;  %v1229_v34 = vld [vmem:[%s18420_s27 + $0x1a70] sm:$0xff]  ;;  %v1222_v60 = vld [vmem:[%s18420_s27 + $0x1a38] sm:$0xff] }
 0x430   : > { %v1230_v61 = vld [vmem:[%s18420_s27 + $0x1a78] sm:$0xff]  ;;  %v16499_v0 = vcombine.high %v1221_v58, %v1229_v34 }
 0x431   : > { %v16501_v1 = vcombine.high %v1222_v60, %v1230_v61  ;;  %v16500_v8 = vcombine.low %v1222_v60, %v1230_v61  ;;  %v1317_v61 = vld [vmem:[%s18420_s27 + $0x1d30] sm:$0xff] }
 0x432   : > { %7704 = vmatpush1.bf16.msra.mxu0 %v16386_v4  ;;  %7868 = vmatpush1.bf16.msra.mxu1 %v16388_v5  ;;  %v1245_v4 = vld [vmem:[%s18420_s27 + $0x1af0] sm:$0xff]  ;;  %v1238_v5 = vld [vmem:[%s18420_s27 + $0x1ab8] sm:$0xff] }
 0x433   : > { %7705 = vmatprep.subr.bf16.mxu0 %v16403_v6  ;;  %7869 = vmatprep.subr.bf16.mxu1 %v16405_v7  ;;  %v1246_v6 = vld [vmem:[%s18420_s27 + $0x1af8] sm:$0xff]  ;;  %v16498_v7 = vcombine.low %v1221_v58, %v1229_v34  ;;  %v16515_v10 = vcombine.high %v1237_v3, %v1245_v4 }
 0x434   : > { %v16517_v11 = vcombine.high %v1238_v5, %v1246_v6  ;;  %v16516_v59 = vcombine.low %v1238_v5, %v1246_v6  ;;  %v1333_v6 = vld [vmem:[%s18420_s27 + $0x1db0] sm:$0xff] }
 0x436   : > { %7706 = vmatpush1.bf16.msra.mxu0 %v16402_v9  ;;  %7870 = vmatpush1.bf16.msra.mxu1 %v16404_v13  ;;  %v1261_v9 = vld [vmem:[%s18420_s27 + $0x1b70] sm:$0xff]  ;;  %v1254_v13 = vld [vmem:[%s18420_s27 + $0x1b38] sm:$0xff] }
 0x437   : > { %7707 = vmatprep.subr.bf16.mxu0 %v16419_v14  ;;  %7871 = vmatprep.subr.bf16.mxu1 %v16421_v15  ;;  %v1262_v14 = vld [vmem:[%s18420_s27 + $0x1b78] sm:$0xff]  ;;  %v16514_v15 = vcombine.low %v1237_v3, %v1245_v4  ;;  %v16531_v17 = vcombine.high %v1253_v31, %v1261_v9 }
 0x438   : > { %v16533_v18 = vcombine.high %v1254_v13, %v1262_v14 }
 0x43a   : > { %7708 = vmatpush1.bf16.msra.mxu0 %v16418_v19  ;;  %7872 = vmatpush1.bf16.msra.mxu1 %v16420_v20  ;;  %v1269_v19 = vld [vmem:[%s18420_s27 + $0x1bb0] sm:$0xff] }
 0x43b   : > { %7718 = vmatprep.subr.bf16.mxu0 %v16435_v22  ;;  %7882 = vmatprep.subr.bf16.mxu1 %v16437_v24  ;;  %v1277_v20 = vld [vmem:[%s18420_s27 + $0x1bf0] sm:$0xff] }
 0x43d   : > { %7710 = vmatmul.mubr.bf16.vlgmr.msra.gmra.mrb[12].mxu0 %v18707_v2  ;;  %7874 = vmatmul.mubr.bf16.vlgmr.msra.gmra.mrb[12].mxu1 %v18707_v2  ;;  %v16466_v2 = vcombine.low %v1189_v37, %v1197_v38  ;;  %v16547_v37 = vcombine.high %v1269_v19, %v1277_v20  ;;  %v16549_v38 = vcombine.high %v1270_v27, %v1278_v30  ;;  %v1365_v30 = vld [vmem:[%s18420_s27 + $0x1eb0] sm:$0xff] }
 0x43e   : > { %7719 = vmatpush1.bf16.msra.mxu0 %v16434_v63  ;;  %7883 = vmatpush1.bf16.msra.mxu1 %v16436_v35  ;;  %v16530_v63 = vcombine.low %v1253_v31, %v1261_v9 }
 0x43f   : > { %7720 = vmatprep.subr.bf16.mxu0 %v16451_v55  ;;  %7884 = vmatprep.subr.bf16.mxu1 %v16453_v36  ;;  %v16532_v36 = vcombine.low %v1254_v13, %v1262_v14  ;;  %v1349_v14 = vld [vmem:[%s18420_s27 + $0x1e30] sm:$0xff] }
 0x440   : > { %7750 = vmatprep.mubr.bf16.mxu0 %v18713_v12  ;;  %7914 = vmatprep.mubr.bf16.mxu1 %v18713_v12  ;;  %v16484_v12 = vcombine.low %v1206_v49, %v1214_v52  ;;  %v1301_v52 = vld [vmem:[%s18420_s27 + $0x1cb0] sm:$0xff] }
 0x442   : > { %7721 = vmatpush1.bf16.msra.mxu0 %v16450_v42  ;;  %7885 = vmatpush1.bf16.msra.mxu1 %v16452_v43  ;;  %v1286_v43 = vld [vmem:[%s18420_s27 + $0x1c38] sm:$0xff] }
 0x443   : > { %7722 = vmatprep.subr.bf16.mxu0 %v16467_v45  ;;  %7886 = vmatprep.subr.bf16.mxu1 %v16469_v25  ;;  %v1294_v45 = vld [vmem:[%s18420_s27 + $0x1c78] sm:$0xff]  ;;  %v16546_v25 = vcombine.low %v1269_v19, %v1277_v20 }
 0x444   : > { %v16565_v49 = vcombine.high %v1286_v43, %v1294_v45  ;;  %v16564_v58 = vcombine.low %v1286_v43, %v1294_v45  ;;  %v1389_v43 = vld [vmem:[%s18420_s27 + $0x1f70] sm:$0xff]  ;;  %v1382_v45 = vld [vmem:[%s18420_s27 + $0x1f38] sm:$0xff] }
 0x446   : > { %7723 = vmatpush1.bf16.msra.mxu0 %v16466_v2  ;;  %7887 = vmatpush1.bf16.msra.mxu1 %v16468_v54  ;;  %v1309_v2 = vld [vmem:[%s18420_s27 + $0x1cf0] sm:$0xff]  ;;  %v1302_v54 = vld [vmem:[%s18420_s27 + $0x1cb8] sm:$0xff] }
 0x447   : > { %7724 = vmatprep.subr.bf16.mxu0 %v16483_v56  ;;  %7888 = vmatprep.subr.bf16.mxu1 %v16485_v57  ;;  %v1310_v56 = vld [vmem:[%s18420_s27 + $0x1cf8] sm:$0xff]  ;;  %v16562_v57 = vcombine.low %v1285_v39, %v1293_v40  ;;  %v16579_v34 = vcombine.high %v1301_v52, %v1309_v2 }
 0x448   : > { %v16581_v60 = vcombine.high %v1302_v54, %v1310_v56  ;;  %v16580_v3 = vcombine.low %v1302_v54, %v1310_v56  ;;  %v1397_v54 = vld [vmem:[%s18420_s27 + $0x1fb0] sm:$0xff] }
 0x449   : > { %v1405_v56 = vld [vmem:[%s18420_s27 + $0x1ff0] sm:$0xff] }
 0x44a   : > { %7725 = vmatpush1.bf16.msra.mxu0 %v16482_v62  ;;  %7889 = vmatpush1.bf16.msra.mxu1 %v16484_v12  ;;  %v1325_v62 = vld [vmem:[%s18420_s27 + $0x1d70] sm:$0xff]  ;;  %v1318_v12 = vld [vmem:[%s18420_s27 + $0x1d38] sm:$0xff] }
 0x44b   : > { %7726 = vmatprep.subr.bf16.mxu0 %v16499_v0  ;;  %7890 = vmatprep.subr.bf16.mxu1 %v16501_v1  ;;  %v1326_v0 = vld [vmem:[%s18420_s27 + $0x1d78] sm:$0xff]  ;;  %v16578_v1 = vcombine.low %v1301_v52, %v1309_v2  ;;  %v16595_v4 = vcombine.high %v1317_v61, %v1325_v62 }
 0x44c   : > { %v16597_v5 = vcombine.high %v1318_v12, %v1326_v0  ;;  %v16596_v31 = vcombine.low %v1318_v12, %v1326_v0  ;;  %v7987_v0 = vld [vmem:[%s19627_s14] sm:$0xff] }
 0x44e   : > { %7727 = vmatpush1.bf16.msra.mxu0 %v16498_v7  ;;  %7891 = vmatpush1.bf16.msra.mxu1 %v16500_v8  ;;  %v1341_v7 = vld [vmem:[%s18420_s27 + $0x1df0] sm:$0xff]  ;;  %v1334_v8 = vld [vmem:[%s18420_s27 + $0x1db8] sm:$0xff] }
 0x44f   : > { %7728 = vmatprep.subr.bf16.mxu0 %v16515_v10  ;;  %7892 = vmatprep.subr.bf16.mxu1 %v16517_v11  ;;  %v1342_v10 = vld [vmem:[%s18420_s27 + $0x1df8] sm:$0xff]  ;;  %v16594_v11 = vcombine.low %v1317_v61, %v1325_v62  ;;  %v16611_v9 = vcombine.high %v1333_v6, %v1341_v7  ;;  %v16675_v62 = vcombine.high %v1397_v54, %v1405_v56 }
 0x450   : > { %v19573_v41 = vpop.f32.mrb[8].mxu0  ;;  %v19577_v22 = vpop.f32.mrb[8].mxu1  ;;  %v16613_v13 = vcombine.high %v1334_v8, %v1342_v10  ;;  %v16612_v19 = vcombine.low %v1334_v8, %v1342_v10  ;;  %v7995_v10 = vld [vmem:[%s19627_s14 + $0x40] sm:$0xff] }
 0x451   : > { %v19579_v24 = vpop.f32.mrb[9].mxu0  ;;  %v19583_v32 = vpop.f32.mrb[9].mxu1 }
 0x452   : > { %v7428_v51 = vpop.f32.mrb[10].mxu0  ;;  %7729 = vmatpush1.bf16.msra.mxu0 %v16514_v15  ;;  %v7592_v35 = vpop.f32.mrb[10].mxu1  ;;  %7893 = vmatpush1.bf16.msra.mxu1 %v16516_v59  ;;  %v1357_v15 = vld [vmem:[%s18420_s27 + $0x1e70] sm:$0xff]  ;;  %v1350_v59 = vld [vmem:[%s18420_s27 + $0x1e38] sm:$0xff] }
 0x453   : > { %v7429_v55 = vpop.f32.mrb[11].mxu0  ;;  %7730 = vmatprep.subr.bf16.mxu0 %v16531_v17  ;;  %7894 = vmatprep.subr.bf16.mxu1 %v16533_v18  ;;  %v7593_v42 = vpop.f32.mrb[11].mxu1  ;;  %v1358_v17 = vld [vmem:[%s18420_s27 + $0x1e78] sm:$0xff]  ;;  %v16610_v18 = vcombine.low %v1333_v6, %v1341_v7  ;;  %v16627_v20 = vcombine.high %v1349_v14, %v1357_v15  ;;  %v1373_v51 = vld [vmem:[%s18420_s27 + $0x1ef0] sm:$0xff] }
 0x454   : > { %v16629_v27 = vcombine.high %v1350_v59, %v1358_v17  ;;  %v1374_v35 = vld [vmem:[%s18420_s27 + $0x1ef8] sm:$0xff]  ;;  %v1417_v55 = vsub.s32 1, %v18464_v44  ;;  %v16643_v39 = vcombine.high %v1365_v30, %v1373_v51  ;;  %v1381_v42 = vld [vmem:[%s18420_s27 + $0x1f30] sm:$0xff] }
 0x455   : > { %v16659_v52 = vcombine.high %v1381_v42, %v1389_v43 }
 0x456   : > { %7731 = vmatpush1.bf16.msra.mxu0 %v16530_v63  ;;  %7895 = vmatpush1.bf16.msra.mxu1 %v16532_v36  ;;  %v1366_v63 = vld [vmem:[%s18420_s27 + $0x1eb8] sm:$0xff]  ;;  %v16626_v36 = vcombine.low %v1349_v14, %v1357_v15  ;;  %v8000_v14 = vld [vmem:[%s19627_s14 + $0x68] sm:$0xff] }
 0x457   : > { %7732 = vmatprep.subr.bf16.mxu0 %v16547_v37  ;;  %7896 = vmatprep.subr.bf16.mxu1 %v16549_v38  ;;  %v19611_v37 = vld [vmem:[%s18429_s26] sm:$0xff]  ;;  %v16628_v38 = vcombine.low %v1350_v59, %v1358_v17  ;;  %v16645_v40 = vcombine.high %v1366_v63, %v1374_v35 }
 0x458   : > { %v8003_v17 = vld [vmem:[%s19627_s14 + $0x80] sm:$0xff] }
 0x45a   : > { %7733 = vmatpush1.bf16.msra.mxu0 %v16546_v25  ;;  %7897 = vmatpush1.bf16.msra.mxu1 %v16548_v47  ;;  %v1390_v25 = vld [vmem:[%s18420_s27 + $0x1f78] sm:$0xff]  ;;  %v1418_v47 = vrot.slane %v19611_v37, %v1417_v55 }
 0x45b   : > { %7734 = vmatprep.subr.bf16.mxu0 %v16563_v48  ;;  %7898 = vmatprep.subr.bf16.mxu1 %v16565_v49  ;;  %v16642_v48 = vcombine.low %v1365_v30, %v1373_v51  ;;  %v16644_v49 = vcombine.low %v1366_v63, %v1374_v35  ;;  %v16661_v2 = vcombine.high %v1382_v45, %v1390_v25  ;;  %v8008_v30 = vld [vmem:[%s19627_s14 + $0xa8] sm:$0xff] }
 0x45c   : > { %v16660_v61 = vcombine.low %v1382_v45, %v1390_v25 }
 0x45e   : > { %7735 = vmatpush1.bf16.msra.mxu0 %v16562_v57  ;;  %7899 = vmatpush1.bf16.msra.mxu1 %v16564_v58  ;;  %v1398_v57 = vld [vmem:[%s18420_s27 + $0x1fb8] sm:$0xff] }
 0x45f   : > { %7736 = vmatprep.subr.bf16.mxu0 %v16579_v34  ;;  %7900 = vmatprep.subr.bf16.mxu1 %v16581_v60  ;;  %v1406_v58 = vld [vmem:[%s18420_s27 + $0x1ff8] sm:$0xff]  ;;  %v17710_v34 = vadd.f32 %v19019_v29, %v1418_v47  ;;  %v16658_v60 = vcombine.low %v1381_v42, %v1389_v43  ;;  %v7988_v29 = vld [vmem:[%s19627_s14 + $0x8] sm:$0xff]  ;;  %v8019_v47 = vld [vmem:[%s19627_s14 + $0x100] sm:$0xff] }
 0x460   : > { %v16677_v12 = vcombine.high %v1398_v57, %v1406_v58  ;;  %v16676_v6 = vcombine.low %v1398_v57, %v1406_v58  ;;  %v8027_v58 = vld [vmem:[%s19627_s14 + $0x140] sm:$0xff] }
 0x461   : > { %vm7924_vm0 = vcmp.gt.f32.partialorder %v17710_v34, 0.0 }
 0x462   : > { %7737 = vmatpush1.bf16.msra.mxu0 %v16578_v1  ;;  %7901 = vmatpush1.bf16.msra.mxu1 %v16580_v3  ;;  %v7991_v1 = vld [vmem:[%s19627_s14 + $0x20] sm:$0xff]  ;;  %v7992_v3 = vld [vmem:[%s19627_s14 + $0x28] sm:$0xff] }
 0x463   : > { %7738 = vmatprep.subr.bf16.mxu0 %v16595_v4  ;;  %7902 = vmatprep.subr.bf16.mxu1 %v16597_v5  ;;  %v7940_v4 = vmul.f32 0.01, %v17710_v34  ;;  %v16674_v5 = vcombine.low %v1397_v54, %v1405_v56  ;;  %v16679_v7 = vcombine.high %v7987_v0, %v7991_v1  ;;  %v16681_v8 = vcombine.high %v7988_v29, %v7992_v3 }
 0x464   : > { %v16680_v15 = vcombine.low %v7988_v29, %v7992_v3  ;;  %v8035_v29 = vld [vmem:[%s19627_s14 + $0x180] sm:$0xff] }
 0x465   : > { %v8039_v3 = vld [vmem:[%s19627_s14 + $0x1a0] sm:$0xff] }
 0x466   : > { %7739 = vmatpush1.bf16.msra.mxu0 %v16594_v11  ;;  %7903 = vmatpush1.bf16.msra.mxu1 %v16596_v31  ;;  %v7999_v11 = vld [vmem:[%s19627_s14 + $0x60] sm:$0xff]  ;;  %v7956_v31 = vsel %vm7924_vm0, %v17710_v34, %v7940_v4  ;;  %v8036_v4 = vld [vmem:[%s19627_s14 + $0x188] sm:$0xff] }
 0x467   : > { %7740 = vmatprep.subr.bf16.mxu0 %v16611_v9  ;;  %7904 = vmatprep.subr.bf16.mxu1 %v16613_v13  ;;  %v16678_v9 = vcombine.low %v7987_v0, %v7991_v1  ;;  %v7996_v13 = vld [vmem:[%s19627_s14 + $0x48] sm:$0xff]  ;;  %v16687_v59 = vcombine.high %v7995_v10, %v7999_v11  ;;  %v16686_v51 = vcombine.low %v7995_v10, %v7999_v11  ;;  %v8031_v34 = vld [vmem:[%s19627_s14 + $0x160] sm:$0xff] }
 0x468   : > { %v16688_v63 = vcombine.low %v7996_v13, %v8000_v14  ;;  %v16719_v0 = vcombine.high %v8027_v58, %v8031_v34  ;;  %v8043_v11 = vld [vmem:[%s19627_s14 + $0x1c0] sm:$0xff] }
 0x46a   : > { %7741 = vmatpush1.bf16.msra.mxu0 %v16610_v18  ;;  %7905 = vmatpush1.bf16.msra.mxu1 %v16612_v19  ;;  %v8007_v18 = vld [vmem:[%s19627_s14 + $0xa0] sm:$0xff]  ;;  %v19639_v19 = vpack.c.bf16 %v7956_v31, %v7956_v31 }
 0x46b   : > { %7742 = vmatprep.subr.bf16.mxu0 %v16627_v20  ;;  %7906 = vmatprep.subr.bf16.mxu1 %v16629_v27  ;;  %v16689_v20 = vcombine.high %v7996_v13, %v8000_v14  ;;  %v8004_v27 = vld [vmem:[%s19627_s14 + $0x88] sm:$0xff]  ;;  %v16695_v35 = vcombine.high %v8003_v17, %v8007_v18  ;;  %v16694_v42 = vcombine.low %v8003_v17, %v8007_v18  ;;  %v8047_v31 = vld [vmem:[%s19627_s14 + $0x1e0] sm:$0xff] }
 0x46c   : > { %v16696_v43 = vcombine.low %v8004_v27, %v8008_v30  ;;  %v8048_v13 = vld [vmem:[%s19627_s14 + $0x1e8] sm:$0xff]  ;;  %v16726_v14 = vcombine.low %v8035_v29, %v8039_v3  ;;  %v8051_v18 = vld [vmem:[%s19627_s14 + $0x200] sm:$0xff] }
 0x46e   : > { %7743 = vmatpush1.bf16.msra.mxu0 %v16626_v36  ;;  %7907 = vmatpush1.bf16.msra.mxu1 %v16628_v38  ;;  %v16697_v36 = vcombine.high %v8004_v27, %v8008_v30  ;;  %v8011_v38 = vld [vmem:[%s19627_s14 + $0xc0] sm:$0xff]  ;;  %v8052_v27 = vld [vmem:[%s19627_s14 + $0x208] sm:$0xff] }
 0x46f   : > { %7744 = vmatprep.subr.bf16.mxu0 %v16643_v39  ;;  %7908 = vmatprep.subr.bf16.mxu1 %v16645_v40  ;;  %v8015_v39 = vld [vmem:[%s19627_s14 + $0xe0] sm:$0xff]  ;;  %v8012_v40 = vld [vmem:[%s19627_s14 + $0xc8] sm:$0xff] }
 0x470   : > { %v16703_v45 = vcombine.high %v8011_v38, %v8015_v39  ;;  %v8056_v30 = vld [vmem:[%s19627_s14 + $0x228] sm:$0xff] }
 0x472   : > { %7745 = vmatpush1.bf16.msra.mxu0 %v16642_v48  ;;  %7909 = vmatpush1.bf16.msra.mxu1 %v16644_v49  ;;  %v8023_v48 = vld [vmem:[%s19627_s14 + $0x120] sm:$0xff]  ;;  %v8020_v49 = vld [vmem:[%s19627_s14 + $0x108] sm:$0xff] }
 0x473   : > { %7746 = vmatprep.subr.bf16.mxu0 %v16659_v52  ;;  %7910 = vmatprep.subr.bf16.mxu1 %v16661_v2  ;;  %v8024_v52 = vld [vmem:[%s19627_s14 + $0x128] sm:$0xff]  ;;  %v16702_v2 = vcombine.low %v8011_v38, %v8015_v39  ;;  %v16711_v56 = vcombine.high %v8019_v47, %v8023_v48  ;;  %v8059_v38 = vld [vmem:[%s19627_s14 + $0x240] sm:$0xff] }
 0x474   : > { %v16713_v57 = vcombine.high %v8020_v49, %v8024_v52  ;;  %v8063_v39 = vld [vmem:[%s19627_s14 + $0x260] sm:$0xff] }
 0x476   : > { %7747 = vmatpush1.bf16.msra.mxu0 %v16658_v60  ;;  %7911 = vmatpush1.bf16.msra.mxu1 %v16660_v61  ;;  %v8028_v60 = vld [vmem:[%s19627_s14 + $0x148] sm:$0xff] }
 0x477   : > { %7748 = vmatprep.subr.bf16.mxu0 %v16675_v62  ;;  %7912 = vmatprep.subr.bf16.mxu1 %v16677_v12  ;;  %v8032_v61 = vld [vmem:[%s19627_s14 + $0x168] sm:$0xff]  ;;  %v16710_v62 = vcombine.low %v8019_v47, %v8023_v48  ;;  %v16712_v12 = vcombine.low %v8020_v49, %v8024_v52  ;;  %v8067_v47 = vld [vmem:[%s19627_s14 + $0x280] sm:$0xff] }
 0x478   : > { %v16721_v1 = vcombine.high %v8028_v60, %v8032_v61  ;;  %v8071_v48 = vld [vmem:[%s19627_s14 + $0x2a0] sm:$0xff]  ;;  %v8068_v49 = vld [vmem:[%s19627_s14 + $0x288] sm:$0xff] }
 0x479   : > { %v8072_v52 = vld [vmem:[%s19627_s14 + $0x2a8] sm:$0xff] }
 0x47a   : > { %7749 = vmatpush1.bf16.msra.mxu0 %v16674_v5  ;;  %7913 = vmatpush1.bf16.msra.mxu1 %v16676_v6  ;;  %v8040_v5 = vld [vmem:[%s19627_s14 + $0x1a8] sm:$0xff]  ;;  %v16718_v6 = vcombine.low %v8027_v58, %v8031_v34  ;;  %v8075_v58 = vld [vmem:[%s19627_s14 + $0x2c0] sm:$0xff] }
 0x47b   : > { %14131 = vmatprep.subr.bf16.mxu0 %v16679_v7  ;;  %14459 = vmatprep.subr.bf16.mxu1 %v16681_v8  ;;  %v16720_v7 = vcombine.low %v8028_v60, %v8032_v61  ;;  %v16727_v8 = vcombine.high %v8035_v29, %v8039_v3  ;;  %v16729_v10 = vcombine.high %v8036_v4, %v8040_v5  ;;  %v8079_v34 = vld [vmem:[%s19627_s14 + $0x2e0] sm:$0xff]  ;;  %v8076_v60 = vld [vmem:[%s19627_s14 + $0x2c8] sm:$0xff] }
 0x47c   : > { %v8080_v61 = vld [vmem:[%s19627_s14 + $0x2e8] sm:$0xff]  ;;  %v8083_v29 = vld [vmem:[%s19627_s14 + $0x300] sm:$0xff] }
 0x47d   : > { %7751 = vmatmul.mubr.bf16.vlgmr.msra.gmra.mrb[12].mxu0 %v18781_v26  ;;  %7915 = vmatmul.mubr.bf16.vlgmr.msra.gmra.mrb[12].mxu1 %v18781_v26  ;;  %v8016_v26 = vld [vmem:[%s19627_s14 + $0xe8] sm:$0xff]  ;;  %v8087_v3 = vld [vmem:[%s19627_s14 + $0x320] sm:$0xff] }
 0x47e   : > { %14132 = vmatpush1.bf16.msra.mxu0 %v16678_v9  ;;  %14163 = vmatprep.mubr.bf16.mxu0 %v19639_v19  ;;  %v16705_v25 = vcombine.high %v8012_v40, %v8016_v26  ;;  %v16704_v54 = vcombine.low %v8012_v40, %v8016_v26  ;;  %v8044_v9 = vld [vmem:[%s19627_s14 + $0x1c8] sm:$0xff] }
 0x47f   : > { %14460 = vmatpush1.bf16.msra.mxu1 %v16680_v15  ;;  %14491 = vmatprep.mubr.bf16.mxu1 %v19639_v19  ;;  %v16728_v15 = vcombine.low %v8036_v4, %v8040_v5  ;;  %v16737_v17 = vcombine.high %v8044_v9, %v8048_v13  ;;  %v8060_v40 = vld [vmem:[%s19627_s14 + $0x248] sm:$0xff] }
 0x480   : > { %14133 = vmatprep.subr.bf16.mxu0 %v16687_v59  ;;  %14461 = vmatprep.subr.bf16.mxu1 %v16689_v20  ;;  %v16735_v59 = vcombine.high %v8043_v11, %v8047_v31  ;;  %v8055_v20 = vld [vmem:[%s19627_s14 + $0x220] sm:$0xff]  ;;  %v8064_v26 = vld [vmem:[%s19627_s14 + $0x268] sm:$0xff] }
 0x481   : > { %v8084_v4 = vld [vmem:[%s19627_s14 + $0x308] sm:$0xff] }
 0x482   : > { %14134 = vmatpush1.bf16.msra.mxu0 %v16686_v51  ;;  %v16734_v51 = vcombine.low %v8043_v11, %v8047_v31  ;;  %v8088_v5 = vld [vmem:[%s19627_s14 + $0x328] sm:$0xff]  ;;  %v8091_v31 = vld [vmem:[%s19627_s14 + $0x340] sm:$0xff] }
 0x483   : > { %14462 = vmatpush1.bf16.msra.mxu1 %v16688_v63  ;;  %14135 = vmatprep.subr.bf16.mxu0 %v16695_v35  ;;  %v16736_v63 = vcombine.low %v8044_v9, %v8048_v13  ;;  %v16743_v35 = vcombine.high %v8051_v18, %v8055_v20  ;;  %v16777_v11 = vcombine.high %v8084_v4, %v8088_v5  ;;  %v8095_v9 = vld [vmem:[%s19627_s14 + $0x360] sm:$0xff]  ;;  %v8092_v13 = vld [vmem:[%s19627_s14 + $0x348] sm:$0xff] }
 0x484   : > { %14463 = vmatprep.subr.bf16.mxu1 %v16697_v36  ;;  %v16745_v36 = vcombine.high %v8052_v27, %v8056_v30 }
 0x486   : > { %14136 = vmatpush1.bf16.msra.mxu0 %v16694_v42  ;;  %v16742_v42 = vcombine.low %v8051_v18, %v8055_v20  ;;  %v16783_v18 = vcombine.high %v8091_v31, %v8095_v9 }
 0x487   : > { %14464 = vmatpush1.bf16.msra.mxu1 %v16696_v43  ;;  %14137 = vmatprep.subr.bf16.mxu0 %v16703_v45  ;;  %v16744_v43 = vcombine.low %v8052_v27, %v8056_v30  ;;  %v16751_v45 = vcombine.high %v8059_v38, %v8063_v39  ;;  %v8099_v30 = vld [vmem:[%s19627_s14 + $0x380] sm:$0xff] }
 0x488   : > { %14465 = vmatprep.subr.bf16.mxu1 %v16705_v25  ;;  %v16753_v25 = vcombine.high %v8060_v40, %v8064_v26 }
 0x48a   : > { %14138 = vmatpush1.bf16.msra.mxu0 %v16702_v2  ;;  %v16750_v2 = vcombine.low %v8059_v38, %v8063_v39  ;;  %v16782_v38 = vcombine.low %v8091_v31, %v8095_v9  ;;  %v8131_v31 = vld [vmem:[%s19627_s14 + $0x480] sm:$0xff] }
 0x48b   : > { %14466 = vmatpush1.bf16.msra.mxu1 %v16704_v54  ;;  %14139 = vmatprep.subr.bf16.mxu0 %v16711_v56  ;;  %v16752_v54 = vcombine.low %v8060_v40, %v8064_v26  ;;  %v16759_v56 = vcombine.high %v8067_v47, %v8071_v48  ;;  %v8135_v9 = vld [vmem:[%s19627_s14 + $0x4a0] sm:$0xff] }
 0x48c   : > { %14467 = vmatprep.subr.bf16.mxu1 %v16713_v57  ;;  %v16761_v57 = vcombine.high %v8068_v49, %v8072_v52 }
 0x48e   : > { %14140 = vmatpush1.bf16.msra.mxu0 %v16710_v62  ;;  %v16758_v62 = vcombine.low %v8067_v47, %v8071_v48  ;;  %v8112_v47 = vld [vmem:[%s19627_s14 + $0x3e8] sm:$0xff] }
 0x48f   : > { %14468 = vmatpush1.bf16.msra.mxu1 %v16712_v12  ;;  %14141 = vmatprep.subr.bf16.mxu0 %v16719_v0  ;;  %v16760_v12 = vcombine.low %v8068_v49, %v8072_v52  ;;  %v16767_v0 = vcombine.high %v8075_v58, %v8079_v34 }
 0x490   : > { %14469 = vmatprep.subr.bf16.mxu1 %v16721_v1  ;;  %v16769_v1 = vcombine.high %v8076_v60, %v8080_v61 }
 0x492   : > { %14142 = vmatpush1.bf16.msra.mxu0 %v16718_v6  ;;  %v16766_v6 = vcombine.low %v8075_v58, %v8079_v34  ;;  %v8116_v58 = vld [vmem:[%s19627_s14 + $0x408] sm:$0xff] }
 0x493   : > { %14470 = vmatpush1.bf16.msra.mxu1 %v16720_v7  ;;  %14143 = vmatprep.subr.bf16.mxu0 %v16727_v8  ;;  %v16768_v7 = vcombine.low %v8076_v60, %v8080_v61  ;;  %v16775_v8 = vcombine.high %v8083_v29, %v8087_v3  ;;  %v8120_v34 = vld [vmem:[%s19627_s14 + $0x428] sm:$0xff] }
 0x494   : > { %14471 = vmatprep.subr.bf16.mxu1 %v16729_v10  ;;  %v1413_v10 = vsub.s32 0, %v18464_v44 }
 0x496   : > { %14144 = vmatpush1.bf16.msra.mxu0 %v16726_v14  ;;  %v8096_v14 = vld [vmem:[%s19627_s14 + $0x368] sm:$0xff]  ;;  %v1414_v20 = vrot.slane %v19611_v37, %v1413_v10 }
 0x497   : > { %14472 = vmatpush1.bf16.msra.mxu1 %v16728_v15  ;;  %14145 = vmatprep.subr.bf16.mxu0 %v16735_v59  ;;  %v1425_v15 = vsub.s32 3, %v18464_v44  ;;  %v16774_v59 = vcombine.low %v8083_v29, %v8087_v3  ;;  %v16785_v27 = vcombine.high %v8092_v13, %v8096_v14  ;;  %v16784_v39 = vcombine.low %v8092_v13, %v8096_v14  ;;  %v8127_v29 = vld [vmem:[%s19627_s14 + $0x460] sm:$0xff] }
 0x498   : > { %14473 = vmatprep.subr.bf16.mxu1 %v16737_v17  ;;  %v16776_v17 = vcombine.low %v8084_v4, %v8088_v5  ;;  %v17709_v26 = vadd.f32 %v19013_v21, %v1414_v20  ;;  %v8124_v5 = vld [vmem:[%s19627_s14 + $0x448] sm:$0xff] }
 0x49a   : > { %14146 = vmatpush1.bf16.msra.mxu0 %v16734_v51  ;;  %v8103_v51 = vld [vmem:[%s19627_s14 + $0x3a0] sm:$0xff]  ;;  %vm7923_vm1 = vcmp.gt.f32.partialorder %v17709_v26, 0.0 }
 0x49b   : > { %14474 = vmatpush1.bf16.msra.mxu1 %v16736_v63  ;;  %14147 = vmatprep.subr.bf16.mxu0 %v16743_v35  ;;  %v8100_v63 = vld [vmem:[%s19627_s14 + $0x388] sm:$0xff]  ;;  %v16791_v40 = vcombine.high %v8099_v30, %v8103_v51  ;;  %v16790_v49 = vcombine.low %v8099_v30, %v8103_v51  ;;  %v8139_v51 = vld [vmem:[%s19627_s14 + $0x4c0] sm:$0xff] }
 0x49c   : > { %14475 = vmatprep.subr.bf16.mxu1 %v16745_v36  ;;  %v8104_v35 = vld [vmem:[%s19627_s14 + $0x3a8] sm:$0xff]  ;;  %v1426_v36 = vrot.slane %v19611_v37, %v1425_v15 }
 0x49d   : > { %v16792_v52 = vcombine.low %v8100_v63, %v8104_v35 }
 0x49e   : > { %14148 = vmatpush1.bf16.msra.mxu0 %v16742_v42  ;;  %v16793_v42 = vcombine.high %v8100_v63, %v8104_v35  ;;  %v17712_v48 = vadd.f32 %v19023_v33, %v1426_v36  ;;  %v8143_v63 = vld [vmem:[%s19627_s14 + $0x4e0] sm:$0xff]  ;;  %v8140_v35 = vld [vmem:[%s19627_s14 + $0x4c8] sm:$0xff] }
 0x49f   : > { %14476 = vmatpush1.bf16.msra.mxu1 %v16744_v43  ;;  %14149 = vmatprep.subr.bf16.mxu0 %v16751_v45  ;;  %v8107_v43 = vld [vmem:[%s19627_s14 + $0x3c0] sm:$0xff]  ;;  %v8144_v36 = vld [vmem:[%s19627_s14 + $0x4e8] sm:$0xff] }
 0x4a0   : > { %14477 = vmatprep.subr.bf16.mxu1 %v16753_v25  ;;  %v8111_v45 = vld [vmem:[%s19627_s14 + $0x3e0] sm:$0xff]  ;;  %v8108_v25 = vld [vmem:[%s19627_s14 + $0x3c8] sm:$0xff]  ;;  %v7942_v60 = vmul.f32 0.01, %v17712_v48  ;;  %vm7926_vm2 = vcmp.gt.f32.partialorder %v17712_v48, 0.0 }
 0x4a1   : > { %v16801_v21 = vcombine.high %v8108_v25, %v8112_v47  ;;  %v16798_v33 = vcombine.low %v8107_v43, %v8111_v45  ;;  %v16800_v61 = vcombine.low %v8108_v25, %v8112_v47  ;;  %v8152_v25 = vld [vmem:[%s19627_s14 + $0x528] sm:$0xff]  ;;  %v16830_v47 = vcombine.low %v8139_v51, %v8143_v63 }
 0x4a2   : > { %14150 = vmatpush1.bf16.msra.mxu0 %v16750_v2  ;;  %v16799_v2 = vcombine.high %v8107_v43, %v8111_v45  ;;  %v7958_v3 = vsel %vm7926_vm2, %v17712_v48, %v7942_v60  ;;  %v8151_v43 = vld [vmem:[%s19627_s14 + $0x520] sm:$0xff]  ;;  %v8148_v45 = vld [vmem:[%s19627_s14 + $0x508] sm:$0xff]  ;;  %v16832_v48 = vcombine.low %v8140_v35, %v8144_v36 }
 0x4a3   : > { %14478 = vmatpush1.bf16.msra.mxu1 %v16752_v54  ;;  %14151 = vmatprep.subr.bf16.mxu0 %v16759_v56  ;;  %v7939_v54 = vmul.f32 0.01, %v17709_v26  ;;  %v8115_v56 = vld [vmem:[%s19627_s14 + $0x400] sm:$0xff]  ;;  %v19721_v13 = vpack.c.bf16 %v7958_v3, %v7958_v3 }
 0x4a4   : > { %14479 = vmatprep.subr.bf16.mxu1 %v16761_v57  ;;  %v8119_v57 = vld [vmem:[%s19627_s14 + $0x420] sm:$0xff] }
 0x4a5   : > { %v16806_v4 = vcombine.low %v8115_v56, %v8119_v57 }
 0x4a6   : > { %14152 = vmatpush1.bf16.msra.mxu0 %v16758_v62  ;;  %v16807_v62 = vcombine.high %v8115_v56, %v8119_v57  ;;  %v8160_v56 = vld [vmem:[%s19627_s14 + $0x568] sm:$0xff] }
 0x4a7   : > { %14480 = vmatpush1.bf16.msra.mxu1 %v16760_v12  ;;  %14153 = vmatprep.subr.bf16.mxu0 %v16767_v0  ;;  %v7955_v12 = vsel %vm7923_vm1, %v17709_v26, %v7939_v54  ;;  %v16809_v0 = vcombine.high %v8116_v58, %v8120_v34  ;;  %v16833_v26 = vcombine.high %v8140_v35, %v8144_v36  ;;  %v8159_v54 = vld [vmem:[%s19627_s14 + $0x560] sm:$0xff] }
 0x4a8   : > { %14481 = vmatprep.subr.bf16.mxu1 %v16769_v1  ;;  %v8123_v1 = vld [vmem:[%s19627_s14 + $0x440] sm:$0xff] }
 0x4a9   : > { %v8187_v35 = vld [vmem:[%s19627_s14 + $0x640] sm:$0xff] }
 0x4aa   : > { %14154 = vmatpush1.bf16.msra.mxu0 %v16766_v6  ;;  %v8128_v6 = vld [vmem:[%s19627_s14 + $0x468] sm:$0xff]  ;;  %v8191_v36 = vld [vmem:[%s19627_s14 + $0x660] sm:$0xff] }
 0x4ab   : > { %14482 = vmatpush1.bf16.msra.mxu1 %v16768_v7  ;;  %14155 = vmatprep.subr.bf16.mxu0 %v16775_v8  ;;  %v19717_v7 = vpack.c.bf16 %v7955_v12, %v7955_v12  ;;  %v16808_v8 = vcombine.low %v8116_v58, %v8120_v34  ;;  %v16817_v14 = vcombine.high %v8124_v5, %v8128_v6  ;;  %v8168_v12 = vld [vmem:[%s19627_s14 + $0x5a8] sm:$0xff] }
 0x4ac   : > { %14483 = vmatprep.subr.bf16.mxu1 %v16777_v11  ;;  %v16815_v11 = vcombine.high %v8123_v1, %v8127_v29  ;;  %v16816_v20 = vcombine.low %v8124_v5, %v8128_v6  ;;  %v16840_v58 = vcombine.low %v8148_v45, %v8152_v25  ;;  %v8175_v5 = vld [vmem:[%s19627_s14 + $0x5e0] sm:$0xff]  ;;  %v8172_v6 = vld [vmem:[%s19627_s14 + $0x5c8] sm:$0xff] }
 0x4ae   : > { %14156 = vmatpush1.bf16.msra.mxu0 %v16774_v59  ;;  %v8132_v59 = vld [vmem:[%s19627_s14 + $0x488] sm:$0xff] }
 0x4af   : > { %14484 = vmatpush1.bf16.msra.mxu1 %v16776_v17  ;;  %14157 = vmatprep.subr.bf16.mxu0 %v16783_v18  ;;  %v8136_v17 = vld [vmem:[%s19627_s14 + $0x4a8] sm:$0xff]  ;;  %v16814_v18 = vcombine.low %v8123_v1, %v8127_v29 }
 0x4b0   : > { %14485 = vmatprep.subr.bf16.mxu1 %v16785_v27  ;;  %v16823_v27 = vcombine.high %v8131_v31, %v8135_v9  ;;  %v16825_v30 = vcombine.high %v8132_v59, %v8136_v17 }
 0x4b2   : > { %14158 = vmatpush1.bf16.msra.mxu0 %v16782_v38  ;;  %v16822_v38 = vcombine.low %v8131_v31, %v8135_v9 }
 0x4b3   : > { %14486 = vmatpush1.bf16.msra.mxu1 %v16784_v39  ;;  %14159 = vmatprep.subr.bf16.mxu0 %v16791_v40  ;;  %v16824_v39 = vcombine.low %v8132_v59, %v8136_v17  ;;  %v16831_v40 = vcombine.high %v8139_v51, %v8143_v63  ;;  %v8179_v59 = vld [vmem:[%s19627_s14 + $0x600] sm:$0xff] }
 0x4b4   : > { %14487 = vmatprep.subr.bf16.mxu1 %v16793_v42  ;;  %v8147_v42 = vld [vmem:[%s19627_s14 + $0x500] sm:$0xff] }
 0x4b5   : > { %v16838_v57 = vcombine.low %v8147_v42, %v8151_v43  ;;  %v8183_v17 = vld [vmem:[%s19627_s14 + $0x620] sm:$0xff] }
 0x4b6   : > { %14160 = vmatpush1.bf16.msra.mxu0 %v16790_v49  ;;  %v16839_v49 = vcombine.high %v8147_v42, %v8151_v43  ;;  %v16871_v51 = vcombine.high %v8179_v59, %v8183_v17  ;;  %v16879_v42 = vcombine.high %v8187_v35, %v8191_v36 }
 0x4b7   : > { %14488 = vmatpush1.bf16.msra.mxu1 %v16792_v52  ;;  %14161 = vmatprep.subr.bf16.mxu0 %v16799_v2  ;;  %v16841_v52 = vcombine.high %v8148_v45, %v8152_v25  ;;  %v8155_v2 = vld [vmem:[%s19627_s14 + $0x540] sm:$0xff] }
 0x4b8   : > { %14489 = vmatprep.subr.bf16.mxu1 %v16801_v21  ;;  %v8156_v21 = vld [vmem:[%s19627_s14 + $0x548] sm:$0xff]  ;;  %v16847_v34 = vcombine.high %v8155_v2, %v8159_v54  ;;  %v8195_v45 = vld [vmem:[%s19627_s14 + $0x680] sm:$0xff] }
 0x4b9   : > { %v16849_v60 = vcombine.high %v8156_v21, %v8160_v56  ;;  %v16848_v1 = vcombine.low %v8156_v21, %v8160_v56  ;;  %v8199_v25 = vld [vmem:[%s19627_s14 + $0x6a0] sm:$0xff] }
 0x4ba   : > { %14162 = vmatpush1.bf16.msra.mxu0 %v16798_v33  ;;  %v8163_v33 = vld [vmem:[%s19627_s14 + $0x580] sm:$0xff] }
 0x4bb   : > { %14490 = vmatpush1.bf16.msra.mxu1 %v16800_v61  ;;  %14172 = vmatprep.subr.bf16.mxu0 %v16807_v62  ;;  %v8167_v61 = vld [vmem:[%s19627_s14 + $0x5a0] sm:$0xff]  ;;  %v8164_v62 = vld [vmem:[%s19627_s14 + $0x588] sm:$0xff] }
 0x4bc   : > { %14500 = vmatprep.subr.bf16.mxu1 %v16809_v0  ;;  %v16846_v0 = vcombine.low %v8155_v2, %v8159_v54  ;;  %v16855_v29 = vcombine.high %v8163_v33, %v8167_v61  ;;  %v16857_v3 = vcombine.high %v8164_v62, %v8168_v12  ;;  %v16856_v31 = vcombine.low %v8164_v62, %v8168_v12  ;;  %v8203_v21 = vld [vmem:[%s19627_s14 + $0x6c0] sm:$0xff] }
 0x4bd   : > { %14164 = vmatmul.mubr.bf16.vlgmr.msra.gmra.mrb[16].mxu0 %v19717_v7  ;;  %v16887_v2 = vcombine.high %v8195_v45, %v8199_v25  ;;  %v8207_v56 = vld [vmem:[%s19627_s14 + $0x6e0] sm:$0xff] }
 0x4be   : > { %14492 = vmatmul.mubr.bf16.vlgmr.msra.gmra.mrb[16].mxu1 %v19717_v7  ;;  %14173 = vmatpush1.bf16.msra.mxu0 %v16806_v4  ;;  %v8171_v4 = vld [vmem:[%s19627_s14 + $0x5c0] sm:$0xff] }
 0x4bf   : > { %14204 = vmatprep.mubr.bf16.mxu0 %v19721_v13  ;;  %14501 = vmatpush1.bf16.msra.mxu1 %v16808_v8  ;;  %v8176_v8 = vld [vmem:[%s19627_s14 + $0x5e8] sm:$0xff]  ;;  %v16863_v9 = vcombine.high %v8171_v4, %v8175_v5  ;;  %v8211_v62 = vld [vmem:[%s19627_s14 + $0x700] sm:$0xff] }
 0x4c0   : > { %14532 = vmatprep.mubr.bf16.mxu1 %v19721_v13  ;;  %14174 = vmatprep.subr.bf16.mxu0 %v16815_v11  ;;  %v16854_v11 = vcombine.low %v8163_v33, %v8167_v61  ;;  %v16895_v33 = vcombine.high %v8203_v21, %v8207_v56  ;;  %v8215_v12 = vld [vmem:[%s19627_s14 + $0x720] sm:$0xff] }
 0x4c1   : > { %14502 = vmatprep.subr.bf16.mxu1 %v16817_v14  ;;  %v16865_v14 = vcombine.high %v8172_v6, %v8176_v8 }
 0x4c2   : > { %14175 = vmatpush1.bf16.msra.mxu0 %v16814_v18  ;;  %v8180_v18 = vld [vmem:[%s19627_s14 + $0x608] sm:$0xff] }
 0x4c3   : > { %14503 = vmatpush1.bf16.msra.mxu1 %v16816_v20  ;;  %14176 = vmatprep.subr.bf16.mxu0 %v16823_v27  ;;  %v8184_v20 = vld [vmem:[%s19627_s14 + $0x628] sm:$0xff]  ;;  %v16862_v27 = vcombine.low %v8171_v4, %v8175_v5  ;;  %v16903_v4 = vcombine.high %v8211_v62, %v8215_v12  ;;  %v1421_v5 = vsub.s32 2, %v18464_v44 }
 0x4c4   : > { %14504 = vmatprep.subr.bf16.mxu1 %v16825_v30  ;;  %v16864_v30 = vcombine.low %v8172_v6, %v8176_v8  ;;  %v16873_v63 = vcombine.high %v8180_v18, %v8184_v20  ;;  %v8219_v8 = vld [vmem:[%s19627_s14 + $0x740] sm:$0xff] }
 0x4c6   : > { %14177 = vmatpush1.bf16.msra.mxu0 %v16822_v38  ;;  %v8188_v38 = vld [vmem:[%s19627_s14 + $0x648] sm:$0xff] }
 0x4c7   : > { %14505 = vmatpush1.bf16.msra.mxu1 %v16824_v39  ;;  %14178 = vmatprep.subr.bf16.mxu0 %v16831_v40  ;;  %v8192_v39 = vld [vmem:[%s19627_s14 + $0x668] sm:$0xff]  ;;  %v16870_v40 = vcombine.low %v8179_v59, %v8183_v17  ;;  %v16902_v59 = vcombine.low %v8211_v62, %v8215_v12  ;;  %v8251_v62 = vld [vmem:[%s19627_s14 + $0x840] sm:$0xff] }
 0x4c8   : > { %14506 = vmatprep.subr.bf16.mxu1 %v16833_v26  ;;  %v16872_v26 = vcombine.low %v8180_v18, %v8184_v20  ;;  %v16881_v43 = vcombine.high %v8188_v38, %v8192_v39  ;;  %v1422_v20 = vrot.slane %v19611_v37, %v1421_v5  ;;  %v8255_v12 = vld [vmem:[%s19627_s14 + $0x860] sm:$0xff] }
 0x4ca   : > { %14179 = vmatpush1.bf16.msra.mxu0 %v16830_v47  ;;  %v8196_v47 = vld [vmem:[%s19627_s14 + $0x688] sm:$0xff] }
 0x4cb   : > { %14507 = vmatpush1.bf16.msra.mxu1 %v16832_v48  ;;  %14180 = vmatprep.subr.bf16.mxu0 %v16839_v49  ;;  %v8200_v48 = vld [vmem:[%s19627_s14 + $0x6a8] sm:$0xff]  ;;  %v16878_v49 = vcombine.low %v8187_v35, %v8191_v36 }
 0x4cc   : > { %14508 = vmatprep.subr.bf16.mxu1 %v16841_v52  ;;  %v16880_v52 = vcombine.low %v8188_v38, %v8192_v39  ;;  %v16889_v54 = vcombine.high %v8196_v47, %v8200_v48  ;;  %v8232_v35 = vld [vmem:[%s19627_s14 + $0x7a8] sm:$0xff] }
 0x4ce   : > { %14181 = vmatpush1.bf16.msra.mxu0 %v16838_v57  ;;  %v8204_v57 = vld [vmem:[%s19627_s14 + $0x6c8] sm:$0xff] }
 0x4cf   : > { %14509 = vmatpush1.bf16.msra.mxu1 %v16840_v58  ;;  %14182 = vmatprep.subr.bf16.mxu0 %v16847_v34  ;;  %v8208_v58 = vld [vmem:[%s19627_s14 + $0x6e8] sm:$0xff]  ;;  %v16886_v34 = vcombine.low %v8195_v45, %v8199_v25  ;;  %v8239_v45 = vld [vmem:[%s19627_s14 + $0x7e0] sm:$0xff] }
 0x4d0   : > { %14510 = vmatprep.subr.bf16.mxu1 %v16849_v60  ;;  %v16888_v60 = vcombine.low %v8196_v47, %v8200_v48  ;;  %v16897_v61 = vcombine.high %v8204_v57, %v8208_v58  ;;  %v8236_v25 = vld [vmem:[%s19627_s14 + $0x7c8] sm:$0xff] }
 0x4d1   : > { %v8240_v47 = vld [vmem:[%s19627_s14 + $0x7e8] sm:$0xff] }
 0x4d2   : > { %14183 = vmatpush1.bf16.msra.mxu0 %v16846_v0  ;;  %v8212_v0 = vld [vmem:[%s19627_s14 + $0x708] sm:$0xff] }
 0x4d3   : > { %14511 = vmatpush1.bf16.msra.mxu1 %v16848_v1  ;;  %14184 = vmatprep.subr.bf16.mxu0 %v16855_v29  ;;  %v8216_v1 = vld [vmem:[%s19627_s14 + $0x728] sm:$0xff]  ;;  %v16894_v29 = vcombine.low %v8203_v21, %v8207_v56  ;;  %v8247_v21 = vld [vmem:[%s19627_s14 + $0x820] sm:$0xff] }
 0x4d4   : > { %14512 = vmatprep.subr.bf16.mxu1 %v16857_v3  ;;  %v16896_v3 = vcombine.low %v8204_v57, %v8208_v58  ;;  %v16905_v6 = vcombine.high %v8212_v0, %v8216_v1  ;;  %v16904_v17 = vcombine.low %v8212_v0, %v8216_v1  ;;  %v8244_v56 = vld [vmem:[%s19627_s14 + $0x808] sm:$0xff] }
 0x4d5   : > { %v8248_v57 = vld [vmem:[%s19627_s14 + $0x828] sm:$0xff] }
 0x4d6   : > { %14185 = vmatpush1.bf16.msra.mxu0 %v16854_v11  ;;  %v8223_v11 = vld [vmem:[%s19627_s14 + $0x760] sm:$0xff] }
 0x4d7   : > { %14513 = vmatpush1.bf16.msra.mxu1 %v16856_v31  ;;  %14186 = vmatprep.subr.bf16.mxu0 %v16863_v9  ;;  %v8220_v31 = vld [vmem:[%s19627_s14 + $0x748] sm:$0xff]  ;;  %v16911_v18 = vcombine.high %v8219_v8, %v8223_v11  ;;  %v16910_v38 = vcombine.low %v8219_v8, %v8223_v11  ;;  %v16943_v8 = vcombine.high %v8251_v62, %v8255_v12  ;;  %v8259_v11 = vld [vmem:[%s19627_s14 + $0x880] sm:$0xff] }
 0x4d8   : > { %14514 = vmatprep.subr.bf16.mxu1 %v16865_v14  ;;  %v8224_v9 = vld [vmem:[%s19627_s14 + $0x768] sm:$0xff]  ;;  %v1433_v14 = vsub.s32 5, %v18464_v44 }
 0x4d9   : > { %v16912_v39 = vcombine.low %v8220_v31, %v8224_v9 }
 0x4da   : > { %14187 = vmatpush1.bf16.msra.mxu0 %v16862_v27  ;;  %v16913_v27 = vcombine.high %v8220_v31, %v8224_v9  ;;  %v1434_v36 = vrot.slane %v19611_v37, %v1433_v14  ;;  %v8263_v31 = vld [vmem:[%s19627_s14 + $0x8a0] sm:$0xff] }
 0x4db   : > { %14515 = vmatpush1.bf16.msra.mxu1 %v16864_v30  ;;  %14188 = vmatprep.subr.bf16.mxu0 %v16871_v51  ;;  %v8227_v30 = vld [vmem:[%s19627_s14 + $0x780] sm:$0xff] }
 0x4dc   : > { %14516 = vmatprep.subr.bf16.mxu1 %v16873_v63  ;;  %v8231_v51 = vld [vmem:[%s19627_s14 + $0x7a0] sm:$0xff]  ;;  %v8228_v63 = vld [vmem:[%s19627_s14 + $0x788] sm:$0xff]  ;;  %v17714_v37 = vadd.f32 %v19299_v16, %v1434_v36 }
 0x4dd   : > { %v16918_v48 = vcombine.low %v8227_v30, %v8231_v51  ;;  %v8268_v36 = vld [vmem:[%s19627_s14 + $0x8c8] sm:$0xff] }
 0x4de   : > { %14189 = vmatpush1.bf16.msra.mxu0 %v16870_v40  ;;  %v16919_v40 = vcombine.high %v8227_v30, %v8231_v51  ;;  %v7944_v58 = vmul.f32 0.01, %v17714_v37  ;;  %vm7928_vm4 = vcmp.gt.f32.partialorder %v17714_v37, 0.0  ;;  %v16951_v30 = vcombine.high %v8259_v11, %v8263_v31 }
 0x4df   : > { %14517 = vmatpush1.bf16.msra.mxu1 %v16872_v26  ;;  %14190 = vmatprep.subr.bf16.mxu0 %v16879_v42  ;;  %v17711_v26 = vadd.f32 %v19017_v28, %v1422_v20  ;;  %v16921_v42 = vcombine.high %v8228_v63, %v8232_v35  ;;  %v16929_v28 = vcombine.high %v8236_v25, %v8240_v47 }
 0x4e0   : > { %14518 = vmatprep.subr.bf16.mxu1 %v16881_v43  ;;  %v8235_v43 = vld [vmem:[%s19627_s14 + $0x7c0] sm:$0xff]  ;;  %v7960_v0 = vsel %vm7928_vm4, %v17714_v37, %v7944_v58  ;;  %v16942_v20 = vcombine.low %v8251_v62, %v8255_v12 }
 0x4e1   : > { %vm7925_vm3 = vcmp.gt.f32.partialorder %v17711_v26, 0.0  ;;  %v16926_v16 = vcombine.low %v8235_v43, %v8239_v45  ;;  %v19803_v9 = vpack.c.bf16 %v7960_v0, %v7960_v0 }
 0x4e2   : > { %14191 = vmatpush1.bf16.msra.mxu0 %v16878_v49  ;;  %v16920_v49 = vcombine.low %v8228_v63, %v8232_v35  ;;  %v8267_v63 = vld [vmem:[%s19627_s14 + $0x8c0] sm:$0xff] }
 0x4e3   : > { %14519 = vmatpush1.bf16.msra.mxu1 %v16880_v52  ;;  %14192 = vmatprep.subr.bf16.mxu0 %v16887_v2  ;;  %v16927_v52 = vcombine.high %v8235_v43, %v8239_v45  ;;  %v7941_v2 = vmul.f32 0.01, %v17711_v26  ;;  %v8271_v35 = vld [vmem:[%s19627_s14 + $0x8e0] sm:$0xff] }
 0x4e4   : > { %14520 = vmatprep.subr.bf16.mxu1 %v16889_v54  ;;  %v8243_v54 = vld [vmem:[%s19627_s14 + $0x800] sm:$0xff]  ;;  %v16958_v37 = vcombine.low %v8267_v63, %v8271_v35 }
 0x4e5   : > { %v16934_v1 = vcombine.low %v8243_v54, %v8247_v21  ;;  %v8275_v43 = vld [vmem:[%s19627_s14 + $0x900] sm:$0xff] }
 0x4e6   : > { %14193 = vmatpush1.bf16.msra.mxu0 %v16886_v34  ;;  %v16928_v34 = vcombine.low %v8236_v25, %v8240_v47  ;;  %v8279_v45 = vld [vmem:[%s19627_s14 + $0x920] sm:$0xff]  ;;  %v8276_v25 = vld [vmem:[%s19627_s14 + $0x908] sm:$0xff] }
 0x4e7   : > { %14521 = vmatpush1.bf16.msra.mxu1 %v16888_v60  ;;  %14194 = vmatprep.subr.bf16.mxu0 %v16895_v33  ;;  %v16935_v60 = vcombine.high %v8243_v54, %v8247_v21  ;;  %v7957_v33 = vsel %vm7925_vm3, %v17711_v26, %v7941_v2  ;;  %v16959_v26 = vcombine.high %v8267_v63, %v8271_v35  ;;  %v8280_v47 = vld [vmem:[%s19627_s14 + $0x928] sm:$0xff]  ;;  %v8283_v2 = vld [vmem:[%s19627_s14 + $0x940] sm:$0xff] }
 0x4e8   : > { %14522 = vmatprep.subr.bf16.mxu1 %v16897_v61  ;;  %v16937_v61 = vcombine.high %v8244_v56, %v8248_v57  ;;  %v8284_v54 = vld [vmem:[%s19627_s14 + $0x948] sm:$0xff] }
 0x4e9   : > { %v8288_v21 = vld [vmem:[%s19627_s14 + $0x968] sm:$0xff] }
 0x4ea   : > { %14195 = vmatpush1.bf16.msra.mxu0 %v16894_v29  ;;  %v8252_v29 = vld [vmem:[%s19627_s14 + $0x848] sm:$0xff]  ;;  %v16976_v12 = vcombine.low %v8284_v54, %v8288_v21 }
 0x4eb   : > { %14523 = vmatpush1.bf16.msra.mxu1 %v16896_v3  ;;  %14196 = vmatprep.subr.bf16.mxu0 %v16903_v4  ;;  %v8256_v3 = vld [vmem:[%s19627_s14 + $0x868] sm:$0xff]  ;;  %v19799_v4 = vpack.c.bf16 %v7957_v33, %v7957_v33 }
 0x4ec   : > { %14524 = vmatprep.subr.bf16.mxu1 %v16905_v6  ;;  %v16936_v6 = vcombine.low %v8244_v56, %v8248_v57  ;;  %v16966_v56 = vcombine.low %v8275_v43, %v8279_v45  ;;  %v16968_v57 = vcombine.low %v8276_v25, %v8280_v47  ;;  %v8292_v33 = vld [vmem:[%s19627_s14 + $0x988] sm:$0xff] }
 0x4ee   : > { %14197 = vmatpush1.bf16.msra.mxu0 %v16902_v59  ;;  %v16945_v59 = vcombine.high %v8252_v29, %v8256_v3 }
 0x4ef   : > { %14525 = vmatpush1.bf16.msra.mxu1 %v16904_v17  ;;  %14198 = vmatprep.subr.bf16.mxu0 %v16911_v18  ;;  %v8260_v17 = vld [vmem:[%s19627_s14 + $0x888] sm:$0xff] }
 0x4f0   : > { %14526 = vmatprep.subr.bf16.mxu1 %v16913_v27  ;;  %v8264_v18 = vld [vmem:[%s19627_s14 + $0x8a8] sm:$0xff]  ;;  %v16944_v27 = vcombine.low %v8252_v29, %v8256_v3  ;;  %v8299_v29 = vld [vmem:[%s19627_s14 + $0x9c0] sm:$0xff] }
 0x4f1   : > { %v16953_v51 = vcombine.high %v8260_v17, %v8264_v18  ;;  %v8303_v3 = vld [vmem:[%s19627_s14 + $0x9e0] sm:$0xff] }
 0x4f2   : > { %14199 = vmatpush1.bf16.msra.mxu0 %v16910_v38  ;;  %v8272_v38 = vld [vmem:[%s19627_s14 + $0x8e8] sm:$0xff] }
 0x4f3   : > { %14527 = vmatpush1.bf16.msra.mxu1 %v16912_v39  ;;  %14200 = vmatprep.subr.bf16.mxu0 %v16919_v40  ;;  %v16950_v39 = vcombine.low %v8259_v11, %v8263_v31  ;;  %v16952_v40 = vcombine.low %v8260_v17, %v8264_v18  ;;  %v8307_v18 = vld [vmem:[%s19627_s14 + $0xa00] sm:$0xff] }
 0x4f4   : > { %14528 = vmatprep.subr.bf16.mxu1 %v16921_v42  ;;  %v16961_v42 = vcombine.high %v8268_v36, %v8272_v38 }
 0x4f6   : > { %14201 = vmatpush1.bf16.msra.mxu0 %v16918_v48  ;;  %v16960_v48 = vcombine.low %v8268_v36, %v8272_v38  ;;  %v8315_v38 = vld [vmem:[%s19627_s14 + $0xa40] sm:$0xff] }
 0x4f7   : > { %14529 = vmatpush1.bf16.msra.mxu1 %v16920_v49  ;;  %14202 = vmatprep.subr.bf16.mxu0 %v16927_v52  ;;  %v16967_v49 = vcombine.high %v8275_v43, %v8279_v45  ;;  %v16969_v52 = vcombine.high %v8276_v25, %v8280_v47  ;;  %v8323_v47 = vld [vmem:[%s19627_s14 + $0xa80] sm:$0xff] }
 0x4f8   : > { %14530 = vmatprep.subr.bf16.mxu1 %v16929_v28  ;;  %v8287_v28 = vld [vmem:[%s19627_s14 + $0x960] sm:$0xff] }
 0x4f9   : > { %v16975_v58 = vcombine.high %v8283_v2, %v8287_v28  ;;  %v16974_v62 = vcombine.low %v8283_v2, %v8287_v28 }
 0x4fa   : > { %14203 = vmatpush1.bf16.msra.mxu0 %v16926_v16  ;;  %v16977_v16 = vcombine.high %v8284_v54, %v8288_v21  ;;  %v8331_v21 = vld [vmem:[%s19627_s14 + $0xac0] sm:$0xff] }
 0x4fb   : > { %14531 = vmatpush1.bf16.msra.mxu1 %v16928_v34  ;;  %14213 = vmatprep.subr.bf16.mxu0 %v16935_v60  ;;  %v8291_v34 = vld [vmem:[%s19627_s14 + $0x980] sm:$0xff] }
 0x4fc   : > { %14541 = vmatprep.subr.bf16.mxu1 %v16937_v61  ;;  %v8295_v60 = vld [vmem:[%s19627_s14 + $0x9a0] sm:$0xff]  ;;  %v8296_v61 = vld [vmem:[%s19627_s14 + $0x9a8] sm:$0xff] }
 0x4fd   : > { %14205 = vmatmul.mubr.bf16.vlgmr.msra.gmra.mrb[16].mxu0 %v19799_v4  ;;  %v16983_v0 = vcombine.high %v8291_v34, %v8295_v60  ;;  %v16982_v11 = vcombine.low %v8291_v34, %v8295_v60  ;;  %v16984_v31 = vcombine.low %v8292_v33, %v8296_v61 }
 0x4fe   : > { %14533 = vmatmul.mubr.bf16.vlgmr.msra.gmra.mrb[16].mxu1 %v19799_v4  ;;  %14214 = vmatpush1.bf16.msra.mxu0 %v16934_v1  ;;  %v16985_v1 = vcombine.high %v8292_v33, %v8296_v61  ;;  %v8339_v61 = vld [vmem:[%s19627_s14 + $0xb00] sm:$0xff] }
 0x4ff   : > { %14245 = vmatprep.mubr.bf16.mxu0 %v19803_v9  ;;  %14542 = vmatpush1.bf16.msra.mxu1 %v16936_v6  ;;  %v8300_v6 = vld [vmem:[%s19627_s14 + $0x9c8] sm:$0xff] }
 0x500   : > { %14573 = vmatprep.mubr.bf16.mxu1 %v19803_v9  ;;  %14215 = vmatprep.subr.bf16.mxu0 %v16943_v8  ;;  %v8304_v8 = vld [vmem:[%s19627_s14 + $0x9e8] sm:$0xff] }
 0x501   : > { %14543 = vmatprep.subr.bf16.mxu1 %v16945_v59  ;;  %v16991_v59 = vcombine.high %v8299_v29, %v8303_v3  ;;  %v16993_v17 = vcombine.high %v8300_v6, %v8304_v8  ;;  %v16992_v63 = vcombine.low %v8300_v6, %v8304_v8  ;;  %v1429_v6 = vsub.s32 4, %v18464_v44 }
 0x502   : > { %14216 = vmatpush1.bf16.msra.mxu0 %v16942_v20  ;;  %v8311_v20 = vld [vmem:[%s19627_s14 + $0xa20] sm:$0xff] }
 0x503   : > { %14544 = vmatpush1.bf16.msra.mxu1 %v16944_v27  ;;  %14217 = vmatprep.subr.bf16.mxu0 %v16951_v30  ;;  %v8308_v27 = vld [vmem:[%s19627_s14 + $0xa08] sm:$0xff]  ;;  %v16999_v35 = vcombine.high %v8307_v18, %v8311_v20 }
 0x504   : > { %14545 = vmatprep.subr.bf16.mxu1 %v16953_v51  ;;  %v8312_v30 = vld [vmem:[%s19627_s14 + $0xa28] sm:$0xff]  ;;  %v16990_v51 = vcombine.low %v8299_v29, %v8303_v3 }
 0x505   : > { %v17001_v36 = vcombine.high %v8308_v27, %v8312_v30  ;;  %v17000_v43 = vcombine.low %v8308_v27, %v8312_v30 }
 0x506   : > { %14218 = vmatpush1.bf16.msra.mxu0 %v16950_v39  ;;  %v8319_v39 = vld [vmem:[%s19627_s14 + $0xa60] sm:$0xff] }
 0x507   : > { %14546 = vmatpush1.bf16.msra.mxu1 %v16952_v40  ;;  %14219 = vmatprep.subr.bf16.mxu0 %v16959_v26  ;;  %v8316_v40 = vld [vmem:[%s19627_s14 + $0xa48] sm:$0xff]  ;;  %v17007_v45 = vcombine.high %v8315_v38, %v8319_v39 }
 0x508   : > { %14547 = vmatprep.subr.bf16.mxu1 %v16961_v42  ;;  %v8320_v26 = vld [vmem:[%s19627_s14 + $0xa68] sm:$0xff]  ;;  %v16998_v42 = vcombine.low %v8307_v18, %v8311_v20  ;;  %v1441_v18 = vsub.s32 7, %v18464_v44 }
 0x509   : > { %v17009_v25 = vcombine.high %v8316_v40, %v8320_v26  ;;  %v17008_v2 = vcombine.low %v8316_v40, %v8320_v26  ;;  %v8360_v40 = vld [vmem:[%s19627_s14 + $0xba8] sm:$0xff] }
 0x50a   : > { %14220 = vmatpush1.bf16.msra.mxu0 %v16958_v37  ;;  %v8327_v37 = vld [vmem:[%s19627_s14 + $0xaa0] sm:$0xff] }
 0x50b   : > { %14548 = vmatpush1.bf16.msra.mxu1 %v16960_v48  ;;  %14221 = vmatprep.subr.bf16.mxu0 %v16967_v49  ;;  %v8324_v48 = vld [vmem:[%s19627_s14 + $0xa88] sm:$0xff]  ;;  %v17015_v28 = vcombine.high %v8323_v47, %v8327_v37 }
 0x50c   : > { %14549 = vmatprep.subr.bf16.mxu1 %v16969_v52  ;;  %v8328_v49 = vld [vmem:[%s19627_s14 + $0xaa8] sm:$0xff]  ;;  %v17006_v52 = vcombine.low %v8315_v38, %v8319_v39  ;;  %v8359_v38 = vld [vmem:[%s19627_s14 + $0xba0] sm:$0xff] }
 0x50d   : > { %v17017_v54 = vcombine.high %v8324_v48, %v8328_v49  ;;  %v17016_v34 = vcombine.low %v8324_v48, %v8328_v49  ;;  %v8356_v39 = vld [vmem:[%s19627_s14 + $0xb88] sm:$0xff]  ;;  %v8367_v48 = vld [vmem:[%s19627_s14 + $0xbe0] sm:$0xff] }
 0x50e   : > { %14222 = vmatpush1.bf16.msra.mxu0 %v16966_v56  ;;  %v8335_v56 = vld [vmem:[%s19627_s14 + $0xae0] sm:$0xff]  ;;  %v8364_v49 = vld [vmem:[%s19627_s14 + $0xbc8] sm:$0xff] }
 0x50f   : > { %14550 = vmatpush1.bf16.msra.mxu1 %v16968_v57  ;;  %14223 = vmatprep.subr.bf16.mxu0 %v16975_v58  ;;  %v8332_v57 = vld [vmem:[%s19627_s14 + $0xac8] sm:$0xff]  ;;  %v17023_v60 = vcombine.high %v8331_v21, %v8335_v56 }
 0x510   : > { %14551 = vmatprep.subr.bf16.mxu1 %v16977_v16  ;;  %v8336_v58 = vld [vmem:[%s19627_s14 + $0xae8] sm:$0xff]  ;;  %v17014_v16 = vcombine.low %v8323_v47, %v8327_v37  ;;  %v17049_v47 = vcombine.high %v8356_v39, %v8360_v40  ;;  %v8363_v37 = vld [vmem:[%s19627_s14 + $0xbc0] sm:$0xff] }
 0x511   : > { %v17025_v33 = vcombine.high %v8332_v57, %v8336_v58  ;;  %v17024_v29 = vcombine.low %v8332_v57, %v8336_v58  ;;  %v8371_v57 = vld [vmem:[%s19627_s14 + $0xc00] sm:$0xff] }
 0x512   : > { %14224 = vmatpush1.bf16.msra.mxu0 %v16974_v62  ;;  %v8343_v62 = vld [vmem:[%s19627_s14 + $0xb20] sm:$0xff] }
 0x513   : > { %14552 = vmatpush1.bf16.msra.mxu1 %v16976_v12  ;;  %14225 = vmatprep.subr.bf16.mxu0 %v16983_v0  ;;  %v8340_v12 = vld [vmem:[%s19627_s14 + $0xb08] sm:$0xff]  ;;  %v17031_v3 = vcombine.high %v8339_v61, %v8343_v62  ;;  %v17030_v20 = vcombine.low %v8339_v61, %v8343_v62  ;;  %v8375_v58 = vld [vmem:[%s19627_s14 + $0xc20] sm:$0xff] }
 0x514   : > { %14553 = vmatprep.subr.bf16.mxu1 %v16985_v1  ;;  %v8344_v0 = vld [vmem:[%s19627_s14 + $0xb28] sm:$0xff]  ;;  %v17022_v1 = vcombine.low %v8331_v21, %v8335_v56  ;;  %v17055_v21 = vcombine.high %v8363_v37, %v8367_v48  ;;  %v17063_v61 = vcombine.high %v8371_v57, %v8375_v58 }
 0x515   : > { %v17033_v8 = vcombine.high %v8340_v12, %v8344_v0  ;;  %v17032_v27 = vcombine.low %v8340_v12, %v8344_v0  ;;  %v8379_v0 = vld [vmem:[%s19627_s14 + $0xc40] sm:$0xff] }
 0x516   : > { %14226 = vmatpush1.bf16.msra.mxu0 %v16982_v11  ;;  %v8347_v11 = vld [vmem:[%s19627_s14 + $0xb40] sm:$0xff] }
 0x517   : > { %14554 = vmatpush1.bf16.msra.mxu1 %v16984_v31  ;;  %14227 = vmatprep.subr.bf16.mxu0 %v16991_v59  ;;  %v8351_v31 = vld [vmem:[%s19627_s14 + $0xb60] sm:$0xff]  ;;  %v8348_v59 = vld [vmem:[%s19627_s14 + $0xb48] sm:$0xff] }
 0x518   : > { %14555 = vmatprep.subr.bf16.mxu1 %v16993_v17  ;;  %v8352_v17 = vld [vmem:[%s19627_s14 + $0xb68] sm:$0xff]  ;;  %v17039_v30 = vcombine.high %v8347_v11, %v8351_v31 }
 0x51a   : > { %14228 = vmatpush1.bf16.msra.mxu0 %v16990_v51  ;;  %v19858_v51 = vld [vmem:[%s18429_s26] sm:$0xff] }
 0x51b   : > { %14556 = vmatpush1.bf16.msra.mxu1 %v16992_v63  ;;  %14229 = vmatprep.subr.bf16.mxu0 %v16999_v35  ;;  %v1430_v63 = vrot.slane %v19858_v51, %v1429_v6  ;;  %v17041_v35 = vcombine.high %v8348_v59, %v8352_v17  ;;  %v1442_v26 = vrot.slane %v19858_v51, %v1441_v18 }
 0x51c   : > { %14557 = vmatprep.subr.bf16.mxu1 %v17001_v36  ;;  %v8355_v36 = vld [vmem:[%s19627_s14 + $0xb80] sm:$0xff] }
 0x51e   : > { %14230 = vmatpush1.bf16.msra.mxu0 %v16998_v42  ;;  %v17038_v42 = vcombine.low %v8347_v11, %v8351_v31  ;;  %v8384_v11 = vld [vmem:[%s19627_s14 + $0xc68] sm:$0xff] }
 0x51f   : > { %14558 = vmatpush1.bf16.msra.mxu1 %v17000_v43  ;;  %14231 = vmatprep.subr.bf16.mxu0 %v17007_v45  ;;  %v17040_v43 = vcombine.low %v8348_v59, %v8352_v17  ;;  %v17047_v45 = vcombine.high %v8355_v36, %v8359_v38 }
 0x520   : > { %14559 = vmatprep.subr.bf16.mxu1 %v17009_v25  ;;  %v17713_v25 = vadd.f32 %v19293_v46, %v1430_v63 }
 0x522   : > { %14232 = vmatpush1.bf16.msra.mxu0 %v17006_v52  ;;  %v8368_v52 = vld [vmem:[%s19627_s14 + $0xbe8] sm:$0xff]  ;;  %v7943_v56 = vmul.f32 0.01, %v17713_v25  ;;  %vm7927_vm5 = vcmp.gt.f32.partialorder %v17713_v25, 0.0 }
 0x523   : > { %14560 = vmatpush1.bf16.msra.mxu1 %v17008_v2  ;;  %14233 = vmatprep.subr.bf16.mxu0 %v17015_v28  ;;  %v17716_v2 = vadd.f32 %v19303_v23, %v1442_v26  ;;  %v17046_v28 = vcombine.low %v8355_v36, %v8359_v38  ;;  %v17057_v46 = vcombine.high %v8364_v49, %v8368_v52  ;;  %v8392_v36 = vld [vmem:[%s19627_s14 + $0xca8] sm:$0xff] }
 0x524   : > { %14561 = vmatprep.subr.bf16.mxu1 %v17017_v54  ;;  %v17048_v54 = vcombine.low %v8356_v39, %v8360_v40  ;;  %v17054_v23 = vcombine.low %v8363_v37, %v8367_v48  ;;  %v7959_v62 = vsel %vm7927_vm5, %v17713_v25, %v7943_v56  ;;  %v8400_v25 = vld [vmem:[%s19627_s14 + $0xce8] sm:$0xff] }
 0x525   : > { %vm7930_vm6 = vcmp.gt.f32.partialorder %v17716_v2, 0.0  ;;  %v19884_v31 = vpack.c.bf16 %v7959_v62, %v7959_v62 }
 0x526   : > { %14234 = vmatpush1.bf16.msra.mxu0 %v17014_v16  ;;  %v8372_v16 = vld [vmem:[%s19627_s14 + $0xc08] sm:$0xff] }
 0x527   : > { %14562 = vmatpush1.bf16.msra.mxu1 %v17016_v34  ;;  %14235 = vmatprep.subr.bf16.mxu0 %v17023_v60  ;;  %v8376_v34 = vld [vmem:[%s19627_s14 + $0xc28] sm:$0xff]  ;;  %v7946_v60 = vmul.f32 0.01, %v17716_v2 }
 0x528   : > { %14563 = vmatprep.subr.bf16.mxu1 %v17025_v33  ;;  %v17056_v33 = vcombine.low %v8364_v49, %v8368_v52  ;;  %v17065_v12 = vcombine.high %v8372_v16, %v8376_v34  ;;  %v17064_v59 = vcombine.low %v8372_v16, %v8376_v34  ;;  %v8403_v52 = vld [vmem:[%s19627_s14 + $0xd00] sm:$0xff]  ;;  %v8412_v34 = vld [vmem:[%s19627_s14 + $0xd48] sm:$0xff] }
 0x529   : > { %v8415_v16 = vld [vmem:[%s19627_s14 + $0xd60] sm:$0xff] }
 0x52a   : > { %14236 = vmatpush1.bf16.msra.mxu0 %v17022_v1  ;;  %v8383_v1 = vld [vmem:[%s19627_s14 + $0xc60] sm:$0xff] }
 0x52b   : > { %14564 = vmatpush1.bf16.msra.mxu1 %v17024_v29  ;;  %14237 = vmatprep.subr.bf16.mxu0 %v17031_v3  ;;  %v7962_v29 = vsel %vm7930_vm6, %v17716_v2, %v7946_v60  ;;  %v17062_v3 = vcombine.low %v8371_v57, %v8375_v58  ;;  %v17071_v17 = vcombine.high %v8379_v0, %v8383_v1  ;;  %v8407_v2 = vld [vmem:[%s19627_s14 + $0xd20] sm:$0xff]  ;;  %v8416_v60 = vld [vmem:[%s19627_s14 + $0xd68] sm:$0xff] }
 0x52c   : > { %14565 = vmatprep.subr.bf16.mxu1 %v17033_v8  ;;  %v8380_v8 = vld [vmem:[%s19627_s14 + $0xc48] sm:$0xff]  ;;  %v17070_v38 = vcombine.low %v8379_v0, %v8383_v1  ;;  %v8411_v58 = vld [vmem:[%s19627_s14 + $0xd40] sm:$0xff]  ;;  %v17105_v62 = vcombine.high %v8412_v34, %v8416_v60 }
 0x52d   : > { %v17073_v63 = vcombine.high %v8380_v8, %v8384_v11  ;;  %v17072_v39 = vcombine.low %v8380_v8, %v8384_v11  ;;  %v8423_v0 = vld [vmem:[%s19627_s14 + $0xda0] sm:$0xff]  ;;  %v8420_v1 = vld [vmem:[%s19627_s14 + $0xd88] sm:$0xff]  ;;  %v17104_v8 = vcombine.low %v8412_v34, %v8416_v60 }
 0x52e   : > { %14238 = vmatpush1.bf16.msra.mxu0 %v17030_v20  ;;  %v8387_v20 = vld [vmem:[%s19627_s14 + $0xc80] sm:$0xff] }
 0x52f   : > { %14566 = vmatpush1.bf16.msra.mxu1 %v17032_v27  ;;  %14239 = vmatprep.subr.bf16.mxu0 %v17039_v30  ;;  %v8391_v27 = vld [vmem:[%s19627_s14 + $0xca0] sm:$0xff]  ;;  %v19888_v30 = vpack.c.bf16 %v7962_v29, %v7962_v29  ;;  %v8424_v29 = vld [vmem:[%s19627_s14 + $0xda8] sm:$0xff] }
 0x530   : > { %14567 = vmatprep.subr.bf16.mxu1 %v17041_v35  ;;  %v8388_v35 = vld [vmem:[%s19627_s14 + $0xc88] sm:$0xff]  ;;  %v17079_v40 = vcombine.high %v8387_v20, %v8391_v27 }
 0x531   : > { %v17081_v26 = vcombine.high %v8388_v35, %v8392_v36  ;;  %v17080_v37 = vcombine.low %v8388_v35, %v8392_v36  ;;  %v8428_v36 = vld [vmem:[%s19627_s14 + $0xdc8] sm:$0xff] }
 0x532   : > { %14240 = vmatpush1.bf16.msra.mxu0 %v17038_v42  ;;  %v8395_v42 = vld [vmem:[%s19627_s14 + $0xcc0] sm:$0xff] }
 0x533   : > { %14568 = vmatpush1.bf16.msra.mxu1 %v17040_v43  ;;  %14241 = vmatprep.subr.bf16.mxu0 %v17047_v45  ;;  %v8399_v43 = vld [vmem:[%s19627_s14 + $0xce0] sm:$0xff]  ;;  %v8396_v45 = vld [vmem:[%s19627_s14 + $0xcc8] sm:$0xff] }
 0x534   : > { %14569 = vmatprep.subr.bf16.mxu1 %v17049_v47  ;;  %v17078_v47 = vcombine.low %v8387_v20, %v8391_v27  ;;  %v17087_v48 = vcombine.high %v8395_v42, %v8399_v43  ;;  %v17089_v49 = vcombine.high %v8396_v45, %v8400_v25  ;;  %v17088_v56 = vcombine.low %v8396_v45, %v8400_v25  ;;  %v8427_v20 = vld [vmem:[%s19627_s14 + $0xdc0] sm:$0xff] }
 0x535   : > { %v8431_v27 = vld [vmem:[%s19627_s14 + $0xde0] sm:$0xff]  ;;  %v17112_v45 = vcombine.low %v8420_v1, %v8424_v29 }
 0x536   : > { %14242 = vmatpush1.bf16.msra.mxu0 %v17046_v28  ;;  %v8404_v28 = vld [vmem:[%s19627_s14 + $0xd08] sm:$0xff]  ;;  %v17119_v25 = vcombine.high %v8427_v20, %v8431_v27 }
 0x537   : > { %14570 = vmatpush1.bf16.msra.mxu1 %v17048_v54  ;;  %14243 = vmatprep.subr.bf16.mxu0 %v17055_v21  ;;  %v8408_v54 = vld [vmem:[%s19627_s14 + $0xd28] sm:$0xff]  ;;  %v17086_v21 = vcombine.low %v8395_v42, %v8399_v43 }
 0x538   : > { %14571 = vmatprep.subr.bf16.mxu1 %v17057_v46  ;;  %v17095_v46 = vcombine.high %v8403_v52, %v8407_v2  ;;  %v17097_v57 = vcombine.high %v8404_v28, %v8408_v54 }
 0x53a   : > { %14244 = vmatpush1.bf16.msra.mxu0 %v17054_v23  ;;  %v17094_v23 = vcombine.low %v8403_v52, %v8407_v2  ;;  %v8436_v52 = vld [vmem:[%s19627_s14 + $0xe08] sm:$0xff] }
 0x53b   : > { %14572 = vmatpush1.bf16.msra.mxu1 %v17056_v33  ;;  %14254 = vmatprep.subr.bf16.mxu0 %v17063_v61  ;;  %v17096_v33 = vcombine.low %v8404_v28, %v8408_v54  ;;  %v17103_v61 = vcombine.high %v8411_v58, %v8415_v16  ;;  %v8440_v2 = vld [vmem:[%s19627_s14 + $0xe28] sm:$0xff]  ;;  %v17118_v28 = vcombine.low %v8427_v20, %v8431_v27 }
 0x53c   : > { %14582 = vmatprep.subr.bf16.mxu1 %v17065_v12  ;;  %v8419_v12 = vld [vmem:[%s19627_s14 + $0xd80] sm:$0xff]  ;;  %v17128_v60 = vcombine.low %v8436_v52, %v8440_v2  ;;  %v8460_v20 = vld [vmem:[%s19627_s14 + $0xec8] sm:$0xff] }
 0x53d   : > { %14246 = vmatmul.mubr.bf16.vlgmr.msra.gmra.mrb[16].mxu0 %v19884_v31  ;;  %v17111_v11 = vcombine.high %v8419_v12, %v8423_v0  ;;  %v8464_v27 = vld [vmem:[%s19627_s14 + $0xee8] sm:$0xff] }
 0x53e   : > { %14574 = vmatmul.mubr.bf16.vlgmr.msra.gmra.mrb[16].mxu1 %v19884_v31  ;;  %14255 = vmatpush1.bf16.msra.mxu0 %v17062_v3  ;;  %v17102_v3 = vcombine.low %v8411_v58, %v8415_v16  ;;  %v8444_v58 = vld [vmem:[%s19627_s14 + $0xe48] sm:$0xff] }
 0x53f   : > { %14286 = vmatprep.mubr.bf16.mxu0 %v19888_v30  ;;  %14583 = vmatpush1.bf16.msra.mxu1 %v17064_v59  ;;  %v8448_v16 = vld [vmem:[%s19627_s14 + $0xe68] sm:$0xff] }
 0x540   : > { %14614 = vmatprep.mubr.bf16.mxu1 %v19888_v30  ;;  %14256 = vmatprep.subr.bf16.mxu0 %v17071_v17  ;;  %v17113_v17 = vcombine.high %v8420_v1, %v8424_v29  ;;  %v17136_v29 = vcombine.low %v8444_v58, %v8448_v16 }
 0x541   : > { %14584 = vmatprep.subr.bf16.mxu1 %v17073_v63 }
 0x542   : > { %14257 = vmatpush1.bf16.msra.mxu0 %v17070_v38  ;;  %v8432_v38 = vld [vmem:[%s19627_s14 + $0xde8] sm:$0xff] }
 0x543   : > { %14585 = vmatpush1.bf16.msra.mxu1 %v17072_v39  ;;  %14258 = vmatprep.subr.bf16.mxu0 %v17079_v40  ;;  %v17120_v54 = vcombine.low %v8428_v36, %v8432_v38 }
 0x544   : > { %14586 = vmatprep.subr.bf16.mxu1 %v17081_v26  ;;  %v17110_v26 = vcombine.low %v8419_v12, %v8423_v0  ;;  %v8452_v12 = vld [vmem:[%s19627_s14 + $0xe88] sm:$0xff] }
 0x545   : > { %v8456_v0 = vld [vmem:[%s19627_s14 + $0xea8] sm:$0xff] }
 0x546   : > { %14259 = vmatpush1.bf16.msra.mxu0 %v17078_v47  ;;  %v17121_v47 = vcombine.high %v8428_v36, %v8432_v38  ;;  %v17144_v38 = vcombine.low %v8452_v12, %v8456_v0 }
 0x547   : > { %14587 = vmatpush1.bf16.msra.mxu1 %v17080_v37  ;;  %14260 = vmatprep.subr.bf16.mxu0 %v17087_v48  ;;  %v8435_v37 = vld [vmem:[%s19627_s14 + $0xe00] sm:$0xff] }
 0x548   : > { %14588 = vmatprep.subr.bf16.mxu1 %v17089_v49  ;;  %v8439_v48 = vld [vmem:[%s19627_s14 + $0xe20] sm:$0xff] }
 0x549   : > { %v17126_v34 = vcombine.low %v8435_v37, %v8439_v48 }
 0x54a   : > { %14261 = vmatpush1.bf16.msra.mxu0 %v17086_v21  ;;  %v17127_v21 = vcombine.high %v8435_v37, %v8439_v48  ;;  %v17152_v37 = vcombine.low %v8460_v20, %v8464_v27 }
 0x54b   : > { %14589 = vmatpush1.bf16.msra.mxu1 %v17088_v56  ;;  %14262 = vmatprep.subr.bf16.mxu0 %v17095_v46  ;;  %v17129_v56 = vcombine.high %v8436_v52, %v8440_v2  ;;  %v8443_v46 = vld [vmem:[%s19627_s14 + $0xe40] sm:$0xff] }
 0x54c   : > { %14590 = vmatprep.subr.bf16.mxu1 %v17097_v57  ;;  %v8447_v57 = vld [vmem:[%s19627_s14 + $0xe60] sm:$0xff] }
 0x54d   : > { %v17134_v1 = vcombine.low %v8443_v46, %v8447_v57  ;;  %v8475_v2 = vld [vmem:[%s19627_s14 + $0xf40] sm:$0xff] }
 0x54e   : > { %14263 = vmatpush1.bf16.msra.mxu0 %v17094_v23  ;;  %v17135_v23 = vcombine.high %v8443_v46, %v8447_v57  ;;  %v19950_v46 = vld [vmem:[%s18429_s26 + $0x8] sm:$0xff] }
 0x54f   : > { %14591 = vmatpush1.bf16.msra.mxu1 %v17096_v33  ;;  %14264 = vmatprep.subr.bf16.mxu0 %v17103_v61  ;;  %v17137_v33 = vcombine.high %v8444_v58, %v8448_v16  ;;  %v8451_v61 = vld [vmem:[%s19627_s14 + $0xe80] sm:$0xff] }
 0x550   : > { %v19912_v59 = vpop.f32.mrb[12].mxu0  ;;  %14592 = vmatprep.subr.bf16.mxu1 %v17105_v62  ;;  %v19916_v63 = vpop.f32.mrb[12].mxu1  ;;  %v8455_v62 = vld [vmem:[%s19627_s14 + $0xea0] sm:$0xff] }
 0x551   : > { %v19918_v35 = vpop.f32.mrb[13].mxu0  ;;  %v19922_v39 = vpop.f32.mrb[13].mxu1  ;;  %v17142_v36 = vcombine.low %v8451_v61, %v8455_v62 }
 0x552   : > { %v7756_v40 = vpop.f32.mrb[14].mxu0  ;;  %14265 = vmatpush1.bf16.msra.mxu0 %v17102_v3  ;;  %v7920_v42 = vpop.f32.mrb[14].mxu1  ;;  %v17143_v3 = vcombine.high %v8451_v61, %v8455_v62  ;;  %v8488_v61 = vld [vmem:[%s19627_s14 + $0xfa8] sm:$0xff]  ;;  %v1450_v62 = vrot.slane %v19950_v46, %v1417_v55 }
 0x553   : > { %14593 = vmatpush1.bf16.msra.mxu1 %v17104_v8  ;;  %v7757_v43 = vpop.f32.mrb[15].mxu0  ;;  %14266 = vmatprep.subr.bf16.mxu0 %v17111_v11  ;;  %v7921_v49 = vpop.f32.mrb[15].mxu1  ;;  %v17145_v8 = vcombine.high %v8452_v12, %v8456_v0  ;;  %v8459_v11 = vld [vmem:[%s19627_s14 + $0xec0] sm:$0xff] }
 0x554   : > { %14594 = vmatprep.subr.bf16.mxu1 %v17113_v17  ;;  %v8463_v17 = vld [vmem:[%s19627_s14 + $0xee0] sm:$0xff]  ;;  %v1437_v49 = vsub.s32 6, %v18464_v44  ;;  %v17718_v55 = vadd.f32 %v19579_v24, %v1450_v62  ;;  %v8520_v62 = vld [vmem:[%s19627_s14 + $0x10a8] sm:$0xff] }
 0x555   : > { %v17151_v40 = vcombine.high %v8459_v11, %v8463_v17  ;;  %v8467_v42 = vld [vmem:[%s19627_s14 + $0xf00] sm:$0xff] }
 0x556   : > { %14267 = vmatpush1.bf16.msra.mxu0 %v17110_v26  ;;  %v17153_v26 = vcombine.high %v8460_v20, %v8464_v27  ;;  %v8471_v43 = vld [vmem:[%s19627_s14 + $0xf20] sm:$0xff]  ;;  %v1438_v16 = vrot.slane %v19858_v51, %v1437_v49  ;;  %vm7932_vm8 = vcmp.gt.f32.partialorder %v17718_v55, 0.0 }
 0x557   : > { %14595 = vmatpush1.bf16.msra.mxu1 %v17112_v45  ;;  %14268 = vmatprep.subr.bf16.mxu0 %v17119_v25  ;;  %v8468_v45 = vld [vmem:[%s19627_s14 + $0xf08] sm:$0xff]  ;;  %v17159_v48 = vcombine.high %v8467_v42, %v8471_v43 }
 0x558   : > { %14596 = vmatprep.subr.bf16.mxu1 %v17121_v47  ;;  %v8472_v25 = vld [vmem:[%s19627_s14 + $0xf28] sm:$0xff]  ;;  %v17150_v47 = vcombine.low %v8459_v11, %v8463_v17 }
 0x559   : > { %v17161_v52 = vcombine.high %v8468_v45, %v8472_v25  ;;  %v17160_v57 = vcombine.low %v8468_v45, %v8472_v25  ;;  %v8492_v11 = vld [vmem:[%s19627_s14 + $0xfc8] sm:$0xff]  ;;  %v7948_v45 = vmul.f32 0.01, %v17718_v55 }
 0x55a   : > { %14269 = vmatpush1.bf16.msra.mxu0 %v17118_v28  ;;  %v8479_v28 = vld [vmem:[%s19627_s14 + $0xf60] sm:$0xff]  ;;  %v8496_v17 = vld [vmem:[%s19627_s14 + $0xfe8] sm:$0xff] }
 0x55b   : > { %14597 = vmatpush1.bf16.msra.mxu1 %v17120_v54  ;;  %14270 = vmatprep.subr.bf16.mxu0 %v17127_v21  ;;  %v8476_v54 = vld [vmem:[%s19627_s14 + $0xf48] sm:$0xff]  ;;  %v17167_v58 = vcombine.high %v8475_v2, %v8479_v28  ;;  %v17166_v12 = vcombine.low %v8475_v2, %v8479_v28  ;;  %v17184_v25 = vcombine.low %v8492_v11, %v8496_v17  ;;  %v8511_v2 = vld [vmem:[%s19627_s14 + $0x1060] sm:$0xff] }
 0x55c   : > { %14598 = vmatprep.subr.bf16.mxu1 %v17129_v56  ;;  %v8480_v21 = vld [vmem:[%s19627_s14 + $0xf68] sm:$0xff]  ;;  %v17158_v56 = vcombine.low %v8467_v42, %v8471_v43  ;;  %v7964_v28 = vsel %vm7932_vm8, %v17718_v55, %v7948_v45 }
 0x55d   : > { %v17168_v0 = vcombine.low %v8476_v54, %v8480_v21  ;;  %v8500_v42 = vld [vmem:[%s19627_s14 + $0x1008] sm:$0xff] }
 0x55e   : > { %14271 = vmatpush1.bf16.msra.mxu0 %v17126_v34  ;;  %v17169_v34 = vcombine.high %v8476_v54, %v8480_v21  ;;  %v8504_v43 = vld [vmem:[%s19627_s14 + $0x1028] sm:$0xff] }
 0x55f   : > { %14599 = vmatpush1.bf16.msra.mxu1 %v17128_v60  ;;  %14272 = vmatprep.subr.bf16.mxu0 %v17135_v23  ;;  %v8483_v60 = vld [vmem:[%s19627_s14 + $0xf80] sm:$0xff]  ;;  %v8508_v21 = vld [vmem:[%s19627_s14 + $0x1048] sm:$0xff] }
 0x560   : > { %14600 = vmatprep.subr.bf16.mxu1 %v17137_v33  ;;  %v8487_v23 = vld [vmem:[%s19627_s14 + $0xfa0] sm:$0xff]  ;;  %v8484_v33 = vld [vmem:[%s19627_s14 + $0xf88] sm:$0xff] }
 0x561   : > { %v17175_v51 = vcombine.high %v8483_v60, %v8487_v23  ;;  %v17174_v20 = vcombine.low %v8483_v60, %v8487_v23  ;;  %v17176_v27 = vcombine.low %v8484_v33, %v8488_v61  ;;  %v8519_v60 = vld [vmem:[%s19627_s14 + $0x10a0] sm:$0xff]  ;;  %v19980_v23 = vpack.c.bf16 %v7964_v28, %v7964_v28 }
 0x562   : > { %14273 = vmatpush1.bf16.msra.mxu0 %v17134_v1  ;;  %v17715_v1 = vadd.f32 %v19297_v50, %v1438_v16  ;;  %v17185_v50 = vcombine.high %v8492_v11, %v8496_v17  ;;  %v8528_v11 = vld [vmem:[%s19627_s14 + $0x10e8] sm:$0xff] }
 0x563   : > { %14601 = vmatpush1.bf16.msra.mxu1 %v17136_v29  ;;  %14274 = vmatprep.subr.bf16.mxu0 %v17143_v3  ;;  %v17177_v29 = vcombine.high %v8484_v33, %v8488_v61  ;;  %v8491_v3 = vld [vmem:[%s19627_s14 + $0xfc0] sm:$0xff]  ;;  %v8516_v61 = vld [vmem:[%s19627_s14 + $0x1088] sm:$0xff] }
 0x564   : > { %14602 = vmatprep.subr.bf16.mxu1 %v17145_v8  ;;  %v8495_v8 = vld [vmem:[%s19627_s14 + $0xfe0] sm:$0xff]  ;;  %vm7929_vm7 = vcmp.gt.f32.partialorder %v17715_v1, 0.0  ;;  %v17208_v55 = vcombine.low %v8516_v61, %v8520_v62 }
 0x565   : > { %v17182_v24 = vcombine.low %v8491_v3, %v8495_v8 }
 0x566   : > { %14275 = vmatpush1.bf16.msra.mxu0 %v17142_v36  ;;  %v17183_v36 = vcombine.high %v8491_v3, %v8495_v8  ;;  %v8527_v3 = vld [vmem:[%s19627_s14 + $0x10e0] sm:$0xff]  ;;  %v8524_v8 = vld [vmem:[%s19627_s14 + $0x10c8] sm:$0xff] }
 0x567   : > { %14603 = vmatpush1.bf16.msra.mxu1 %v17144_v38  ;;  %14276 = vmatprep.subr.bf16.mxu0 %v17151_v40  ;;  %v7945_v38 = vmul.f32 0.01, %v17715_v1  ;;  %v8499_v40 = vld [vmem:[%s19627_s14 + $0x1000] sm:$0xff] }
 0x568   : > { %14604 = vmatprep.subr.bf16.mxu1 %v17153_v26  ;;  %v8503_v26 = vld [vmem:[%s19627_s14 + $0x1020] sm:$0xff] }
 0x569   : > { %v17190_v54 = vcombine.low %v8499_v40, %v8503_v26 }
 0x56a   : > { %14277 = vmatpush1.bf16.msra.mxu0 %v17150_v47  ;;  %v17191_v47 = vcombine.high %v8499_v40, %v8503_v26  ;;  %v8536_v40 = vld [vmem:[%s19627_s14 + $0x1128] sm:$0xff] }
 0x56b   : > { %14605 = vmatpush1.bf16.msra.mxu1 %v17152_v37  ;;  %14278 = vmatprep.subr.bf16.mxu0 %v17159_v48  ;;  %v7961_v37 = vsel %vm7929_vm7, %v17715_v1, %v7945_v38  ;;  %v17193_v48 = vcombine.high %v8500_v42, %v8504_v43  ;;  %v17209_v1 = vcombine.high %v8516_v61, %v8520_v62  ;;  %v8535_v38 = vld [vmem:[%s19627_s14 + $0x1120] sm:$0xff] }
 0x56c   : > { %14606 = vmatprep.subr.bf16.mxu1 %v17161_v52  ;;  %v8507_v52 = vld [vmem:[%s19627_s14 + $0x1040] sm:$0xff] }
 0x56d   : > { %v17199_v16 = vcombine.high %v8507_v52, %v8511_v2  ;;  %v8555_v61 = vld [vmem:[%s19627_s14 + $0x11c0] sm:$0xff] }
 0x56e   : > { %14279 = vmatpush1.bf16.msra.mxu0 %v17158_v56  ;;  %v8512_v56 = vld [vmem:[%s19627_s14 + $0x1068] sm:$0xff]  ;;  %v8559_v62 = vld [vmem:[%s19627_s14 + $0x11e0] sm:$0xff] }
 0x56f   : > { %14607 = vmatpush1.bf16.msra.mxu1 %v17160_v57  ;;  %14280 = vmatprep.subr.bf16.mxu0 %v17167_v58  ;;  %v19976_v57 = vpack.c.bf16 %v7961_v37, %v7961_v37  ;;  %v17192_v58 = vcombine.low %v8500_v42, %v8504_v43  ;;  %v17201_v33 = vcombine.high %v8508_v21, %v8512_v56  ;;  %v8544_v37 = vld [vmem:[%s19627_s14 + $0x1168] sm:$0xff] }
 0x570   : > { %14608 = vmatprep.subr.bf16.mxu1 %v17169_v34  ;;  %v8515_v34 = vld [vmem:[%s19627_s14 + $0x1080] sm:$0xff]  ;;  %v17216_v42 = vcombine.low %v8524_v8, %v8528_v11 }
 0x571   : > { %v17206_v17 = vcombine.low %v8515_v34, %v8519_v60 }
 0x572   : > { %14281 = vmatpush1.bf16.msra.mxu0 %v17166_v12  ;;  %v17198_v12 = vcombine.low %v8507_v52, %v8511_v2 }
 0x573   : > { %14609 = vmatpush1.bf16.msra.mxu1 %v17168_v0  ;;  %14282 = vmatprep.subr.bf16.mxu0 %v17175_v51  ;;  %v17200_v0 = vcombine.low %v8508_v21, %v8512_v56  ;;  %v17207_v51 = vcombine.high %v8515_v34, %v8519_v60  ;;  %v8551_v21 = vld [vmem:[%s19627_s14 + $0x11a0] sm:$0xff]  ;;  %v8548_v56 = vld [vmem:[%s19627_s14 + $0x1188] sm:$0xff] }
 0x574   : > { %14610 = vmatprep.subr.bf16.mxu1 %v17177_v29  ;;  %v8523_v29 = vld [vmem:[%s19627_s14 + $0x10c0] sm:$0xff] }
 0x575   : > { %v17214_v26 = vcombine.low %v8523_v29, %v8527_v3 }
 0x576   : > { %14283 = vmatpush1.bf16.msra.mxu0 %v17174_v20  ;;  %v17215_v20 = vcombine.high %v8523_v29, %v8527_v3  ;;  %v17247_v29 = vcombine.high %v8555_v61, %v8559_v62 }
 0x577   : > { %14611 = vmatpush1.bf16.msra.mxu1 %v17176_v27  ;;  %14284 = vmatprep.subr.bf16.mxu0 %v17183_v36  ;;  %v17217_v27 = vcombine.high %v8524_v8, %v8528_v11  ;;  %v8531_v36 = vld [vmem:[%s19627_s14 + $0x1100] sm:$0xff] }
 0x578   : > { %14612 = vmatprep.subr.bf16.mxu1 %v17185_v50  ;;  %v8532_v50 = vld [vmem:[%s19627_s14 + $0x1108] sm:$0xff]  ;;  %v17223_v43 = vcombine.high %v8531_v36, %v8535_v38  ;;  %v8563_v8 = vld [vmem:[%s19627_s14 + $0x1200] sm:$0xff] }
 0x579   : > { %v17225_v45 = vcombine.high %v8532_v50, %v8536_v40  ;;  %v17224_v52 = vcombine.low %v8532_v50, %v8536_v40  ;;  %v8567_v11 = vld [vmem:[%s19627_s14 + $0x1220] sm:$0xff] }
 0x57a   : > { %14285 = vmatpush1.bf16.msra.mxu0 %v17182_v24  ;;  %v8539_v24 = vld [vmem:[%s19627_s14 + $0x1140] sm:$0xff] }
 0x57b   : > { %14613 = vmatpush1.bf16.msra.mxu1 %v17184_v25  ;;  %14295 = vmatprep.subr.bf16.mxu0 %v17191_v47  ;;  %v8543_v25 = vld [vmem:[%s19627_s14 + $0x1160] sm:$0xff]  ;;  %v8540_v47 = vld [vmem:[%s19627_s14 + $0x1148] sm:$0xff] }
 0x57c   : > { %14623 = vmatprep.subr.bf16.mxu1 %v17193_v48  ;;  %v17222_v48 = vcombine.low %v8531_v36, %v8535_v38  ;;  %v17231_v2 = vcombine.high %v8539_v24, %v8543_v25  ;;  %v17233_v28 = vcombine.high %v8540_v47, %v8544_v37  ;;  %v17232_v34 = vcombine.low %v8540_v47, %v8544_v37  ;;  %v8571_v50 = vld [vmem:[%s19627_s14 + $0x1240] sm:$0xff] }
 0x57d   : > { %14287 = vmatmul.mubr.bf16.vlgmr.msra.gmra.mrb[16].mxu0 %v19976_v57  ;;  %v17255_v36 = vcombine.high %v8563_v8, %v8567_v11  ;;  %v8575_v40 = vld [vmem:[%s19627_s14 + $0x1260] sm:$0xff] }
 0x57e   : > { %14615 = vmatmul.mubr.bf16.vlgmr.msra.gmra.mrb[16].mxu1 %v19976_v57  ;;  %14296 = vmatpush1.bf16.msra.mxu0 %v17190_v54  ;;  %v8547_v54 = vld [vmem:[%s19627_s14 + $0x1180] sm:$0xff] }
 0x57f   : > { %14327 = vmatprep.mubr.bf16.mxu0 %v19980_v23  ;;  %14624 = vmatpush1.bf16.msra.mxu1 %v17192_v58  ;;  %v8552_v58 = vld [vmem:[%s19627_s14 + $0x11a8] sm:$0xff]  ;;  %v17239_v60 = vcombine.high %v8547_v54, %v8551_v21  ;;  %v8579_v47 = vld [vmem:[%s19627_s14 + $0x1280] sm:$0xff] }
 0x580   : > { %14655 = vmatprep.mubr.bf16.mxu1 %v19980_v23  ;;  %14297 = vmatprep.subr.bf16.mxu0 %v17199_v16  ;;  %v17230_v16 = vcombine.low %v8539_v24, %v8543_v25  ;;  %v17263_v24 = vcombine.high %v8571_v50, %v8575_v40  ;;  %v8583_v37 = vld [vmem:[%s19627_s14 + $0x12a0] sm:$0xff] }
 0x581   : > { %14625 = vmatprep.subr.bf16.mxu1 %v17201_v33  ;;  %v17241_v33 = vcombine.high %v8548_v56, %v8552_v58 }
 0x582   : > { %14298 = vmatpush1.bf16.msra.mxu0 %v17198_v12  ;;  %v8556_v12 = vld [vmem:[%s19627_s14 + $0x11c8] sm:$0xff] }
 0x583   : > { %14626 = vmatpush1.bf16.msra.mxu1 %v17200_v0  ;;  %14299 = vmatprep.subr.bf16.mxu0 %v17207_v51  ;;  %v8560_v0 = vld [vmem:[%s19627_s14 + $0x11e8] sm:$0xff]  ;;  %v17238_v51 = vcombine.low %v8547_v54, %v8551_v21  ;;  %v17271_v54 = vcombine.high %v8579_v47, %v8583_v37 }
 0x584   : > { %14627 = vmatprep.subr.bf16.mxu1 %v17209_v1  ;;  %v17240_v1 = vcombine.low %v8548_v56, %v8552_v58  ;;  %v17249_v3 = vcombine.high %v8556_v12, %v8560_v0  ;;  %v8587_v56 = vld [vmem:[%s19627_s14 + $0x12c0] sm:$0xff] }
 0x585   : > { %v8591_v58 = vld [vmem:[%s19627_s14 + $0x12e0] sm:$0xff] }
 0x586   : > { %14300 = vmatpush1.bf16.msra.mxu0 %v17206_v17  ;;  %v8564_v17 = vld [vmem:[%s19627_s14 + $0x1208] sm:$0xff] }
 0x587   : > { %14628 = vmatpush1.bf16.msra.mxu1 %v17208_v55  ;;  %14301 = vmatprep.subr.bf16.mxu0 %v17215_v20  ;;  %v8568_v55 = vld [vmem:[%s19627_s14 + $0x1228] sm:$0xff]  ;;  %v17246_v20 = vcombine.low %v8555_v61, %v8559_v62  ;;  %v17279_v61 = vcombine.high %v8587_v56, %v8591_v58 }
 0x588   : > { %14629 = vmatprep.subr.bf16.mxu1 %v17217_v27  ;;  %v17248_v27 = vcombine.low %v8556_v12, %v8560_v0  ;;  %v17257_v38 = vcombine.high %v8564_v17, %v8568_v55  ;;  %v8595_v12 = vld [vmem:[%s19627_s14 + $0x1300] sm:$0xff] }
 0x589   : > { %v8599_v0 = vld [vmem:[%s19627_s14 + $0x1320] sm:$0xff] }
 0x58a   : > { %14302 = vmatpush1.bf16.msra.mxu0 %v17214_v26  ;;  %v8572_v26 = vld [vmem:[%s19627_s14 + $0x1248] sm:$0xff] }
 0x58b   : > { %14630 = vmatpush1.bf16.msra.mxu1 %v17216_v42  ;;  %14303 = vmatprep.subr.bf16.mxu0 %v17223_v43  ;;  %v8576_v42 = vld [vmem:[%s19627_s14 + $0x1268] sm:$0xff]  ;;  %v17254_v43 = vcombine.low %v8563_v8, %v8567_v11  ;;  %v17287_v8 = vcombine.high %v8595_v12, %v8599_v0 }
 0x58c   : > { %14631 = vmatprep.subr.bf16.mxu1 %v17225_v45  ;;  %v17256_v45 = vcombine.low %v8564_v17, %v8568_v55  ;;  %v17265_v25 = vcombine.high %v8572_v26, %v8576_v42  ;;  %v8603_v17 = vld [vmem:[%s19627_s14 + $0x1340] sm:$0xff] }
 0x58d   : > { %v8607_v55 = vld [vmem:[%s19627_s14 + $0x1360] sm:$0xff] }
 0x58e   : > { %14304 = vmatpush1.bf16.msra.mxu0 %v17222_v48  ;;  %v8580_v48 = vld [vmem:[%s19627_s14 + $0x1288] sm:$0xff] }
 0x58f   : > { %14632 = vmatpush1.bf16.msra.mxu1 %v17224_v52  ;;  %14305 = vmatprep.subr.bf16.mxu0 %v17231_v2  ;;  %v8584_v52 = vld [vmem:[%s19627_s14 + $0x12a8] sm:$0xff]  ;;  %v17262_v2 = vcombine.low %v8571_v50, %v8575_v40  ;;  %v17295_v50 = vcombine.high %v8603_v17, %v8607_v55  ;;  %v1446_v40 = vrot.slane %v19950_v46, %v1413_v10 }
 0x590   : > { %14633 = vmatprep.subr.bf16.mxu1 %v17233_v28  ;;  %v17264_v28 = vcombine.low %v8572_v26, %v8576_v42  ;;  %v17273_v21 = vcombine.high %v8580_v48, %v8584_v52  ;;  %v8611_v42 = vld [vmem:[%s19627_s14 + $0x1380] sm:$0xff] }
 0x592   : > { %14306 = vmatpush1.bf16.msra.mxu0 %v17230_v16  ;;  %v8588_v16 = vld [vmem:[%s19627_s14 + $0x12c8] sm:$0xff] }
 0x593   : > { %14634 = vmatpush1.bf16.msra.mxu1 %v17232_v34  ;;  %14307 = vmatprep.subr.bf16.mxu0 %v17239_v60  ;;  %v8592_v34 = vld [vmem:[%s19627_s14 + $0x12e8] sm:$0xff]  ;;  %v17270_v60 = vcombine.low %v8579_v47, %v8583_v37  ;;  %v17294_v47 = vcombine.low %v8603_v17, %v8607_v55 }
 0x594   : > { %14635 = vmatprep.subr.bf16.mxu1 %v17241_v33  ;;  %v17272_v33 = vcombine.low %v8580_v48, %v8584_v52  ;;  %v17281_v62 = vcombine.high %v8588_v16, %v8592_v34  ;;  %v17717_v48 = vadd.f32 %v19573_v41, %v1446_v40  ;;  %v8636_v55 = vld [vmem:[%s19627_s14 + $0x1448] sm:$0xff]  ;;  %v8647_v40 = vld [vmem:[%s19627_s14 + $0x14a0] sm:$0xff] }
 0x596   : > { %14308 = vmatpush1.bf16.msra.mxu0 %v17238_v51  ;;  %v8596_v51 = vld [vmem:[%s19627_s14 + $0x1308] sm:$0xff]  ;;  %vm7931_vm9 = vcmp.gt.f32.partialorder %v17717_v48, 0.0 }
 0x597   : > { %14636 = vmatpush1.bf16.msra.mxu1 %v17240_v1  ;;  %14309 = vmatprep.subr.bf16.mxu0 %v17247_v29  ;;  %v8600_v1 = vld [vmem:[%s19627_s14 + $0x1328] sm:$0xff]  ;;  %v17278_v29 = vcombine.low %v8587_v56, %v8591_v58 }
 0x598   : > { %14637 = vmatprep.subr.bf16.mxu1 %v17249_v3  ;;  %v17280_v3 = vcombine.low %v8588_v16, %v8592_v34  ;;  %v17289_v11 = vcombine.high %v8596_v51, %v8600_v1  ;;  %v7947_v34 = vmul.f32 0.01, %v17717_v48 }
 0x59a   : > { %14310 = vmatpush1.bf16.msra.mxu0 %v17246_v20  ;;  %v8604_v20 = vld [vmem:[%s19627_s14 + $0x1348] sm:$0xff] }
 0x59b   : > { %14638 = vmatpush1.bf16.msra.mxu1 %v17248_v27  ;;  %14311 = vmatprep.subr.bf16.mxu0 %v17255_v36  ;;  %v8608_v27 = vld [vmem:[%s19627_s14 + $0x1368] sm:$0xff]  ;;  %v17286_v36 = vcombine.low %v8595_v12, %v8599_v0 }
 0x59c   : > { %14639 = vmatprep.subr.bf16.mxu1 %v17257_v38  ;;  %v17288_v38 = vcombine.low %v8596_v51, %v8600_v1  ;;  %v17297_v26 = vcombine.high %v8604_v20, %v8608_v27  ;;  %v17296_v37 = vcombine.low %v8604_v20, %v8608_v27  ;;  %v7963_v1 = vsel %vm7931_vm9, %v17717_v48, %v7947_v34  ;;  %v8640_v20 = vld [vmem:[%s19627_s14 + $0x1468] sm:$0xff]  ;;  %v8655_v48 = vld [vmem:[%s19627_s14 + $0x14e0] sm:$0xff] }
 0x59d   : > { %v20056_v27 = vpack.c.bf16 %v7963_v1, %v7963_v1  ;;  %v8664_v34 = vld [vmem:[%s19627_s14 + $0x1528] sm:$0xff] }
 0x59e   : > { %14312 = vmatpush1.bf16.msra.mxu0 %v17254_v43  ;;  %v8615_v43 = vld [vmem:[%s19627_s14 + $0x13a0] sm:$0xff] }
 0x59f   : > { %14640 = vmatpush1.bf16.msra.mxu1 %v17256_v45  ;;  %14313 = vmatprep.subr.bf16.mxu0 %v17263_v24  ;;  %v8612_v45 = vld [vmem:[%s19627_s14 + $0x1388] sm:$0xff]  ;;  %v17303_v10 = vcombine.high %v8611_v42, %v8615_v43  ;;  %v17302_v56 = vcombine.low %v8611_v42, %v8615_v43  ;;  %v17329_v42 = vcombine.high %v8636_v55, %v8640_v20 }
 0x5a0   : > { %14641 = vmatprep.subr.bf16.mxu1 %v17265_v25  ;;  %v8616_v24 = vld [vmem:[%s19627_s14 + $0x13a8] sm:$0xff]  ;;  %v1458_v25 = vrot.slane %v19950_v46, %v1425_v15 }
 0x5a1   : > { %v17305_v52 = vcombine.high %v8612_v45, %v8616_v24  ;;  %v17304_v58 = vcombine.low %v8612_v45, %v8616_v24  ;;  %v8644_v43 = vld [vmem:[%s19627_s14 + $0x1488] sm:$0xff] }
 0x5a2   : > { %14314 = vmatpush1.bf16.msra.mxu0 %v17262_v2  ;;  %v8619_v2 = vld [vmem:[%s19627_s14 + $0x13c0] sm:$0xff]  ;;  %v17720_v15 = vadd.f32 %v19583_v32, %v1458_v25  ;;  %v8648_v45 = vld [vmem:[%s19627_s14 + $0x14a8] sm:$0xff]  ;;  %v17328_v25 = vcombine.low %v8636_v55, %v8640_v20 }
 0x5a3   : > { %14642 = vmatpush1.bf16.msra.mxu1 %v17264_v28  ;;  %14315 = vmatprep.subr.bf16.mxu0 %v17271_v54  ;;  %v8623_v28 = vld [vmem:[%s19627_s14 + $0x13e0] sm:$0xff]  ;;  %v8620_v54 = vld [vmem:[%s19627_s14 + $0x13c8] sm:$0xff] }
 0x5a4   : > { %14643 = vmatprep.subr.bf16.mxu1 %v17273_v21  ;;  %v8624_v21 = vld [vmem:[%s19627_s14 + $0x13e8] sm:$0xff]  ;;  %v17311_v16 = vcombine.high %v8619_v2, %v8623_v28  ;;  %v7950_v12 = vmul.f32 0.01, %v17720_v15  ;;  %v17310_v32 = vcombine.low %v8619_v2, %v8623_v28  ;;  %vm7934_vm10 = vcmp.gt.f32.partialorder %v17720_v15, 0.0 }
 0x5a5   : > { %v17313_v41 = vcombine.high %v8620_v54, %v8624_v21  ;;  %v17312_v0 = vcombine.low %v8620_v54, %v8624_v21  ;;  %v8656_v2 = vld [vmem:[%s19627_s14 + $0x14e8] sm:$0xff]  ;;  %v17336_v54 = vcombine.low %v8644_v43, %v8648_v45 }
 0x5a6   : > { %14316 = vmatpush1.bf16.msra.mxu0 %v17270_v60  ;;  %v8627_v60 = vld [vmem:[%s19627_s14 + $0x1400] sm:$0xff]  ;;  %v8680_v55 = vld [vmem:[%s19627_s14 + $0x15a8] sm:$0xff] }
 0x5a7   : > { %14644 = vmatpush1.bf16.msra.mxu1 %v17272_v33  ;;  %14317 = vmatprep.subr.bf16.mxu0 %v17279_v61  ;;  %v8631_v33 = vld [vmem:[%s19627_s14 + $0x1420] sm:$0xff]  ;;  %v8628_v61 = vld [vmem:[%s19627_s14 + $0x1408] sm:$0xff] }
 0x5a8   : > { %14645 = vmatprep.subr.bf16.mxu1 %v17281_v62  ;;  %v8632_v62 = vld [vmem:[%s19627_s14 + $0x1428] sm:$0xff]  ;;  %v17319_v51 = vcombine.high %v8627_v60, %v8631_v33  ;;  %v17318_v17 = vcombine.low %v8627_v60, %v8631_v33 }
 0x5aa   : > { %14318 = vmatpush1.bf16.msra.mxu0 %v17278_v29  ;;  %v17321_v29 = vcombine.high %v8628_v61, %v8632_v62 }
 0x5ab   : > { %14646 = vmatpush1.bf16.msra.mxu1 %v17280_v3  ;;  %14319 = vmatprep.subr.bf16.mxu0 %v17287_v8  ;;  %v8635_v3 = vld [vmem:[%s19627_s14 + $0x1440] sm:$0xff] }
 0x5ac   : > { %14647 = vmatprep.subr.bf16.mxu1 %v17289_v11  ;;  %v8639_v8 = vld [vmem:[%s19627_s14 + $0x1460] sm:$0xff]  ;;  %v7966_v11 = vsel %vm7934_vm10, %v17720_v15, %v7950_v12 }
 0x5ad   : > { %v17326_v24 = vcombine.low %v8635_v3, %v8639_v8  ;;  %v8671_v12 = vld [vmem:[%s19627_s14 + $0x1560] sm:$0xff] }
 0x5ae   : > { %14320 = vmatpush1.bf16.msra.mxu0 %v17286_v36  ;;  %v17320_v36 = vcombine.low %v8628_v61, %v8632_v62  ;;  %v8667_v62 = vld [vmem:[%s19627_s14 + $0x1540] sm:$0xff] }
 0x5af   : > { %14648 = vmatpush1.bf16.msra.mxu1 %v17288_v38  ;;  %14321 = vmatprep.subr.bf16.mxu0 %v17295_v50  ;;  %v17327_v38 = vcombine.high %v8635_v3, %v8639_v8  ;;  %v8643_v50 = vld [vmem:[%s19627_s14 + $0x1480] sm:$0xff]  ;;  %v17358_v20 = vcombine.low %v8667_v62, %v8671_v12 }
 0x5b0   : > { %14649 = vmatprep.subr.bf16.mxu1 %v17297_v26  ;;  %v20060_v26 = vpack.c.bf16 %v7966_v11, %v7966_v11  ;;  %v17334_v28 = vcombine.low %v8643_v50, %v8647_v40  ;;  %v8675_v8 = vld [vmem:[%s19627_s14 + $0x1580] sm:$0xff] }
 0x5b1   : > { %v8679_v11 = vld [vmem:[%s19627_s14 + $0x15a0] sm:$0xff] }
 0x5b2   : > { %14322 = vmatpush1.bf16.msra.mxu0 %v17294_v47  ;;  %v17335_v47 = vcombine.high %v8643_v50, %v8647_v40  ;;  %v8683_v40 = vld [vmem:[%s19627_s14 + $0x15c0] sm:$0xff] }
 0x5b3   : > { %14650 = vmatpush1.bf16.msra.mxu1 %v17296_v37  ;;  %14323 = vmatprep.subr.bf16.mxu0 %v17303_v10  ;;  %v17337_v37 = vcombine.high %v8644_v43, %v8648_v45  ;;  %v8651_v10 = vld [vmem:[%s19627_s14 + $0x14c0] sm:$0xff]  ;;  %v8684_v43 = vld [vmem:[%s19627_s14 + $0x15c8] sm:$0xff] }
 0x5b4   : > { %14651 = vmatprep.subr.bf16.mxu1 %v17305_v52  ;;  %v8652_v52 = vld [vmem:[%s19627_s14 + $0x14c8] sm:$0xff]  ;;  %v17343_v21 = vcombine.high %v8651_v10, %v8655_v48 }
 0x5b5   : > { %v17345_v15 = vcombine.high %v8652_v52, %v8656_v2  ;;  %v17344_v60 = vcombine.low %v8652_v52, %v8656_v2  ;;  %v8688_v45 = vld [vmem:[%s19627_s14 + $0x15e8] sm:$0xff] }
 0x5b6   : > { %14324 = vmatpush1.bf16.msra.mxu0 %v17302_v56  ;;  %v8659_v56 = vld [vmem:[%s19627_s14 + $0x1500] sm:$0xff]  ;;  %v8692_v52 = vld [vmem:[%s19627_s14 + $0x1608] sm:$0xff] }
 0x5b7   : > { %14652 = vmatpush1.bf16.msra.mxu1 %v17304_v58  ;;  %14325 = vmatprep.subr.bf16.mxu0 %v17311_v16  ;;  %v8663_v58 = vld [vmem:[%s19627_s14 + $0x1520] sm:$0xff]  ;;  %v8660_v16 = vld [vmem:[%s19627_s14 + $0x1508] sm:$0xff] }
 0x5b8   : > { %14653 = vmatprep.subr.bf16.mxu1 %v17313_v41  ;;  %v17342_v41 = vcombine.low %v8651_v10, %v8655_v48  ;;  %v17351_v33 = vcombine.high %v8659_v56, %v8663_v58  ;;  %v17353_v61 = vcombine.high %v8660_v16, %v8664_v34  ;;  %v17352_v1 = vcombine.low %v8660_v16, %v8664_v34  ;;  %v8691_v10 = vld [vmem:[%s19627_s14 + $0x1600] sm:$0xff]  ;;  %v8696_v2 = vld [vmem:[%s19627_s14 + $0x1628] sm:$0xff] }
 0x5b9   : > { %v8695_v48 = vld [vmem:[%s19627_s14 + $0x1620] sm:$0xff]  ;;  %v8700_v16 = vld [vmem:[%s19627_s14 + $0x1648] sm:$0xff] }
 0x5ba   : > { %14326 = vmatpush1.bf16.msra.mxu0 %v17310_v32  ;;  %v8668_v32 = vld [vmem:[%s19627_s14 + $0x1548] sm:$0xff] }
 0x5bb   : > { %14654 = vmatpush1.bf16.msra.mxu1 %v17312_v0  ;;  %14336 = vmatprep.subr.bf16.mxu0 %v17319_v51  ;;  %v8672_v0 = vld [vmem:[%s19627_s14 + $0x1568] sm:$0xff]  ;;  %v17350_v51 = vcombine.low %v8659_v56, %v8663_v58  ;;  %v8699_v56 = vld [vmem:[%s19627_s14 + $0x1640] sm:$0xff] }
 0x5bc   : > { %14664 = vmatprep.subr.bf16.mxu1 %v17321_v29  ;;  %v17359_v29 = vcombine.high %v8667_v62, %v8671_v12  ;;  %v17361_v3 = vcombine.high %v8668_v32, %v8672_v0  ;;  %v8703_v58 = vld [vmem:[%s19627_s14 + $0x1660] sm:$0xff]  ;;  %v8704_v34 = vld [vmem:[%s19627_s14 + $0x1668] sm:$0xff] }
 0x5bd   : > { %14328 = vmatmul.mubr.bf16.vlgmr.msra.gmra.mrb[16].mxu0 %v20056_v27  ;;  %v8707_v62 = vld [vmem:[%s19627_s14 + $0x1680] sm:$0xff] }
 0x5be   : > { %14656 = vmatmul.mubr.bf16.vlgmr.msra.gmra.mrb[16].mxu1 %v20056_v27  ;;  %14337 = vmatpush1.bf16.msra.mxu0 %v17318_v17  ;;  %v8676_v17 = vld [vmem:[%s19627_s14 + $0x1588] sm:$0xff]  ;;  %v8711_v12 = vld [vmem:[%s19627_s14 + $0x16a0] sm:$0xff] }
 0x5bf   : > { %14368 = vmatprep.mubr.bf16.mxu0 %v20060_v26  ;;  %14665 = vmatpush1.bf16.msra.mxu1 %v17320_v36  ;;  %v17360_v36 = vcombine.low %v8668_v32, %v8672_v0  ;;  %v17369_v50 = vcombine.high %v8676_v17, %v8680_v55  ;;  %v8708_v32 = vld [vmem:[%s19627_s14 + $0x1688] sm:$0xff] }
 0x5c0   : > { %14696 = vmatprep.mubr.bf16.mxu1 %v20060_v26  ;;  %14338 = vmatprep.subr.bf16.mxu0 %v17327_v38  ;;  %v17367_v38 = vcombine.high %v8675_v8, %v8679_v11  ;;  %v8712_v0 = vld [vmem:[%s19627_s14 + $0x16a8] sm:$0xff] }
 0x5c1   : > { %14666 = vmatprep.subr.bf16.mxu1 %v17329_v42  ;;  %v8687_v42 = vld [vmem:[%s19627_s14 + $0x15e0] sm:$0xff] }
 0x5c2   : > { %14339 = vmatpush1.bf16.msra.mxu0 %v17326_v24  ;;  %v17366_v24 = vcombine.low %v8675_v8, %v8679_v11  ;;  %v8715_v8 = vld [vmem:[%s19627_s14 + $0x16c0] sm:$0xff] }
 0x5c3   : > { %14667 = vmatpush1.bf16.msra.mxu1 %v17328_v25  ;;  %14340 = vmatprep.subr.bf16.mxu0 %v17335_v47  ;;  %v17368_v25 = vcombine.low %v8676_v17, %v8680_v55  ;;  %v17375_v47 = vcombine.high %v8683_v40, %v8687_v42  ;;  %v8719_v11 = vld [vmem:[%s19627_s14 + $0x16e0] sm:$0xff]  ;;  %v8716_v17 = vld [vmem:[%s19627_s14 + $0x16c8] sm:$0xff] }
 0x5c4   : > { %14668 = vmatprep.subr.bf16.mxu1 %v17337_v37  ;;  %v17377_v37 = vcombine.high %v8684_v43, %v8688_v45  ;;  %v8720_v55 = vld [vmem:[%s19627_s14 + $0x16e8] sm:$0xff] }
 0x5c6   : > { %14341 = vmatpush1.bf16.msra.mxu0 %v17334_v28  ;;  %v17374_v28 = vcombine.low %v8683_v40, %v8687_v42  ;;  %v8723_v40 = vld [vmem:[%s19627_s14 + $0x1700] sm:$0xff] }
 0x5c7   : > { %14669 = vmatpush1.bf16.msra.mxu1 %v17336_v54  ;;  %14342 = vmatprep.subr.bf16.mxu0 %v17343_v21  ;;  %v17376_v54 = vcombine.low %v8684_v43, %v8688_v45  ;;  %v17383_v21 = vcombine.high %v8691_v10, %v8695_v48  ;;  %v8727_v42 = vld [vmem:[%s19627_s14 + $0x1720] sm:$0xff]  ;;  %v8724_v43 = vld [vmem:[%s19627_s14 + $0x1708] sm:$0xff] }
 0x5c8   : > { %14670 = vmatprep.subr.bf16.mxu1 %v17345_v15  ;;  %v17385_v15 = vcombine.high %v8692_v52, %v8696_v2  ;;  %v8728_v45 = vld [vmem:[%s19627_s14 + $0x1728] sm:$0xff] }
 0x5ca   : > { %14343 = vmatpush1.bf16.msra.mxu0 %v17342_v41  ;;  %v17382_v41 = vcombine.low %v8691_v10, %v8695_v48  ;;  %v8731_v10 = vld [vmem:[%s19627_s14 + $0x1740] sm:$0xff] }
 0x5cb   : > { %14671 = vmatpush1.bf16.msra.mxu1 %v17344_v60  ;;  %14344 = vmatprep.subr.bf16.mxu0 %v17351_v33  ;;  %v17384_v60 = vcombine.low %v8692_v52, %v8696_v2  ;;  %v17391_v33 = vcombine.high %v8699_v56, %v8703_v58  ;;  %v8735_v48 = vld [vmem:[%s19627_s14 + $0x1760] sm:$0xff]  ;;  %v8732_v52 = vld [vmem:[%s19627_s14 + $0x1748] sm:$0xff] }
 0x5cc   : > { %14672 = vmatprep.subr.bf16.mxu1 %v17353_v61  ;;  %v17393_v61 = vcombine.high %v8700_v16, %v8704_v34  ;;  %v8736_v2 = vld [vmem:[%s19627_s14 + $0x1768] sm:$0xff] }
 0x5ce   : > { %14345 = vmatpush1.bf16.msra.mxu0 %v17350_v51  ;;  %v17390_v51 = vcombine.low %v8699_v56, %v8703_v58  ;;  %v17425_v56 = vcombine.high %v8732_v52, %v8736_v2  ;;  %v8739_v58 = vld [vmem:[%s19627_s14 + $0x1780] sm:$0xff] }
 0x5cf   : > { %14673 = vmatpush1.bf16.msra.mxu1 %v17352_v1  ;;  %14346 = vmatprep.subr.bf16.mxu0 %v17359_v29  ;;  %v17392_v1 = vcombine.low %v8700_v16, %v8704_v34  ;;  %v17399_v29 = vcombine.high %v8707_v62, %v8711_v12  ;;  %v8743_v16 = vld [vmem:[%s19627_s14 + $0x17a0] sm:$0xff]  ;;  %v8740_v34 = vld [vmem:[%s19627_s14 + $0x1788] sm:$0xff] }
 0x5d0   : > { %14674 = vmatprep.subr.bf16.mxu1 %v17361_v3  ;;  %v17401_v3 = vcombine.high %v8708_v32, %v8712_v0 }
 0x5d2   : > { %14347 = vmatpush1.bf16.msra.mxu0 %v17358_v20  ;;  %v17398_v20 = vcombine.low %v8707_v62, %v8711_v12 }
 0x5d3   : > { %14675 = vmatpush1.bf16.msra.mxu1 %v17360_v36  ;;  %14348 = vmatprep.subr.bf16.mxu0 %v17367_v38  ;;  %v17400_v36 = vcombine.low %v8708_v32, %v8712_v0  ;;  %v17407_v38 = vcombine.high %v8715_v8, %v8719_v11  ;;  %v8747_v32 = vld [vmem:[%s19627_s14 + $0x17c0] sm:$0xff] }
 0x5d4   : > { %14676 = vmatprep.subr.bf16.mxu1 %v17369_v50  ;;  %v17409_v50 = vcombine.high %v8716_v17, %v8720_v55  ;;  %v8751_v0 = vld [vmem:[%s19627_s14 + $0x17e0] sm:$0xff] }
 0x5d6   : > { %14349 = vmatpush1.bf16.msra.mxu0 %v17366_v24  ;;  %v17406_v24 = vcombine.low %v8715_v8, %v8719_v11  ;;  %v8755_v11 = vld [vmem:[%s19627_s14 + $0x1800] sm:$0xff] }
 0x5d7   : > { %14677 = vmatpush1.bf16.msra.mxu1 %v17368_v25  ;;  %14350 = vmatprep.subr.bf16.mxu0 %v17375_v47  ;;  %v17408_v25 = vcombine.low %v8716_v17, %v8720_v55  ;;  %v17415_v47 = vcombine.high %v8723_v40, %v8727_v42  ;;  %v8759_v17 = vld [vmem:[%s19627_s14 + $0x1820] sm:$0xff]  ;;  %v8756_v55 = vld [vmem:[%s19627_s14 + $0x1808] sm:$0xff] }
 0x5d8   : > { %14678 = vmatprep.subr.bf16.mxu1 %v17377_v37  ;;  %v17417_v37 = vcombine.high %v8724_v43, %v8728_v45 }
 0x5da   : > { %14351 = vmatpush1.bf16.msra.mxu0 %v17374_v28  ;;  %v17414_v28 = vcombine.low %v8723_v40, %v8727_v42 }
 0x5db   : > { %14679 = vmatpush1.bf16.msra.mxu1 %v17376_v54  ;;  %14352 = vmatprep.subr.bf16.mxu0 %v17383_v21  ;;  %v17416_v54 = vcombine.low %v8724_v43, %v8728_v45  ;;  %v17423_v21 = vcombine.high %v8731_v10, %v8735_v48  ;;  %v8763_v43 = vld [vmem:[%s19627_s14 + $0x1840] sm:$0xff] }
 0x5dc   : > { %14680 = vmatprep.subr.bf16.mxu1 %v17385_v15  ;;  %v1454_v15 = vrot.slane %v19950_v46, %v1421_v5  ;;  %v17431_v5 = vcombine.high %v8739_v58, %v8743_v16  ;;  %v8767_v45 = vld [vmem:[%s19627_s14 + $0x1860] sm:$0xff] }
 0x5de   : > { %14353 = vmatpush1.bf16.msra.mxu0 %v17382_v41  ;;  %v8744_v41 = vld [vmem:[%s19627_s14 + $0x17a8] sm:$0xff]  ;;  %v17719_v62 = vadd.f32 %v19577_v22, %v1454_v15 }
 0x5df   : > { %14681 = vmatpush1.bf16.msra.mxu1 %v17384_v60  ;;  %14354 = vmatprep.subr.bf16.mxu0 %v17391_v33  ;;  %v1466_v60 = vrot.slane %v19950_v46, %v1433_v14  ;;  %v17422_v33 = vcombine.low %v8731_v10, %v8735_v48  ;;  %v17433_v12 = vcombine.high %v8740_v34, %v8744_v41  ;;  %v8772_v15 = vld [vmem:[%s19627_s14 + $0x1888] sm:$0xff] }
 0x5e0   : > { %14682 = vmatprep.subr.bf16.mxu1 %v17393_v61  ;;  %v17424_v61 = vcombine.low %v8732_v52, %v8736_v2  ;;  %v17430_v46 = vcombine.low %v8739_v58, %v8743_v16  ;;  %v7949_v8 = vmul.f32 0.01, %v17719_v62  ;;  %vm7933_vm11 = vcmp.gt.f32.partialorder %v17719_v62, 0.0  ;;  %v8771_v2 = vld [vmem:[%s19627_s14 + $0x1880] sm:$0xff] }
 0x5e1   : > { %v17722_v14 = vadd.f32 %v19918_v35, %v1466_v60  ;;  %v17438_v35 = vcombine.low %v8747_v32, %v8751_v0  ;;  %v17455_v52 = vcombine.high %v8763_v43, %v8767_v45  ;;  %v17454_v58 = vcombine.low %v8763_v43, %v8767_v45  ;;  %v8779_v60 = vld [vmem:[%s19627_s14 + $0x18c0] sm:$0xff]  ;;  %v8804_v43 = vld [vmem:[%s19627_s14 + $0x1988] sm:$0xff] }
 0x5e2   : > { %14355 = vmatpush1.bf16.msra.mxu0 %v17390_v51  ;;  %v8748_v51 = vld [vmem:[%s19627_s14 + $0x17c8] sm:$0xff]  ;;  %v7965_v40 = vsel %vm7933_vm11, %v17719_v62, %v7949_v8 }
 0x5e3   : > { %14683 = vmatpush1.bf16.msra.mxu1 %v17392_v1  ;;  %14356 = vmatprep.subr.bf16.mxu0 %v17399_v29  ;;  %v8752_v1 = vld [vmem:[%s19627_s14 + $0x17e8] sm:$0xff]  ;;  %v17432_v29 = vcombine.low %v8740_v34, %v8744_v41  ;;  %vm7936_vm12 = vcmp.gt.f32.partialorder %v17722_v14, 0.0  ;;  %v20136_v10 = vpack.c.bf16 %v7965_v40, %v7965_v40  ;;  %v8803_v40 = vld [vmem:[%s19627_s14 + $0x1980] sm:$0xff] }
 0x5e4   : > { %14684 = vmatprep.subr.bf16.mxu1 %v17401_v3  ;;  %v17439_v3 = vcombine.high %v8747_v32, %v8751_v0  ;;  %v17441_v22 = vcombine.high %v8748_v51, %v8752_v1  ;;  %v8808_v45 = vld [vmem:[%s19627_s14 + $0x19a8] sm:$0xff] }
 0x5e6   : > { %14357 = vmatpush1.bf16.msra.mxu0 %v17398_v20  ;;  %v8760_v20 = vld [vmem:[%s19627_s14 + $0x1828] sm:$0xff] }
 0x5e7   : > { %14685 = vmatpush1.bf16.msra.mxu1 %v17400_v36  ;;  %14358 = vmatprep.subr.bf16.mxu0 %v17407_v38  ;;  %v7952_v36 = vmul.f32 0.01, %v17722_v14  ;;  %v17440_v38 = vcombine.low %v8748_v51, %v8752_v1  ;;  %v17449_v42 = vcombine.high %v8756_v55, %v8760_v20  ;;  %v17448_v48 = vcombine.low %v8756_v55, %v8760_v20  ;;  %v8787_v51 = vld [vmem:[%s19627_s14 + $0x1900] sm:$0xff]  ;;  %v8796_v55 = vld [vmem:[%s19627_s14 + $0x1948] sm:$0xff] }
 0x5e8   : > { %14686 = vmatprep.subr.bf16.mxu1 %v17409_v50  ;;  %v17447_v50 = vcombine.high %v8755_v11, %v8759_v17  ;;  %v8791_v1 = vld [vmem:[%s19627_s14 + $0x1920] sm:$0xff]  ;;  %v8800_v20 = vld [vmem:[%s19627_s14 + $0x1968] sm:$0xff] }
 0x5e9   : > { %v17479_v8 = vcombine.high %v8787_v51, %v8791_v1 }
 0x5ea   : > { %14359 = vmatpush1.bf16.msra.mxu0 %v17406_v24  ;;  %v7968_v24 = vsel %vm7936_vm12, %v17722_v14, %v7952_v36  ;;  %v8788_v14 = vld [vmem:[%s19627_s14 + $0x1908] sm:$0xff]  ;;  %v17478_v36 = vcombine.low %v8787_v51, %v8791_v1 }
 0x5eb   : > { %14687 = vmatpush1.bf16.msra.mxu1 %v17408_v25  ;;  %14360 = vmatprep.subr.bf16.mxu0 %v17415_v47  ;;  %v17446_v25 = vcombine.low %v8755_v11, %v8759_v17  ;;  %v8764_v47 = vld [vmem:[%s19627_s14 + $0x1848] sm:$0xff]  ;;  %v8795_v11 = vld [vmem:[%s19627_s14 + $0x1940] sm:$0xff] }
 0x5ec   : > { %14688 = vmatprep.subr.bf16.mxu1 %v17417_v37  ;;  %v8768_v37 = vld [vmem:[%s19627_s14 + $0x1868] sm:$0xff]  ;;  %v8799_v17 = vld [vmem:[%s19627_s14 + $0x1960] sm:$0xff] }
 0x5ed   : > { %v17456_v16 = vcombine.low %v8764_v47, %v8768_v37  ;;  %v8832_v51 = vld [vmem:[%s19627_s14 + $0x1a68] sm:$0xff] }
 0x5ee   : > { %14361 = vmatpush1.bf16.msra.mxu0 %v17414_v28  ;;  %v8775_v28 = vld [vmem:[%s19627_s14 + $0x18a0] sm:$0xff] }
 0x5ef   : > { %14689 = vmatpush1.bf16.msra.mxu1 %v17416_v54  ;;  %14362 = vmatprep.subr.bf16.mxu0 %v17423_v21  ;;  %v20140_v54 = vpack.c.bf16 %v7968_v24, %v7968_v24  ;;  %v17457_v21 = vcombine.high %v8764_v47, %v8768_v37  ;;  %v17463_v34 = vcombine.high %v8771_v2, %v8775_v28 }
 0x5f0   : > { %14690 = vmatprep.subr.bf16.mxu1 %v17425_v56  ;;  %v8776_v56 = vld [vmem:[%s19627_s14 + $0x18a8] sm:$0xff]  ;;  %v17462_v62 = vcombine.low %v8771_v2, %v8775_v28  ;;  %v17486_v24 = vcombine.low %v8795_v11, %v8799_v17  ;;  %v17497_v37 = vcombine.high %v8804_v43, %v8808_v45 }
 0x5f1   : > { %v17465_v41 = vcombine.high %v8772_v15, %v8776_v56  ;;  %v8812_v2 = vld [vmem:[%s19627_s14 + $0x19c8] sm:$0xff] }
 0x5f2   : > { %14363 = vmatpush1.bf16.msra.mxu0 %v17422_v33  ;;  %v8783_v33 = vld [vmem:[%s19627_s14 + $0x18e0] sm:$0xff]  ;;  %v8816_v28 = vld [vmem:[%s19627_s14 + $0x19e8] sm:$0xff] }
 0x5f3   : > { %14691 = vmatpush1.bf16.msra.mxu1 %v17424_v61  ;;  %14364 = vmatprep.subr.bf16.mxu0 %v17431_v5  ;;  %v8780_v61 = vld [vmem:[%s19627_s14 + $0x18c8] sm:$0xff]  ;;  %v17471_v32 = vcombine.high %v8779_v60, %v8783_v33 }
 0x5f4   : > { %14692 = vmatprep.subr.bf16.mxu1 %v17433_v12  ;;  %v8784_v5 = vld [vmem:[%s19627_s14 + $0x18e8] sm:$0xff]  ;;  %v17464_v12 = vcombine.low %v8772_v15, %v8776_v56  ;;  %v17496_v15 = vcombine.low %v8804_v43, %v8808_v45 }
 0x5f5   : > { %v17473_v0 = vcombine.high %v8780_v61, %v8784_v5 }
 0x5f6   : > { %14365 = vmatpush1.bf16.msra.mxu0 %v17430_v46  ;;  %v8792_v46 = vld [vmem:[%s19627_s14 + $0x1928] sm:$0xff] }
 0x5f7   : > { %14693 = vmatpush1.bf16.msra.mxu1 %v17432_v29  ;;  %14366 = vmatprep.subr.bf16.mxu0 %v17439_v3  ;;  %v17470_v29 = vcombine.low %v8779_v60, %v8783_v33  ;;  %v17472_v3 = vcombine.low %v8780_v61, %v8784_v5  ;;  %v8824_v60 = vld [vmem:[%s19627_s14 + $0x1a28] sm:$0xff]  ;;  %v17504_v61 = vcombine.low %v8812_v2, %v8816_v28 }
 0x5f8   : > { %14694 = vmatprep.subr.bf16.mxu1 %v17441_v22  ;;  %v17481_v22 = vcombine.high %v8788_v14, %v8792_v46 }
 0x5fa   : > { %14367 = vmatpush1.bf16.msra.mxu0 %v17438_v35  ;;  %v17480_v35 = vcombine.low %v8788_v14, %v8792_v46 }
 0x5fb   : > { %14695 = vmatpush1.bf16.msra.mxu1 %v17440_v38  ;;  %14377 = vmatprep.subr.bf16.mxu0 %v17447_v50  ;;  %v17487_v38 = vcombine.high %v8795_v11, %v8799_v17  ;;  %v17489_v50 = vcombine.high %v8796_v55, %v8800_v20  ;;  %v8840_v11 = vld [vmem:[%s19627_s14 + $0x1aa8] sm:$0xff] }
 0x5fc   : > { %14705 = vmatprep.subr.bf16.mxu1 %v17449_v42  ;;  %v8807_v42 = vld [vmem:[%s19627_s14 + $0x19a0] sm:$0xff] }
 0x5fd   : > { %14369 = vmatmul.mubr.bf16.vlgmr.msra.gmra.mrb[16].mxu0 %v20136_v10  ;;  %v17495_v47 = vcombine.high %v8803_v40, %v8807_v42 }
 0x5fe   : > { %14697 = vmatmul.mubr.bf16.vlgmr.msra.gmra.mrb[16].mxu1 %v20136_v10  ;;  %14378 = vmatpush1.bf16.msra.mxu0 %v17446_v25  ;;  %v17488_v25 = vcombine.low %v8796_v55, %v8800_v20 }
 0x5ff   : > { %14409 = vmatprep.mubr.bf16.mxu0 %v20140_v54  ;;  %14706 = vmatpush1.bf16.msra.mxu1 %v17448_v48  ;;  %v8811_v48 = vld [vmem:[%s19627_s14 + $0x19c0] sm:$0xff] }
 0x600   : > { %14737 = vmatprep.mubr.bf16.mxu1 %v20140_v54  ;;  %14379 = vmatprep.subr.bf16.mxu0 %v17455_v52  ;;  %v8815_v52 = vld [vmem:[%s19627_s14 + $0x19e0] sm:$0xff] }
 0x601   : > { %14707 = vmatprep.subr.bf16.mxu1 %v17457_v21  ;;  %v17494_v21 = vcombine.low %v8803_v40, %v8807_v42  ;;  %v17503_v56 = vcombine.high %v8811_v48, %v8815_v52  ;;  %v17502_v33 = vcombine.low %v8811_v48, %v8815_v52  ;;  %v8848_v40 = vld [vmem:[%s19627_s14 + $0x1ae8] sm:$0xff] }
 0x602   : > { %14380 = vmatpush1.bf16.msra.mxu0 %v17454_v58  ;;  %v17505_v58 = vcombine.high %v8812_v2, %v8816_v28  ;;  %v8856_v48 = vld [vmem:[%s19627_s14 + $0x1b28] sm:$0xff] }
 0x603   : > { %14708 = vmatpush1.bf16.msra.mxu1 %v17456_v16  ;;  %14381 = vmatprep.subr.bf16.mxu0 %v17463_v34  ;;  %v8819_v16 = vld [vmem:[%s19627_s14 + $0x1a00] sm:$0xff] }
 0x604   : > { %14709 = vmatprep.subr.bf16.mxu1 %v17465_v41  ;;  %v8823_v34 = vld [vmem:[%s19627_s14 + $0x1a20] sm:$0xff]  ;;  %v8820_v41 = vld [vmem:[%s19627_s14 + $0x1a08] sm:$0xff] }
 0x605   : > { %v17511_v5 = vcombine.high %v8819_v16, %v8823_v34  ;;  %v17510_v1 = vcombine.low %v8819_v16, %v8823_v34  ;;  %v17512_v14 = vcombine.low %v8820_v41, %v8824_v60  ;;  %v8864_v16 = vld [vmem:[%s19627_s14 + $0x1b68] sm:$0xff] }
 0x606   : > { %14382 = vmatpush1.bf16.msra.mxu0 %v17462_v62  ;;  %v17513_v62 = vcombine.high %v8820_v41, %v8824_v60 }
 0x607   : > { %14710 = vmatpush1.bf16.msra.mxu1 %v17464_v12  ;;  %14383 = vmatprep.subr.bf16.mxu0 %v17471_v32  ;;  %v8827_v12 = vld [vmem:[%s19627_s14 + $0x1a40] sm:$0xff] }
 0x608   : > { %14711 = vmatprep.subr.bf16.mxu1 %v17473_v0  ;;  %v8831_v32 = vld [vmem:[%s19627_s14 + $0x1a60] sm:$0xff]  ;;  %v8828_v0 = vld [vmem:[%s19627_s14 + $0x1a48] sm:$0xff] }
 0x609   : > { %v17519_v46 = vcombine.high %v8827_v12, %v8831_v32  ;;  %v17518_v17 = vcombine.low %v8827_v12, %v8831_v32  ;;  %v17520_v55 = vcombine.low %v8828_v0, %v8832_v51  ;;  %v8871_v12 = vld [vmem:[%s19627_s14 + $0x1ba0] sm:$0xff]  ;;  %v8868_v32 = vld [vmem:[%s19627_s14 + $0x1b88] sm:$0xff] }
 0x60a   : > { %14384 = vmatpush1.bf16.msra.mxu0 %v17470_v29  ;;  %v17521_v29 = vcombine.high %v8828_v0, %v8832_v51  ;;  %v8872_v0 = vld [vmem:[%s19627_s14 + $0x1ba8] sm:$0xff] }
 0x60b   : > { %14712 = vmatpush1.bf16.msra.mxu1 %v17472_v3  ;;  %14385 = vmatprep.subr.bf16.mxu0 %v17479_v8  ;;  %v8835_v3 = vld [vmem:[%s19627_s14 + $0x1a80] sm:$0xff] }
 0x60c   : > { %14713 = vmatprep.subr.bf16.mxu1 %v17481_v22  ;;  %v8839_v8 = vld [vmem:[%s19627_s14 + $0x1aa0] sm:$0xff]  ;;  %v8836_v22 = vld [vmem:[%s19627_s14 + $0x1a88] sm:$0xff] }
 0x60d   : > { %v17527_v20 = vcombine.high %v8835_v3, %v8839_v8  ;;  %v17526_v42 = vcombine.low %v8835_v3, %v8839_v8  ;;  %v17528_v43 = vcombine.low %v8836_v22, %v8840_v11  ;;  %v8875_v3 = vld [vmem:[%s19627_s14 + $0x1bc0] sm:$0xff] }
 0x60e   : > { %14386 = vmatpush1.bf16.msra.mxu0 %v17478_v36  ;;  %v17529_v36 = vcombine.high %v8836_v22, %v8840_v11  ;;  %v8879_v8 = vld [vmem:[%s19627_s14 + $0x1be0] sm:$0xff]  ;;  %v8876_v22 = vld [vmem:[%s19627_s14 + $0x1bc8] sm:$0xff] }
 0x60f   : > { %14714 = vmatpush1.bf16.msra.mxu1 %v17480_v35  ;;  %14387 = vmatprep.subr.bf16.mxu0 %v17487_v38  ;;  %v8843_v35 = vld [vmem:[%s19627_s14 + $0x1ac0] sm:$0xff]  ;;  %v8880_v11 = vld [vmem:[%s19627_s14 + $0x1be8] sm:$0xff] }
 0x610   : > { %14715 = vmatprep.subr.bf16.mxu1 %v17489_v50  ;;  %v8847_v38 = vld [vmem:[%s19627_s14 + $0x1ae0] sm:$0xff]  ;;  %v8844_v50 = vld [vmem:[%s19627_s14 + $0x1ac8] sm:$0xff] }
 0x611   : > { %v17535_v45 = vcombine.high %v8843_v35, %v8847_v38  ;;  %v17534_v52 = vcombine.low %v8843_v35, %v8847_v38  ;;  %v17536_v2 = vcombine.low %v8844_v50, %v8848_v40  ;;  %v8883_v35 = vld [vmem:[%s19627_s14 + $0x1c00] sm:$0xff] }
 0x612   : > { %14388 = vmatpush1.bf16.msra.mxu0 %v17486_v24  ;;  %v17537_v24 = vcombine.high %v8844_v50, %v8848_v40  ;;  %v8887_v38 = vld [vmem:[%s19627_s14 + $0x1c20] sm:$0xff]  ;;  %v8884_v50 = vld [vmem:[%s19627_s14 + $0x1c08] sm:$0xff] }
 0x613   : > { %14716 = vmatpush1.bf16.msra.mxu1 %v17488_v25  ;;  %14389 = vmatprep.subr.bf16.mxu0 %v17495_v47  ;;  %v8851_v25 = vld [vmem:[%s19627_s14 + $0x1b00] sm:$0xff]  ;;  %v8888_v40 = vld [vmem:[%s19627_s14 + $0x1c28] sm:$0xff] }
 0x614   : > { %14717 = vmatprep.subr.bf16.mxu1 %v17497_v37  ;;  %v8855_v47 = vld [vmem:[%s19627_s14 + $0x1b20] sm:$0xff]  ;;  %v8852_v37 = vld [vmem:[%s19627_s14 + $0x1b08] sm:$0xff] }
 0x615   : > { %v17543_v28 = vcombine.high %v8851_v25, %v8855_v47  ;;  %v17542_v34 = vcombine.low %v8851_v25, %v8855_v47  ;;  %v17544_v41 = vcombine.low %v8852_v37, %v8856_v48  ;;  %v17577_v25 = vcombine.high %v8884_v50, %v8888_v40  ;;  %v8891_v47 = vld [vmem:[%s19627_s14 + $0x1c40] sm:$0xff] }
 0x616   : > { %14390 = vmatpush1.bf16.msra.mxu0 %v17494_v21  ;;  %v17545_v21 = vcombine.high %v8852_v37, %v8856_v48  ;;  %v8895_v37 = vld [vmem:[%s19627_s14 + $0x1c60] sm:$0xff] }
 0x617   : > { %14718 = vmatpush1.bf16.msra.mxu1 %v17496_v15  ;;  %14391 = vmatprep.subr.bf16.mxu0 %v17503_v56  ;;  %v8859_v15 = vld [vmem:[%s19627_s14 + $0x1b40] sm:$0xff] }
 0x618   : > { %14719 = vmatprep.subr.bf16.mxu1 %v17505_v58  ;;  %v8863_v56 = vld [vmem:[%s19627_s14 + $0x1b60] sm:$0xff]  ;;  %v8860_v58 = vld [vmem:[%s19627_s14 + $0x1b48] sm:$0xff] }
 0x619   : > { %v17551_v60 = vcombine.high %v8859_v15, %v8863_v56 }
 0x61a   : > { %14392 = vmatpush1.bf16.msra.mxu0 %v17502_v33  ;;  %v20193_v33 = vld [vmem:[%s18429_s26 + $0x8] sm:$0xff] }
 0x61b   : > { %14720 = vmatpush1.bf16.msra.mxu1 %v17504_v61  ;;  %14393 = vmatprep.subr.bf16.mxu0 %v17511_v5  ;;  %v1462_v61 = vrot.slane %v20193_v33, %v1429_v6  ;;  %v17553_v5 = vcombine.high %v8860_v58, %v8864_v16  ;;  %v1474_v51 = vrot.slane %v20193_v33, %v1441_v18 }
 0x61c   : > { %14721 = vmatprep.subr.bf16.mxu1 %v17513_v62  ;;  %v8867_v62 = vld [vmem:[%s19627_s14 + $0x1b80] sm:$0xff] }
 0x61d   : > { %v17559_v6 = vcombine.high %v8867_v62, %v8871_v12  ;;  %v17724_v18 = vadd.f32 %v19922_v39, %v1474_v51  ;;  %v17566_v39 = vcombine.low %v8875_v3, %v8879_v8  ;;  %v8911_v51 = vld [vmem:[%s19627_s14 + $0x1ce0] sm:$0xff] }
 0x61e   : > { %14394 = vmatpush1.bf16.msra.mxu0 %v17510_v1  ;;  %v17550_v1 = vcombine.low %v8859_v15, %v8863_v56  ;;  %v17576_v15 = vcombine.low %v8884_v50, %v8888_v40  ;;  %v17583_v56 = vcombine.high %v8891_v47, %v8895_v37  ;;  %v8928_v50 = vld [vmem:[%s19627_s14 + $0x1d68] sm:$0xff] }
 0x61f   : > { %14722 = vmatpush1.bf16.msra.mxu1 %v17512_v14  ;;  %14395 = vmatprep.subr.bf16.mxu0 %v17519_v46  ;;  %v17552_v14 = vcombine.low %v8860_v58, %v8864_v16  ;;  %v17721_v46 = vadd.f32 %v19912_v59, %v1462_v61  ;;  %v17569_v59 = vcombine.high %v8876_v22, %v8880_v11  ;;  %vm7938_vm14 = vcmp.gt.f32.partialorder %v17724_v18, 0.0  ;;  %v8899_v58 = vld [vmem:[%s19627_s14 + $0x1c80] sm:$0xff]  ;;  %v8904_v61 = vld [vmem:[%s19627_s14 + $0x1ca8] sm:$0xff] }
 0x620   : > { %14723 = vmatprep.subr.bf16.mxu1 %v17521_v29  ;;  %v17561_v29 = vcombine.high %v8868_v32, %v8872_v0  ;;  %v8903_v16 = vld [vmem:[%s19627_s14 + $0x1ca0] sm:$0xff] }
 0x621   : > { %vm7935_vm13 = vcmp.gt.f32.partialorder %v17721_v46, 0.0 }
 0x622   : > { %14396 = vmatpush1.bf16.msra.mxu0 %v17518_v17  ;;  %v17558_v17 = vcombine.low %v8867_v62, %v8871_v12  ;;  %v17591_v12 = vcombine.high %v8899_v58, %v8903_v16 }
 0x623   : > { %14724 = vmatpush1.bf16.msra.mxu1 %v17520_v55  ;;  %14397 = vmatprep.subr.bf16.mxu0 %v17527_v20  ;;  %v17560_v55 = vcombine.low %v8868_v32, %v8872_v0  ;;  %v17567_v20 = vcombine.high %v8875_v3, %v8879_v8  ;;  %v8907_v0 = vld [vmem:[%s19627_s14 + $0x1cc0] sm:$0xff] }
 0x624   : > { %14725 = vmatprep.subr.bf16.mxu1 %v17529_v36  ;;  %v7951_v36 = vmul.f32 0.01, %v17721_v46  ;;  %v8915_v8 = vld [vmem:[%s19627_s14 + $0x1d00] sm:$0xff] }
 0x626   : > { %14398 = vmatpush1.bf16.msra.mxu0 %v17526_v42  ;;  %v7954_v42 = vmul.f32 0.01, %v17724_v18 }
 0x627   : > { %14726 = vmatpush1.bf16.msra.mxu1 %v17528_v43  ;;  %14399 = vmatprep.subr.bf16.mxu0 %v17535_v45  ;;  %v17568_v43 = vcombine.low %v8876_v22, %v8880_v11  ;;  %v17575_v45 = vcombine.high %v8883_v35, %v8887_v38  ;;  %v8919_v22 = vld [vmem:[%s19627_s14 + $0x1d20] sm:$0xff]  ;;  %v8916_v11 = vld [vmem:[%s19627_s14 + $0x1d08] sm:$0xff] }
 0x628   : > { %14727 = vmatprep.subr.bf16.mxu1 %v17537_v24  ;;  %v7967_v24 = vsel %vm7935_vm13, %v17721_v46, %v7951_v36  ;;  %v7970_v48 = vsel %vm7938_vm14, %v17724_v18, %v7954_v42  ;;  %v8920_v18 = vld [vmem:[%s19627_s14 + $0x1d28] sm:$0xff]  ;;  %v17606_v40 = vcombine.low %v8915_v8, %v8919_v22 }
 0x629   : > { %v17609_v36 = vcombine.high %v8916_v11, %v8920_v18  ;;  %v17608_v42 = vcombine.low %v8916_v11, %v8920_v18 }
 0x62a   : > { %14400 = vmatpush1.bf16.msra.mxu0 %v17534_v52  ;;  %v17574_v52 = vcombine.low %v8883_v35, %v8887_v38  ;;  %v8927_v35 = vld [vmem:[%s19627_s14 + $0x1d60] sm:$0xff]  ;;  %v8924_v38 = vld [vmem:[%s19627_s14 + $0x1d48] sm:$0xff] }
 0x62b   : > { %14728 = vmatpush1.bf16.msra.mxu1 %v17536_v2  ;;  %14401 = vmatprep.subr.bf16.mxu0 %v17543_v28  ;;  %v8892_v2 = vld [vmem:[%s19627_s14 + $0x1c48] sm:$0xff] }
 0x62c   : > { %14729 = vmatprep.subr.bf16.mxu1 %v17545_v21  ;;  %v8896_v28 = vld [vmem:[%s19627_s14 + $0x1c68] sm:$0xff]  ;;  %v20219_v21 = vpack.c.bf16 %v7967_v24, %v7967_v24  ;;  %v8935_v24 = vld [vmem:[%s19627_s14 + $0x1da0] sm:$0xff] }
 0x62d   : > { %v17584_v62 = vcombine.low %v8892_v2, %v8896_v28 }
 0x62e   : > { %14402 = vmatpush1.bf16.msra.mxu0 %v17542_v34  ;;  %v20223_v34 = vpack.c.bf16 %v7970_v48, %v7970_v48  ;;  %v17616_v48 = vcombine.low %v8924_v38, %v8928_v50 }
 0x62f   : > { %14730 = vmatpush1.bf16.msra.mxu1 %v17544_v41  ;;  %14403 = vmatprep.subr.bf16.mxu0 %v17551_v60  ;;  %v17585_v41 = vcombine.high %v8892_v2, %v8896_v28  ;;  %v8900_v60 = vld [vmem:[%s19627_s14 + $0x1c88] sm:$0xff]  ;;  %v8939_v28 = vld [vmem:[%s19627_s14 + $0x1dc0] sm:$0xff] }
 0x630   : > { %14731 = vmatprep.subr.bf16.mxu1 %v17553_v5  ;;  %v17582_v5 = vcombine.low %v8891_v47, %v8895_v37  ;;  %v17593_v32 = vcombine.high %v8900_v60, %v8904_v61  ;;  %v17592_v46 = vcombine.low %v8900_v60, %v8904_v61  ;;  %v8936_v47 = vld [vmem:[%s19627_s14 + $0x1da8] sm:$0xff] }
 0x632   : > { %14404 = vmatpush1.bf16.msra.mxu0 %v17550_v1  ;;  %v8908_v1 = vld [vmem:[%s19627_s14 + $0x1cc8] sm:$0xff] }
 0x633   : > { %14732 = vmatpush1.bf16.msra.mxu1 %v17552_v14  ;;  %14405 = vmatprep.subr.bf16.mxu0 %v17559_v6  ;;  %v8912_v14 = vld [vmem:[%s19627_s14 + $0x1ce8] sm:$0xff]  ;;  %v17590_v6 = vcombine.low %v8899_v58, %v8903_v16 }
 0x634   : > { %14733 = vmatprep.subr.bf16.mxu1 %v17561_v29  ;;  %v17599_v29 = vcombine.high %v8907_v0, %v8911_v51  ;;  %v17601_v3 = vcombine.high %v8908_v1, %v8912_v14  ;;  %v8944_v58 = vld [vmem:[%s19627_s14 + $0x1de8] sm:$0xff] }
 0x636   : > { %14406 = vmatpush1.bf16.msra.mxu0 %v17558_v17  ;;  %v17598_v17 = vcombine.low %v8907_v0, %v8911_v51 }
 0x637   : > { %14734 = vmatpush1.bf16.msra.mxu1 %v17560_v55  ;;  %14407 = vmatprep.subr.bf16.mxu0 %v17567_v20  ;;  %v17600_v55 = vcombine.low %v8908_v1, %v8912_v14  ;;  %v17607_v20 = vcombine.high %v8915_v8, %v8919_v22 }
 0x638   : > { %14735 = vmatprep.subr.bf16.mxu1 %v17569_v59  ;;  %v8923_v59 = vld [vmem:[%s19627_s14 + $0x1d40] sm:$0xff] }
 0x639   : > { %v17614_v37 = vcombine.low %v8923_v59, %v8927_v35 }
 0x63a   : > { %14408 = vmatpush1.bf16.msra.mxu0 %v17566_v39  ;;  %v17615_v39 = vcombine.high %v8923_v59, %v8927_v35 }
 0x63b   : > { %14736 = vmatpush1.bf16.msra.mxu1 %v17568_v43  ;;  %14418 = vmatprep.subr.bf16.mxu0 %v17575_v45  ;;  %v17617_v43 = vcombine.high %v8924_v38, %v8928_v50  ;;  %v8931_v45 = vld [vmem:[%s19627_s14 + $0x1d80] sm:$0xff] }
 0x63c   : > { %14746 = vmatprep.subr.bf16.mxu1 %v17577_v25  ;;  %v8932_v25 = vld [vmem:[%s19627_s14 + $0x1d88] sm:$0xff]  ;;  %v17622_v16 = vcombine.low %v8931_v45, %v8935_v24 }
 0x63d   : > { %14410 = vmatmul.mubr.bf16.vlgmr.msra.gmra.mrb[16].mxu0 %v20219_v21  ;;  %v17625_v2 = vcombine.high %v8932_v25, %v8936_v47 }
 0x63e   : > { %14738 = vmatmul.mubr.bf16.vlgmr.msra.gmra.mrb[16].mxu1 %v20219_v21  ;;  %14419 = vmatpush1.bf16.msra.mxu0 %v17574_v52  ;;  %v17623_v52 = vcombine.high %v8931_v45, %v8935_v24 }
 0x63f   : > { %14450 = vmatprep.mubr.bf16.mxu0 %v20223_v34  ;;  %14747 = vmatpush1.bf16.msra.mxu1 %v17576_v15  ;;  %v8943_v15 = vld [vmem:[%s19627_s14 + $0x1de0] sm:$0xff] }
 0x640   : > { %14778 = vmatprep.mubr.bf16.mxu1 %v20223_v34  ;;  %14420 = vmatprep.subr.bf16.mxu0 %v17583_v56  ;;  %v8940_v56 = vld [vmem:[%s19627_s14 + $0x1dc8] sm:$0xff]  ;;  %v17631_v60 = vcombine.high %v8939_v28, %v8943_v15  ;;  %v17630_v0 = vcombine.low %v8939_v28, %v8943_v15 }
 0x641   : > { %14748 = vmatprep.subr.bf16.mxu1 %v17585_v41  ;;  %v17624_v41 = vcombine.low %v8932_v25, %v8936_v47  ;;  %v17633_v61 = vcombine.high %v8940_v56, %v8944_v58  ;;  %v17632_v51 = vcombine.low %v8940_v56, %v8944_v58 }
 0x642   : > { %14421 = vmatpush1.bf16.msra.mxu0 %v17582_v5  ;;  %v8947_v5 = vld [vmem:[%s19627_s14 + $0x1e00] sm:$0xff] }
 0x643   : > { %14749 = vmatpush1.bf16.msra.mxu1 %v17584_v62  ;;  %14422 = vmatprep.subr.bf16.mxu0 %v17591_v12  ;;  %v8951_v62 = vld [vmem:[%s19627_s14 + $0x1e20] sm:$0xff]  ;;  %v8948_v12 = vld [vmem:[%s19627_s14 + $0x1e08] sm:$0xff] }
 0x644   : > { %14750 = vmatprep.subr.bf16.mxu1 %v17593_v32  ;;  %v8952_v32 = vld [vmem:[%s19627_s14 + $0x1e28] sm:$0xff]  ;;  %v17639_v1 = vcombine.high %v8947_v5, %v8951_v62  ;;  %v17638_v8 = vcombine.low %v8947_v5, %v8951_v62 }
 0x645   : > { %v17641_v14 = vcombine.high %v8948_v12, %v8952_v32  ;;  %v17640_v22 = vcombine.low %v8948_v12, %v8952_v32  ;;  %v1470_v32 = vrot.slane %v20193_v33, %v1437_v49  ;;  %v9003_v33 = vld [vmem:[%s19627_s14 + $0x1fc0] sm:$0xff] }
 0x646   : > { %14423 = vmatpush1.bf16.msra.mxu0 %v17590_v6  ;;  %v8955_v6 = vld [vmem:[%s19627_s14 + $0x1e40] sm:$0xff] }
 0x647   : > { %14751 = vmatpush1.bf16.msra.mxu1 %v17592_v46  ;;  %14424 = vmatprep.subr.bf16.mxu0 %v17599_v29  ;;  %v8959_v46 = vld [vmem:[%s19627_s14 + $0x1e60] sm:$0xff]  ;;  %v8956_v29 = vld [vmem:[%s19627_s14 + $0x1e48] sm:$0xff]  ;;  %v17723_v44 = vadd.f32 %v19916_v63, %v1470_v32  ;;  %v8014_v32 = vld [vmem:[%s19627_s14 + $0xd8] sm:$0xff] }
 0x648   : > { %14752 = vmatprep.subr.bf16.mxu1 %v17601_v3  ;;  %v8960_v3 = vld [vmem:[%s19627_s14 + $0x1e68] sm:$0xff]  ;;  %v17647_v11 = vcombine.high %v8955_v6, %v8959_v46  ;;  %v17646_v59 = vcombine.low %v8955_v6, %v8959_v46 }
 0x649   : > { %v17649_v18 = vcombine.high %v8956_v29, %v8960_v3  ;;  %v17648_v35 = vcombine.low %v8956_v29, %v8960_v3  ;;  %v9000_v6 = vld [vmem:[%s19627_s14 + $0x1fa8] sm:$0xff]  ;;  %vm7937_vm15 = vcmp.gt.f32.partialorder %v17723_v44, 0.0 }
 0x64a   : > { %14425 = vmatpush1.bf16.msra.mxu0 %v17598_v17  ;;  %v8963_v17 = vld [vmem:[%s19627_s14 + $0x1e80] sm:$0xff] }
 0x64b   : > { %14753 = vmatpush1.bf16.msra.mxu1 %v17600_v55  ;;  %14426 = vmatprep.subr.bf16.mxu0 %v17607_v20  ;;  %v8967_v55 = vld [vmem:[%s19627_s14 + $0x1ea0] sm:$0xff]  ;;  %v8964_v20 = vld [vmem:[%s19627_s14 + $0x1e88] sm:$0xff] }
 0x64c   : > { %14754 = vmatprep.subr.bf16.mxu1 %v17609_v36  ;;  %v8968_v36 = vld [vmem:[%s19627_s14 + $0x1ea8] sm:$0xff]  ;;  %v17655_v38 = vcombine.high %v8963_v17, %v8967_v55  ;;  %v17654_v45 = vcombine.low %v8963_v17, %v8967_v55 }
 0x64d   : > { %v17657_v50 = vcombine.high %v8964_v20, %v8968_v36  ;;  %v17656_v24 = vcombine.low %v8964_v20, %v8968_v36  ;;  %v7953_v20 = vmul.f32 0.01, %v17723_v44  ;;  %v7989_v36 = vld [vmem:[%s19627_s14 + $0x10] sm:$0xff] }
 0x64e   : > { %14427 = vmatpush1.bf16.msra.mxu0 %v17606_v40  ;;  %v8971_v40 = vld [vmem:[%s19627_s14 + $0x1ec0] sm:$0xff] }
 0x64f   : > { %14755 = vmatpush1.bf16.msra.mxu1 %v17608_v42  ;;  %14428 = vmatprep.subr.bf16.mxu0 %v17615_v39  ;;  %v8975_v42 = vld [vmem:[%s19627_s14 + $0x1ee0] sm:$0xff]  ;;  %v8972_v39 = vld [vmem:[%s19627_s14 + $0x1ec8] sm:$0xff] }
 0x650   : > { %14756 = vmatprep.subr.bf16.mxu1 %v17617_v43  ;;  %v8976_v43 = vld [vmem:[%s19627_s14 + $0x1ee8] sm:$0xff]  ;;  %v17663_v25 = vcombine.high %v8971_v40, %v8975_v42  ;;  %v17662_v28 = vcombine.low %v8971_v40, %v8975_v42 }
 0x651   : > { %v17665_v47 = vcombine.high %v8972_v39, %v8976_v43  ;;  %v17664_v15 = vcombine.low %v8972_v39, %v8976_v43  ;;  %v7969_v39 = vsel %vm7937_vm15, %v17723_v44, %v7953_v20 }
 0x652   : > { %14429 = vmatpush1.bf16.msra.mxu0 %v17614_v37  ;;  %v8979_v37 = vld [vmem:[%s19627_s14 + $0x1f00] sm:$0xff] }
 0x653   : > { %14757 = vmatpush1.bf16.msra.mxu1 %v17616_v48  ;;  %14430 = vmatprep.subr.bf16.mxu0 %v17623_v52  ;;  %v8983_v48 = vld [vmem:[%s19627_s14 + $0x1f20] sm:$0xff]  ;;  %v8980_v52 = vld [vmem:[%s19627_s14 + $0x1f08] sm:$0xff] }
 0x654   : > { %14758 = vmatprep.subr.bf16.mxu1 %v17625_v2  ;;  %v8984_v2 = vld [vmem:[%s19627_s14 + $0x1f28] sm:$0xff]  ;;  %v17671_v56 = vcombine.high %v8979_v37, %v8983_v48  ;;  %v17670_v5 = vcombine.low %v8979_v37, %v8983_v48  ;;  %v8002_v37 = vld [vmem:[%s19627_s14 + $0x78] sm:$0xff]  ;;  %v20295_v48 = vpack.c.bf16 %v7969_v39, %v7969_v39 }
 0x655   : > { %v17673_v58 = vcombine.high %v8980_v52, %v8984_v2  ;;  %v17672_v62 = vcombine.low %v8980_v52, %v8984_v2 }
 0x656   : > { %14431 = vmatpush1.bf16.msra.mxu0 %v17622_v16  ;;  %v8987_v16 = vld [vmem:[%s19627_s14 + $0x1f40] sm:$0xff] }
 0x657   : > { %14759 = vmatpush1.bf16.msra.mxu1 %v17624_v41  ;;  %14432 = vmatprep.subr.bf16.mxu0 %v17631_v60  ;;  %v8991_v41 = vld [vmem:[%s19627_s14 + $0x1f60] sm:$0xff]  ;;  %v8988_v60 = vld [vmem:[%s19627_s14 + $0x1f48] sm:$0xff] }
 0x658   : > { %14760 = vmatprep.subr.bf16.mxu1 %v17633_v61  ;;  %v8992_v61 = vld [vmem:[%s19627_s14 + $0x1f68] sm:$0xff]  ;;  %v17679_v12 = vcombine.high %v8987_v16, %v8991_v41  ;;  %v17678_v46 = vcombine.low %v8987_v16, %v8991_v41  ;;  %v8010_v16 = vld [vmem:[%s19627_s14 + $0xb8] sm:$0xff] }
 0x659   : > { %v17680_v29 = vcombine.low %v8988_v60, %v8992_v61 }
 0x65a   : > { %14433 = vmatpush1.bf16.msra.mxu0 %v17630_v0  ;;  %v17681_v0 = vcombine.high %v8988_v60, %v8992_v61 }
 0x65b   : > { %14761 = vmatpush1.bf16.msra.mxu1 %v17632_v51  ;;  %14434 = vmatprep.subr.bf16.mxu0 %v17639_v1  ;;  %v8995_v51 = vld [vmem:[%s19627_s14 + $0x1f80] sm:$0xff] }
 0x65c   : > { %14762 = vmatprep.subr.bf16.mxu1 %v17641_v14  ;;  %v8999_v1 = vld [vmem:[%s19627_s14 + $0x1fa0] sm:$0xff]  ;;  %v8996_v14 = vld [vmem:[%s19627_s14 + $0x1f88] sm:$0xff] }
 0x65d   : > { %v17687_v3 = vcombine.high %v8995_v51, %v8999_v1  ;;  %v17689_v49 = vcombine.high %v8996_v14, %v9000_v6  ;;  %v17688_v17 = vcombine.low %v8996_v14, %v9000_v6  ;;  %v8021_v6 = vld [vmem:[%s19627_s14 + $0x110] sm:$0xff] }
 0x65e   : > { %14435 = vmatpush1.bf16.msra.mxu0 %v17638_v8  ;;  %v9007_v8 = vld [vmem:[%s19627_s14 + $0x1fe0] sm:$0xff] }
 0x65f   : > { %14763 = vmatpush1.bf16.msra.mxu1 %v17640_v22  ;;  %14436 = vmatprep.subr.bf16.mxu0 %v17647_v11  ;;  %v9004_v22 = vld [vmem:[%s19627_s14 + $0x1fc8] sm:$0xff]  ;;  %v17695_v55 = vcombine.high %v9003_v33, %v9007_v8 }
 0x660   : > { %14764 = vmatprep.subr.bf16.mxu1 %v17649_v18  ;;  %v9008_v11 = vld [vmem:[%s19627_s14 + $0x1fe8] sm:$0xff]  ;;  %v17686_v18 = vcombine.low %v8995_v51, %v8999_v1 }
 0x661   : > { %v17697_v63 = vcombine.high %v9004_v22, %v9008_v11  ;;  %v17696_v40 = vcombine.low %v9004_v22, %v9008_v11  ;;  %v8029_v22 = vld [vmem:[%s19627_s14 + $0x150] sm:$0xff] }
 0x662   : > { %14437 = vmatpush1.bf16.msra.mxu0 %v17646_v59  ;;  %v7993_v59 = vld [vmem:[%s19627_s14 + $0x30] sm:$0xff] }
 0x663   : > { %14765 = vmatpush1.bf16.msra.mxu1 %v17648_v35  ;;  %14438 = vmatprep.subr.bf16.mxu0 %v17655_v38  ;;  %v7990_v35 = vld [vmem:[%s19627_s14 + $0x18] sm:$0xff]  ;;  %v16683_v42 = vcombine.high %v7989_v36, %v7993_v59  ;;  %v8033_v11 = vld [vmem:[%s19627_s14 + $0x170] sm:$0xff] }
 0x664   : > { %14766 = vmatprep.subr.bf16.mxu1 %v17657_v50  ;;  %v7994_v38 = vld [vmem:[%s19627_s14 + $0x38] sm:$0xff]  ;;  %v17694_v50 = vcombine.low %v9003_v33, %v9007_v8 }
 0x665   : > { %v16685_v43 = vcombine.high %v7990_v35, %v7994_v38  ;;  %v16684_v52 = vcombine.low %v7990_v35, %v7994_v38  ;;  %v8041_v35 = vld [vmem:[%s19627_s14 + $0x1b0] sm:$0xff]  ;;  %v8038_v38 = vld [vmem:[%s19627_s14 + $0x198] sm:$0xff] }
 0x666   : > { %14439 = vmatpush1.bf16.msra.mxu0 %v17654_v45  ;;  %v7997_v45 = vld [vmem:[%s19627_s14 + $0x50] sm:$0xff] }
 0x667   : > { %14767 = vmatpush1.bf16.msra.mxu1 %v17656_v24  ;;  %14440 = vmatprep.subr.bf16.mxu0 %v17663_v25  ;;  %v8001_v24 = vld [vmem:[%s19627_s14 + $0x70] sm:$0xff]  ;;  %v16682_v25 = vcombine.low %v7989_v36, %v7993_v59 }
 0x668   : > { %14768 = vmatprep.subr.bf16.mxu1 %v17665_v47  ;;  %v7998_v47 = vld [vmem:[%s19627_s14 + $0x58] sm:$0xff]  ;;  %v16691_v2 = vcombine.high %v7997_v45, %v8001_v24  ;;  %v16690_v41 = vcombine.low %v7997_v45, %v8001_v24  ;;  %v8037_v59 = vld [vmem:[%s19627_s14 + $0x190] sm:$0xff] }
 0x669   : > { %v16692_v60 = vcombine.low %v7998_v47, %v8002_v37  ;;  %v16731_v39 = vcombine.high %v8037_v59, %v8041_v35  ;;  %v8045_v45 = vld [vmem:[%s19627_s14 + $0x1d0] sm:$0xff] }
 0x66a   : > { %14441 = vmatpush1.bf16.msra.mxu0 %v17662_v28  ;;  %v8005_v28 = vld [vmem:[%s19627_s14 + $0x90] sm:$0xff] }
 0x66b   : > { %14769 = vmatpush1.bf16.msra.mxu1 %v17664_v15  ;;  %14442 = vmatprep.subr.bf16.mxu0 %v17671_v56  ;;  %v8009_v15 = vld [vmem:[%s19627_s14 + $0xb0] sm:$0xff]  ;;  %v16693_v56 = vcombine.high %v7998_v47, %v8002_v37  ;;  %v8050_v47 = vld [vmem:[%s19627_s14 + $0x1f8] sm:$0xff]  ;;  %v16730_v37 = vcombine.low %v8037_v59, %v8041_v35 }
 0x66c   : > { %14770 = vmatprep.subr.bf16.mxu1 %v17673_v58  ;;  %v8006_v58 = vld [vmem:[%s19627_s14 + $0x98] sm:$0xff]  ;;  %v16699_v61 = vcombine.high %v8005_v28, %v8009_v15  ;;  %v16698_v51 = vcombine.low %v8005_v28, %v8009_v15  ;;  %v8049_v24 = vld [vmem:[%s19627_s14 + $0x1f0] sm:$0xff] }
 0x66d   : > { %v16700_v1 = vcombine.low %v8006_v58, %v8010_v16  ;;  %v8053_v15 = vld [vmem:[%s19627_s14 + $0x210] sm:$0xff] }
 0x66e   : > { %14443 = vmatpush1.bf16.msra.mxu0 %v17670_v5  ;;  %v16701_v5 = vcombine.high %v8006_v58, %v8010_v16  ;;  %v8054_v58 = vld [vmem:[%s19627_s14 + $0x218] sm:$0xff]  ;;  %v8085_v59 = vld [vmem:[%s19627_s14 + $0x310] sm:$0xff] }
 0x66f   : > { %14771 = vmatpush1.bf16.msra.mxu1 %v17672_v62  ;;  %14444 = vmatprep.subr.bf16.mxu0 %v17679_v12  ;;  %v8013_v62 = vld [vmem:[%s19627_s14 + $0xd0] sm:$0xff]  ;;  %v8058_v16 = vld [vmem:[%s19627_s14 + $0x238] sm:$0xff] }
 0x670   : > { %14772 = vmatprep.subr.bf16.mxu1 %v17681_v0  ;;  %v8017_v12 = vld [vmem:[%s19627_s14 + $0xf0] sm:$0xff]  ;;  %v8018_v0 = vld [vmem:[%s19627_s14 + $0xf8] sm:$0xff] }
 0x671   : > { %v16707_v14 = vcombine.high %v8013_v62, %v8017_v12  ;;  %v16706_v44 = vcombine.low %v8013_v62, %v8017_v12  ;;  %v8061_v62 = vld [vmem:[%s19627_s14 + $0x250] sm:$0xff] }
 0x672   : > { %14445 = vmatpush1.bf16.msra.mxu0 %v17678_v46  ;;  %v8025_v46 = vld [vmem:[%s19627_s14 + $0x130] sm:$0xff] }
 0x673   : > { %14773 = vmatpush1.bf16.msra.mxu1 %v17680_v29  ;;  %14446 = vmatprep.subr.bf16.mxu0 %v17687_v3  ;;  %v8022_v29 = vld [vmem:[%s19627_s14 + $0x118] sm:$0xff]  ;;  %v16715_v33 = vcombine.high %v8021_v6, %v8025_v46  ;;  %v8065_v12 = vld [vmem:[%s19627_s14 + $0x270] sm:$0xff] }
 0x674   : > { %14774 = vmatprep.subr.bf16.mxu1 %v17689_v49  ;;  %v8026_v3 = vld [vmem:[%s19627_s14 + $0x138] sm:$0xff]  ;;  %v16708_v49 = vcombine.low %v8014_v32, %v8018_v0  ;;  %v8089_v35 = vld [vmem:[%s19627_s14 + $0x330] sm:$0xff] }
 0x675   : > { %v16717_v8 = vcombine.high %v8022_v29, %v8026_v3  ;;  %v16716_v20 = vcombine.low %v8022_v29, %v8026_v3  ;;  %v8070_v29 = vld [vmem:[%s19627_s14 + $0x298] sm:$0xff] }
 0x676   : > { %14447 = vmatpush1.bf16.msra.mxu0 %v17686_v18  ;;  %v8030_v18 = vld [vmem:[%s19627_s14 + $0x158] sm:$0xff] }
 0x677   : > { %14775 = vmatpush1.bf16.msra.mxu1 %v17688_v17  ;;  %14448 = vmatprep.subr.bf16.mxu0 %v17695_v55  ;;  %v8034_v17 = vld [vmem:[%s19627_s14 + $0x178] sm:$0xff]  ;;  %v16714_v55 = vcombine.low %v8021_v6, %v8025_v46  ;;  %v8069_v6 = vld [vmem:[%s19627_s14 + $0x290] sm:$0xff] }
 0x678   : > { %14776 = vmatprep.subr.bf16.mxu1 %v17697_v63  ;;  %v16723_v63 = vcombine.high %v8029_v22, %v8033_v11  ;;  %v16725_v36 = vcombine.high %v8030_v18, %v8034_v17  ;;  %v8073_v46 = vld [vmem:[%s19627_s14 + $0x2b0] sm:$0xff]  ;;  %v8074_v3 = vld [vmem:[%s19627_s14 + $0x2b8] sm:$0xff] }
 0x67a   : > { %14449 = vmatpush1.bf16.msra.mxu0 %v17694_v50  ;;  %v8042_v50 = vld [vmem:[%s19627_s14 + $0x1b8] sm:$0xff] }
 0x67b   : > { %14777 = vmatpush1.bf16.msra.mxu1 %v17696_v40  ;;  %14787 = vmatprep.subr.bf16.mxu0 %v16683_v42  ;;  %v16722_v40 = vcombine.low %v8029_v22, %v8033_v11  ;;  %v16724_v42 = vcombine.low %v8030_v18, %v8034_v17  ;;  %v8077_v22 = vld [vmem:[%s19627_s14 + $0x2d0] sm:$0xff]  ;;  %v8078_v18 = vld [vmem:[%s19627_s14 + $0x2d8] sm:$0xff] }
 0x67c   : > { %15115 = vmatprep.subr.bf16.mxu1 %v16685_v43  ;;  %v16733_v43 = vcombine.high %v8038_v38, %v8042_v50  ;;  %v8081_v11 = vld [vmem:[%s19627_s14 + $0x2f0] sm:$0xff]  ;;  %v8082_v17 = vld [vmem:[%s19627_s14 + $0x2f8] sm:$0xff] }
 0x67d   : > { %14451 = vmatmul.mubr.bf16.vlgmr.msra.gmra.mrb[16].mxu0 %v20295_v48 }
 0x67e   : > { %14779 = vmatmul.mubr.bf16.vlgmr.msra.gmra.mrb[16].mxu1 %v20295_v48  ;;  %14788 = vmatpush1.bf16.msra.mxu0 %v16682_v25  ;;  %v8046_v25 = vld [vmem:[%s19627_s14 + $0x1d8] sm:$0xff] }
 0x67f   : > { %14819 = vmatprep.mubr.bf16.mxu0 %v19639_v19  ;;  %15116 = vmatpush1.bf16.msra.mxu1 %v16684_v52  ;;  %v16732_v52 = vcombine.low %v8038_v38, %v8042_v50  ;;  %v16741_v28 = vcombine.high %v8046_v25, %v8050_v47  ;;  %v8086_v38 = vld [vmem:[%s19627_s14 + $0x318] sm:$0xff] }
 0x680   : > { %15147 = vmatprep.mubr.bf16.mxu1 %v19639_v19  ;;  %14789 = vmatprep.subr.bf16.mxu0 %v16691_v2  ;;  %v16709_v19 = vcombine.high %v8014_v32, %v8018_v0  ;;  %v16739_v2 = vcombine.high %v8045_v45, %v8049_v24  ;;  %v8062_v32 = vld [vmem:[%s19627_s14 + $0x258] sm:$0xff] }
 0x681   : > { %15117 = vmatprep.subr.bf16.mxu1 %v16693_v56  ;;  %v8057_v56 = vld [vmem:[%s19627_s14 + $0x230] sm:$0xff]  ;;  %v8066_v0 = vld [vmem:[%s19627_s14 + $0x278] sm:$0xff] }
 0x682   : > { %14790 = vmatpush1.bf16.msra.mxu0 %v16690_v41  ;;  %v16738_v41 = vcombine.low %v8045_v45, %v8049_v24  ;;  %v8090_v50 = vld [vmem:[%s19627_s14 + $0x338] sm:$0xff]  ;;  %v8093_v45 = vld [vmem:[%s19627_s14 + $0x350] sm:$0xff] }
 0x683   : > { %15118 = vmatpush1.bf16.msra.mxu1 %v16692_v60  ;;  %14791 = vmatprep.subr.bf16.mxu0 %v16699_v61  ;;  %v16740_v60 = vcombine.low %v8046_v25, %v8050_v47  ;;  %v16747_v61 = vcombine.high %v8053_v15, %v8057_v56  ;;  %v8097_v24 = vld [vmem:[%s19627_s14 + $0x370] sm:$0xff]  ;;  %v8094_v25 = vld [vmem:[%s19627_s14 + $0x358] sm:$0xff] }
 0x684   : > { %15119 = vmatprep.subr.bf16.mxu1 %v16701_v5  ;;  %v16749_v5 = vcombine.high %v8054_v58, %v8058_v16  ;;  %v8098_v47 = vld [vmem:[%s19627_s14 + $0x378] sm:$0xff] }
 0x686   : > { %14792 = vmatpush1.bf16.msra.mxu0 %v16698_v51  ;;  %v16746_v51 = vcombine.low %v8053_v15, %v8057_v56  ;;  %v8101_v15 = vld [vmem:[%s19627_s14 + $0x390] sm:$0xff] }
 0x687   : > { %15120 = vmatpush1.bf16.msra.mxu1 %v16700_v1  ;;  %14793 = vmatprep.subr.bf16.mxu0 %v16707_v14  ;;  %v16748_v1 = vcombine.low %v8054_v58, %v8058_v16  ;;  %v16755_v14 = vcombine.high %v8061_v62, %v8065_v12  ;;  %v8105_v56 = vld [vmem:[%s19627_s14 + $0x3b0] sm:$0xff]  ;;  %v8102_v58 = vld [vmem:[%s19627_s14 + $0x398] sm:$0xff] }
 0x688   : > { %15121 = vmatprep.subr.bf16.mxu1 %v16709_v19  ;;  %v16757_v19 = vcombine.high %v8062_v32, %v8066_v0  ;;  %v8106_v16 = vld [vmem:[%s19627_s14 + $0x3b8] sm:$0xff] }
 0x68a   : > { %14794 = vmatpush1.bf16.msra.mxu0 %v16706_v44  ;;  %v16754_v44 = vcombine.low %v8061_v62, %v8065_v12  ;;  %v8109_v62 = vld [vmem:[%s19627_s14 + $0x3d0] sm:$0xff] }
 0x68b   : > { %15122 = vmatpush1.bf16.msra.mxu1 %v16708_v49  ;;  %14795 = vmatprep.subr.bf16.mxu0 %v16715_v33  ;;  %v16756_v49 = vcombine.low %v8062_v32, %v8066_v0  ;;  %v16763_v33 = vcombine.high %v8069_v6, %v8073_v46  ;;  %v8113_v12 = vld [vmem:[%s19627_s14 + $0x3f0] sm:$0xff]  ;;  %v8110_v32 = vld [vmem:[%s19627_s14 + $0x3d8] sm:$0xff] }
 0x68c   : > { %15123 = vmatprep.subr.bf16.mxu1 %v16717_v8  ;;  %v16765_v8 = vcombine.high %v8070_v29, %v8074_v3  ;;  %v8114_v0 = vld [vmem:[%s19627_s14 + $0x3f8] sm:$0xff] }
 0x68e   : > { %14796 = vmatpush1.bf16.msra.mxu0 %v16714_v55  ;;  %v16762_v55 = vcombine.low %v8069_v6, %v8073_v46  ;;  %v8117_v6 = vld [vmem:[%s19627_s14 + $0x410] sm:$0xff] }
 0x68f   : > { %15124 = vmatpush1.bf16.msra.mxu1 %v16716_v20  ;;  %14797 = vmatprep.subr.bf16.mxu0 %v16723_v63  ;;  %v16764_v20 = vcombine.low %v8070_v29, %v8074_v3  ;;  %v16771_v63 = vcombine.high %v8077_v22, %v8081_v11  ;;  %v8121_v46 = vld [vmem:[%s19627_s14 + $0x430] sm:$0xff]  ;;  %v8118_v29 = vld [vmem:[%s19627_s14 + $0x418] sm:$0xff] }
 0x690   : > { %15125 = vmatprep.subr.bf16.mxu1 %v16725_v36  ;;  %v16773_v36 = vcombine.high %v8078_v18, %v8082_v17  ;;  %v8122_v3 = vld [vmem:[%s19627_s14 + $0x438] sm:$0xff] }
 0x692   : > { %14798 = vmatpush1.bf16.msra.mxu0 %v16722_v40  ;;  %v16770_v40 = vcombine.low %v8077_v22, %v8081_v11  ;;  %v8125_v22 = vld [vmem:[%s19627_s14 + $0x450] sm:$0xff] }
 0x693   : > { %15126 = vmatpush1.bf16.msra.mxu1 %v16724_v42  ;;  %14799 = vmatprep.subr.bf16.mxu0 %v16731_v39  ;;  %v16772_v42 = vcombine.low %v8078_v18, %v8082_v17  ;;  %v16779_v39 = vcombine.high %v8085_v59, %v8089_v35  ;;  %v8129_v11 = vld [vmem:[%s19627_s14 + $0x470] sm:$0xff]  ;;  %v16810_v18 = vcombine.low %v8117_v6, %v8121_v46  ;;  %v8126_v17 = vld [vmem:[%s19627_s14 + $0x458] sm:$0xff] }
 0x694   : > { %15127 = vmatprep.subr.bf16.mxu1 %v16733_v43  ;;  %v16781_v43 = vcombine.high %v8086_v38, %v8090_v50 }
 0x696   : > { %14800 = vmatpush1.bf16.msra.mxu0 %v16730_v37  ;;  %v16778_v37 = vcombine.low %v8085_v59, %v8089_v35  ;;  %v8137_v59 = vld [vmem:[%s19627_s14 + $0x4b0] sm:$0xff] }
 0x697   : > { %15128 = vmatpush1.bf16.msra.mxu1 %v16732_v52  ;;  %14801 = vmatprep.subr.bf16.mxu0 %v16739_v2  ;;  %v16780_v52 = vcombine.low %v8086_v38, %v8090_v50  ;;  %v16787_v2 = vcombine.high %v8093_v45, %v8097_v24  ;;  %v8134_v38 = vld [vmem:[%s19627_s14 + $0x498] sm:$0xff] }
 0x698   : > { %15129 = vmatprep.subr.bf16.mxu1 %v16741_v28  ;;  %v16789_v28 = vcombine.high %v8094_v25, %v8098_v47  ;;  %v8138_v50 = vld [vmem:[%s19627_s14 + $0x4b8] sm:$0xff] }
 0x69a   : > { %14802 = vmatpush1.bf16.msra.mxu0 %v16738_v41  ;;  %v16786_v41 = vcombine.low %v8093_v45, %v8097_v24  ;;  %v8141_v45 = vld [vmem:[%s19627_s14 + $0x4d0] sm:$0xff] }
 0x69b   : > { %15130 = vmatpush1.bf16.msra.mxu1 %v16740_v60  ;;  %14803 = vmatprep.subr.bf16.mxu0 %v16747_v61  ;;  %v16788_v60 = vcombine.low %v8094_v25, %v8098_v47  ;;  %v16795_v61 = vcombine.high %v8101_v15, %v8105_v56  ;;  %v8145_v24 = vld [vmem:[%s19627_s14 + $0x4f0] sm:$0xff]  ;;  %v8142_v25 = vld [vmem:[%s19627_s14 + $0x4d8] sm:$0xff] }
 0x69c   : > { %15131 = vmatprep.subr.bf16.mxu1 %v16749_v5  ;;  %v16797_v5 = vcombine.high %v8102_v58, %v8106_v16 }
 0x69e   : > { %14804 = vmatpush1.bf16.msra.mxu0 %v16746_v51  ;;  %v16794_v51 = vcombine.low %v8101_v15, %v8105_v56  ;;  %v8150_v15 = vld [vmem:[%s19627_s14 + $0x518] sm:$0xff] }
 0x69f   : > { %15132 = vmatpush1.bf16.msra.mxu1 %v16748_v1  ;;  %14805 = vmatprep.subr.bf16.mxu0 %v16755_v14  ;;  %v16796_v1 = vcombine.low %v8102_v58, %v8106_v16  ;;  %v16803_v14 = vcombine.high %v8109_v62, %v8113_v12  ;;  %v8154_v56 = vld [vmem:[%s19627_s14 + $0x538] sm:$0xff]  ;;  %v16834_v58 = vcombine.low %v8141_v45, %v8145_v24 }
 0x6a0   : > { %15133 = vmatprep.subr.bf16.mxu1 %v16757_v19  ;;  %v16805_v19 = vcombine.high %v8110_v32, %v8114_v0 }
 0x6a2   : > { %14806 = vmatpush1.bf16.msra.mxu0 %v16754_v44  ;;  %v16802_v44 = vcombine.low %v8109_v62, %v8113_v12  ;;  %v8158_v62 = vld [vmem:[%s19627_s14 + $0x558] sm:$0xff] }
 0x6a3   : > { %15134 = vmatpush1.bf16.msra.mxu1 %v16756_v49  ;;  %14807 = vmatprep.subr.bf16.mxu0 %v16763_v33  ;;  %v16804_v49 = vcombine.low %v8110_v32, %v8114_v0  ;;  %v16811_v33 = vcombine.high %v8117_v6, %v8121_v46  ;;  %v8162_v12 = vld [vmem:[%s19627_s14 + $0x578] sm:$0xff]  ;;  %v16844_v0 = vcombine.low %v8150_v15, %v8154_v56 }
 0x6a4   : > { %15135 = vmatprep.subr.bf16.mxu1 %v16765_v8  ;;  %v16813_v8 = vcombine.high %v8118_v29, %v8122_v3  ;;  %v8166_v6 = vld [vmem:[%s19627_s14 + $0x598] sm:$0xff] }
 0x6a5   : > { %v8170_v46 = vld [vmem:[%s19627_s14 + $0x5b8] sm:$0xff] }
 0x6a6   : > { %14808 = vmatpush1.bf16.msra.mxu0 %v16762_v55  ;;  %v8130_v55 = vld [vmem:[%s19627_s14 + $0x478] sm:$0xff] }
 0x6a7   : > { %15136 = vmatpush1.bf16.msra.mxu1 %v16764_v20  ;;  %14809 = vmatprep.subr.bf16.mxu0 %v16771_v63  ;;  %v16812_v20 = vcombine.low %v8118_v29, %v8122_v3  ;;  %v16819_v63 = vcombine.high %v8125_v22, %v8129_v11  ;;  %v16821_v35 = vcombine.high %v8126_v17, %v8130_v55 }
 0x6a8   : > { %15137 = vmatprep.subr.bf16.mxu1 %v16773_v36  ;;  %v8133_v36 = vld [vmem:[%s19627_s14 + $0x490] sm:$0xff]  ;;  %v16852_v3 = vcombine.low %v8158_v62, %v8162_v12 }
 0x6a9   : > { %v16826_v47 = vcombine.low %v8133_v36, %v8137_v59 }
 0x6aa   : > { %14810 = vmatpush1.bf16.msra.mxu0 %v16770_v40  ;;  %v16818_v40 = vcombine.low %v8125_v22, %v8129_v11  ;;  %v8174_v22 = vld [vmem:[%s19627_s14 + $0x5d8] sm:$0xff] }
 0x6ab   : > { %15138 = vmatpush1.bf16.msra.mxu1 %v16772_v42  ;;  %14811 = vmatprep.subr.bf16.mxu0 %v16779_v39  ;;  %v16820_v42 = vcombine.low %v8126_v17, %v8130_v55  ;;  %v16827_v39 = vcombine.high %v8133_v36, %v8137_v59  ;;  %v8178_v11 = vld [vmem:[%s19627_s14 + $0x5f8] sm:$0xff]  ;;  %v16860_v17 = vcombine.low %v8166_v6, %v8170_v46  ;;  %v8185_v36 = vld [vmem:[%s19627_s14 + $0x630] sm:$0xff] }
 0x6ac   : > { %15139 = vmatprep.subr.bf16.mxu1 %v16781_v43  ;;  %v16829_v43 = vcombine.high %v8134_v38, %v8138_v50  ;;  %v8182_v59 = vld [vmem:[%s19627_s14 + $0x618] sm:$0xff] }
 0x6ae   : > { %14812 = vmatpush1.bf16.msra.mxu0 %v16778_v37  ;;  %v16828_v37 = vcombine.low %v8134_v38, %v8138_v50  ;;  %v16868_v50 = vcombine.low %v8174_v22, %v8178_v11 }
 0x6af   : > { %15140 = vmatpush1.bf16.msra.mxu1 %v16780_v52  ;;  %14813 = vmatprep.subr.bf16.mxu0 %v16787_v2  ;;  %v16835_v52 = vcombine.high %v8141_v45, %v8145_v24  ;;  %v8149_v2 = vld [vmem:[%s19627_s14 + $0x510] sm:$0xff]  ;;  %v8190_v45 = vld [vmem:[%s19627_s14 + $0x658] sm:$0xff] }
 0x6b0   : > { %15141 = vmatprep.subr.bf16.mxu1 %v16789_v28  ;;  %v8153_v28 = vld [vmem:[%s19627_s14 + $0x530] sm:$0xff]  ;;  %v8194_v24 = vld [vmem:[%s19627_s14 + $0x678] sm:$0xff] }
 0x6b1   : > { %v16842_v32 = vcombine.low %v8149_v2, %v8153_v28 }
 0x6b2   : > { %14814 = vmatpush1.bf16.msra.mxu0 %v16786_v41  ;;  %v16843_v41 = vcombine.high %v8149_v2, %v8153_v28  ;;  %v8198_v2 = vld [vmem:[%s19627_s14 + $0x698] sm:$0xff] }
 0x6b3   : > { %15142 = vmatpush1.bf16.msra.mxu1 %v16788_v60  ;;  %14815 = vmatprep.subr.bf16.mxu0 %v16795_v61  ;;  %v16845_v60 = vcombine.high %v8150_v15, %v8154_v56  ;;  %v8157_v61 = vld [vmem:[%s19627_s14 + $0x550] sm:$0xff]  ;;  %v8202_v28 = vld [vmem:[%s19627_s14 + $0x6b8] sm:$0xff]  ;;  %v16884_v56 = vcombine.low %v8190_v45, %v8194_v24 }
 0x6b4   : > { %15143 = vmatprep.subr.bf16.mxu1 %v16797_v5  ;;  %v8161_v5 = vld [vmem:[%s19627_s14 + $0x570] sm:$0xff] }
 0x6b5   : > { %v16850_v29 = vcombine.low %v8157_v61, %v8161_v5 }
 0x6b6   : > { %14816 = vmatpush1.bf16.msra.mxu0 %v16794_v51  ;;  %v16851_v51 = vcombine.high %v8157_v61, %v8161_v5  ;;  %v8206_v61 = vld [vmem:[%s19627_s14 + $0x6d8] sm:$0xff] }
 0x6b7   : > { %15144 = vmatpush1.bf16.msra.mxu1 %v16796_v1  ;;  %14817 = vmatprep.subr.bf16.mxu0 %v16803_v14  ;;  %v16853_v1 = vcombine.high %v8158_v62, %v8162_v12  ;;  %v8165_v14 = vld [vmem:[%s19627_s14 + $0x590] sm:$0xff]  ;;  %v8210_v5 = vld [vmem:[%s19627_s14 + $0x6f8] sm:$0xff]  ;;  %v16892_v12 = vcombine.low %v8198_v2, %v8202_v28 }
 0x6b8   : > { %15145 = vmatprep.subr.bf16.mxu1 %v16805_v19  ;;  %v8169_v19 = vld [vmem:[%s19627_s14 + $0x5b0] sm:$0xff] }
 0x6ba   : > { %14818 = vmatpush1.bf16.msra.mxu0 %v16802_v44  ;;  %v16859_v44 = vcombine.high %v8165_v14, %v8169_v19 }
 0x6bb   : > { %15146 = vmatpush1.bf16.msra.mxu1 %v16804_v49  ;;  %14828 = vmatprep.subr.bf16.mxu0 %v16811_v33  ;;  %v16861_v49 = vcombine.high %v8166_v6, %v8170_v46  ;;  %v8173_v33 = vld [vmem:[%s19627_s14 + $0x5d0] sm:$0xff]  ;;  %v16900_v46 = vcombine.low %v8206_v61, %v8210_v5 }
 0x6bc   : > { %15156 = vmatprep.subr.bf16.mxu1 %v16813_v8  ;;  %v8177_v8 = vld [vmem:[%s19627_s14 + $0x5f0] sm:$0xff] }
 0x6bd   : > { %14820 = vmatmul.mubr.bf16.vlgmr.msra.gmra.mrb[20].mxu0 %v19717_v7  ;;  %v16867_v55 = vcombine.high %v8173_v33, %v8177_v8  ;;  %v16866_v38 = vcombine.low %v8173_v33, %v8177_v8  ;;  %v8222_v33 = vld [vmem:[%s19627_s14 + $0x758] sm:$0xff] }
 0x6be   : > { %15148 = vmatmul.mubr.bf16.vlgmr.msra.gmra.mrb[20].mxu1 %v19717_v7  ;;  %14829 = vmatpush1.bf16.msra.mxu0 %v16810_v18  ;;  %v8146_v7 = vld [vmem:[%s19627_s14 + $0x4f8] sm:$0xff]  ;;  %v16858_v18 = vcombine.low %v8165_v14, %v8169_v19 }
 0x6bf   : > { %14860 = vmatprep.mubr.bf16.mxu0 %v19721_v13  ;;  %15157 = vmatpush1.bf16.msra.mxu1 %v16812_v20  ;;  %v16836_v16 = vcombine.low %v8142_v25, %v8146_v7  ;;  %v16869_v20 = vcombine.high %v8174_v22, %v8178_v11  ;;  %v8214_v14 = vld [vmem:[%s19627_s14 + $0x718] sm:$0xff] }
 0x6c0   : > { %15188 = vmatprep.mubr.bf16.mxu1 %v19721_v13  ;;  %14830 = vmatprep.subr.bf16.mxu0 %v16819_v63  ;;  %v16837_v13 = vcombine.high %v8142_v25, %v8146_v7  ;;  %v8181_v63 = vld [vmem:[%s19627_s14 + $0x610] sm:$0xff]  ;;  %v8218_v19 = vld [vmem:[%s19627_s14 + $0x738] sm:$0xff] }
 0x6c1   : > { %15158 = vmatprep.subr.bf16.mxu1 %v16821_v35  ;;  %v8186_v35 = vld [vmem:[%s19627_s14 + $0x638] sm:$0xff]  ;;  %v16874_v25 = vcombine.low %v8181_v63, %v8185_v36  ;;  %v16908_v11 = vcombine.low %v8214_v14, %v8218_v19 }
 0x6c2   : > { %14831 = vmatpush1.bf16.msra.mxu0 %v16818_v40  ;;  %v16875_v40 = vcombine.high %v8181_v63, %v8185_v36  ;;  %v16876_v7 = vcombine.low %v8182_v59, %v8186_v35  ;;  %v8226_v8 = vld [vmem:[%s19627_s14 + $0x778] sm:$0xff] }
 0x6c3   : > { %15159 = vmatpush1.bf16.msra.mxu1 %v16820_v42  ;;  %14832 = vmatprep.subr.bf16.mxu0 %v16827_v39  ;;  %v16877_v42 = vcombine.high %v8182_v59, %v8186_v35  ;;  %v8189_v39 = vld [vmem:[%s19627_s14 + $0x650] sm:$0xff]  ;;  %v8230_v63 = vld [vmem:[%s19627_s14 + $0x798] sm:$0xff]  ;;  %v16916_v35 = vcombine.low %v8222_v33, %v8226_v8 }
 0x6c4   : > { %15160 = vmatprep.subr.bf16.mxu1 %v16829_v43  ;;  %v8193_v43 = vld [vmem:[%s19627_s14 + $0x670] sm:$0xff]  ;;  %v8234_v36 = vld [vmem:[%s19627_s14 + $0x7b8] sm:$0xff] }
 0x6c5   : > { %v16882_v15 = vcombine.low %v8189_v39, %v8193_v43 }
 0x6c6   : > { %14833 = vmatpush1.bf16.msra.mxu0 %v16826_v47  ;;  %v16883_v47 = vcombine.high %v8189_v39, %v8193_v43  ;;  %v8238_v39 = vld [vmem:[%s19627_s14 + $0x7d8] sm:$0xff] }
 0x6c7   : > { %15161 = vmatpush1.bf16.msra.mxu1 %v16828_v37  ;;  %14834 = vmatprep.subr.bf16.mxu0 %v16835_v52  ;;  %v16885_v37 = vcombine.high %v8190_v45, %v8194_v24  ;;  %v8197_v52 = vld [vmem:[%s19627_s14 + $0x690] sm:$0xff]  ;;  %v8242_v43 = vld [vmem:[%s19627_s14 + $0x7f8] sm:$0xff]  ;;  %v16924_v24 = vcombine.low %v8230_v63, %v8234_v36 }
 0x6c8   : > { %15162 = vmatprep.subr.bf16.mxu1 %v16837_v13  ;;  %v8201_v13 = vld [vmem:[%s19627_s14 + $0x6b0] sm:$0xff] }
 0x6c9   : > { %v16890_v62 = vcombine.low %v8197_v52, %v8201_v13 }
 0x6ca   : > { %14835 = vmatpush1.bf16.msra.mxu0 %v16834_v58  ;;  %v16891_v58 = vcombine.high %v8197_v52, %v8201_v13  ;;  %v8246_v52 = vld [vmem:[%s19627_s14 + $0x818] sm:$0xff] }
 0x6cb   : > { %15163 = vmatpush1.bf16.msra.mxu1 %v16836_v16  ;;  %14836 = vmatprep.subr.bf16.mxu0 %v16843_v41  ;;  %v16893_v16 = vcombine.high %v8198_v2, %v8202_v28  ;;  %v8205_v41 = vld [vmem:[%s19627_s14 + $0x6d0] sm:$0xff]  ;;  %v8250_v13 = vld [vmem:[%s19627_s14 + $0x838] sm:$0xff]  ;;  %v16932_v28 = vcombine.low %v8238_v39, %v8242_v43 }
 0x6cc   : > { %15164 = vmatprep.subr.bf16.mxu1 %v16845_v60  ;;  %v8209_v60 = vld [vmem:[%s19627_s14 + $0x6f0] sm:$0xff] }
 0x6cd   : > { %v16898_v6 = vcombine.low %v8205_v41, %v8209_v60 }
 0x6ce   : > { %14837 = vmatpush1.bf16.msra.mxu0 %v16842_v32  ;;  %v16899_v32 = vcombine.high %v8205_v41, %v8209_v60  ;;  %v8254_v60 = vld [vmem:[%s19627_s14 + $0x858] sm:$0xff] }
 0x6cf   : > { %15165 = vmatpush1.bf16.msra.mxu1 %v16844_v0  ;;  %14838 = vmatprep.subr.bf16.mxu0 %v16851_v51  ;;  %v16901_v0 = vcombine.high %v8206_v61, %v8210_v5  ;;  %v8213_v51 = vld [vmem:[%s19627_s14 + $0x710] sm:$0xff]  ;;  %v8258_v61 = vld [vmem:[%s19627_s14 + $0x878] sm:$0xff]  ;;  %v16940_v5 = vcombine.low %v8246_v52, %v8250_v13 }
 0x6d0   : > { %15166 = vmatprep.subr.bf16.mxu1 %v16853_v1  ;;  %v8217_v1 = vld [vmem:[%s19627_s14 + $0x730] sm:$0xff] }
 0x6d1   : > { %v16906_v22 = vcombine.low %v8213_v51, %v8217_v1 }
 0x6d2   : > { %14839 = vmatpush1.bf16.msra.mxu0 %v16850_v29  ;;  %v16907_v29 = vcombine.high %v8213_v51, %v8217_v1  ;;  %v8262_v51 = vld [vmem:[%s19627_s14 + $0x898] sm:$0xff] }
 0x6d3   : > { %15167 = vmatpush1.bf16.msra.mxu1 %v16852_v3  ;;  %14840 = vmatprep.subr.bf16.mxu0 %v16859_v44  ;;  %v16909_v3 = vcombine.high %v8214_v14, %v8218_v19  ;;  %v8221_v44 = vld [vmem:[%s19627_s14 + $0x750] sm:$0xff]  ;;  %v8266_v1 = vld [vmem:[%s19627_s14 + $0x8b8] sm:$0xff]  ;;  %v16948_v19 = vcombine.low %v8254_v60, %v8258_v61 }
 0x6d4   : > { %15168 = vmatprep.subr.bf16.mxu1 %v16861_v49  ;;  %v8225_v49 = vld [vmem:[%s19627_s14 + $0x770] sm:$0xff] }
 0x6d5   : > { %v16914_v59 = vcombine.low %v8221_v44, %v8225_v49 }
 0x6d6   : > { %14841 = vmatpush1.bf16.msra.mxu0 %v16858_v18  ;;  %v16915_v18 = vcombine.high %v8221_v44, %v8225_v49  ;;  %v8270_v44 = vld [vmem:[%s19627_s14 + $0x8d8] sm:$0xff] }
 0x6d7   : > { %15169 = vmatpush1.bf16.msra.mxu1 %v16860_v17  ;;  %14842 = vmatprep.subr.bf16.mxu0 %v16867_v55  ;;  %v16917_v17 = vcombine.high %v8222_v33, %v8226_v8  ;;  %v8229_v55 = vld [vmem:[%s19627_s14 + $0x790] sm:$0xff]  ;;  %v16956_v33 = vcombine.low %v8262_v51, %v8266_v1 }
 0x6d8   : > { %15170 = vmatprep.subr.bf16.mxu1 %v16869_v20  ;;  %v8233_v20 = vld [vmem:[%s19627_s14 + $0x7b0] sm:$0xff] }
 0x6d9   : > { %v16922_v45 = vcombine.low %v8229_v55, %v8233_v20 }
 0x6da   : > { %14843 = vmatpush1.bf16.msra.mxu0 %v16866_v38  ;;  %v16923_v38 = vcombine.high %v8229_v55, %v8233_v20 }
 0x6db   : > { %15171 = vmatpush1.bf16.msra.mxu1 %v16868_v50  ;;  %14844 = vmatprep.subr.bf16.mxu0 %v16875_v40  ;;  %v16925_v50 = vcombine.high %v8230_v63, %v8234_v36  ;;  %v8237_v40 = vld [vmem:[%s19627_s14 + $0x7d0] sm:$0xff] }
 0x6dc   : > { %15172 = vmatprep.subr.bf16.mxu1 %v16877_v42  ;;  %v8241_v42 = vld [vmem:[%s19627_s14 + $0x7f0] sm:$0xff] }
 0x6dd   : > { %v16930_v2 = vcombine.low %v8237_v40, %v8241_v42 }
 0x6de   : > { %14845 = vmatpush1.bf16.msra.mxu0 %v16874_v25  ;;  %v16931_v25 = vcombine.high %v8237_v40, %v8241_v42 }
 0x6df   : > { %15173 = vmatpush1.bf16.msra.mxu1 %v16876_v7  ;;  %14846 = vmatprep.subr.bf16.mxu0 %v16883_v47  ;;  %v16933_v7 = vcombine.high %v8238_v39, %v8242_v43  ;;  %v8245_v47 = vld [vmem:[%s19627_s14 + $0x810] sm:$0xff] }
 0x6e0   : > { %15174 = vmatprep.subr.bf16.mxu1 %v16885_v37  ;;  %v8249_v37 = vld [vmem:[%s19627_s14 + $0x830] sm:$0xff] }
 0x6e1   : > { %v16938_v41 = vcombine.low %v8245_v47, %v8249_v37 }
 0x6e2   : > { %14847 = vmatpush1.bf16.msra.mxu0 %v16882_v15  ;;  %v16939_v15 = vcombine.high %v8245_v47, %v8249_v37 }
 0x6e3   : > { %15175 = vmatpush1.bf16.msra.mxu1 %v16884_v56  ;;  %14848 = vmatprep.subr.bf16.mxu0 %v16891_v58  ;;  %v16941_v56 = vcombine.high %v8246_v52, %v8250_v13  ;;  %v8253_v58 = vld [vmem:[%s19627_s14 + $0x850] sm:$0xff] }
 0x6e4   : > { %15176 = vmatprep.subr.bf16.mxu1 %v16893_v16  ;;  %v8257_v16 = vld [vmem:[%s19627_s14 + $0x870] sm:$0xff] }
 0x6e5   : > { %v16946_v14 = vcombine.low %v8253_v58, %v8257_v16 }
 0x6e6   : > { %14849 = vmatpush1.bf16.msra.mxu0 %v16890_v62  ;;  %v16947_v62 = vcombine.high %v8253_v58, %v8257_v16 }
 0x6e7   : > { %15177 = vmatpush1.bf16.msra.mxu1 %v16892_v12  ;;  %14850 = vmatprep.subr.bf16.mxu0 %v16899_v32  ;;  %v8261_v12 = vld [vmem:[%s19627_s14 + $0x890] sm:$0xff] }
 0x6e8   : > { %15178 = vmatprep.subr.bf16.mxu1 %v16901_v0  ;;  %v8265_v32 = vld [vmem:[%s19627_s14 + $0x8b0] sm:$0xff]  ;;  %v16949_v0 = vcombine.high %v8254_v60, %v8258_v61 }
 0x6e9   : > { %v16954_v49 = vcombine.low %v8261_v12, %v8265_v32  ;;  %v8309_v61 = vld [vmem:[%s19627_s14 + $0xa10] sm:$0xff] }
 0x6ea   : > { %14851 = vmatpush1.bf16.msra.mxu0 %v16898_v6  ;;  %v16955_v6 = vcombine.high %v8261_v12, %v8265_v32  ;;  %v8314_v12 = vld [vmem:[%s19627_s14 + $0xa38] sm:$0xff] }
 0x6eb   : > { %15179 = vmatpush1.bf16.msra.mxu1 %v16900_v46  ;;  %14852 = vmatprep.subr.bf16.mxu0 %v16907_v29  ;;  %v16957_v46 = vcombine.high %v8262_v51, %v8266_v1  ;;  %v8269_v29 = vld [vmem:[%s19627_s14 + $0x8d0] sm:$0xff] }
 0x6ec   : > { %15180 = vmatprep.subr.bf16.mxu1 %v16909_v3  ;;  %v8273_v3 = vld [vmem:[%s19627_s14 + $0x8f0] sm:$0xff] }
 0x6ed   : > { %v16963_v8 = vcombine.high %v8269_v29, %v8273_v3  ;;  %v16962_v55 = vcombine.low %v8269_v29, %v8273_v3 }
 0x6ee   : > { %14853 = vmatpush1.bf16.msra.mxu0 %v16906_v22  ;;  %v8277_v22 = vld [vmem:[%s19627_s14 + $0x910] sm:$0xff] }
 0x6ef   : > { %15181 = vmatpush1.bf16.msra.mxu1 %v16908_v11  ;;  %14854 = vmatprep.subr.bf16.mxu0 %v16915_v18  ;;  %v8281_v11 = vld [vmem:[%s19627_s14 + $0x930] sm:$0xff]  ;;  %v8278_v18 = vld [vmem:[%s19627_s14 + $0x918] sm:$0xff] }
 0x6f0   : > { %15182 = vmatprep.subr.bf16.mxu1 %v16917_v17  ;;  %v8282_v17 = vld [vmem:[%s19627_s14 + $0x938] sm:$0xff]  ;;  %v16971_v63 = vcombine.high %v8277_v22, %v8281_v11  ;;  %v16970_v40 = vcombine.low %v8277_v22, %v8281_v11 }
 0x6f1   : > { %v16973_v36 = vcombine.high %v8278_v18, %v8282_v17  ;;  %v16972_v42 = vcombine.low %v8278_v18, %v8282_v17 }
 0x6f2   : > { %14855 = vmatpush1.bf16.msra.mxu0 %v16914_v59  ;;  %v8285_v59 = vld [vmem:[%s19627_s14 + $0x950] sm:$0xff] }
 0x6f3   : > { %15183 = vmatpush1.bf16.msra.mxu1 %v16916_v35  ;;  %14856 = vmatprep.subr.bf16.mxu0 %v16923_v38  ;;  %v8289_v35 = vld [vmem:[%s19627_s14 + $0x970] sm:$0xff]  ;;  %v8286_v38 = vld [vmem:[%s19627_s14 + $0x958] sm:$0xff] }
 0x6f4   : > { %15184 = vmatprep.subr.bf16.mxu1 %v16925_v50  ;;  %v8290_v50 = vld [vmem:[%s19627_s14 + $0x978] sm:$0xff]  ;;  %v16979_v39 = vcombine.high %v8285_v59, %v8289_v35  ;;  %v16978_v47 = vcombine.low %v8285_v59, %v8289_v35 }
 0x6f5   : > { %v16981_v43 = vcombine.high %v8286_v38, %v8290_v50  ;;  %v16980_v37 = vcombine.low %v8286_v38, %v8290_v50 }
 0x6f6   : > { %14857 = vmatpush1.bf16.msra.mxu0 %v16922_v45  ;;  %v8293_v45 = vld [vmem:[%s19627_s14 + $0x990] sm:$0xff] }
 0x6f7   : > { %15185 = vmatpush1.bf16.msra.mxu1 %v16924_v24  ;;  %14858 = vmatprep.subr.bf16.mxu0 %v16931_v25  ;;  %v8297_v24 = vld [vmem:[%s19627_s14 + $0x9b0] sm:$0xff]  ;;  %v8294_v25 = vld [vmem:[%s19627_s14 + $0x998] sm:$0xff] }
 0x6f8   : > { %15186 = vmatprep.subr.bf16.mxu1 %v16933_v7  ;;  %v8298_v7 = vld [vmem:[%s19627_s14 + $0x9b8] sm:$0xff]  ;;  %v16987_v52 = vcombine.high %v8293_v45, %v8297_v24  ;;  %v16986_v58 = vcombine.low %v8293_v45, %v8297_v24 }
 0x6f9   : > { %v16989_v13 = vcombine.high %v8294_v25, %v8298_v7  ;;  %v16988_v16 = vcombine.low %v8294_v25, %v8298_v7 }
 0x6fa   : > { %14859 = vmatpush1.bf16.msra.mxu0 %v16930_v2  ;;  %v8301_v2 = vld [vmem:[%s19627_s14 + $0x9d0] sm:$0xff] }
 0x6fb   : > { %15187 = vmatpush1.bf16.msra.mxu1 %v16932_v28  ;;  %14869 = vmatprep.subr.bf16.mxu0 %v16939_v15  ;;  %v8305_v28 = vld [vmem:[%s19627_s14 + $0x9f0] sm:$0xff]  ;;  %v8302_v15 = vld [vmem:[%s19627_s14 + $0x9d8] sm:$0xff] }
 0x6fc   : > { %15197 = vmatprep.subr.bf16.mxu1 %v16941_v56  ;;  %v8306_v56 = vld [vmem:[%s19627_s14 + $0x9f8] sm:$0xff]  ;;  %v16994_v32 = vcombine.low %v8301_v2, %v8305_v28 }
 0x6fd   : > { %14861 = vmatmul.mubr.bf16.vlgmr.msra.gmra.mrb[20].mxu0 %v19799_v4  ;;  %v16997_v60 = vcombine.high %v8302_v15, %v8306_v56 }
 0x6fe   : > { %15189 = vmatmul.mubr.bf16.vlgmr.msra.gmra.mrb[20].mxu1 %v19799_v4  ;;  %14870 = vmatpush1.bf16.msra.mxu0 %v16938_v41  ;;  %v8274_v4 = vld [vmem:[%s19627_s14 + $0x8f8] sm:$0xff]  ;;  %v16995_v41 = vcombine.high %v8301_v2, %v8305_v28 }
 0x6ff   : > { %14901 = vmatprep.mubr.bf16.mxu0 %v19803_v9  ;;  %15198 = vmatpush1.bf16.msra.mxu1 %v16940_v5  ;;  %v16964_v20 = vcombine.low %v8270_v44, %v8274_v4  ;;  %v8313_v5 = vld [vmem:[%s19627_s14 + $0xa30] sm:$0xff] }
 0x700   : > { %15229 = vmatprep.mubr.bf16.mxu1 %v19803_v9  ;;  %14871 = vmatprep.subr.bf16.mxu0 %v16947_v62  ;;  %v16965_v9 = vcombine.high %v8270_v44, %v8274_v4  ;;  %v8310_v62 = vld [vmem:[%s19627_s14 + $0xa18] sm:$0xff]  ;;  %v17003_v51 = vcombine.high %v8309_v61, %v8313_v5  ;;  %v17002_v29 = vcombine.low %v8309_v61, %v8313_v5 }
 0x701   : > { %15199 = vmatprep.subr.bf16.mxu1 %v16949_v0  ;;  %v16996_v0 = vcombine.low %v8302_v15, %v8306_v56  ;;  %v17005_v1 = vcombine.high %v8310_v62, %v8314_v12  ;;  %v17004_v3 = vcombine.low %v8310_v62, %v8314_v12 }
 0x702   : > { %14872 = vmatpush1.bf16.msra.mxu0 %v16946_v14  ;;  %v8317_v14 = vld [vmem:[%s19627_s14 + $0xa50] sm:$0xff] }
 0x703   : > { %15200 = vmatpush1.bf16.msra.mxu1 %v16948_v19  ;;  %14873 = vmatprep.subr.bf16.mxu0 %v16955_v6  ;;  %v8321_v19 = vld [vmem:[%s19627_s14 + $0xa70] sm:$0xff]  ;;  %v8318_v6 = vld [vmem:[%s19627_s14 + $0xa58] sm:$0xff] }
 0x704   : > { %15201 = vmatprep.subr.bf16.mxu1 %v16957_v46  ;;  %v8322_v46 = vld [vmem:[%s19627_s14 + $0xa78] sm:$0xff]  ;;  %v17011_v44 = vcombine.high %v8317_v14, %v8321_v19  ;;  %v17010_v22 = vcombine.low %v8317_v14, %v8321_v19 }
 0x705   : > { %v17013_v4 = vcombine.high %v8318_v6, %v8322_v46  ;;  %v17012_v11 = vcombine.low %v8318_v6, %v8322_v46 }
 0x706   : > { %14874 = vmatpush1.bf16.msra.mxu0 %v16954_v49  ;;  %v8325_v49 = vld [vmem:[%s19627_s14 + $0xa90] sm:$0xff] }
 0x707   : > { %15202 = vmatpush1.bf16.msra.mxu1 %v16956_v33  ;;  %14875 = vmatprep.subr.bf16.mxu0 %v16963_v8  ;;  %v8329_v33 = vld [vmem:[%s19627_s14 + $0xab0] sm:$0xff]  ;;  %v8326_v8 = vld [vmem:[%s19627_s14 + $0xa98] sm:$0xff] }
 0x708   : > { %15203 = vmatprep.subr.bf16.mxu1 %v16965_v9  ;;  %v8330_v9 = vld [vmem:[%s19627_s14 + $0xab8] sm:$0xff]  ;;  %v17019_v18 = vcombine.high %v8325_v49, %v8329_v33  ;;  %v17018_v59 = vcombine.low %v8325_v49, %v8329_v33 }
 0x709   : > { %v17021_v17 = vcombine.high %v8326_v8, %v8330_v9  ;;  %v17020_v35 = vcombine.low %v8326_v8, %v8330_v9 }
 0x70a   : > { %14876 = vmatpush1.bf16.msra.mxu0 %v16962_v55  ;;  %v8333_v55 = vld [vmem:[%s19627_s14 + $0xad0] sm:$0xff] }
 0x70b   : > { %15204 = vmatpush1.bf16.msra.mxu1 %v16964_v20  ;;  %14877 = vmatprep.subr.bf16.mxu0 %v16971_v63  ;;  %v8337_v20 = vld [vmem:[%s19627_s14 + $0xaf0] sm:$0xff]  ;;  %v8334_v63 = vld [vmem:[%s19627_s14 + $0xad8] sm:$0xff] }
 0x70c   : > { %15205 = vmatprep.subr.bf16.mxu1 %v16973_v36  ;;  %v8338_v36 = vld [vmem:[%s19627_s14 + $0xaf8] sm:$0xff]  ;;  %v17027_v38 = vcombine.high %v8333_v55, %v8337_v20  ;;  %v17026_v45 = vcombine.low %v8333_v55, %v8337_v20 }
 0x70d   : > { %v17029_v50 = vcombine.high %v8334_v63, %v8338_v36  ;;  %v17028_v24 = vcombine.low %v8334_v63, %v8338_v36  ;;  %v8386_v55 = vld [vmem:[%s19627_s14 + $0xc78] sm:$0xff]  ;;  %v8389_v36 = vld [vmem:[%s19627_s14 + $0xc90] sm:$0xff] }
 0x70e   : > { %14878 = vmatpush1.bf16.msra.mxu0 %v16970_v40  ;;  %v8341_v40 = vld [vmem:[%s19627_s14 + $0xb10] sm:$0xff] }
 0x70f   : > { %15206 = vmatpush1.bf16.msra.mxu1 %v16972_v42  ;;  %14879 = vmatprep.subr.bf16.mxu0 %v16979_v39  ;;  %v8345_v42 = vld [vmem:[%s19627_s14 + $0xb30] sm:$0xff]  ;;  %v8342_v39 = vld [vmem:[%s19627_s14 + $0xb18] sm:$0xff] }
 0x710   : > { %15207 = vmatprep.subr.bf16.mxu1 %v16981_v43  ;;  %v8346_v43 = vld [vmem:[%s19627_s14 + $0xb38] sm:$0xff]  ;;  %v17035_v25 = vcombine.high %v8341_v40, %v8345_v42  ;;  %v17034_v2 = vcombine.low %v8341_v40, %v8345_v42 }
 0x711   : > { %v17037_v7 = vcombine.high %v8342_v39, %v8346_v43  ;;  %v17036_v28 = vcombine.low %v8342_v39, %v8346_v43 }
 0x712   : > { %14880 = vmatpush1.bf16.msra.mxu0 %v16978_v47  ;;  %v8349_v47 = vld [vmem:[%s19627_s14 + $0xb50] sm:$0xff] }
 0x713   : > { %15208 = vmatpush1.bf16.msra.mxu1 %v16980_v37  ;;  %14881 = vmatprep.subr.bf16.mxu0 %v16987_v52  ;;  %v8353_v37 = vld [vmem:[%s19627_s14 + $0xb70] sm:$0xff]  ;;  %v8350_v52 = vld [vmem:[%s19627_s14 + $0xb58] sm:$0xff] }
 0x714   : > { %15209 = vmatprep.subr.bf16.mxu1 %v16989_v13  ;;  %v8354_v13 = vld [vmem:[%s19627_s14 + $0xb78] sm:$0xff]  ;;  %v17043_v15 = vcombine.high %v8349_v47, %v8353_v37  ;;  %v17042_v61 = vcombine.low %v8349_v47, %v8353_v37 }
 0x715   : > { %v17045_v56 = vcombine.high %v8350_v52, %v8354_v13  ;;  %v17044_v5 = vcombine.low %v8350_v52, %v8354_v13  ;;  %v8405_v52 = vld [vmem:[%s19627_s14 + $0xd10] sm:$0xff] }
 0x716   : > { %14882 = vmatpush1.bf16.msra.mxu0 %v16986_v58  ;;  %v8357_v58 = vld [vmem:[%s19627_s14 + $0xb90] sm:$0xff] }
 0x717   : > { %15210 = vmatpush1.bf16.msra.mxu1 %v16988_v16  ;;  %14883 = vmatprep.subr.bf16.mxu0 %v16995_v41  ;;  %v8361_v16 = vld [vmem:[%s19627_s14 + $0xbb0] sm:$0xff]  ;;  %v8358_v41 = vld [vmem:[%s19627_s14 + $0xb98] sm:$0xff] }
 0x718   : > { %15211 = vmatprep.subr.bf16.mxu1 %v16997_v60  ;;  %v8362_v60 = vld [vmem:[%s19627_s14 + $0xbb8] sm:$0xff]  ;;  %v17051_v62 = vcombine.high %v8357_v58, %v8361_v16  ;;  %v17050_v14 = vcombine.low %v8357_v58, %v8361_v16  ;;  %v8409_v13 = vld [vmem:[%s19627_s14 + $0xd30] sm:$0xff] }
 0x719   : > { %v17053_v12 = vcombine.high %v8358_v41, %v8362_v60  ;;  %v17052_v19 = vcombine.low %v8358_v41, %v8362_v60  ;;  %v17099_v58 = vcombine.high %v8405_v52, %v8409_v13  ;;  %v8413_v41 = vld [vmem:[%s19627_s14 + $0xd50] sm:$0xff] }
 0x71a   : > { %14884 = vmatpush1.bf16.msra.mxu0 %v16994_v32  ;;  %v8365_v32 = vld [vmem:[%s19627_s14 + $0xbd0] sm:$0xff] }
 0x71b   : > { %15212 = vmatpush1.bf16.msra.mxu1 %v16996_v0  ;;  %14885 = vmatprep.subr.bf16.mxu0 %v17003_v51  ;;  %v8369_v0 = vld [vmem:[%s19627_s14 + $0xbf0] sm:$0xff]  ;;  %v8366_v51 = vld [vmem:[%s19627_s14 + $0xbd8] sm:$0xff] }
 0x71c   : > { %15213 = vmatprep.subr.bf16.mxu1 %v17005_v1  ;;  %v8370_v1 = vld [vmem:[%s19627_s14 + $0xbf8] sm:$0xff]  ;;  %v17059_v6 = vcombine.high %v8365_v32, %v8369_v0  ;;  %v17058_v49 = vcombine.low %v8365_v32, %v8369_v0  ;;  %v8417_v60 = vld [vmem:[%s19627_s14 + $0xd70] sm:$0xff] }
 0x71d   : > { %v17061_v46 = vcombine.high %v8366_v51, %v8370_v1  ;;  %v17060_v33 = vcombine.low %v8366_v51, %v8370_v1  ;;  %v17107_v32 = vcombine.high %v8413_v41, %v8417_v60  ;;  %v8421_v51 = vld [vmem:[%s19627_s14 + $0xd90] sm:$0xff] }
 0x71e   : > { %14886 = vmatpush1.bf16.msra.mxu0 %v17002_v29  ;;  %v8373_v29 = vld [vmem:[%s19627_s14 + $0xc10] sm:$0xff] }
 0x71f   : > { %15214 = vmatpush1.bf16.msra.mxu1 %v17004_v3  ;;  %14887 = vmatprep.subr.bf16.mxu0 %v17011_v44  ;;  %v8377_v3 = vld [vmem:[%s19627_s14 + $0xc30] sm:$0xff]  ;;  %v8374_v44 = vld [vmem:[%s19627_s14 + $0xc18] sm:$0xff] }
 0x720   : > { %15215 = vmatprep.subr.bf16.mxu1 %v17013_v4  ;;  %v8378_v4 = vld [vmem:[%s19627_s14 + $0xc38] sm:$0xff]  ;;  %v17067_v8 = vcombine.high %v8373_v29, %v8377_v3  ;;  %v8425_v1 = vld [vmem:[%s19627_s14 + $0xdb0] sm:$0xff] }
 0x721   : > { %v17069_v9 = vcombine.high %v8374_v44, %v8378_v4  ;;  %v17068_v20 = vcombine.low %v8374_v44, %v8378_v4  ;;  %v8429_v4 = vld [vmem:[%s19627_s14 + $0xdd0] sm:$0xff] }
 0x722   : > { %14888 = vmatpush1.bf16.msra.mxu0 %v17010_v22  ;;  %v8381_v22 = vld [vmem:[%s19627_s14 + $0xc50] sm:$0xff] }
 0x723   : > { %15216 = vmatpush1.bf16.msra.mxu1 %v17012_v11  ;;  %14889 = vmatprep.subr.bf16.mxu0 %v17019_v18  ;;  %v8385_v11 = vld [vmem:[%s19627_s14 + $0xc70] sm:$0xff]  ;;  %v17066_v18 = vcombine.low %v8373_v29, %v8377_v3  ;;  %v17115_v29 = vcombine.high %v8421_v51, %v8425_v1 }
 0x724   : > { %15217 = vmatprep.subr.bf16.mxu1 %v17021_v17  ;;  %v8382_v17 = vld [vmem:[%s19627_s14 + $0xc58] sm:$0xff]  ;;  %v17075_v63 = vcombine.high %v8381_v22, %v8385_v11  ;;  %v17074_v40 = vcombine.low %v8381_v22, %v8385_v11 }
 0x725   : > { %v17076_v42 = vcombine.low %v8382_v17, %v8386_v55  ;;  %v8434_v22 = vld [vmem:[%s19627_s14 + $0xdf8] sm:$0xff] }
 0x726   : > { %14890 = vmatpush1.bf16.msra.mxu0 %v17018_v59  ;;  %v8393_v59 = vld [vmem:[%s19627_s14 + $0xcb0] sm:$0xff] }
 0x727   : > { %15218 = vmatpush1.bf16.msra.mxu1 %v17020_v35  ;;  %14891 = vmatprep.subr.bf16.mxu0 %v17027_v38  ;;  %v17077_v35 = vcombine.high %v8382_v17, %v8386_v55  ;;  %v8390_v38 = vld [vmem:[%s19627_s14 + $0xc98] sm:$0xff]  ;;  %v17083_v39 = vcombine.high %v8389_v36, %v8393_v59  ;;  %v17114_v17 = vcombine.low %v8421_v51, %v8425_v1 }
 0x728   : > { %15219 = vmatprep.subr.bf16.mxu1 %v17029_v50  ;;  %v8394_v50 = vld [vmem:[%s19627_s14 + $0xcb8] sm:$0xff] }
 0x729   : > { %v17085_v43 = vcombine.high %v8390_v38, %v8394_v50  ;;  %v17084_v47 = vcombine.low %v8390_v38, %v8394_v50  ;;  %v8437_v38 = vld [vmem:[%s19627_s14 + $0xe10] sm:$0xff] }
 0x72a   : > { %14892 = vmatpush1.bf16.msra.mxu0 %v17026_v45  ;;  %v8397_v45 = vld [vmem:[%s19627_s14 + $0xcd0] sm:$0xff] }
 0x72b   : > { %15220 = vmatpush1.bf16.msra.mxu1 %v17028_v24  ;;  %14893 = vmatprep.subr.bf16.mxu0 %v17035_v25  ;;  %v8401_v24 = vld [vmem:[%s19627_s14 + $0xcf0] sm:$0xff]  ;;  %v8398_v25 = vld [vmem:[%s19627_s14 + $0xcd8] sm:$0xff] }
 0x72c   : > { %15221 = vmatprep.subr.bf16.mxu1 %v17037_v7  ;;  %v17082_v7 = vcombine.low %v8389_v36, %v8393_v59  ;;  %v17091_v37 = vcombine.high %v8397_v45, %v8401_v24  ;;  %v8441_v50 = vld [vmem:[%s19627_s14 + $0xe30] sm:$0xff] }
 0x72e   : > { %14894 = vmatpush1.bf16.msra.mxu0 %v17034_v2  ;;  %v8406_v2 = vld [vmem:[%s19627_s14 + $0xd18] sm:$0xff] }
 0x72f   : > { %15222 = vmatpush1.bf16.msra.mxu1 %v17036_v28  ;;  %14895 = vmatprep.subr.bf16.mxu0 %v17043_v15  ;;  %v8410_v28 = vld [vmem:[%s19627_s14 + $0xd38] sm:$0xff]  ;;  %v17090_v15 = vcombine.low %v8397_v45, %v8401_v24  ;;  %v17131_v45 = vcombine.high %v8437_v38, %v8441_v50 }
 0x730   : > { %15223 = vmatprep.subr.bf16.mxu1 %v17045_v56  ;;  %v17101_v16 = vcombine.high %v8406_v2, %v8410_v28 }
 0x732   : > { %14896 = vmatpush1.bf16.msra.mxu0 %v17042_v61  ;;  %v8414_v61 = vld [vmem:[%s19627_s14 + $0xd58] sm:$0xff] }
 0x733   : > { %15224 = vmatpush1.bf16.msra.mxu1 %v17044_v5  ;;  %14897 = vmatprep.subr.bf16.mxu0 %v17051_v62  ;;  %v8418_v5 = vld [vmem:[%s19627_s14 + $0xd78] sm:$0xff]  ;;  %v17098_v62 = vcombine.low %v8405_v52, %v8409_v13 }
 0x734   : > { %15225 = vmatprep.subr.bf16.mxu1 %v17053_v12  ;;  %v17100_v12 = vcombine.low %v8406_v2, %v8410_v28  ;;  %v17109_v0 = vcombine.high %v8414_v61, %v8418_v5  ;;  %v8453_v2 = vld [vmem:[%s19627_s14 + $0xe90] sm:$0xff] }
 0x735   : > { %v8457_v28 = vld [vmem:[%s19627_s14 + $0xeb0] sm:$0xff] }
 0x736   : > { %14898 = vmatpush1.bf16.msra.mxu0 %v17050_v14  ;;  %v8422_v14 = vld [vmem:[%s19627_s14 + $0xd98] sm:$0xff] }
 0x737   : > { %15226 = vmatpush1.bf16.msra.mxu1 %v17052_v19  ;;  %14899 = vmatprep.subr.bf16.mxu0 %v17059_v6  ;;  %v8426_v19 = vld [vmem:[%s19627_s14 + $0xdb8] sm:$0xff]  ;;  %v17106_v6 = vcombine.low %v8413_v41, %v8417_v60  ;;  %v17147_v41 = vcombine.high %v8453_v2, %v8457_v28 }
 0x738   : > { %15227 = vmatprep.subr.bf16.mxu1 %v17061_v46  ;;  %v17108_v46 = vcombine.low %v8414_v61, %v8418_v5  ;;  %v17117_v44 = vcombine.high %v8422_v14, %v8426_v19  ;;  %v8461_v61 = vld [vmem:[%s19627_s14 + $0xed0] sm:$0xff] }
 0x739   : > { %v8465_v5 = vld [vmem:[%s19627_s14 + $0xef0] sm:$0xff] }
 0x73a   : > { %14900 = vmatpush1.bf16.msra.mxu0 %v17058_v49  ;;  %v8433_v49 = vld [vmem:[%s19627_s14 + $0xdf0] sm:$0xff]  ;;  %v17155_v51 = vcombine.high %v8461_v61, %v8465_v5 }
 0x73b   : > { %15228 = vmatpush1.bf16.msra.mxu1 %v17060_v33  ;;  %14910 = vmatprep.subr.bf16.mxu0 %v17067_v8  ;;  %v17123_v36 = vcombine.high %v8429_v4, %v8433_v49 }
 0x73c   : > { %15238 = vmatprep.subr.bf16.mxu1 %v17069_v9  ;;  %v8430_v9 = vld [vmem:[%s19627_s14 + $0xdd8] sm:$0xff] }
 0x73d   : > { %14902 = vmatmul.mubr.bf16.vlgmr.msra.gmra.mrb[20].mxu0 %v19884_v31 }
 0x73e   : > { %15230 = vmatmul.mubr.bf16.vlgmr.msra.gmra.mrb[20].mxu1 %v19884_v31  ;;  %14911 = vmatpush1.bf16.msra.mxu0 %v17066_v18  ;;  %v8402_v31 = vld [vmem:[%s19627_s14 + $0xcf8] sm:$0xff] }
 0x73f   : > { %14942 = vmatprep.mubr.bf16.mxu0 %v19888_v30  ;;  %15239 = vmatpush1.bf16.msra.mxu1 %v17068_v20  ;;  %v17092_v56 = vcombine.low %v8398_v25, %v8402_v31 }
 0x740   : > { %15270 = vmatprep.mubr.bf16.mxu1 %v19888_v30  ;;  %14912 = vmatprep.subr.bf16.mxu0 %v17075_v63  ;;  %v17093_v30 = vcombine.high %v8398_v25, %v8402_v31  ;;  %v17116_v63 = vcombine.low %v8422_v14, %v8426_v19  ;;  %v8445_v25 = vld [vmem:[%s19627_s14 + $0xe50] sm:$0xff] }
 0x741   : > { %15240 = vmatprep.subr.bf16.mxu1 %v17077_v35  ;;  %v17125_v35 = vcombine.high %v8430_v9, %v8434_v22  ;;  %v8449_v31 = vld [vmem:[%s19627_s14 + $0xe70] sm:$0xff] }
 0x742   : > { %14913 = vmatpush1.bf16.msra.mxu0 %v17074_v40  ;;  %v8438_v40 = vld [vmem:[%s19627_s14 + $0xe18] sm:$0xff]  ;;  %v17139_v52 = vcombine.high %v8445_v25, %v8449_v31  ;;  %v8469_v14 = vld [vmem:[%s19627_s14 + $0xf10] sm:$0xff] }
 0x743   : > { %15241 = vmatpush1.bf16.msra.mxu1 %v17076_v42  ;;  %14914 = vmatprep.subr.bf16.mxu0 %v17083_v39  ;;  %v8442_v42 = vld [vmem:[%s19627_s14 + $0xe38] sm:$0xff]  ;;  %v17122_v39 = vcombine.low %v8429_v4, %v8433_v49  ;;  %v8473_v19 = vld [vmem:[%s19627_s14 + $0xf30] sm:$0xff] }
 0x744   : > { %15242 = vmatprep.subr.bf16.mxu1 %v17085_v43  ;;  %v17124_v43 = vcombine.low %v8430_v9, %v8434_v22  ;;  %v17133_v24 = vcombine.high %v8438_v40, %v8442_v42  ;;  %v17163_v4 = vcombine.high %v8469_v14, %v8473_v19  ;;  %v8477_v9 = vld [vmem:[%s19627_s14 + $0xf50] sm:$0xff] }
 0x745   : > { %v8481_v22 = vld [vmem:[%s19627_s14 + $0xf70] sm:$0xff] }
 0x746   : > { %14915 = vmatpush1.bf16.msra.mxu0 %v17082_v7  ;;  %v8446_v7 = vld [vmem:[%s19627_s14 + $0xe58] sm:$0xff] }
 0x747   : > { %15243 = vmatpush1.bf16.msra.mxu1 %v17084_v47  ;;  %14916 = vmatprep.subr.bf16.mxu0 %v17091_v37  ;;  %v8450_v47 = vld [vmem:[%s19627_s14 + $0xe78] sm:$0xff]  ;;  %v17130_v37 = vcombine.low %v8437_v38, %v8441_v50 }
 0x748   : > { %15244 = vmatprep.subr.bf16.mxu1 %v17093_v30  ;;  %v17132_v30 = vcombine.low %v8438_v40, %v8442_v42  ;;  %v17141_v13 = vcombine.high %v8446_v7, %v8450_v47  ;;  %v8486_v38 = vld [vmem:[%s19627_s14 + $0xf98] sm:$0xff]  ;;  %v17170_v40 = vcombine.low %v8477_v9, %v8481_v22 }
 0x749   : > { %v8490_v50 = vld [vmem:[%s19627_s14 + $0xfb8] sm:$0xff] }
 0x74a   : > { %14917 = vmatpush1.bf16.msra.mxu0 %v17090_v15  ;;  %v8454_v15 = vld [vmem:[%s19627_s14 + $0xe98] sm:$0xff] }
 0x74b   : > { %15245 = vmatpush1.bf16.msra.mxu1 %v17092_v56  ;;  %14918 = vmatprep.subr.bf16.mxu0 %v17099_v58  ;;  %v8458_v56 = vld [vmem:[%s19627_s14 + $0xeb8] sm:$0xff]  ;;  %v17138_v58 = vcombine.low %v8445_v25, %v8449_v31 }
 0x74c   : > { %15246 = vmatprep.subr.bf16.mxu1 %v17101_v16  ;;  %v17140_v16 = vcombine.low %v8446_v7, %v8450_v47  ;;  %v17149_v60 = vcombine.high %v8454_v15, %v8458_v56  ;;  %v8494_v25 = vld [vmem:[%s19627_s14 + $0xfd8] sm:$0xff]  ;;  %v17180_v47 = vcombine.low %v8486_v38, %v8490_v50 }
 0x74d   : > { %v8498_v31 = vld [vmem:[%s19627_s14 + $0xff8] sm:$0xff] }
 0x74e   : > { %14919 = vmatpush1.bf16.msra.mxu0 %v17098_v62  ;;  %v8462_v62 = vld [vmem:[%s19627_s14 + $0xed8] sm:$0xff] }
 0x74f   : > { %15247 = vmatpush1.bf16.msra.mxu1 %v17100_v12  ;;  %14920 = vmatprep.subr.bf16.mxu0 %v17107_v32  ;;  %v8466_v12 = vld [vmem:[%s19627_s14 + $0xef8] sm:$0xff]  ;;  %v17146_v32 = vcombine.low %v8453_v2, %v8457_v28 }
 0x750   : > { %v20525_v3 = vpop.f32.mrb[16].mxu0  ;;  %15248 = vmatprep.subr.bf16.mxu1 %v17109_v0  ;;  %v17148_v0 = vcombine.low %v8454_v15, %v8458_v56  ;;  %v17157_v1 = vcombine.high %v8462_v62, %v8466_v12  ;;  %v8502_v2 = vld [vmem:[%s19627_s14 + $0x1018] sm:$0xff]  ;;  %v17188_v56 = vcombine.low %v8494_v25, %v8498_v31 }
 0x751   : > { %v20529_v33 = vpop.f32.mrb[16].mxu1  ;;  %v20531_v8 = vpop.f32.mrb[17].mxu0  ;;  %v8506_v28 = vld [vmem:[%s19627_s14 + $0x1038] sm:$0xff] }
 0x752   : > { %v20535_v11 = vpop.f32.mrb[17].mxu1  ;;  %v14456_v18 = vpop.f32.mrb[18].mxu0  ;;  %14921 = vmatpush1.bf16.msra.mxu0 %v17106_v6  ;;  %v8470_v6 = vld [vmem:[%s19627_s14 + $0xf18] sm:$0xff] }
 0x753   : > { %v14784_v55 = vpop.f32.mrb[18].mxu1  ;;  %15249 = vmatpush1.bf16.msra.mxu1 %v17108_v46  ;;  %v14457_v20 = vpop.f32.mrb[19].mxu0  ;;  %14922 = vmatprep.subr.bf16.mxu0 %v17115_v29  ;;  %v8474_v46 = vld [vmem:[%s19627_s14 + $0xf38] sm:$0xff]  ;;  %v17154_v29 = vcombine.low %v8461_v61, %v8465_v5 }
 0x754   : > { %v14785_v59 = vpop.f32.mrb[19].mxu1  ;;  %15250 = vmatprep.subr.bf16.mxu1 %v17117_v44  ;;  %v17156_v44 = vcombine.low %v8462_v62, %v8466_v12  ;;  %v17165_v49 = vcombine.high %v8470_v6, %v8474_v46  ;;  %v8478_v18 = vld [vmem:[%s19627_s14 + $0xf58] sm:$0xff]  ;;  %v17162_v55 = vcombine.low %v8469_v14, %v8473_v19  ;;  %v17164_v20 = vcombine.low %v8470_v6, %v8474_v46 }
 0x755   : > { %v8485_v59 = vld [vmem:[%s19627_s14 + $0xf90] sm:$0xff]  ;;  %v8510_v5 = vld [vmem:[%s19627_s14 + $0x1058] sm:$0xff]  ;;  %v17196_v12 = vcombine.low %v8502_v2, %v8506_v28 }
 0x756   : > { %14923 = vmatpush1.bf16.msra.mxu0 %v17114_v17  ;;  %v8482_v17 = vld [vmem:[%s19627_s14 + $0xf78] sm:$0xff] }
 0x757   : > { %15251 = vmatpush1.bf16.msra.mxu1 %v17116_v63  ;;  %14924 = vmatprep.subr.bf16.mxu0 %v17123_v36  ;;  %v17171_v63 = vcombine.high %v8477_v9, %v8481_v22  ;;  %v17173_v36 = vcombine.high %v8478_v18, %v8482_v17  ;;  %v17172_v42 = vcombine.low %v8478_v18, %v8482_v17  ;;  %v8514_v62 = vld [vmem:[%s19627_s14 + $0x1078] sm:$0xff] }
 0x758   : > { %15252 = vmatprep.subr.bf16.mxu1 %v17125_v35  ;;  %v8489_v35 = vld [vmem:[%s19627_s14 + $0xfb0] sm:$0xff]  ;;  %v8518_v14 = vld [vmem:[%s19627_s14 + $0x1098] sm:$0xff]  ;;  %v17204_v46 = vcombine.low %v8510_v5, %v8514_v62 }
 0x759   : > { %v17178_v7 = vcombine.low %v8485_v59, %v8489_v35  ;;  %v8522_v19 = vld [vmem:[%s19627_s14 + $0x10b8] sm:$0xff] }
 0x75a   : > { %14925 = vmatpush1.bf16.msra.mxu0 %v17122_v39  ;;  %v17179_v39 = vcombine.high %v8485_v59, %v8489_v35  ;;  %v8526_v9 = vld [vmem:[%s19627_s14 + $0x10d8] sm:$0xff]  ;;  %v17212_v18 = vcombine.low %v8518_v14, %v8522_v19 }
 0x75b   : > { %15253 = vmatpush1.bf16.msra.mxu1 %v17124_v43  ;;  %14926 = vmatprep.subr.bf16.mxu0 %v17131_v45  ;;  %v17181_v43 = vcombine.high %v8486_v38, %v8490_v50  ;;  %v8493_v45 = vld [vmem:[%s19627_s14 + $0xfd0] sm:$0xff] }
 0x75c   : > { %15254 = vmatprep.subr.bf16.mxu1 %v17133_v24  ;;  %v8497_v24 = vld [vmem:[%s19627_s14 + $0xff0] sm:$0xff] }
 0x75d   : > { %v17186_v15 = vcombine.low %v8493_v45, %v8497_v24 }
 0x75e   : > { %14927 = vmatpush1.bf16.msra.mxu0 %v17130_v37  ;;  %v17187_v37 = vcombine.high %v8493_v45, %v8497_v24 }
 0x75f   : > { %15255 = vmatpush1.bf16.msra.mxu1 %v17132_v30  ;;  %14928 = vmatprep.subr.bf16.mxu0 %v17139_v52  ;;  %v17189_v30 = vcombine.high %v8494_v25, %v8498_v31  ;;  %v8501_v52 = vld [vmem:[%s19627_s14 + $0x1010] sm:$0xff] }
 0x760   : > { %15256 = vmatprep.subr.bf16.mxu1 %v17141_v13  ;;  %v8505_v13 = vld [vmem:[%s19627_s14 + $0x1030] sm:$0xff] }
 0x761   : > { %v17194_v61 = vcombine.low %v8501_v52, %v8505_v13 }
 0x762   : > { %14929 = vmatpush1.bf16.msra.mxu0 %v17138_v58  ;;  %v17195_v58 = vcombine.high %v8501_v52, %v8505_v13 }
 0x763   : > { %15257 = vmatpush1.bf16.msra.mxu1 %v17140_v16  ;;  %14930 = vmatprep.subr.bf16.mxu0 %v17147_v41  ;;  %v17197_v16 = vcombine.high %v8502_v2, %v8506_v28  ;;  %v8509_v41 = vld [vmem:[%s19627_s14 + $0x1050] sm:$0xff] }
 0x764   : > { %15258 = vmatprep.subr.bf16.mxu1 %v17149_v60  ;;  %v8513_v60 = vld [vmem:[%s19627_s14 + $0x1070] sm:$0xff] }
 0x765   : > { %v17202_v6 = vcombine.low %v8509_v41, %v8513_v60 }
 0x766   : > { %14931 = vmatpush1.bf16.msra.mxu0 %v17146_v32  ;;  %v17203_v32 = vcombine.high %v8509_v41, %v8513_v60 }
 0x767   : > { %15259 = vmatpush1.bf16.msra.mxu1 %v17148_v0  ;;  %14932 = vmatprep.subr.bf16.mxu0 %v17155_v51  ;;  %v8517_v0 = vld [vmem:[%s19627_s14 + $0x1090] sm:$0xff] }
 0x768   : > { %15260 = vmatprep.subr.bf16.mxu1 %v17157_v1  ;;  %v8521_v51 = vld [vmem:[%s19627_s14 + $0x10b0] sm:$0xff]  ;;  %v17205_v1 = vcombine.high %v8510_v5, %v8514_v62 }
 0x769   : > { %v17210_v22 = vcombine.low %v8517_v0, %v8521_v51  ;;  %v8565_v62 = vld [vmem:[%s19627_s14 + $0x1210] sm:$0xff] }
 0x76a   : > { %14933 = vmatpush1.bf16.msra.mxu0 %v17154_v29  ;;  %v17211_v29 = vcombine.high %v8517_v0, %v8521_v51  ;;  %v8570_v0 = vld [vmem:[%s19627_s14 + $0x1238] sm:$0xff] }
 0x76b   : > { %15261 = vmatpush1.bf16.msra.mxu1 %v17156_v44  ;;  %14934 = vmatprep.subr.bf16.mxu0 %v17163_v4  ;;  %v17213_v44 = vcombine.high %v8518_v14, %v8522_v19  ;;  %v8525_v4 = vld [vmem:[%s19627_s14 + $0x10d0] sm:$0xff] }
 0x76c   : > { %15262 = vmatprep.subr.bf16.mxu1 %v17165_v49  ;;  %v8529_v49 = vld [vmem:[%s19627_s14 + $0x10f0] sm:$0xff] }
 0x76d   : > { %v17219_v17 = vcombine.high %v8525_v4, %v8529_v49  ;;  %v17218_v59 = vcombine.low %v8525_v4, %v8529_v49 }
 0x76e   : > { %14935 = vmatpush1.bf16.msra.mxu0 %v17162_v55  ;;  %v8533_v55 = vld [vmem:[%s19627_s14 + $0x1110] sm:$0xff] }
 0x76f   : > { %15263 = vmatpush1.bf16.msra.mxu1 %v17164_v20  ;;  %14936 = vmatprep.subr.bf16.mxu0 %v17171_v63  ;;  %v8537_v20 = vld [vmem:[%s19627_s14 + $0x1130] sm:$0xff]  ;;  %v8534_v63 = vld [vmem:[%s19627_s14 + $0x1118] sm:$0xff] }
 0x770   : > { %15264 = vmatprep.subr.bf16.mxu1 %v17173_v36  ;;  %v8538_v36 = vld [vmem:[%s19627_s14 + $0x1138] sm:$0xff]  ;;  %v17227_v38 = vcombine.high %v8533_v55, %v8537_v20  ;;  %v17226_v45 = vcombine.low %v8533_v55, %v8537_v20 }
 0x771   : > { %v17229_v50 = vcombine.high %v8534_v63, %v8538_v36  ;;  %v17228_v24 = vcombine.low %v8534_v63, %v8538_v36 }
 0x772   : > { %14937 = vmatpush1.bf16.msra.mxu0 %v17170_v40  ;;  %v8541_v40 = vld [vmem:[%s19627_s14 + $0x1150] sm:$0xff] }
 0x773   : > { %15265 = vmatpush1.bf16.msra.mxu1 %v17172_v42  ;;  %14938 = vmatprep.subr.bf16.mxu0 %v17179_v39  ;;  %v8545_v42 = vld [vmem:[%s19627_s14 + $0x1170] sm:$0xff]  ;;  %v8542_v39 = vld [vmem:[%s19627_s14 + $0x1158] sm:$0xff] }
 0x774   : > { %15266 = vmatprep.subr.bf16.mxu1 %v17181_v43  ;;  %v8546_v43 = vld [vmem:[%s19627_s14 + $0x1178] sm:$0xff]  ;;  %v17235_v25 = vcombine.high %v8541_v40, %v8545_v42  ;;  %v17234_v52 = vcombine.low %v8541_v40, %v8545_v42 }
 0x775   : > { %v17237_v31 = vcombine.high %v8542_v39, %v8546_v43  ;;  %v17236_v13 = vcombine.low %v8542_v39, %v8546_v43 }
 0x776   : > { %14939 = vmatpush1.bf16.msra.mxu0 %v17178_v7  ;;  %v8549_v7 = vld [vmem:[%s19627_s14 + $0x1190] sm:$0xff] }
 0x777   : > { %15267 = vmatpush1.bf16.msra.mxu1 %v17180_v47  ;;  %14940 = vmatprep.subr.bf16.mxu0 %v17187_v37  ;;  %v8553_v47 = vld [vmem:[%s19627_s14 + $0x11b0] sm:$0xff]  ;;  %v8550_v37 = vld [vmem:[%s19627_s14 + $0x1198] sm:$0xff] }
 0x778   : > { %15268 = vmatprep.subr.bf16.mxu1 %v17189_v30  ;;  %v8554_v30 = vld [vmem:[%s19627_s14 + $0x11b8] sm:$0xff]  ;;  %v17243_v2 = vcombine.high %v8549_v7, %v8553_v47  ;;  %v17242_v41 = vcombine.low %v8549_v7, %v8553_v47 }
 0x779   : > { %v17245_v28 = vcombine.high %v8550_v37, %v8554_v30  ;;  %v17244_v60 = vcombine.low %v8550_v37, %v8554_v30 }
 0x77a   : > { %14941 = vmatpush1.bf16.msra.mxu0 %v17186_v15  ;;  %v8557_v15 = vld [vmem:[%s19627_s14 + $0x11d0] sm:$0xff] }
 0x77b   : > { %15269 = vmatpush1.bf16.msra.mxu1 %v17188_v56  ;;  %14951 = vmatprep.subr.bf16.mxu0 %v17195_v58  ;;  %v8561_v56 = vld [vmem:[%s19627_s14 + $0x11f0] sm:$0xff]  ;;  %v8558_v58 = vld [vmem:[%s19627_s14 + $0x11d8] sm:$0xff] }
 0x77c   : > { %15279 = vmatprep.subr.bf16.mxu1 %v17197_v16  ;;  %v8562_v16 = vld [vmem:[%s19627_s14 + $0x11f8] sm:$0xff]  ;;  %v17250_v51 = vcombine.low %v8557_v15, %v8561_v56 }
 0x77d   : > { %14943 = vmatmul.mubr.bf16.vlgmr.msra.gmra.mrb[20].mxu0 %v19976_v57  ;;  %v17253_v5 = vcombine.high %v8558_v58, %v8562_v16 }
 0x77e   : > { %15271 = vmatmul.mubr.bf16.vlgmr.msra.gmra.mrb[20].mxu1 %v19976_v57  ;;  %14952 = vmatpush1.bf16.msra.mxu0 %v17194_v61  ;;  %v8530_v57 = vld [vmem:[%s19627_s14 + $0x10f8] sm:$0xff]  ;;  %v17251_v61 = vcombine.high %v8557_v15, %v8561_v56 }
 0x77f   : > { %14983 = vmatprep.mubr.bf16.mxu0 %v19980_v23  ;;  %15280 = vmatpush1.bf16.msra.mxu1 %v17196_v12  ;;  %v17220_v35 = vcombine.low %v8526_v9, %v8530_v57  ;;  %v8569_v12 = vld [vmem:[%s19627_s14 + $0x1230] sm:$0xff] }
 0x780   : > { %15311 = vmatprep.mubr.bf16.mxu1 %v19980_v23  ;;  %14953 = vmatprep.subr.bf16.mxu0 %v17203_v32  ;;  %v17221_v23 = vcombine.high %v8526_v9, %v8530_v57  ;;  %v8566_v32 = vld [vmem:[%s19627_s14 + $0x1218] sm:$0xff]  ;;  %v17259_v14 = vcombine.high %v8565_v62, %v8569_v12  ;;  %v17258_v4 = vcombine.low %v8565_v62, %v8569_v12 }
 0x781   : > { %15281 = vmatprep.subr.bf16.mxu1 %v17205_v1  ;;  %v17252_v1 = vcombine.low %v8558_v58, %v8562_v16  ;;  %v17261_v19 = vcombine.high %v8566_v32, %v8570_v0  ;;  %v17260_v49 = vcombine.low %v8566_v32, %v8570_v0 }
 0x782   : > { %14954 = vmatpush1.bf16.msra.mxu0 %v17202_v6  ;;  %v8573_v6 = vld [vmem:[%s19627_s14 + $0x1250] sm:$0xff] }
 0x783   : > { %15282 = vmatpush1.bf16.msra.mxu1 %v17204_v46  ;;  %14955 = vmatprep.subr.bf16.mxu0 %v17211_v29  ;;  %v8577_v46 = vld [vmem:[%s19627_s14 + $0x1270] sm:$0xff]  ;;  %v8574_v29 = vld [vmem:[%s19627_s14 + $0x1258] sm:$0xff] }
 0x784   : > { %15283 = vmatprep.subr.bf16.mxu1 %v17213_v44  ;;  %v8578_v44 = vld [vmem:[%s19627_s14 + $0x1278] sm:$0xff]  ;;  %v17267_v9 = vcombine.high %v8573_v6, %v8577_v46  ;;  %v17266_v55 = vcombine.low %v8573_v6, %v8577_v46 }
 0x785   : > { %v17269_v57 = vcombine.high %v8574_v29, %v8578_v44  ;;  %v17268_v20 = vcombine.low %v8574_v29, %v8578_v44 }
 0x786   : > { %14956 = vmatpush1.bf16.msra.mxu0 %v17210_v22  ;;  %v8581_v22 = vld [vmem:[%s19627_s14 + $0x1290] sm:$0xff] }
 0x787   : > { %15284 = vmatpush1.bf16.msra.mxu1 %v17212_v18  ;;  %14957 = vmatprep.subr.bf16.mxu0 %v17219_v17  ;;  %v8585_v18 = vld [vmem:[%s19627_s14 + $0x12b0] sm:$0xff]  ;;  %v8582_v17 = vld [vmem:[%s19627_s14 + $0x1298] sm:$0xff] }
 0x788   : > { %15285 = vmatprep.subr.bf16.mxu1 %v17221_v23  ;;  %v8586_v23 = vld [vmem:[%s19627_s14 + $0x12b8] sm:$0xff]  ;;  %v17275_v63 = vcombine.high %v8581_v22, %v8585_v18  ;;  %v17274_v40 = vcombine.low %v8581_v22, %v8585_v18 }
 0x789   : > { %v17277_v36 = vcombine.high %v8582_v17, %v8586_v23  ;;  %v17276_v42 = vcombine.low %v8582_v17, %v8586_v23 }
 0x78a   : > { %14958 = vmatpush1.bf16.msra.mxu0 %v17218_v59  ;;  %v8589_v59 = vld [vmem:[%s19627_s14 + $0x12d0] sm:$0xff] }
 0x78b   : > { %15286 = vmatpush1.bf16.msra.mxu1 %v17220_v35  ;;  %14959 = vmatprep.subr.bf16.mxu0 %v17227_v38  ;;  %v8593_v35 = vld [vmem:[%s19627_s14 + $0x12f0] sm:$0xff]  ;;  %v8590_v38 = vld [vmem:[%s19627_s14 + $0x12d8] sm:$0xff] }
 0x78c   : > { %15287 = vmatprep.subr.bf16.mxu1 %v17229_v50  ;;  %v8594_v50 = vld [vmem:[%s19627_s14 + $0x12f8] sm:$0xff]  ;;  %v17283_v39 = vcombine.high %v8589_v59, %v8593_v35  ;;  %v17282_v7 = vcombine.low %v8589_v59, %v8593_v35 }
 0x78d   : > { %v17285_v43 = vcombine.high %v8590_v38, %v8594_v50  ;;  %v17284_v47 = vcombine.low %v8590_v38, %v8594_v50  ;;  %v8642_v59 = vld [vmem:[%s19627_s14 + $0x1478] sm:$0xff]  ;;  %v8645_v50 = vld [vmem:[%s19627_s14 + $0x1490] sm:$0xff] }
 0x78e   : > { %14960 = vmatpush1.bf16.msra.mxu0 %v17226_v45  ;;  %v8597_v45 = vld [vmem:[%s19627_s14 + $0x1310] sm:$0xff] }
 0x78f   : > { %15288 = vmatpush1.bf16.msra.mxu1 %v17228_v24  ;;  %14961 = vmatprep.subr.bf16.mxu0 %v17235_v25  ;;  %v8601_v24 = vld [vmem:[%s19627_s14 + $0x1330] sm:$0xff]  ;;  %v8598_v25 = vld [vmem:[%s19627_s14 + $0x1318] sm:$0xff] }
 0x790   : > { %15289 = vmatprep.subr.bf16.mxu1 %v17237_v31  ;;  %v8602_v31 = vld [vmem:[%s19627_s14 + $0x1338] sm:$0xff]  ;;  %v17291_v37 = vcombine.high %v8597_v45, %v8601_v24  ;;  %v17290_v15 = vcombine.low %v8597_v45, %v8601_v24 }
 0x791   : > { %v17293_v30 = vcombine.high %v8598_v25, %v8602_v31  ;;  %v17292_v56 = vcombine.low %v8598_v25, %v8602_v31 }
 0x792   : > { %14962 = vmatpush1.bf16.msra.mxu0 %v17234_v52  ;;  %v8605_v52 = vld [vmem:[%s19627_s14 + $0x1350] sm:$0xff] }
 0x793   : > { %15290 = vmatpush1.bf16.msra.mxu1 %v17236_v13  ;;  %14963 = vmatprep.subr.bf16.mxu0 %v17243_v2  ;;  %v8609_v13 = vld [vmem:[%s19627_s14 + $0x1370] sm:$0xff]  ;;  %v8606_v2 = vld [vmem:[%s19627_s14 + $0x1358] sm:$0xff] }
 0x794   : > { %15291 = vmatprep.subr.bf16.mxu1 %v17245_v28  ;;  %v8610_v28 = vld [vmem:[%s19627_s14 + $0x1378] sm:$0xff]  ;;  %v17299_v58 = vcombine.high %v8605_v52, %v8609_v13  ;;  %v17298_v62 = vcombine.low %v8605_v52, %v8609_v13 }
 0x795   : > { %v17301_v16 = vcombine.high %v8606_v2, %v8610_v28  ;;  %v17300_v12 = vcombine.low %v8606_v2, %v8610_v28  ;;  %v8661_v2 = vld [vmem:[%s19627_s14 + $0x1510] sm:$0xff] }
 0x796   : > { %14964 = vmatpush1.bf16.msra.mxu0 %v17242_v41  ;;  %v8613_v41 = vld [vmem:[%s19627_s14 + $0x1390] sm:$0xff] }
 0x797   : > { %15292 = vmatpush1.bf16.msra.mxu1 %v17244_v60  ;;  %14965 = vmatprep.subr.bf16.mxu0 %v17251_v61  ;;  %v8617_v60 = vld [vmem:[%s19627_s14 + $0x13b0] sm:$0xff]  ;;  %v8614_v61 = vld [vmem:[%s19627_s14 + $0x1398] sm:$0xff] }
 0x798   : > { %15293 = vmatprep.subr.bf16.mxu1 %v17253_v5  ;;  %v8618_v5 = vld [vmem:[%s19627_s14 + $0x13b8] sm:$0xff]  ;;  %v17307_v32 = vcombine.high %v8613_v41, %v8617_v60  ;;  %v17306_v6 = vcombine.low %v8613_v41, %v8617_v60  ;;  %v8665_v28 = vld [vmem:[%s19627_s14 + $0x1530] sm:$0xff] }
 0x799   : > { %v17309_v0 = vcombine.high %v8614_v61, %v8618_v5  ;;  %v17308_v46 = vcombine.low %v8614_v61, %v8618_v5  ;;  %v17355_v41 = vcombine.high %v8661_v2, %v8665_v28  ;;  %v8669_v61 = vld [vmem:[%s19627_s14 + $0x1550] sm:$0xff] }
 0x79a   : > { %14966 = vmatpush1.bf16.msra.mxu0 %v17250_v51  ;;  %v8621_v51 = vld [vmem:[%s19627_s14 + $0x13d0] sm:$0xff] }
 0x79b   : > { %15294 = vmatpush1.bf16.msra.mxu1 %v17252_v1  ;;  %14967 = vmatprep.subr.bf16.mxu0 %v17259_v14  ;;  %v8625_v1 = vld [vmem:[%s19627_s14 + $0x13f0] sm:$0xff]  ;;  %v8622_v14 = vld [vmem:[%s19627_s14 + $0x13d8] sm:$0xff] }
 0x79c   : > { %15295 = vmatprep.subr.bf16.mxu1 %v17261_v19  ;;  %v8626_v19 = vld [vmem:[%s19627_s14 + $0x13f8] sm:$0xff]  ;;  %v17315_v29 = vcombine.high %v8621_v51, %v8625_v1  ;;  %v17314_v22 = vcombine.low %v8621_v51, %v8625_v1  ;;  %v8673_v5 = vld [vmem:[%s19627_s14 + $0x1570] sm:$0xff] }
 0x79d   : > { %v17317_v44 = vcombine.high %v8622_v14, %v8626_v19  ;;  %v17316_v18 = vcombine.low %v8622_v14, %v8626_v19  ;;  %v17363_v51 = vcombine.high %v8669_v61, %v8673_v5  ;;  %v8677_v14 = vld [vmem:[%s19627_s14 + $0x1590] sm:$0xff] }
 0x79e   : > { %14968 = vmatpush1.bf16.msra.mxu0 %v17258_v4  ;;  %v8629_v4 = vld [vmem:[%s19627_s14 + $0x1410] sm:$0xff] }
 0x79f   : > { %15296 = vmatpush1.bf16.msra.mxu1 %v17260_v49  ;;  %14969 = vmatprep.subr.bf16.mxu0 %v17267_v9  ;;  %v8633_v49 = vld [vmem:[%s19627_s14 + $0x1430] sm:$0xff]  ;;  %v8630_v9 = vld [vmem:[%s19627_s14 + $0x1418] sm:$0xff] }
 0x7a0   : > { %15297 = vmatprep.subr.bf16.mxu1 %v17269_v57  ;;  %v8634_v57 = vld [vmem:[%s19627_s14 + $0x1438] sm:$0xff]  ;;  %v17323_v17 = vcombine.high %v8629_v4, %v8633_v49  ;;  %v8681_v19 = vld [vmem:[%s19627_s14 + $0x15b0] sm:$0xff] }
 0x7a1   : > { %v17325_v23 = vcombine.high %v8630_v9, %v8634_v57  ;;  %v17324_v35 = vcombine.low %v8630_v9, %v8634_v57  ;;  %v8685_v9 = vld [vmem:[%s19627_s14 + $0x15d0] sm:$0xff] }
 0x7a2   : > { %14970 = vmatpush1.bf16.msra.mxu0 %v17266_v55  ;;  %v8637_v55 = vld [vmem:[%s19627_s14 + $0x1450] sm:$0xff] }
 0x7a3   : > { %15298 = vmatpush1.bf16.msra.mxu1 %v17268_v20  ;;  %14971 = vmatprep.subr.bf16.mxu0 %v17275_v63  ;;  %v8641_v20 = vld [vmem:[%s19627_s14 + $0x1470] sm:$0xff]  ;;  %v17322_v63 = vcombine.low %v8629_v4, %v8633_v49  ;;  %v17371_v4 = vcombine.high %v8677_v14, %v8681_v19 }
 0x7a4   : > { %15299 = vmatprep.subr.bf16.mxu1 %v17277_v36  ;;  %v8638_v36 = vld [vmem:[%s19627_s14 + $0x1458] sm:$0xff]  ;;  %v17331_v38 = vcombine.high %v8637_v55, %v8641_v20  ;;  %v17330_v45 = vcombine.low %v8637_v55, %v8641_v20  ;;  %v8689_v57 = vld [vmem:[%s19627_s14 + $0x15f0] sm:$0xff] }
 0x7a5   : > { %v17332_v24 = vcombine.low %v8638_v36, %v8642_v59  ;;  %v17379_v55 = vcombine.high %v8685_v9, %v8689_v57 }
 0x7a6   : > { %14972 = vmatpush1.bf16.msra.mxu0 %v17274_v40  ;;  %v8649_v40 = vld [vmem:[%s19627_s14 + $0x14b0] sm:$0xff] }
 0x7a7   : > { %15300 = vmatpush1.bf16.msra.mxu1 %v17276_v42  ;;  %14973 = vmatprep.subr.bf16.mxu0 %v17283_v39  ;;  %v17333_v42 = vcombine.high %v8638_v36, %v8642_v59  ;;  %v8646_v39 = vld [vmem:[%s19627_s14 + $0x1498] sm:$0xff]  ;;  %v17339_v25 = vcombine.high %v8645_v50, %v8649_v40  ;;  %v8697_v36 = vld [vmem:[%s19627_s14 + $0x1630] sm:$0xff] }
 0x7a8   : > { %15301 = vmatprep.subr.bf16.mxu1 %v17285_v43  ;;  %v8650_v43 = vld [vmem:[%s19627_s14 + $0x14b8] sm:$0xff] }
 0x7a9   : > { %v17341_v31 = vcombine.high %v8646_v39, %v8650_v43  ;;  %v17340_v52 = vcombine.low %v8646_v39, %v8650_v43  ;;  %v8694_v59 = vld [vmem:[%s19627_s14 + $0x1618] sm:$0xff]  ;;  %v8701_v39 = vld [vmem:[%s19627_s14 + $0x1650] sm:$0xff] }
 0x7aa   : > { %14974 = vmatpush1.bf16.msra.mxu0 %v17282_v7  ;;  %v8653_v7 = vld [vmem:[%s19627_s14 + $0x14d0] sm:$0xff] }
 0x7ab   : > { %15302 = vmatpush1.bf16.msra.mxu1 %v17284_v47  ;;  %14975 = vmatprep.subr.bf16.mxu0 %v17291_v37  ;;  %v8657_v47 = vld [vmem:[%s19627_s14 + $0x14f0] sm:$0xff]  ;;  %v8654_v37 = vld [vmem:[%s19627_s14 + $0x14d8] sm:$0xff] }
 0x7ac   : > { %15303 = vmatprep.subr.bf16.mxu1 %v17293_v30  ;;  %v17338_v30 = vcombine.low %v8645_v50, %v8649_v40  ;;  %v17347_v13 = vcombine.high %v8653_v7, %v8657_v47  ;;  %v8705_v43 = vld [vmem:[%s19627_s14 + $0x1670] sm:$0xff] }
 0x7ae   : > { %14976 = vmatpush1.bf16.msra.mxu0 %v17290_v15  ;;  %v8662_v15 = vld [vmem:[%s19627_s14 + $0x1518] sm:$0xff] }
 0x7af   : > { %15304 = vmatpush1.bf16.msra.mxu1 %v17292_v56  ;;  %14977 = vmatprep.subr.bf16.mxu0 %v17299_v58  ;;  %v8666_v56 = vld [vmem:[%s19627_s14 + $0x1538] sm:$0xff]  ;;  %v17346_v58 = vcombine.low %v8653_v7, %v8657_v47  ;;  %v17395_v7 = vcombine.high %v8701_v39, %v8705_v43 }
 0x7b0   : > { %15305 = vmatprep.subr.bf16.mxu1 %v17301_v16  ;;  %v17357_v60 = vcombine.high %v8662_v15, %v8666_v56 }
 0x7b2   : > { %14978 = vmatpush1.bf16.msra.mxu0 %v17298_v62  ;;  %v8670_v62 = vld [vmem:[%s19627_s14 + $0x1558] sm:$0xff] }
 0x7b3   : > { %15306 = vmatpush1.bf16.msra.mxu1 %v17300_v12  ;;  %14979 = vmatprep.subr.bf16.mxu0 %v17307_v32  ;;  %v8674_v12 = vld [vmem:[%s19627_s14 + $0x1578] sm:$0xff]  ;;  %v17354_v32 = vcombine.low %v8661_v2, %v8665_v28 }
 0x7b4   : > { %15307 = vmatprep.subr.bf16.mxu1 %v17309_v0  ;;  %v17356_v0 = vcombine.low %v8662_v15, %v8666_v56  ;;  %v17365_v1 = vcombine.high %v8670_v62, %v8674_v12  ;;  %v8717_v15 = vld [vmem:[%s19627_s14 + $0x16d0] sm:$0xff] }
 0x7b5   : > { %v8721_v56 = vld [vmem:[%s19627_s14 + $0x16f0] sm:$0xff] }
 0x7b6   : > { %14980 = vmatpush1.bf16.msra.mxu0 %v17306_v6  ;;  %v8678_v6 = vld [vmem:[%s19627_s14 + $0x1598] sm:$0xff] }
 0x7b7   : > { %15308 = vmatpush1.bf16.msra.mxu1 %v17308_v46  ;;  %14981 = vmatprep.subr.bf16.mxu0 %v17315_v29  ;;  %v8682_v46 = vld [vmem:[%s19627_s14 + $0x15b8] sm:$0xff]  ;;  %v17362_v29 = vcombine.low %v8669_v61, %v8673_v5  ;;  %v17411_v61 = vcombine.high %v8717_v15, %v8721_v56 }
 0x7b8   : > { %15309 = vmatprep.subr.bf16.mxu1 %v17317_v44  ;;  %v17364_v44 = vcombine.low %v8670_v62, %v8674_v12  ;;  %v17373_v49 = vcombine.high %v8678_v6, %v8682_v46  ;;  %v8725_v62 = vld [vmem:[%s19627_s14 + $0x1710] sm:$0xff] }
 0x7b9   : > { %v8729_v12 = vld [vmem:[%s19627_s14 + $0x1730] sm:$0xff] }
 0x7ba   : > { %14982 = vmatpush1.bf16.msra.mxu0 %v17314_v22  ;;  %v8686_v22 = vld [vmem:[%s19627_s14 + $0x15d8] sm:$0xff] }
 0x7bb   : > { %15310 = vmatpush1.bf16.msra.mxu1 %v17316_v18  ;;  %14992 = vmatprep.subr.bf16.mxu0 %v17323_v17  ;;  %v8690_v18 = vld [vmem:[%s19627_s14 + $0x15f8] sm:$0xff]  ;;  %v17370_v17 = vcombine.low %v8677_v14, %v8681_v19  ;;  %v17419_v14 = vcombine.high %v8725_v62, %v8729_v12 }
 0x7bc   : > { %15320 = vmatprep.subr.bf16.mxu1 %v17325_v23  ;;  %v17372_v23 = vcombine.low %v8678_v6, %v8682_v46  ;;  %v17381_v20 = vcombine.high %v8686_v22, %v8690_v18  ;;  %v17380_v50 = vcombine.low %v8686_v22, %v8690_v18  ;;  %v8733_v6 = vld [vmem:[%s19627_s14 + $0x1750] sm:$0xff] }
 0x7bd   : > { %14984 = vmatmul.mubr.bf16.vlgmr.msra.gmra.mrb[20].mxu0 %v20056_v27  ;;  %v8737_v46 = vld [vmem:[%s19627_s14 + $0x1770] sm:$0xff] }
 0x7be   : > { %15312 = vmatmul.mubr.bf16.vlgmr.msra.gmra.mrb[20].mxu1 %v20056_v27  ;;  %14993 = vmatpush1.bf16.msra.mxu0 %v17322_v63  ;;  %v8658_v27 = vld [vmem:[%s19627_s14 + $0x14f8] sm:$0xff]  ;;  %v8693_v63 = vld [vmem:[%s19627_s14 + $0x1610] sm:$0xff] }
 0x7bf   : > { %15024 = vmatprep.mubr.bf16.mxu0 %v20060_v26  ;;  %15321 = vmatpush1.bf16.msra.mxu1 %v17324_v35  ;;  %v17348_v16 = vcombine.low %v8654_v37, %v8658_v27  ;;  %v8698_v35 = vld [vmem:[%s19627_s14 + $0x1638] sm:$0xff]  ;;  %v17387_v40 = vcombine.high %v8693_v63, %v8697_v36  ;;  %v8741_v22 = vld [vmem:[%s19627_s14 + $0x1790] sm:$0xff] }
 0x7c0   : > { %15352 = vmatprep.mubr.bf16.mxu1 %v20060_v26  ;;  %14994 = vmatprep.subr.bf16.mxu0 %v17331_v38  ;;  %v17349_v26 = vcombine.high %v8654_v37, %v8658_v27  ;;  %v17378_v38 = vcombine.low %v8685_v9, %v8689_v57  ;;  %v8709_v37 = vld [vmem:[%s19627_s14 + $0x1690] sm:$0xff]  ;;  %v17427_v9 = vcombine.high %v8733_v6, %v8737_v46 }
 0x7c1   : > { %15322 = vmatprep.subr.bf16.mxu1 %v17333_v42  ;;  %v17389_v42 = vcombine.high %v8694_v59, %v8698_v35  ;;  %v8713_v27 = vld [vmem:[%s19627_s14 + $0x16b0] sm:$0xff] }
 0x7c2   : > { %14995 = vmatpush1.bf16.msra.mxu0 %v17330_v45  ;;  %v8702_v45 = vld [vmem:[%s19627_s14 + $0x1658] sm:$0xff]  ;;  %v17403_v2 = vcombine.high %v8709_v37, %v8713_v27  ;;  %v8745_v18 = vld [vmem:[%s19627_s14 + $0x17b0] sm:$0xff] }
 0x7c3   : > { %15323 = vmatpush1.bf16.msra.mxu1 %v17332_v24  ;;  %14996 = vmatprep.subr.bf16.mxu0 %v17339_v25  ;;  %v8706_v24 = vld [vmem:[%s19627_s14 + $0x1678] sm:$0xff]  ;;  %v17386_v25 = vcombine.low %v8693_v63, %v8697_v36  ;;  %v17435_v63 = vcombine.high %v8741_v22, %v8745_v18 }
 0x7c4   : > { %15324 = vmatprep.subr.bf16.mxu1 %v17341_v31  ;;  %v17388_v31 = vcombine.low %v8694_v59, %v8698_v35  ;;  %v17397_v47 = vcombine.high %v8702_v45, %v8706_v24  ;;  %v8749_v59 = vld [vmem:[%s19627_s14 + $0x17d0] sm:$0xff] }
 0x7c5   : > { %v8753_v35 = vld [vmem:[%s19627_s14 + $0x17f0] sm:$0xff] }
 0x7c6   : > { %14997 = vmatpush1.bf16.msra.mxu0 %v17338_v30  ;;  %v8710_v30 = vld [vmem:[%s19627_s14 + $0x1698] sm:$0xff] }
 0x7c7   : > { %15325 = vmatpush1.bf16.msra.mxu1 %v17340_v52  ;;  %14998 = vmatprep.subr.bf16.mxu0 %v17347_v13  ;;  %v8714_v52 = vld [vmem:[%s19627_s14 + $0x16b8] sm:$0xff]  ;;  %v17394_v13 = vcombine.low %v8701_v39, %v8705_v43  ;;  %v17443_v39 = vcombine.high %v8749_v59, %v8753_v35 }
 0x7c8   : > { %15326 = vmatprep.subr.bf16.mxu1 %v17349_v26  ;;  %v17396_v26 = vcombine.low %v8702_v45, %v8706_v24  ;;  %v17405_v28 = vcombine.high %v8710_v30, %v8714_v52  ;;  %v8757_v45 = vld [vmem:[%s19627_s14 + $0x1810] sm:$0xff] }
 0x7c9   : > { %v8761_v24 = vld [vmem:[%s19627_s14 + $0x1830] sm:$0xff] }
 0x7ca   : > { %14999 = vmatpush1.bf16.msra.mxu0 %v17346_v58  ;;  %v8718_v58 = vld [vmem:[%s19627_s14 + $0x16d8] sm:$0xff] }
 0x7cb   : > { %15327 = vmatpush1.bf16.msra.mxu1 %v17348_v16  ;;  %15000 = vmatprep.subr.bf16.mxu0 %v17355_v41  ;;  %v8722_v16 = vld [vmem:[%s19627_s14 + $0x16f8] sm:$0xff]  ;;  %v17402_v41 = vcombine.low %v8709_v37, %v8713_v27  ;;  %v17451_v37 = vcombine.high %v8757_v45, %v8761_v24 }
 0x7cc   : > { %15328 = vmatprep.subr.bf16.mxu1 %v17357_v60  ;;  %v17404_v60 = vcombine.low %v8710_v30, %v8714_v52  ;;  %v17413_v5 = vcombine.high %v8718_v58, %v8722_v16  ;;  %v8765_v30 = vld [vmem:[%s19627_s14 + $0x1850] sm:$0xff] }
 0x7cd   : > { %v8769_v52 = vld [vmem:[%s19627_s14 + $0x1870] sm:$0xff] }
 0x7ce   : > { %15001 = vmatpush1.bf16.msra.mxu0 %v17354_v32  ;;  %v8726_v32 = vld [vmem:[%s19627_s14 + $0x1718] sm:$0xff] }
 0x7cf   : > { %15329 = vmatpush1.bf16.msra.mxu1 %v17356_v0  ;;  %15002 = vmatprep.subr.bf16.mxu0 %v17363_v51  ;;  %v8730_v0 = vld [vmem:[%s19627_s14 + $0x1738] sm:$0xff]  ;;  %v17410_v51 = vcombine.low %v8717_v15, %v8721_v56  ;;  %v17459_v15 = vcombine.high %v8765_v30, %v8769_v52  ;;  %v8773_v56 = vld [vmem:[%s19627_s14 + $0x1890] sm:$0xff] }
 0x7d0   : > { %15330 = vmatprep.subr.bf16.mxu1 %v17365_v1  ;;  %v17412_v1 = vcombine.low %v8718_v58, %v8722_v16  ;;  %v17421_v19 = vcombine.high %v8726_v32, %v8730_v0  ;;  %v8777_v58 = vld [vmem:[%s19627_s14 + $0x18b0] sm:$0xff] }
 0x7d2   : > { %15003 = vmatpush1.bf16.msra.mxu0 %v17362_v29  ;;  %v8734_v29 = vld [vmem:[%s19627_s14 + $0x1758] sm:$0xff] }
 0x7d3   : > { %15331 = vmatpush1.bf16.msra.mxu1 %v17364_v44  ;;  %15004 = vmatprep.subr.bf16.mxu0 %v17371_v4  ;;  %v8738_v44 = vld [vmem:[%s19627_s14 + $0x1778] sm:$0xff]  ;;  %v17418_v4 = vcombine.low %v8725_v62, %v8729_v12  ;;  %v17467_v62 = vcombine.high %v8773_v56, %v8777_v58 }
 0x7d4   : > { %15332 = vmatprep.subr.bf16.mxu1 %v17373_v49  ;;  %v17420_v49 = vcombine.low %v8726_v32, %v8730_v0  ;;  %v17429_v57 = vcombine.high %v8734_v29, %v8738_v44  ;;  %v8781_v32 = vld [vmem:[%s19627_s14 + $0x18d0] sm:$0xff] }
 0x7d5   : > { %v8785_v0 = vld [vmem:[%s19627_s14 + $0x18f0] sm:$0xff] }
 0x7d6   : > { %15005 = vmatpush1.bf16.msra.mxu0 %v17370_v17  ;;  %v8742_v17 = vld [vmem:[%s19627_s14 + $0x1798] sm:$0xff] }
 0x7d7   : > { %15333 = vmatpush1.bf16.msra.mxu1 %v17372_v23  ;;  %15006 = vmatprep.subr.bf16.mxu0 %v17379_v55  ;;  %v8746_v23 = vld [vmem:[%s19627_s14 + $0x17b8] sm:$0xff]  ;;  %v17426_v55 = vcombine.low %v8733_v6, %v8737_v46  ;;  %v8789_v6 = vld [vmem:[%s19627_s14 + $0x1910] sm:$0xff] }
 0x7d8   : > { %15334 = vmatprep.subr.bf16.mxu1 %v17381_v20  ;;  %v17428_v20 = vcombine.low %v8734_v29, %v8738_v44  ;;  %v17437_v36 = vcombine.high %v8742_v17, %v8746_v23  ;;  %v8793_v46 = vld [vmem:[%s19627_s14 + $0x1930] sm:$0xff]  ;;  %v8790_v29 = vld [vmem:[%s19627_s14 + $0x1918] sm:$0xff] }
 0x7d9   : > { %v8794_v44 = vld [vmem:[%s19627_s14 + $0x1938] sm:$0xff] }
 0x7da   : > { %15007 = vmatpush1.bf16.msra.mxu0 %v17378_v38  ;;  %v8750_v38 = vld [vmem:[%s19627_s14 + $0x17d8] sm:$0xff] }
 0x7db   : > { %15335 = vmatpush1.bf16.msra.mxu1 %v17380_v50  ;;  %15008 = vmatprep.subr.bf16.mxu0 %v17387_v40  ;;  %v8754_v50 = vld [vmem:[%s19627_s14 + $0x17f8] sm:$0xff]  ;;  %v17434_v40 = vcombine.low %v8741_v22, %v8745_v18  ;;  %v8797_v22 = vld [vmem:[%s19627_s14 + $0x1950] sm:$0xff] }
 0x7dc   : > { %15336 = vmatprep.subr.bf16.mxu1 %v17389_v42  ;;  %v17436_v42 = vcombine.low %v8742_v17, %v8746_v23  ;;  %v17445_v43 = vcombine.high %v8750_v38, %v8754_v50  ;;  %v8801_v18 = vld [vmem:[%s19627_s14 + $0x1970] sm:$0xff]  ;;  %v8798_v17 = vld [vmem:[%s19627_s14 + $0x1958] sm:$0xff] }
 0x7dd   : > { %v8802_v23 = vld [vmem:[%s19627_s14 + $0x1978] sm:$0xff] }
 0x7de   : > { %15009 = vmatpush1.bf16.msra.mxu0 %v17386_v25  ;;  %v8758_v25 = vld [vmem:[%s19627_s14 + $0x1818] sm:$0xff] }
 0x7df   : > { %15337 = vmatpush1.bf16.msra.mxu1 %v17388_v31  ;;  %15010 = vmatprep.subr.bf16.mxu0 %v17395_v7  ;;  %v8762_v31 = vld [vmem:[%s19627_s14 + $0x1838] sm:$0xff]  ;;  %v17442_v7 = vcombine.low %v8749_v59, %v8753_v35  ;;  %v8805_v59 = vld [vmem:[%s19627_s14 + $0x1990] sm:$0xff] }
 0x7e0   : > { %15338 = vmatprep.subr.bf16.mxu1 %v17397_v47  ;;  %v17444_v47 = vcombine.low %v8750_v38, %v8754_v50  ;;  %v17453_v27 = vcombine.high %v8758_v25, %v8762_v31  ;;  %v8809_v35 = vld [vmem:[%s19627_s14 + $0x19b0] sm:$0xff]  ;;  %v8806_v38 = vld [vmem:[%s19627_s14 + $0x1998] sm:$0xff] }
 0x7e1   : > { %v8810_v50 = vld [vmem:[%s19627_s14 + $0x19b8] sm:$0xff] }
 0x7e2   : > { %15011 = vmatpush1.bf16.msra.mxu0 %v17394_v13  ;;  %v17450_v13 = vcombine.low %v8757_v45, %v8761_v24  ;;  %v8813_v45 = vld [vmem:[%s19627_s14 + $0x19d0] sm:$0xff] }
 0x7e3   : > { %15339 = vmatpush1.bf16.msra.mxu1 %v17396_v26  ;;  %15012 = vmatprep.subr.bf16.mxu0 %v17403_v2  ;;  %v8766_v26 = vld [vmem:[%s19627_s14 + $0x1858] sm:$0xff]  ;;  %v8817_v24 = vld [vmem:[%s19627_s14 + $0x19f0] sm:$0xff] }
 0x7e4   : > { %15340 = vmatprep.subr.bf16.mxu1 %v17405_v28  ;;  %v8770_v2 = vld [vmem:[%s19627_s14 + $0x1878] sm:$0xff]  ;;  %v17452_v28 = vcombine.low %v8758_v25, %v8762_v31 }
 0x7e5   : > { %v17461_v16 = vcombine.high %v8766_v26, %v8770_v2  ;;  %v8814_v25 = vld [vmem:[%s19627_s14 + $0x19d8] sm:$0xff] }
 0x7e6   : > { %15013 = vmatpush1.bf16.msra.mxu0 %v17402_v41  ;;  %v8774_v41 = vld [vmem:[%s19627_s14 + $0x1898] sm:$0xff] }
 0x7e7   : > { %15341 = vmatpush1.bf16.msra.mxu1 %v17404_v60  ;;  %15014 = vmatprep.subr.bf16.mxu0 %v17411_v61  ;;  %v8778_v60 = vld [vmem:[%s19627_s14 + $0x18b8] sm:$0xff]  ;;  %v17458_v61 = vcombine.low %v8765_v30, %v8769_v52  ;;  %v8821_v30 = vld [vmem:[%s19627_s14 + $0x1a10] sm:$0xff] }
 0x7e8   : > { %15342 = vmatprep.subr.bf16.mxu1 %v17413_v5  ;;  %v17460_v5 = vcombine.low %v8766_v26, %v8770_v2  ;;  %v17469_v12 = vcombine.high %v8774_v41, %v8778_v60  ;;  %v8818_v31 = vld [vmem:[%s19627_s14 + $0x19f8] sm:$0xff]  ;;  %v8825_v52 = vld [vmem:[%s19627_s14 + $0x1a30] sm:$0xff]  ;;  %v17506_v2 = vcombine.low %v8813_v45, %v8817_v24 }
 0x7e9   : > { %v8826_v26 = vld [vmem:[%s19627_s14 + $0x1a38] sm:$0xff] }
 0x7ea   : > { %15015 = vmatpush1.bf16.msra.mxu0 %v17410_v51  ;;  %v8782_v51 = vld [vmem:[%s19627_s14 + $0x18d8] sm:$0xff] }
 0x7eb   : > { %15343 = vmatpush1.bf16.msra.mxu1 %v17412_v1  ;;  %15016 = vmatprep.subr.bf16.mxu0 %v17419_v14  ;;  %v17466_v1 = vcombine.low %v8773_v56, %v8777_v58  ;;  %v17468_v14 = vcombine.low %v8774_v41, %v8778_v60  ;;  %v8829_v58 = vld [vmem:[%s19627_s14 + $0x1a50] sm:$0xff]  ;;  %v8830_v41 = vld [vmem:[%s19627_s14 + $0x1a58] sm:$0xff] }
 0x7ec   : > { %15344 = vmatprep.subr.bf16.mxu1 %v17421_v19  ;;  %v17475_v19 = vcombine.high %v8781_v32, %v8785_v0  ;;  %v8834_v60 = vld [vmem:[%s19627_s14 + $0x1a78] sm:$0xff] }
 0x7ee   : > { %15017 = vmatpush1.bf16.msra.mxu0 %v17418_v4  ;;  %v17474_v4 = vcombine.low %v8781_v32, %v8785_v0  ;;  %v8837_v32 = vld [vmem:[%s19627_s14 + $0x1a90] sm:$0xff] }
 0x7ef   : > { %15345 = vmatpush1.bf16.msra.mxu1 %v17420_v49  ;;  %15018 = vmatprep.subr.bf16.mxu0 %v17427_v9  ;;  %v17483_v9 = vcombine.high %v8789_v6, %v8793_v46  ;;  %v8841_v0 = vld [vmem:[%s19627_s14 + $0x1ab0] sm:$0xff] }
 0x7f0   : > { %15346 = vmatprep.subr.bf16.mxu1 %v17429_v57  ;;  %v17485_v57 = vcombine.high %v8790_v29, %v8794_v44 }
 0x7f2   : > { %15019 = vmatpush1.bf16.msra.mxu0 %v17426_v55  ;;  %v17482_v55 = vcombine.low %v8789_v6, %v8793_v46  ;;  %v8845_v6 = vld [vmem:[%s19627_s14 + $0x1ad0] sm:$0xff] }
 0x7f3   : > { %15347 = vmatpush1.bf16.msra.mxu1 %v17428_v20  ;;  %15020 = vmatprep.subr.bf16.mxu0 %v17435_v63  ;;  %v17484_v20 = vcombine.low %v8790_v29, %v8794_v44  ;;  %v17491_v63 = vcombine.high %v8797_v22, %v8801_v18  ;;  %v8849_v46 = vld [vmem:[%s19627_s14 + $0x1af0] sm:$0xff]  ;;  %v8846_v29 = vld [vmem:[%s19627_s14 + $0x1ad8] sm:$0xff] }
 0x7f4   : > { %15348 = vmatprep.subr.bf16.mxu1 %v17437_v36  ;;  %v17493_v36 = vcombine.high %v8798_v17, %v8802_v23  ;;  %v8850_v44 = vld [vmem:[%s19627_s14 + $0x1af8] sm:$0xff] }
 0x7f6   : > { %15021 = vmatpush1.bf16.msra.mxu0 %v17434_v40  ;;  %v17490_v40 = vcombine.low %v8797_v22, %v8801_v18  ;;  %v8853_v22 = vld [vmem:[%s19627_s14 + $0x1b10] sm:$0xff] }
 0x7f7   : > { %15349 = vmatpush1.bf16.msra.mxu1 %v17436_v42  ;;  %15022 = vmatprep.subr.bf16.mxu0 %v17443_v39  ;;  %v17492_v42 = vcombine.low %v8798_v17, %v8802_v23  ;;  %v17499_v39 = vcombine.high %v8805_v59, %v8809_v35  ;;  %v8857_v18 = vld [vmem:[%s19627_s14 + $0x1b30] sm:$0xff]  ;;  %v8854_v17 = vld [vmem:[%s19627_s14 + $0x1b18] sm:$0xff] }
 0x7f8   : > { %15350 = vmatprep.subr.bf16.mxu1 %v17445_v43  ;;  %v17501_v43 = vcombine.high %v8806_v38, %v8810_v50  ;;  %v8858_v23 = vld [vmem:[%s19627_s14 + $0x1b38] sm:$0xff] }
 0x7fa   : > { %15023 = vmatpush1.bf16.msra.mxu0 %v17442_v7  ;;  %v17498_v7 = vcombine.low %v8805_v59, %v8809_v35  ;;  %v8861_v59 = vld [vmem:[%s19627_s14 + $0x1b50] sm:$0xff] }
 0x7fb   : > { %15351 = vmatpush1.bf16.msra.mxu1 %v17444_v47  ;;  %15033 = vmatprep.subr.bf16.mxu0 %v17451_v37  ;;  %v17500_v47 = vcombine.low %v8806_v38, %v8810_v50  ;;  %v17507_v37 = vcombine.high %v8813_v45, %v8817_v24  ;;  %v8865_v35 = vld [vmem:[%s19627_s14 + $0x1b70] sm:$0xff]  ;;  %v8862_v38 = vld [vmem:[%s19627_s14 + $0x1b58] sm:$0xff] }
 0x7fc   : > { %15361 = vmatprep.subr.bf16.mxu1 %v17453_v27  ;;  %v17509_v27 = vcombine.high %v8814_v25, %v8818_v31  ;;  %v8866_v50 = vld [vmem:[%s19627_s14 + $0x1b78] sm:$0xff]  ;;  %v8869_v45 = vld [vmem:[%s19627_s14 + $0x1b90] sm:$0xff] }
 0x7fd   : > { %15025 = vmatmul.mubr.bf16.vlgmr.msra.gmra.mrb[20].mxu0 %v20136_v10  ;;  %v8873_v24 = vld [vmem:[%s19627_s14 + $0x1bb0] sm:$0xff] }
 0x7fe   : > { %15353 = vmatmul.mubr.bf16.vlgmr.msra.gmra.mrb[20].mxu1 %v20136_v10  ;;  %15034 = vmatpush1.bf16.msra.mxu0 %v17450_v13  ;;  %v8786_v10 = vld [vmem:[%s19627_s14 + $0x18f8] sm:$0xff] }
 0x7ff   : > { %15065 = vmatprep.mubr.bf16.mxu0 %v20140_v54  ;;  %15362 = vmatpush1.bf16.msra.mxu1 %v17452_v28  ;;  %v17476_v49 = vcombine.low %v8782_v51, %v8786_v10  ;;  %v8822_v13 = vld [vmem:[%s19627_s14 + $0x1a18] sm:$0xff]  ;;  %v17508_v28 = vcombine.low %v8814_v25, %v8818_v31 }
 0x800   : > { %15393 = vmatprep.mubr.bf16.mxu1 %v20140_v54  ;;  %15035 = vmatprep.subr.bf16.mxu0 %v17459_v15  ;;  %v17477_v54 = vcombine.high %v8782_v51, %v8786_v10  ;;  %v17515_v15 = vcombine.high %v8821_v30, %v8825_v52  ;;  %v17517_v56 = vcombine.high %v8822_v13, %v8826_v26  ;;  %v8838_v51 = vld [vmem:[%s19627_s14 + $0x1a98] sm:$0xff] }
 0x801   : > { %15363 = vmatprep.subr.bf16.mxu1 %v17461_v16  ;;  %v8833_v16 = vld [vmem:[%s19627_s14 + $0x1a70] sm:$0xff]  ;;  %v8842_v10 = vld [vmem:[%s19627_s14 + $0x1ab8] sm:$0xff] }
 0x802   : > { %15036 = vmatpush1.bf16.msra.mxu0 %v17458_v61  ;;  %v17514_v61 = vcombine.low %v8821_v30, %v8825_v52  ;;  %v8870_v25 = vld [vmem:[%s19627_s14 + $0x1b98] sm:$0xff]  ;;  %v8877_v30 = vld [vmem:[%s19627_s14 + $0x1bd0] sm:$0xff] }
 0x803   : > { %15364 = vmatpush1.bf16.msra.mxu1 %v17460_v5  ;;  %15037 = vmatprep.subr.bf16.mxu0 %v17467_v62  ;;  %v17516_v5 = vcombine.low %v8822_v13, %v8826_v26  ;;  %v17523_v62 = vcombine.high %v8829_v58, %v8833_v16  ;;  %v8874_v31 = vld [vmem:[%s19627_s14 + $0x1bb8] sm:$0xff]  ;;  %v8881_v52 = vld [vmem:[%s19627_s14 + $0x1bf0] sm:$0xff] }
 0x804   : > { %15365 = vmatprep.subr.bf16.mxu1 %v17469_v12  ;;  %v17525_v12 = vcombine.high %v8830_v41, %v8834_v60  ;;  %v8878_v13 = vld [vmem:[%s19627_s14 + $0x1bd8] sm:$0xff] }
 0x805   : > { %v8882_v26 = vld [vmem:[%s19627_s14 + $0x1bf8] sm:$0xff] }
 0x806   : > { %15038 = vmatpush1.bf16.msra.mxu0 %v17466_v1  ;;  %v17522_v1 = vcombine.low %v8829_v58, %v8833_v16  ;;  %v8885_v58 = vld [vmem:[%s19627_s14 + $0x1c10] sm:$0xff] }
 0x807   : > { %15366 = vmatpush1.bf16.msra.mxu1 %v17468_v14  ;;  %15039 = vmatprep.subr.bf16.mxu0 %v17475_v19  ;;  %v17524_v14 = vcombine.low %v8830_v41, %v8834_v60  ;;  %v17531_v19 = vcombine.high %v8837_v32, %v8841_v0  ;;  %v8889_v16 = vld [vmem:[%s19627_s14 + $0x1c30] sm:$0xff]  ;;  %v8886_v41 = vld [vmem:[%s19627_s14 + $0x1c18] sm:$0xff] }
 0x808   : > { %15367 = vmatprep.subr.bf16.mxu1 %v17477_v54  ;;  %v17533_v54 = vcombine.high %v8838_v51, %v8842_v10  ;;  %v8890_v60 = vld [vmem:[%s19627_s14 + $0x1c38] sm:$0xff] }
 0x80a   : > { %15040 = vmatpush1.bf16.msra.mxu0 %v17474_v4  ;;  %v17530_v4 = vcombine.low %v8837_v32, %v8841_v0  ;;  %v8893_v32 = vld [vmem:[%s19627_s14 + $0x1c50] sm:$0xff] }
 0x80b   : > { %15368 = vmatpush1.bf16.msra.mxu1 %v17476_v49  ;;  %15041 = vmatprep.subr.bf16.mxu0 %v17483_v9  ;;  %v17532_v49 = vcombine.low %v8838_v51, %v8842_v10  ;;  %v17539_v9 = vcombine.high %v8845_v6, %v8849_v46  ;;  %v8897_v0 = vld [vmem:[%s19627_s14 + $0x1c70] sm:$0xff]  ;;  %v17578_v51 = vcombine.low %v8885_v58, %v8889_v16  ;;  %v8894_v10 = vld [vmem:[%s19627_s14 + $0x1c58] sm:$0xff] }
 0x80c   : > { %15369 = vmatprep.subr.bf16.mxu1 %v17485_v57  ;;  %v17541_v57 = vcombine.high %v8846_v29, %v8850_v44 }
 0x80e   : > { %15042 = vmatpush1.bf16.msra.mxu0 %v17482_v55  ;;  %v17538_v55 = vcombine.low %v8845_v6, %v8849_v46  ;;  %v8905_v6 = vld [vmem:[%s19627_s14 + $0x1cb0] sm:$0xff] }
 0x80f   : > { %15370 = vmatpush1.bf16.msra.mxu1 %v17484_v20  ;;  %15043 = vmatprep.subr.bf16.mxu0 %v17491_v63  ;;  %v17540_v20 = vcombine.low %v8846_v29, %v8850_v44  ;;  %v17547_v63 = vcombine.high %v8853_v22, %v8857_v18  ;;  %v8902_v29 = vld [vmem:[%s19627_s14 + $0x1c98] sm:$0xff] }
 0x810   : > { %15371 = vmatprep.subr.bf16.mxu1 %v17493_v36  ;;  %v17549_v36 = vcombine.high %v8854_v17, %v8858_v23  ;;  %v8906_v44 = vld [vmem:[%s19627_s14 + $0x1cb8] sm:$0xff] }
 0x812   : > { %15044 = vmatpush1.bf16.msra.mxu0 %v17490_v40  ;;  %v17546_v40 = vcombine.low %v8853_v22, %v8857_v18  ;;  %v8909_v22 = vld [vmem:[%s19627_s14 + $0x1cd0] sm:$0xff] }
 0x813   : > { %15372 = vmatpush1.bf16.msra.mxu1 %v17492_v42  ;;  %15045 = vmatprep.subr.bf16.mxu0 %v17499_v39  ;;  %v17548_v42 = vcombine.low %v8854_v17, %v8858_v23  ;;  %v17555_v39 = vcombine.high %v8861_v59, %v8865_v35  ;;  %v8913_v18 = vld [vmem:[%s19627_s14 + $0x1cf0] sm:$0xff]  ;;  %v8910_v17 = vld [vmem:[%s19627_s14 + $0x1cd8] sm:$0xff] }
 0x814   : > { %15373 = vmatprep.subr.bf16.mxu1 %v17501_v43  ;;  %v17557_v43 = vcombine.high %v8862_v38, %v8866_v50 }
 0x816   : > { %15046 = vmatpush1.bf16.msra.mxu0 %v17498_v7  ;;  %v17554_v7 = vcombine.low %v8861_v59, %v8865_v35  ;;  %v8918_v59 = vld [vmem:[%s19627_s14 + $0x1d18] sm:$0xff] }
 0x817   : > { %15374 = vmatpush1.bf16.msra.mxu1 %v17500_v47  ;;  %15047 = vmatprep.subr.bf16.mxu0 %v17507_v37  ;;  %v17556_v47 = vcombine.low %v8862_v38, %v8866_v50  ;;  %v17563_v37 = vcombine.high %v8869_v45, %v8873_v24  ;;  %v8922_v35 = vld [vmem:[%s19627_s14 + $0x1d38] sm:$0xff]  ;;  %v17602_v38 = vcombine.low %v8909_v22, %v8913_v18 }
 0x818   : > { %15375 = vmatprep.subr.bf16.mxu1 %v17509_v27  ;;  %v17565_v27 = vcombine.high %v8870_v25, %v8874_v31 }
 0x81a   : > { %15048 = vmatpush1.bf16.msra.mxu0 %v17506_v2  ;;  %v17562_v2 = vcombine.low %v8869_v45, %v8873_v24  ;;  %v8926_v45 = vld [vmem:[%s19627_s14 + $0x1d58] sm:$0xff] }
 0x81b   : > { %15376 = vmatpush1.bf16.msra.mxu1 %v17508_v28  ;;  %15049 = vmatprep.subr.bf16.mxu0 %v17515_v15  ;;  %v17564_v28 = vcombine.low %v8870_v25, %v8874_v31  ;;  %v17571_v15 = vcombine.high %v8877_v30, %v8881_v52  ;;  %v8930_v24 = vld [vmem:[%s19627_s14 + $0x1d78] sm:$0xff]  ;;  %v17612_v31 = vcombine.low %v8918_v59, %v8922_v35 }
 0x81c   : > { %15377 = vmatprep.subr.bf16.mxu1 %v17517_v56  ;;  %v17573_v56 = vcombine.high %v8878_v13, %v8882_v26 }
 0x81e   : > { %15050 = vmatpush1.bf16.msra.mxu0 %v17514_v61  ;;  %v17570_v61 = vcombine.low %v8877_v30, %v8881_v52  ;;  %v8934_v30 = vld [vmem:[%s19627_s14 + $0x1d98] sm:$0xff] }
 0x81f   : > { %15378 = vmatpush1.bf16.msra.mxu1 %v17516_v5  ;;  %15051 = vmatprep.subr.bf16.mxu0 %v17523_v62  ;;  %v17572_v5 = vcombine.low %v8878_v13, %v8882_v26  ;;  %v17579_v62 = vcombine.high %v8885_v58, %v8889_v16  ;;  %v8938_v52 = vld [vmem:[%s19627_s14 + $0x1db8] sm:$0xff]  ;;  %v17620_v26 = vcombine.low %v8926_v45, %v8930_v24 }
 0x820   : > { %15379 = vmatprep.subr.bf16.mxu1 %v17525_v12  ;;  %v17581_v12 = vcombine.high %v8886_v41, %v8890_v60  ;;  %v8942_v58 = vld [vmem:[%s19627_s14 + $0x1dd8] sm:$0xff] }
 0x821   : > { %v8946_v16 = vld [vmem:[%s19627_s14 + $0x1df8] sm:$0xff] }
 0x822   : > { %15052 = vmatpush1.bf16.msra.mxu0 %v17522_v1  ;;  %v8898_v1 = vld [vmem:[%s19627_s14 + $0x1c78] sm:$0xff] }
 0x823   : > { %15380 = vmatpush1.bf16.msra.mxu1 %v17524_v14  ;;  %15053 = vmatprep.subr.bf16.mxu0 %v17531_v19  ;;  %v17580_v14 = vcombine.low %v8886_v41, %v8890_v60  ;;  %v17587_v19 = vcombine.high %v8893_v32, %v8897_v0  ;;  %v17589_v46 = vcombine.high %v8894_v10, %v8898_v1 }
 0x824   : > { %15381 = vmatprep.subr.bf16.mxu1 %v17533_v54  ;;  %v8901_v54 = vld [vmem:[%s19627_s14 + $0x1c90] sm:$0xff]  ;;  %v17628_v60 = vcombine.low %v8934_v30, %v8938_v52 }
 0x825   : > { %v17594_v23 = vcombine.low %v8901_v54, %v8905_v6 }
 0x826   : > { %15054 = vmatpush1.bf16.msra.mxu0 %v17530_v4  ;;  %v17586_v4 = vcombine.low %v8893_v32, %v8897_v0  ;;  %v8950_v32 = vld [vmem:[%s19627_s14 + $0x1e18] sm:$0xff] }
 0x827   : > { %15382 = vmatpush1.bf16.msra.mxu1 %v17532_v49  ;;  %15055 = vmatprep.subr.bf16.mxu0 %v17539_v9  ;;  %v17588_v49 = vcombine.low %v8894_v10, %v8898_v1  ;;  %v17595_v9 = vcombine.high %v8901_v54, %v8905_v6  ;;  %v8954_v0 = vld [vmem:[%s19627_s14 + $0x1e38] sm:$0xff]  ;;  %v17636_v10 = vcombine.low %v8942_v58, %v8946_v16  ;;  %v8961_v54 = vld [vmem:[%s19627_s14 + $0x1e70] sm:$0xff] }
 0x828   : > { %15383 = vmatprep.subr.bf16.mxu1 %v17541_v57  ;;  %v17597_v57 = vcombine.high %v8902_v29, %v8906_v44  ;;  %v8958_v6 = vld [vmem:[%s19627_s14 + $0x1e58] sm:$0xff] }
 0x82a   : > { %15056 = vmatpush1.bf16.msra.mxu0 %v17538_v55  ;;  %v17596_v55 = vcombine.low %v8902_v29, %v8906_v44  ;;  %v17644_v44 = vcombine.low %v8950_v32, %v8954_v0 }
 0x82b   : > { %15384 = vmatpush1.bf16.msra.mxu1 %v17540_v20  ;;  %15057 = vmatprep.subr.bf16.mxu0 %v17547_v63  ;;  %v17603_v20 = vcombine.high %v8909_v22, %v8913_v18  ;;  %v8917_v63 = vld [vmem:[%s19627_s14 + $0x1d10] sm:$0xff]  ;;  %v8966_v22 = vld [vmem:[%s19627_s14 + $0x1e98] sm:$0xff] }
 0x82c   : > { %15385 = vmatprep.subr.bf16.mxu1 %v17549_v36  ;;  %v8921_v36 = vld [vmem:[%s19627_s14 + $0x1d30] sm:$0xff]  ;;  %v8970_v18 = vld [vmem:[%s19627_s14 + $0x1eb8] sm:$0xff] }
 0x82d   : > { %v17610_v25 = vcombine.low %v8917_v63, %v8921_v36 }
 0x82e   : > { %15058 = vmatpush1.bf16.msra.mxu0 %v17546_v40  ;;  %v17611_v40 = vcombine.high %v8917_v63, %v8921_v36  ;;  %v8974_v63 = vld [vmem:[%s19627_s14 + $0x1ed8] sm:$0xff] }
 0x82f   : > { %15386 = vmatpush1.bf16.msra.mxu1 %v17548_v42  ;;  %15059 = vmatprep.subr.bf16.mxu0 %v17555_v39  ;;  %v17613_v42 = vcombine.high %v8918_v59, %v8922_v35  ;;  %v8925_v39 = vld [vmem:[%s19627_s14 + $0x1d50] sm:$0xff]  ;;  %v8978_v36 = vld [vmem:[%s19627_s14 + $0x1ef8] sm:$0xff]  ;;  %v17660_v35 = vcombine.low %v8966_v22, %v8970_v18 }
 0x830   : > { %15387 = vmatprep.subr.bf16.mxu1 %v17557_v43  ;;  %v8929_v43 = vld [vmem:[%s19627_s14 + $0x1d70] sm:$0xff] }
 0x831   : > { %v17618_v13 = vcombine.low %v8925_v39, %v8929_v43 }
 0x832   : > { %15060 = vmatpush1.bf16.msra.mxu0 %v17554_v7  ;;  %v17619_v7 = vcombine.high %v8925_v39, %v8929_v43  ;;  %v8982_v39 = vld [vmem:[%s19627_s14 + $0x1f18] sm:$0xff] }
 0x833   : > { %15388 = vmatpush1.bf16.msra.mxu1 %v17556_v47  ;;  %15061 = vmatprep.subr.bf16.mxu0 %v17563_v37  ;;  %v17621_v47 = vcombine.high %v8926_v45, %v8930_v24  ;;  %v8933_v37 = vld [vmem:[%s19627_s14 + $0x1d90] sm:$0xff]  ;;  %v8986_v43 = vld [vmem:[%s19627_s14 + $0x1f38] sm:$0xff]  ;;  %v17668_v24 = vcombine.low %v8974_v63, %v8978_v36 }
 0x834   : > { %15389 = vmatprep.subr.bf16.mxu1 %v17565_v27  ;;  %v8937_v27 = vld [vmem:[%s19627_s14 + $0x1db0] sm:$0xff] }
 0x835   : > { %v17626_v41 = vcombine.low %v8933_v37, %v8937_v27 }
 0x836   : > { %15062 = vmatpush1.bf16.msra.mxu0 %v17562_v2  ;;  %v17627_v2 = vcombine.high %v8933_v37, %v8937_v27  ;;  %v8990_v37 = vld [vmem:[%s19627_s14 + $0x1f58] sm:$0xff] }
 0x837   : > { %15390 = vmatpush1.bf16.msra.mxu1 %v17564_v28  ;;  %15063 = vmatprep.subr.bf16.mxu0 %v17571_v15  ;;  %v17629_v28 = vcombine.high %v8934_v30, %v8938_v52  ;;  %v8941_v15 = vld [vmem:[%s19627_s14 + $0x1dd0] sm:$0xff]  ;;  %v8994_v27 = vld [vmem:[%s19627_s14 + $0x1f78] sm:$0xff]  ;;  %v17676_v52 = vcombine.low %v8982_v39, %v8986_v43 }
 0x838   : > { %15391 = vmatprep.subr.bf16.mxu1 %v17573_v56  ;;  %v8945_v56 = vld [vmem:[%s19627_s14 + $0x1df0] sm:$0xff] }
 0x83a   : > { %15064 = vmatpush1.bf16.msra.mxu0 %v17570_v61  ;;  %v17635_v61 = vcombine.high %v8941_v15, %v8945_v56 }
 0x83b   : > { %15392 = vmatpush1.bf16.msra.mxu1 %v17572_v5  ;;  %15074 = vmatprep.subr.bf16.mxu0 %v17579_v62  ;;  %v17637_v5 = vcombine.high %v8942_v58, %v8946_v16  ;;  %v8949_v62 = vld [vmem:[%s19627_s14 + $0x1e10] sm:$0xff]  ;;  %v17684_v16 = vcombine.low %v8990_v37, %v8994_v27 }
 0x83c   : > { %15402 = vmatprep.subr.bf16.mxu1 %v17581_v12  ;;  %v8953_v12 = vld [vmem:[%s19627_s14 + $0x1e30] sm:$0xff] }
 0x83d   : > { %15066 = vmatmul.mubr.bf16.vlgmr.msra.gmra.mrb[20].mxu0 %v20219_v21  ;;  %v17643_v1 = vcombine.high %v8949_v62, %v8953_v12  ;;  %v17642_v29 = vcombine.low %v8949_v62, %v8953_v12  ;;  %v9006_v62 = vld [vmem:[%s19627_s14 + $0x1fd8] sm:$0xff] }
 0x83e   : > { %15394 = vmatmul.mubr.bf16.vlgmr.msra.gmra.mrb[20].mxu1 %v20219_v21  ;;  %15075 = vmatpush1.bf16.msra.mxu0 %v17578_v51  ;;  %v8914_v21 = vld [vmem:[%s19627_s14 + $0x1cf8] sm:$0xff]  ;;  %v17634_v51 = vcombine.low %v8941_v15, %v8945_v56 }
 0x83f   : > { %15106 = vmatprep.mubr.bf16.mxu0 %v20223_v34  ;;  %15403 = vmatpush1.bf16.msra.mxu1 %v17580_v14  ;;  %v17604_v50 = vcombine.low %v8910_v17, %v8914_v21  ;;  %v17645_v14 = vcombine.high %v8950_v32, %v8954_v0  ;;  %v8998_v15 = vld [vmem:[%s19627_s14 + $0x1f98] sm:$0xff] }
 0x840   : > { %15434 = vmatprep.mubr.bf16.mxu1 %v20223_v34  ;;  %15076 = vmatprep.subr.bf16.mxu0 %v17587_v19  ;;  %v17605_v34 = vcombine.high %v8910_v17, %v8914_v21  ;;  %v8957_v19 = vld [vmem:[%s19627_s14 + $0x1e50] sm:$0xff]  ;;  %v9002_v56 = vld [vmem:[%s19627_s14 + $0x1fb8] sm:$0xff] }
 0x841   : > { %15404 = vmatprep.subr.bf16.mxu1 %v17589_v46  ;;  %v8962_v46 = vld [vmem:[%s19627_s14 + $0x1e78] sm:$0xff]  ;;  %v17650_v17 = vcombine.low %v8957_v19, %v8961_v54  ;;  %v17692_v0 = vcombine.low %v8998_v15, %v9002_v56 }
 0x842   : > { %15077 = vmatpush1.bf16.msra.mxu0 %v17586_v4  ;;  %v17651_v4 = vcombine.high %v8957_v19, %v8961_v54  ;;  %v17652_v21 = vcombine.low %v8958_v6, %v8962_v46  ;;  %v9010_v12 = vld [vmem:[%s19627_s14 + $0x1ff8] sm:$0xff] }
 0x843   : > { %15405 = vmatpush1.bf16.msra.mxu1 %v17588_v49  ;;  %15078 = vmatprep.subr.bf16.mxu0 %v17595_v9  ;;  %v17653_v49 = vcombine.high %v8958_v6, %v8962_v46  ;;  %v8965_v9 = vld [vmem:[%s19627_s14 + $0x1e90] sm:$0xff] }
 0x844   : > { %15406 = vmatprep.subr.bf16.mxu1 %v17597_v57  ;;  %v8969_v57 = vld [vmem:[%s19627_s14 + $0x1eb0] sm:$0xff] }
 0x845   : > { %v17658_v59 = vcombine.low %v8965_v9, %v8969_v57 }
 0x846   : > { %15079 = vmatpush1.bf16.msra.mxu0 %v17594_v23  ;;  %v17659_v23 = vcombine.high %v8965_v9, %v8969_v57  ;;  %v18194_v9 = vmov (!%p17702_p2), 0.0  }
 0x847   : > { %15407 = vmatpush1.bf16.msra.mxu1 %v17596_v55  ;;  %15080 = vmatprep.subr.bf16.mxu0 %v17603_v20  ;;  %v17661_v55 = vcombine.high %v8966_v22, %v8970_v18  ;;  %v8973_v20 = vld [vmem:[%s19627_s14 + $0x1ed0] sm:$0xff]  ;;  %15447 = vst [vmem:[%s18440_s7] sm:$0xff] (!%p17702_p2), %v18194_v9  ;;  %15448 = vst [vmem:[%s18440_s7 + $0x8] sm:$0xff] (!%p17702_p2), %v18194_v9 }
 0x848   : > { %15408 = vmatprep.subr.bf16.mxu1 %v17605_v34  ;;  %v8977_v34 = vld [vmem:[%s19627_s14 + $0x1ef0] sm:$0xff] }
 0x849   : > { %v17666_v45 = vcombine.low %v8973_v20, %v8977_v34 }
 0x84a   : > { %15081 = vmatpush1.bf16.msra.mxu0 %v17602_v38  ;;  %v17667_v38 = vcombine.high %v8973_v20, %v8977_v34 }
 0x84b   : > { %15409 = vmatpush1.bf16.msra.mxu1 %v17604_v50  ;;  %15082 = vmatprep.subr.bf16.mxu0 %v17611_v40  ;;  %v17669_v50 = vcombine.high %v8974_v63, %v8978_v36  ;;  %v8981_v40 = vld [vmem:[%s19627_s14 + $0x1f10] sm:$0xff] }
 0x84c   : > { %15410 = vmatprep.subr.bf16.mxu1 %v17613_v42  ;;  %v8985_v42 = vld [vmem:[%s19627_s14 + $0x1f30] sm:$0xff] }
 0x84d   : > { %v17674_v30 = vcombine.low %v8981_v40, %v8985_v42 }
 0x84e   : > { %15083 = vmatpush1.bf16.msra.mxu0 %v17610_v25  ;;  %v17675_v25 = vcombine.high %v8981_v40, %v8985_v42 }
 0x84f   : > { %15411 = vmatpush1.bf16.msra.mxu1 %v17612_v31  ;;  %15084 = vmatprep.subr.bf16.mxu0 %v17619_v7  ;;  %v17677_v31 = vcombine.high %v8982_v39, %v8986_v43  ;;  %v8989_v7 = vld [vmem:[%s19627_s14 + $0x1f50] sm:$0xff] }
 0x850   : > { %15412 = vmatprep.subr.bf16.mxu1 %v17621_v47  ;;  %v8993_v47 = vld [vmem:[%s19627_s14 + $0x1f70] sm:$0xff] }
 0x851   : > { %v17682_v58 = vcombine.low %v8989_v7, %v8993_v47 }
 0x852   : > { %15085 = vmatpush1.bf16.msra.mxu0 %v17618_v13  ;;  %v17683_v13 = vcombine.high %v8989_v7, %v8993_v47 }
 0x853   : > { %15413 = vmatpush1.bf16.msra.mxu1 %v17620_v26  ;;  %15086 = vmatprep.subr.bf16.mxu0 %v17627_v2  ;;  %v17685_v26 = vcombine.high %v8990_v37, %v8994_v27  ;;  %v8997_v2 = vld [vmem:[%s19627_s14 + $0x1f90] sm:$0xff] }
 0x854   : > { %15414 = vmatprep.subr.bf16.mxu1 %v17629_v28  ;;  %v9001_v28 = vld [vmem:[%s19627_s14 + $0x1fb0] sm:$0xff] }
 0x855   : > { %v17690_v32 = vcombine.low %v8997_v2, %v9001_v28 }
 0x856   : > { %15087 = vmatpush1.bf16.msra.mxu0 %v17626_v41  ;;  %v17691_v41 = vcombine.high %v8997_v2, %v9001_v28 }
 0x857   : > { %15415 = vmatpush1.bf16.msra.mxu1 %v17628_v60  ;;  %15088 = vmatprep.subr.bf16.mxu0 %v17635_v61  ;;  %v17693_v60 = vcombine.high %v8998_v15, %v9002_v56  ;;  %v9005_v61 = vld [vmem:[%s19627_s14 + $0x1fd0] sm:$0xff] }
 0x858   : > { %15416 = vmatprep.subr.bf16.mxu1 %v17637_v5  ;;  %v9009_v5 = vld [vmem:[%s19627_s14 + $0x1ff0] sm:$0xff] }
 0x85a   : > { %15089 = vmatpush1.bf16.msra.mxu0 %v17634_v51  ;;  %v17699_v51 = vcombine.high %v9005_v61, %v9009_v5 }
 0x85b   : > { %15417 = vmatpush1.bf16.msra.mxu1 %v17636_v10  ;;  %15090 = vmatprep.subr.bf16.mxu0 %v17643_v1  ;;  %v17701_v10 = vcombine.high %v9006_v62, %v9010_v12  ;;  %v17698_v1 = vcombine.low %v9005_v61, %v9009_v5 }
 0x85c   : > { %15418 = vmatprep.subr.bf16.mxu1 %v17645_v14  ;;  %v17700_v14 = vcombine.low %v9006_v62, %v9010_v12 }
 0x85e   : > { %15091 = vmatpush1.bf16.msra.mxu0 %v17642_v29 }
 0x85f   : > { %15419 = vmatpush1.bf16.msra.mxu1 %v17644_v44  ;;  %15092 = vmatprep.subr.bf16.mxu0 %v17651_v4 }
 0x860   : > { %15420 = vmatprep.subr.bf16.mxu1 %v17653_v49 }
 0x862   : > { %15093 = vmatpush1.bf16.msra.mxu0 %v17650_v17 }
 0x863   : > { %15421 = vmatpush1.bf16.msra.mxu1 %v17652_v21  ;;  %15094 = vmatprep.subr.bf16.mxu0 %v17659_v23 }
 0x864   : > { %15422 = vmatprep.subr.bf16.mxu1 %v17661_v55 }
 0x866   : > { %15095 = vmatpush1.bf16.msra.mxu0 %v17658_v59 }
 0x867   : > { %15423 = vmatpush1.bf16.msra.mxu1 %v17660_v35  ;;  %15096 = vmatprep.subr.bf16.mxu0 %v17667_v38 }
 0x868   : > { %15424 = vmatprep.subr.bf16.mxu1 %v17669_v50 }
 0x86a   : > { %15097 = vmatpush1.bf16.msra.mxu0 %v17666_v45 }
 0x86b   : > { %15425 = vmatpush1.bf16.msra.mxu1 %v17668_v24  ;;  %15098 = vmatprep.subr.bf16.mxu0 %v17675_v25 }
 0x86c   : > { %15426 = vmatprep.subr.bf16.mxu1 %v17677_v31 }
 0x86e   : > { %15099 = vmatpush1.bf16.msra.mxu0 %v17674_v30 }
 0x86f   : > { %15427 = vmatpush1.bf16.msra.mxu1 %v17676_v52  ;;  %15100 = vmatprep.subr.bf16.mxu0 %v17683_v13 }
 0x870   : > { %15428 = vmatprep.subr.bf16.mxu1 %v17685_v26 }
 0x872   : > { %15101 = vmatpush1.bf16.msra.mxu0 %v17682_v58 }
 0x873   : > { %15429 = vmatpush1.bf16.msra.mxu1 %v17684_v16  ;;  %15102 = vmatprep.subr.bf16.mxu0 %v17691_v41 }
 0x874   : > { %15430 = vmatprep.subr.bf16.mxu1 %v17693_v60 }
 0x876   : > { %15103 = vmatpush1.bf16.msra.mxu0 %v17690_v32 }
 0x877   : > { %15431 = vmatpush1.bf16.msra.mxu1 %v17692_v0  ;;  %15104 = vmatprep.subr.bf16.mxu0 %v17699_v51 }
 0x878   : > { %15432 = vmatprep.subr.bf16.mxu1 %v17701_v10 }
 0x87a   : > { %15105 = vmatpush1.bf16.msra.mxu0 %v17698_v1 }
 0x87b   : > { %15433 = vmatpush1.bf16.msra.mxu1 %v17700_v14 }
 0x87d   : > { %15107 = vmatmul.mubr.bf16.vlgmr.msra.gmra.mrb[20].mxu0 %v20295_v48 }
 0x87e   : > { %15435 = vmatmul.mubr.bf16.vlgmr.msra.gmra.mrb[20].mxu1 %v20295_v48 }
 0x94e   : > { %15446 = sbr.rel (%p17702_p2) target bundleno = 2389 (0x955), region = 52 }
 0x950   : > { %v15108_v19 = vpop.f32.mrb[20].mxu0 }
 0x951   : > { %v15436_v54 = vpop.f32.mrb[20].mxu1  ;;  %v15110_v6 = vpop.f32.mrb[21].mxu0 }
 0x952   : > { %v15438_v46 = vpop.f32.mrb[21].mxu1  ;;  %v15112_v29 = vpop.f32.mrb[22].mxu0 }
 0x953   : > { %v15440_v44 = vpop.f32.mrb[22].mxu1  ;;  %v15113_v4 = vpop.f32.mrb[23].mxu0 }
 0x954   : > { %v15441_v49 = vpop.f32.mrb[23].mxu1 }
 0x955 PF: > { %v15459_v48 = vcombine.low %v20525_v3, %v20531_v8  ;;  %v15460_v57 = vcombine.low %v20529_v33, %v20535_v11  ;;  %v15476_v22 = vcombine.low %v15108_v19, %v15110_v6  ;;  %v15477_v18 = vcombine.low %v15436_v54, %v15438_v46  ;;  %v15449_v20 = vld [vmem:[%s18440_s7] sm:$0xff]  ;;  %v15450_v34 = vld [vmem:[%s18440_s7 + $0x8] sm:$0xff] }
 0x957   : > { %v15467_v17 = vrot.slane %v15459_v48, %v18471_v53  ;;  %v15474_v21 = vrot.slane %v15460_v57, %v18471_v53  ;;  %v15484_v23 = vrot.slane %v15476_v22, %v18471_v53  ;;  %v15491_v55 = vrot.slane %v15477_v18, %v18471_v53 }
 0x959   : > { %v15475_v63 = vcombine.low %v15467_v17, %v15474_v21  ;;  %v15492_v36 = vcombine.low %v15484_v23, %v15491_v55 }
 0x95b   : > { %v15495_v59 = vadd.f32 %v15475_v63, %v15449_v20  ;;  %v15496_v35 = vadd.f32 %v15492_v36, %v15450_v34 }
 0x95d   : > { %15497 = vst [vmem:[%s18440_s7] sm:$0xff] %v15495_v59  ;;  %15498 = vst [vmem:[%s18440_s7 + $0x8] sm:$0xff] %v15496_v35 }
 0x95e PF: > { %s20_s22 = sadd.s32 1, %s18184_s22   ;;  %s20904_s25 = sld [smem:[#allocation9_spill]] }
 0x95f   : > { %p17_p7 = scmp.ge.s32.totalorder %s20_s22, 6   ;;  %s20905_s2 = sld [smem:[#allocation10_spill]] }
 0x960   : > { %s20906_s15 = smov %s18160_s16  ;;  %s20907_s16 = smov %s18164_s17 }
 0x961   : > { %s20908_s17 = smov %s18295_s11  ;;  %s20909_s18 = smov %s18176_s20 }
 0x962   : > { %s20910_s19 = smov %s18180_s21  ;;  %19 = sbr.rel (!%p17_p7) target bundleno = 9 (0x9), region = 104 }
 0x964   : > { %s20911_s20 = smov %s20904_s25 }
 0x965   : > { %s20912_s21 = smov %s20905_s2 }
 0x969   :  { %15520 = vsyncpa [#allocation3], 1 }
 0x96a   :  { %15522 = vsyncpa [#allocation3 + $0x1], 1 }
 0x96b   :  { %15523 = vsyncpa [#allocation5], 1 }
 0x96c   :  { %15525 = vsyncpa [#allocation5 + $0x1], 1 }

</bundles_post_ra>
